<compile_context>
chip_gen: v5e
topology: v5e:2x2
jax: 0.10.0
libtpu: 0.0.40
codegen_flags: <defaults>
</compile_context>

<pallas_src>
import functools

import numpy as np
import jax
import jax.numpy as jnp
from jax import lax
from jax.experimental import pallas as pl
from jax.experimental.pallas import tpu as pltpu


def _upsample_matrix(size):
    """(S, 2S) matrix for 1-D x2 linear upsampling, align_corners=False, edge clamped.

    out[2k]   = 0.75*x[k] + 0.25*x[max(k-1, 0)]
    out[2k+1] = 0.75*x[k] + 0.25*x[min(k+1, S-1)]
    """
    u = np.zeros((size, 2 * size), np.float32)
    for k in range(size):
        u[k, 2 * k] += 0.75
        u[max(k - 1, 0), 2 * k] += 0.25
        u[k, 2 * k + 1] += 0.75
        u[min(k + 1, size - 1), 2 * k + 1] += 0.25
    return u


def _shift_mask_table(h, w):
    """(16, H*W) 0/1 masks; row kh*3+kw zeroes positions whose conv source
    (h+kh-1, w+kw-1) falls outside the image (i.e. the zero padding)."""
    tbl = np.zeros((16, h * w), np.float32)  # padded to 16 rows (sublane multiple)
    hh, ww = np.meshgrid(np.arange(h), np.arange(w), indexing="ij")
    for kh in range(3):
        for kw in range(3):
            dh, dw = kh - 1, kw - 1
            valid = ((hh + dh >= 0) & (hh + dh < h) &
                     (ww + dw >= 0) & (ww + dw < w))
            tbl[kh * 3 + kw] = valid.reshape(-1).astype(np.float32)
    return tbl


# ---------------------------------------------------------------------------
# Fused kernel: depthwise 3x3x3 -> pointwise 1x1x1 -> ReLU -> trilinear x2 up
# One grid step = one batch element.
# ---------------------------------------------------------------------------
def _decoder_block_kernel(wdw_ref, wpw_ref, mask_ref, uhw_ref, udblk_ref,
                          x_ref, out_ref, xpad_ref, *, width):
    # x_ref    : (1, Cin*D, H*W)       input, (channel, depth) rows, H*W on lanes
    # out_ref  : (1, Cout, 2D, 2H*2W)  output, one lane-dense slab per channel
    # xpad_ref : (3, Cin*D, H*W)       scratch: input pre-shifted by (kd-1) along D
    # wdw_ref  : (Cin*27,)   SMEM      depthwise taps, idx = ci*27 + kd*9 + kh*3 + kw
    # wpw_ref  : (Cout*Cin,) SMEM      pointwise weights, idx = co*Cin + ci
    # mask_ref : (16, H*W)   VMEM      per-(kh,kw) zero-padding masks
    # uhw_ref  : (H*W, 2H*2W) VMEM     kron(U_h, U_w) upsample matrix
    # udblk_ref: (Cout*2D, Cout*D)     kron(I_cout, U_d^T) upsample matrix
    _, cind, hw = x_ref.shape
    cout, d2, _ = out_ref.shape[1], out_ref.shape[2], out_ref.shape[3]
    d = d2 // 2
    cin = cind // d

    # ---- stage 0: three D-shifted copies of the input (halo planes zeroed only) ----
    x0 = x_ref[0]                                      # (Cin*D, H*W)
    xpad_ref[1] = x0                                   # kd = 1 : no D shift
    xpad_ref[0, 1:cind, :] = x0[0:cind - 1, :]         # kd = 0 : reads plane dd-1
    xpad_ref[2, 0:cind - 1, :] = x0[1:cind, :]         # kd = 2 : reads plane dd+1
    zero_row = jnp.zeros((1, hw), jnp.float32)
    for ci in range(cin):                              # zero only the D halo planes
        xpad_ref[0, ci * d:ci * d + 1, :] = zero_row
        xpad_ref[2, ci * d + d - 1:ci * d + d, :] = zero_row

    # ---- stage 1: depthwise 3x3x3 conv, stride 1, pad 1 (lane-dense VPU MACs) -------
    accs = [jnp.zeros((d, hw), jnp.float32) for _ in range(cin)]
    for kd in range(3):
        xk = xpad_ref[kd]                              # (Cin*D, H*W), aligned load
        for kh in range(3):
            for kw in range(3):
                s = (kh - 1) * width + (kw - 1)
                if s == 0:
                    r = xk
                else:
                    m = kh * 3 + kw
                    # (kh,kw) window shift = lane roll (XLU) + zero-pad mask,
                    # shared by all channels and all depth planes.
                    r = (pltpu.roll(xk, shift=(-s) % hw, axis=1)
                         * mask_ref[m:m + 1, :])
                for ci in range(cin):
                    tap = wdw_ref[ci * 27 + kd * 9 + kh * 3 + kw]
                    accs[ci] = accs[ci] + r[ci * d:(ci + 1) * d, :] * tap

    # ---- stage 2: pointwise 1x1x1 conv + ReLU, packed as one (Cout*D, H*W) slab -----
    rows = []
    for co in range(cout):
        p = accs[0] * wpw_ref[co * cin]
        for ci in range(1, cin):
            p = p + accs[ci] * wpw_ref[co * cin + ci]
        rows.append(jnp.maximum(p, 0.0))
    pw = jnp.concatenate(rows, axis=0)                 # (Cout*D, H*W)

    # ---- stage 3: separable trilinear x2 upsample as two batched MXU matmuls --------
    y = jnp.dot(pw, uhw_ref[...], preferred_element_type=jnp.float32)    # (Cout*D, 2H*2W)
    z = jnp.dot(udblk_ref[...], y, preferred_element_type=jnp.float32)   # (Cout*2D, 2H*2W)

    # ---- stage 4: lane-dense stores, one (2D, 2H*2W) slab per output channel --------
    for co in range(cout):
        out_ref[0, co] = z[co * d2:(co + 1) * d2, :]


# ---------------------------------------------------------------------------
# Wrapper: DecoderBlock forward
# ---------------------------------------------------------------------------
def decoder_block_forward(x_ncdhw, w_dw, w_pw):
    """x: (N, Cin, D, H, W); w_dw: (Cin, 1, 3, 3, 3); w_pw: (Cout, Cin).
    Returns (N, Cout, 2D, 2H, 2W) float32 (same as the PyTorch module)."""
    n, cin, d, h, w = x_ncdhw.shape
    cout = w_pw.shape[0]
    hw, d2, hw4 = h * w, 2 * d, 4 * h * w

    # Lane-dense views: H*W on the lane axis, (channel, depth) merged on sublanes.
    x = x_ncdhw.astype(jnp.float32).reshape(n, cin * d, hw)
    wdw = w_dw.astype(jnp.float32).reshape(cin * 27)           # 1-D SMEM table
    wpw = w_pw.astype(jnp.float32).reshape(cout * cin)         # 1-D SMEM table

    masks = jnp.asarray(_shift_mask_table(h, w))               # (16, H*W)
    u_hw = jnp.asarray(np.kron(_upsample_matrix(h),
                               _upsample_matrix(w)))           # (H*W, 2H*2W)
    u_dblk = jnp.asarray(np.kron(np.eye(cout, dtype=np.float32),
                                 _upsample_matrix(d).T))       # (Cout*2D, Cout*D)

    kernel = functools.partial(_decoder_block_kernel, width=w)

    out_flat = pl.pallas_call(
        kernel,
        out_shape=jax.ShapeDtypeStruct((n, cout, d2, hw4), jnp.float32),
        grid=(n,),
        in_specs=[
            pl.BlockSpec(memory_space=pltpu.MemorySpace.SMEM),        # depthwise taps
            pl.BlockSpec(memory_space=pltpu.MemorySpace.SMEM),        # pointwise weights
            pl.BlockSpec((16, hw), lambda i: (0, 0)),                 # (kh,kw) pad masks
            pl.BlockSpec((hw, hw4), lambda i: (0, 0)),                # kron(U_h, U_w)
            pl.BlockSpec((cout * d2, cout * d), lambda i: (0, 0)),    # kron(I, U_d^T)
            pl.BlockSpec((1, cin * d, hw), lambda i: (i, 0, 0)),      # input tile
        ],
        out_specs=pl.BlockSpec((1, cout, d2, hw4), lambda i: (i, 0, 0, 0)),
        scratch_shapes=[pltpu.VMEM((3, cin * d, hw), jnp.float32)],   # D-shifted input
        compiler_params=pltpu.CompilerParams(dimension_semantics=("parallel",)),
    )(wdw, wpw, masks, u_hw, u_dblk, x)

    return out_flat.reshape(n, cout, d2, 2 * h, 2 * w)


# ---------------------------------------------------------------------------
# Pure-JAX reference (same math, no Pallas) for a correctness check
# ---------------------------------------------------------------------------
def _upsample_axis_ref(x, axis):
    s = x.shape[axis]
    prev = jnp.take(x, jnp.clip(jnp.arange(s) - 1, 0, s - 1), axis=axis)
    nxt = jnp.take(x, jnp.clip(jnp.arange(s) + 1, 0, s - 1), axis=axis)
    even = 0.75 * x + 0.25 * prev
    odd = 0.75 * x + 0.25 * nxt
    out = jnp.stack([even, odd], axis=axis + 1)
    shape = list(x.shape)
    shape[axis] = 2 * s
    return out.reshape(shape)


def reference_forward(x_ncdhw, w_dw, w_pw):
    cin = x_ncdhw.shape[1]
    dw = lax.conv_general_dilated(
        x_ncdhw, w_dw, window_strides=(1, 1, 1),
        padding=((1, 1), (1, 1), (1, 1)),
        dimension_numbers=("NCDHW", "OIDHW", "NCDHW"),
        feature_group_count=cin, precision=lax.Precision.HIGHEST)
    pw = jnp.maximum(jnp.einsum("oi,nidhw->nodhw", w_pw, dw,
                                precision=lax.Precision.HIGHEST), 0.0)
    out = pw
    for ax in (2, 3, 4):
        out = _upsample_axis_ref(out, ax)
    return out


if __name__ == "__main__":
    N, Cin, Cout, D, H, W = 2, 4, 8, 8, 16, 16

    key = jax.random.PRNGKey(0)
    kx, kdw, kpw = jax.random.split(key, 3)
    x = jax.random.normal(kx, (N, Cin, D, H, W), jnp.float32)
    w_dw = 0.2 * jax.random.normal(kdw, (Cin, 1, 3, 3, 3), jnp.float32)   # depthwise
    w_pw = 0.2 * jax.random.normal(kpw, (Cout, Cin), jnp.float32)         # pointwise

    out = jax.block_until_ready(decoder_block_forward(x, w_dw, w_pw))
    assert out.shape == (N, Cout, 2 * D, 2 * H, 2 * W), out.shape

    ref = jax.block_until_ready(reference_forward(x, w_dw, w_pw))
    max_err = float(jnp.max(jnp.abs(out - ref)))
    assert max_err < 1e-3, f"max abs err {max_err}"

    print("KERNEL_OK")
</pallas_src>

<mosaic_0001>
module attributes {stable_mosaic.version = 11 : i64} {
  func.func @_decoder_block_kernel(%arg0: i32, %arg1: memref<108xf32, #tpu.memory_space<smem>>, %arg2: memref<32xf32, #tpu.memory_space<smem>>, %arg3: memref<16x256xf32, #tpu.memory_space<vmem>>, %arg4: memref<256x1024xf32, #tpu.memory_space<vmem>>, %arg5: memref<128x64xf32, #tpu.memory_space<vmem>>, %arg6: memref<1x32x256xf32, #tpu.memory_space<vmem>>, %arg7: memref<1x8x16x1024xf32, #tpu.memory_space<vmem>>, %arg8: memref<3x32x256xf32, #tpu.memory_space<vmem>>) attributes {dimension_semantics = [#tpu.dimension_semantics<parallel>], iteration_bounds = array<i64: 2>, scalar_prefetch = 0 : i64, scratch_operands = 1 : i64, tpu.core_type = #tpu.core_type<tc>, window_params = [{transform_indices = @transform_0, window_bounds = array<i64: 108>}, {transform_indices = @transform_1, window_bounds = array<i64: 32>}, {pipeline_mode = #tpu.pipeline_mode<synchronous>, transform_indices = @transform_2, window_bounds = array<i64: 16, 256>}, {pipeline_mode = #tpu.pipeline_mode<synchronous>, transform_indices = @transform_3, window_bounds = array<i64: 256, 1024>}, {pipeline_mode = #tpu.pipeline_mode<synchronous>, transform_indices = @transform_4, window_bounds = array<i64: 128, 64>}, {transform_indices = @transform_5, window_bounds = array<i64: 1, 32, 256>}, {transform_indices = @transform_6, window_bounds = array<i64: 1, 8, 16, 1024>}]} {
    %c0 = arith.constant 0 : index
    %c0_0 = arith.constant 0 : index
    %c0_1 = arith.constant 0 : index
    %0 = vector.load %arg6[%c0, %c0_0, %c0_1] : memref<1x32x256xf32, #tpu.memory_space<vmem>>, vector<1x32x256xf32>
    %1 = vector.shape_cast %0 : vector<1x32x256xf32> to vector<32x256xf32>
    %c1 = arith.constant 1 : index
    %c0_2 = arith.constant 0 : index
    %c0_3 = arith.constant 0 : index
    %2 = vector.load %arg8[%c1, %c0_2, %c0_3] : memref<3x32x256xf32, #tpu.memory_space<vmem>>, vector<1x32x256xf32>
    %3 = vector.shape_cast %2 : vector<1x32x256xf32> to vector<32x256xf32>
    %4 = vector.shape_cast %1 : vector<32x256xf32> to vector<1x32x256xf32>
    tpu.vector_store %arg8[%c1, %c0_2, %c0_3], %4 {strides = array<i32>} : memref<3x32x256xf32, #tpu.memory_space<vmem>>, vector<1x32x256xf32>,
    %5 = vector.extract_strided_slice %1 {offsets = [0, 0], sizes = [31, 256], strides = [1, 1]} : vector<32x256xf32> to vector<31x256xf32>
    %c0_4 = arith.constant 0 : index
    %c1_5 = arith.constant 1 : index
    %c0_6 = arith.constant 0 : index
    %6 = vector.load %arg8[%c0_4, %c1_5, %c0_6] : memref<3x32x256xf32, #tpu.memory_space<vmem>>, vector<1x31x256xf32>
    %7 = vector.shape_cast %6 : vector<1x31x256xf32> to vector<31x256xf32>
    %8 = vector.shape_cast %5 : vector<31x256xf32> to vector<1x31x256xf32>
    tpu.vector_store %arg8[%c0_4, %c1_5, %c0_6], %8 {strides = array<i32>} : memref<3x32x256xf32, #tpu.memory_space<vmem>>, vector<1x31x256xf32>,
    %9 = vector.extract_strided_slice %1 {offsets = [1, 0], sizes = [31, 256], strides = [1, 1]} : vector<32x256xf32> to vector<31x256xf32>
    %c2 = arith.constant 2 : index
    %c0_7 = arith.constant 0 : index
    %c0_8 = arith.constant 0 : index
    %10 = vector.load %arg8[%c2, %c0_7, %c0_8] : memref<3x32x256xf32, #tpu.memory_space<vmem>>, vector<1x31x256xf32>
    %11 = vector.shape_cast %10 : vector<1x31x256xf32> to vector<31x256xf32>
    %12 = vector.shape_cast %9 : vector<31x256xf32> to vector<1x31x256xf32>
    tpu.vector_store %arg8[%c2, %c0_7, %c0_8], %12 {strides = array<i32>} : memref<3x32x256xf32, #tpu.memory_space<vmem>>, vector<1x31x256xf32>,
    %cst = arith.constant 0.000000e+00 : f32
    %13 = vector.broadcast %cst : f32 to vector<1x256xf32>
    %c0_9 = arith.constant 0 : index
    %c0_10 = arith.constant 0 : index
    %c0_11 = arith.constant 0 : index
    %14 = vector.load %arg8[%c0_9, %c0_10, %c0_11] : memref<3x32x256xf32, #tpu.memory_space<vmem>>, vector<1x1x256xf32>
    %15 = vector.shape_cast %14 : vector<1x1x256xf32> to vector<1x256xf32>
    %16 = vector.shape_cast %13 : vector<1x256xf32> to vector<1x1x256xf32>
    tpu.vector_store %arg8[%c0_9, %c0_10, %c0_11], %16 {strides = array<i32>} : memref<3x32x256xf32, #tpu.memory_space<vmem>>, vector<1x1x256xf32>,
    %c2_12 = arith.constant 2 : index
    %c7 = arith.constant 7 : index
    %c0_13 = arith.constant 0 : index
    %17 = vector.load %arg8[%c2_12, %c7, %c0_13] : memref<3x32x256xf32, #tpu.memory_space<vmem>>, vector<1x1x256xf32>
    %18 = vector.shape_cast %17 : vector<1x1x256xf32> to vector<1x256xf32>
    %19 = vector.shape_cast %13 : vector<1x256xf32> to vector<1x1x256xf32>
    tpu.vector_store %arg8[%c2_12, %c7, %c0_13], %19 {strides = array<i32>} : memref<3x32x256xf32, #tpu.memory_space<vmem>>, vector<1x1x256xf32>,
    %c0_14 = arith.constant 0 : index
    %c8 = arith.constant 8 : index
    %c0_15 = arith.constant 0 : index
    %20 = vector.load %arg8[%c0_14, %c8, %c0_15] : memref<3x32x256xf32, #tpu.memory_space<vmem>>, vector<1x1x256xf32>
    %21 = vector.shape_cast %20 : vector<1x1x256xf32> to vector<1x256xf32>
    %22 = vector.shape_cast %13 : vector<1x256xf32> to vector<1x1x256xf32>
    tpu.vector_store %arg8[%c0_14, %c8, %c0_15], %22 {strides = array<i32>} : memref<3x32x256xf32, #tpu.memory_space<vmem>>, vector<1x1x256xf32>,
    %c2_16 = arith.constant 2 : index
    %c15 = arith.constant 15 : index
    %c0_17 = arith.constant 0 : index
    %23 = vector.load %arg8[%c2_16, %c15, %c0_17] : memref<3x32x256xf32, #tpu.memory_space<vmem>>, vector<1x1x256xf32>
    %24 = vector.shape_cast %23 : vector<1x1x256xf32> to vector<1x256xf32>
    %25 = vector.shape_cast %13 : vector<1x256xf32> to vector<1x1x256xf32>
    tpu.vector_store %arg8[%c2_16, %c15, %c0_17], %25 {strides = array<i32>} : memref<3x32x256xf32, #tpu.memory_space<vmem>>, vector<1x1x256xf32>,
    %c0_18 = arith.constant 0 : index
    %c16 = arith.constant 16 : index
    %c0_19 = arith.constant 0 : index
    %26 = vector.load %arg8[%c0_18, %c16, %c0_19] : memref<3x32x256xf32, #tpu.memory_space<vmem>>, vector<1x1x256xf32>
    %27 = vector.shape_cast %26 : vector<1x1x256xf32> to vector<1x256xf32>
    %28 = vector.shape_cast %13 : vector<1x256xf32> to vector<1x1x256xf32>
    tpu.vector_store %arg8[%c0_18, %c16, %c0_19], %28 {strides = array<i32>} : memref<3x32x256xf32, #tpu.memory_space<vmem>>, vector<1x1x256xf32>,
    %c2_20 = arith.constant 2 : index
    %c23 = arith.constant 23 : index
    %c0_21 = arith.constant 0 : index
    %29 = vector.load %arg8[%c2_20, %c23, %c0_21] : memref<3x32x256xf32, #tpu.memory_space<vmem>>, vector<1x1x256xf32>
    %30 = vector.shape_cast %29 : vector<1x1x256xf32> to vector<1x256xf32>
    %31 = vector.shape_cast %13 : vector<1x256xf32> to vector<1x1x256xf32>
    tpu.vector_store %arg8[%c2_20, %c23, %c0_21], %31 {strides = array<i32>} : memref<3x32x256xf32, #tpu.memory_space<vmem>>, vector<1x1x256xf32>,
    %c0_22 = arith.constant 0 : index
    %c24 = arith.constant 24 : index
    %c0_23 = arith.constant 0 : index
    %32 = vector.load %arg8[%c0_22, %c24, %c0_23] : memref<3x32x256xf32, #tpu.memory_space<vmem>>, vector<1x1x256xf32>
    %33 = vector.shape_cast %32 : vector<1x1x256xf32> to vector<1x256xf32>
    %34 = vector.shape_cast %13 : vector<1x256xf32> to vector<1x1x256xf32>
    tpu.vector_store %arg8[%c0_22, %c24, %c0_23], %34 {strides = array<i32>} : memref<3x32x256xf32, #tpu.memory_space<vmem>>, vector<1x1x256xf32>,
    %c2_24 = arith.constant 2 : index
    %c31 = arith.constant 31 : index
    %c0_25 = arith.constant 0 : index
    %35 = vector.load %arg8[%c2_24, %c31, %c0_25] : memref<3x32x256xf32, #tpu.memory_space<vmem>>, vector<1x1x256xf32>
    %36 = vector.shape_cast %35 : vector<1x1x256xf32> to vector<1x256xf32>
    %37 = vector.shape_cast %13 : vector<1x256xf32> to vector<1x1x256xf32>
    tpu.vector_store %arg8[%c2_24, %c31, %c0_25], %37 {strides = array<i32>} : memref<3x32x256xf32, #tpu.memory_space<vmem>>, vector<1x1x256xf32>,
    %cst_26 = arith.constant 0.000000e+00 : f32
    %38 = vector.broadcast %cst_26 : f32 to vector<8x256xf32>
    %cst_27 = arith.constant 0.000000e+00 : f32
    %39 = vector.broadcast %cst_27 : f32 to vector<8x256xf32>
    %cst_28 = arith.constant 0.000000e+00 : f32
    %40 = vector.broadcast %cst_28 : f32 to vector<8x256xf32>
    %cst_29 = arith.constant 0.000000e+00 : f32
    %41 = vector.broadcast %cst_29 : f32 to vector<8x256xf32>
    %c0_30 = arith.constant 0 : index
    %c0_31 = arith.constant 0 : index
    %c0_32 = arith.constant 0 : index
    %42 = vector.load %arg8[%c0_30, %c0_31, %c0_32] : memref<3x32x256xf32, #tpu.memory_space<vmem>>, vector<1x32x256xf32>
    %43 = vector.shape_cast %42 : vector<1x32x256xf32> to vector<32x256xf32>
    %c17_i32 = arith.constant 17 : i32
    %44 = tpu.dynamic_rotate %43 by %c17_i32 dim 1 : vector<32x256xf32>, i32 -> vector<32x256xf32>
    %c0_33 = arith.constant 0 : index
    %c0_34 = arith.constant 0 : index
    %45 = vector.load %arg3[%c0_33, %c0_34] : memref<16x256xf32, #tpu.memory_space<vmem>>, vector<1x256xf32>
    %46 = vector.broadcast %45 : vector<1x256xf32> to vector<32x256xf32>
    %47 = arith.mulf %44, %46 : vector<32x256xf32>
    %c0_35 = arith.constant 0 : index
    %48 = memref.load %arg1[%c0_35] : memref<108xf32, #tpu.memory_space<smem>>
    %49 = vector.extract_strided_slice %47 {offsets = [0, 0], sizes = [8, 256], strides = [1, 1]} : vector<32x256xf32> to vector<8x256xf32>
    %50 = vector.broadcast %48 : f32 to vector<8x256xf32>
    %51 = arith.mulf %49, %50 : vector<8x256xf32>
    %52 = arith.addf %38, %51 : vector<8x256xf32>
    %c27 = arith.constant 27 : index
    %53 = memref.load %arg1[%c27] : memref<108xf32, #tpu.memory_space<smem>>
    %54 = vector.extract_strided_slice %47 {offsets = [8, 0], sizes = [8, 256], strides = [1, 1]} : vector<32x256xf32> to vector<8x256xf32>
    %55 = vector.broadcast %53 : f32 to vector<8x256xf32>
    %56 = arith.mulf %54, %55 : vector<8x256xf32>
    %57 = arith.addf %39, %56 : vector<8x256xf32>
    %c54 = arith.constant 54 : index
    %58 = memref.load %arg1[%c54] : memref<108xf32, #tpu.memory_space<smem>>
    %59 = vector.extract_strided_slice %47 {offsets = [16, 0], sizes = [8, 256], strides = [1, 1]} : vector<32x256xf32> to vector<8x256xf32>
    %60 = vector.broadcast %58 : f32 to vector<8x256xf32>
    %61 = arith.mulf %59, %60 : vector<8x256xf32>
    %62 = arith.addf %40, %61 : vector<8x256xf32>
    %c81 = arith.constant 81 : index
    %63 = memref.load %arg1[%c81] : memref<108xf32, #tpu.memory_space<smem>>
    %64 = vector.extract_strided_slice %47 {offsets = [24, 0], sizes = [8, 256], strides = [1, 1]} : vector<32x256xf32> to vector<8x256xf32>
    %65 = vector.broadcast %63 : f32 to vector<8x256xf32>
    %66 = arith.mulf %64, %65 : vector<8x256xf32>
    %67 = arith.addf %41, %66 : vector<8x256xf32>
    %c16_i32 = arith.constant 16 : i32
    %68 = tpu.dynamic_rotate %43 by %c16_i32 dim 1 : vector<32x256xf32>, i32 -> vector<32x256xf32>
    %c1_36 = arith.constant 1 : index
    %c0_37 = arith.constant 0 : index
    %69 = vector.load %arg3[%c1_36, %c0_37] : memref<16x256xf32, #tpu.memory_space<vmem>>, vector<1x256xf32>
    %70 = vector.broadcast %69 : vector<1x256xf32> to vector<32x256xf32>
    %71 = arith.mulf %68, %70 : vector<32x256xf32>
    %c1_38 = arith.constant 1 : index
    %72 = memref.load %arg1[%c1_38] : memref<108xf32, #tpu.memory_space<smem>>
    %73 = vector.extract_strided_slice %71 {offsets = [0, 0], sizes = [8, 256], strides = [1, 1]} : vector<32x256xf32> to vector<8x256xf32>
    %74 = vector.broadcast %72 : f32 to vector<8x256xf32>
    %75 = arith.mulf %73, %74 : vector<8x256xf32>
    %76 = arith.addf %52, %75 : vector<8x256xf32>
    %c28 = arith.constant 28 : index
    %77 = memref.load %arg1[%c28] : memref<108xf32, #tpu.memory_space<smem>>
    %78 = vector.extract_strided_slice %71 {offsets = [8, 0], sizes = [8, 256], strides = [1, 1]} : vector<32x256xf32> to vector<8x256xf32>
    %79 = vector.broadcast %77 : f32 to vector<8x256xf32>
    %80 = arith.mulf %78, %79 : vector<8x256xf32>
    %81 = arith.addf %57, %80 : vector<8x256xf32>
    %c55 = arith.constant 55 : index
    %82 = memref.load %arg1[%c55] : memref<108xf32, #tpu.memory_space<smem>>
    %83 = vector.extract_strided_slice %71 {offsets = [16, 0], sizes = [8, 256], strides = [1, 1]} : vector<32x256xf32> to vector<8x256xf32>
    %84 = vector.broadcast %82 : f32 to vector<8x256xf32>
    %85 = arith.mulf %83, %84 : vector<8x256xf32>
    %86 = arith.addf %62, %85 : vector<8x256xf32>
    %c82 = arith.constant 82 : index
    %87 = memref.load %arg1[%c82] : memref<108xf32, #tpu.memory_space<smem>>
    %88 = vector.extract_strided_slice %71 {offsets = [24, 0], sizes = [8, 256], strides = [1, 1]} : vector<32x256xf32> to vector<8x256xf32>
    %89 = vector.broadcast %87 : f32 to vector<8x256xf32>
    %90 = arith.mulf %88, %89 : vector<8x256xf32>
    %91 = arith.addf %67, %90 : vector<8x256xf32>
    %c15_i32 = arith.constant 15 : i32
    %92 = tpu.dynamic_rotate %43 by %c15_i32 dim 1 : vector<32x256xf32>, i32 -> vector<32x256xf32>
    %c2_39 = arith.constant 2 : index
    %c0_40 = arith.constant 0 : index
    %93 = vector.load %arg3[%c2_39, %c0_40] : memref<16x256xf32, #tpu.memory_space<vmem>>, vector<1x256xf32>
    %94 = vector.broadcast %93 : vector<1x256xf32> to vector<32x256xf32>
    %95 = arith.mulf %92, %94 : vector<32x256xf32>
    %c2_41 = arith.constant 2 : index
    %96 = memref.load %arg1[%c2_41] : memref<108xf32, #tpu.memory_space<smem>>
    %97 = vector.extract_strided_slice %95 {offsets = [0, 0], sizes = [8, 256], strides = [1, 1]} : vector<32x256xf32> to vector<8x256xf32>
    %98 = vector.broadcast %96 : f32 to vector<8x256xf32>
    %99 = arith.mulf %97, %98 : vector<8x256xf32>
    %100 = arith.addf %76, %99 : vector<8x256xf32>
    %c29 = arith.constant 29 : index
    %101 = memref.load %arg1[%c29] : memref<108xf32, #tpu.memory_space<smem>>
    %102 = vector.extract_strided_slice %95 {offsets = [8, 0], sizes = [8, 256], strides = [1, 1]} : vector<32x256xf32> to vector<8x256xf32>
    %103 = vector.broadcast %101 : f32 to vector<8x256xf32>
    %104 = arith.mulf %102, %103 : vector<8x256xf32>
    %105 = arith.addf %81, %104 : vector<8x256xf32>
    %c56 = arith.constant 56 : index
    %106 = memref.load %arg1[%c56] : memref<108xf32, #tpu.memory_space<smem>>
    %107 = vector.extract_strided_slice %95 {offsets = [16, 0], sizes = [8, 256], strides = [1, 1]} : vector<32x256xf32> to vector<8x256xf32>
    %108 = vector.broadcast %106 : f32 to vector<8x256xf32>
    %109 = arith.mulf %107, %108 : vector<8x256xf32>
    %110 = arith.addf %86, %109 : vector<8x256xf32>
    %c83 = arith.constant 83 : index
    %111 = memref.load %arg1[%c83] : memref<108xf32, #tpu.memory_space<smem>>
    %112 = vector.extract_strided_slice %95 {offsets = [24, 0], sizes = [8, 256], strides = [1, 1]} : vector<32x256xf32> to vector<8x256xf32>
    %113 = vector.broadcast %111 : f32 to vector<8x256xf32>
    %114 = arith.mulf %112, %113 : vector<8x256xf32>
    %115 = arith.addf %91, %114 : vector<8x256xf32>
    %c1_i32 = arith.constant 1 : i32
    %116 = tpu.dynamic_rotate %43 by %c1_i32 dim 1 : vector<32x256xf32>, i32 -> vector<32x256xf32>
    %c3 = arith.constant 3 : index
    %c0_42 = arith.constant 0 : index
    %117 = vector.load %arg3[%c3, %c0_42] : memref<16x256xf32, #tpu.memory_space<vmem>>, vector<1x256xf32>
    %118 = vector.broadcast %117 : vector<1x256xf32> to vector<32x256xf32>
    %119 = arith.mulf %116, %118 : vector<32x256xf32>
    %c3_43 = arith.constant 3 : index
    %120 = memref.load %arg1[%c3_43] : memref<108xf32, #tpu.memory_space<smem>>
    %121 = vector.extract_strided_slice %119 {offsets = [0, 0], sizes = [8, 256], strides = [1, 1]} : vector<32x256xf32> to vector<8x256xf32>
    %122 = vector.broadcast %120 : f32 to vector<8x256xf32>
    %123 = arith.mulf %121, %122 : vector<8x256xf32>
    %124 = arith.addf %100, %123 : vector<8x256xf32>
    %c30 = arith.constant 30 : index
    %125 = memref.load %arg1[%c30] : memref<108xf32, #tpu.memory_space<smem>>
    %126 = vector.extract_strided_slice %119 {offsets = [8, 0], sizes = [8, 256], strides = [1, 1]} : vector<32x256xf32> to vector<8x256xf32>
    %127 = vector.broadcast %125 : f32 to vector<8x256xf32>
    %128 = arith.mulf %126, %127 : vector<8x256xf32>
    %129 = arith.addf %105, %128 : vector<8x256xf32>
    %c57 = arith.constant 57 : index
    %130 = memref.load %arg1[%c57] : memref<108xf32, #tpu.memory_space<smem>>
    %131 = vector.extract_strided_slice %119 {offsets = [16, 0], sizes = [8, 256], strides = [1, 1]} : vector<32x256xf32> to vector<8x256xf32>
    %132 = vector.broadcast %130 : f32 to vector<8x256xf32>
    %133 = arith.mulf %131, %132 : vector<8x256xf32>
    %134 = arith.addf %110, %133 : vector<8x256xf32>
    %c84 = arith.constant 84 : index
    %135 = memref.load %arg1[%c84] : memref<108xf32, #tpu.memory_space<smem>>
    %136 = vector.extract_strided_slice %119 {offsets = [24, 0], sizes = [8, 256], strides = [1, 1]} : vector<32x256xf32> to vector<8x256xf32>
    %137 = vector.broadcast %135 : f32 to vector<8x256xf32>
    %138 = arith.mulf %136, %137 : vector<8x256xf32>
    %139 = arith.addf %115, %138 : vector<8x256xf32>
    %c4 = arith.constant 4 : index
    %140 = memref.load %arg1[%c4] : memref<108xf32, #tpu.memory_space<smem>>
    %141 = vector.extract_strided_slice %43 {offsets = [0, 0], sizes = [8, 256], strides = [1, 1]} : vector<32x256xf32> to vector<8x256xf32>
    %142 = vector.broadcast %140 : f32 to vector<8x256xf32>
    %143 = arith.mulf %141, %142 : vector<8x256xf32>
    %144 = arith.addf %124, %143 : vector<8x256xf32>
    %c31_44 = arith.constant 31 : index
    %145 = memref.load %arg1[%c31_44] : memref<108xf32, #tpu.memory_space<smem>>
    %146 = vector.extract_strided_slice %43 {offsets = [8, 0], sizes = [8, 256], strides = [1, 1]} : vector<32x256xf32> to vector<8x256xf32>
    %147 = vector.broadcast %145 : f32 to vector<8x256xf32>
    %148 = arith.mulf %146, %147 : vector<8x256xf32>
    %149 = arith.addf %129, %148 : vector<8x256xf32>
    %c58 = arith.constant 58 : index
    %150 = memref.load %arg1[%c58] : memref<108xf32, #tpu.memory_space<smem>>
    %151 = vector.extract_strided_slice %43 {offsets = [16, 0], sizes = [8, 256], strides = [1, 1]} : vector<32x256xf32> to vector<8x256xf32>
    %152 = vector.broadcast %150 : f32 to vector<8x256xf32>
    %153 = arith.mulf %151, %152 : vector<8x256xf32>
    %154 = arith.addf %134, %153 : vector<8x256xf32>
    %c85 = arith.constant 85 : index
    %155 = memref.load %arg1[%c85] : memref<108xf32, #tpu.memory_space<smem>>
    %156 = vector.extract_strided_slice %43 {offsets = [24, 0], sizes = [8, 256], strides = [1, 1]} : vector<32x256xf32> to vector<8x256xf32>
    %157 = vector.broadcast %155 : f32 to vector<8x256xf32>
    %158 = arith.mulf %156, %157 : vector<8x256xf32>
    %159 = arith.addf %139, %158 : vector<8x256xf32>
    %c255_i32 = arith.constant 255 : i32
    %160 = tpu.dynamic_rotate %43 by %c255_i32 dim 1 : vector<32x256xf32>, i32 -> vector<32x256xf32>
    %c5 = arith.constant 5 : index
    %c0_45 = arith.constant 0 : index
    %161 = vector.load %arg3[%c5, %c0_45] : memref<16x256xf32, #tpu.memory_space<vmem>>, vector<1x256xf32>
    %162 = vector.broadcast %161 : vector<1x256xf32> to vector<32x256xf32>
    %163 = arith.mulf %160, %162 : vector<32x256xf32>
    %c5_46 = arith.constant 5 : index
    %164 = memref.load %arg1[%c5_46] : memref<108xf32, #tpu.memory_space<smem>>
    %165 = vector.extract_strided_slice %163 {offsets = [0, 0], sizes = [8, 256], strides = [1, 1]} : vector<32x256xf32> to vector<8x256xf32>
    %166 = vector.broadcast %164 : f32 to vector<8x256xf32>
    %167 = arith.mulf %165, %166 : vector<8x256xf32>
    %168 = arith.addf %144, %167 : vector<8x256xf32>
    %c32 = arith.constant 32 : index
    %169 = memref.load %arg1[%c32] : memref<108xf32, #tpu.memory_space<smem>>
    %170 = vector.extract_strided_slice %163 {offsets = [8, 0], sizes = [8, 256], strides = [1, 1]} : vector<32x256xf32> to vector<8x256xf32>
    %171 = vector.broadcast %169 : f32 to vector<8x256xf32>
    %172 = arith.mulf %170, %171 : vector<8x256xf32>
    %173 = arith.addf %149, %172 : vector<8x256xf32>
    %c59 = arith.constant 59 : index
    %174 = memref.load %arg1[%c59] : memref<108xf32, #tpu.memory_space<smem>>
    %175 = vector.extract_strided_slice %163 {offsets = [16, 0], sizes = [8, 256], strides = [1, 1]} : vector<32x256xf32> to vector<8x256xf32>
    %176 = vector.broadcast %174 : f32 to vector<8x256xf32>
    %177 = arith.mulf %175, %176 : vector<8x256xf32>
    %178 = arith.addf %154, %177 : vector<8x256xf32>
    %c86 = arith.constant 86 : index
    %179 = memref.load %arg1[%c86] : memref<108xf32, #tpu.memory_space<smem>>
    %180 = vector.extract_strided_slice %163 {offsets = [24, 0], sizes = [8, 256], strides = [1, 1]} : vector<32x256xf32> to vector<8x256xf32>
    %181 = vector.broadcast %179 : f32 to vector<8x256xf32>
    %182 = arith.mulf %180, %181 : vector<8x256xf32>
    %183 = arith.addf %159, %182 : vector<8x256xf32>
    %c241_i32 = arith.constant 241 : i32
    %184 = tpu.dynamic_rotate %43 by %c241_i32 dim 1 : vector<32x256xf32>, i32 -> vector<32x256xf32>
    %c6 = arith.constant 6 : index
    %c0_47 = arith.constant 0 : index
    %185 = vector.load %arg3[%c6, %c0_47] : memref<16x256xf32, #tpu.memory_space<vmem>>, vector<1x256xf32>
    %186 = vector.broadcast %185 : vector<1x256xf32> to vector<32x256xf32>
    %187 = arith.mulf %184, %186 : vector<32x256xf32>
    %c6_48 = arith.constant 6 : index
    %188 = memref.load %arg1[%c6_48] : memref<108xf32, #tpu.memory_space<smem>>
    %189 = vector.extract_strided_slice %187 {offsets = [0, 0], sizes = [8, 256], strides = [1, 1]} : vector<32x256xf32> to vector<8x256xf32>
    %190 = vector.broadcast %188 : f32 to vector<8x256xf32>
    %191 = arith.mulf %189, %190 : vector<8x256xf32>
    %192 = arith.addf %168, %191 : vector<8x256xf32>
    %c33 = arith.constant 33 : index
    %193 = memref.load %arg1[%c33] : memref<108xf32, #tpu.memory_space<smem>>
    %194 = vector.extract_strided_slice %187 {offsets = [8, 0], sizes = [8, 256], strides = [1, 1]} : vector<32x256xf32> to vector<8x256xf32>
    %195 = vector.broadcast %193 : f32 to vector<8x256xf32>
    %196 = arith.mulf %194, %195 : vector<8x256xf32>
    %197 = arith.addf %173, %196 : vector<8x256xf32>
    %c60 = arith.constant 60 : index
    %198 = memref.load %arg1[%c60] : memref<108xf32, #tpu.memory_space<smem>>
    %199 = vector.extract_strided_slice %187 {offsets = [16, 0], sizes = [8, 256], strides = [1, 1]} : vector<32x256xf32> to vector<8x256xf32>
    %200 = vector.broadcast %198 : f32 to vector<8x256xf32>
    %201 = arith.mulf %199, %200 : vector<8x256xf32>
    %202 = arith.addf %178, %201 : vector<8x256xf32>
    %c87 = arith.constant 87 : index
    %203 = memref.load %arg1[%c87] : memref<108xf32, #tpu.memory_space<smem>>
    %204 = vector.extract_strided_slice %187 {offsets = [24, 0], sizes = [8, 256], strides = [1, 1]} : vector<32x256xf32> to vector<8x256xf32>
    %205 = vector.broadcast %203 : f32 to vector<8x256xf32>
    %206 = arith.mulf %204, %205 : vector<8x256xf32>
    %207 = arith.addf %183, %206 : vector<8x256xf32>
    %c240_i32 = arith.constant 240 : i32
    %208 = tpu.dynamic_rotate %43 by %c240_i32 dim 1 : vector<32x256xf32>, i32 -> vector<32x256xf32>
    %c7_49 = arith.constant 7 : index
    %c0_50 = arith.constant 0 : index
    %209 = vector.load %arg3[%c7_49, %c0_50] : memref<16x256xf32, #tpu.memory_space<vmem>>, vector<1x256xf32>
    %210 = vector.broadcast %209 : vector<1x256xf32> to vector<32x256xf32>
    %211 = arith.mulf %208, %210 : vector<32x256xf32>
    %c7_51 = arith.constant 7 : index
    %212 = memref.load %arg1[%c7_51] : memref<108xf32, #tpu.memory_space<smem>>
    %213 = vector.extract_strided_slice %211 {offsets = [0, 0], sizes = [8, 256], strides = [1, 1]} : vector<32x256xf32> to vector<8x256xf32>
    %214 = vector.broadcast %212 : f32 to vector<8x256xf32>
    %215 = arith.mulf %213, %214 : vector<8x256xf32>
    %216 = arith.addf %192, %215 : vector<8x256xf32>
    %c34 = arith.constant 34 : index
    %217 = memref.load %arg1[%c34] : memref<108xf32, #tpu.memory_space<smem>>
    %218 = vector.extract_strided_slice %211 {offsets = [8, 0], sizes = [8, 256], strides = [1, 1]} : vector<32x256xf32> to vector<8x256xf32>
    %219 = vector.broadcast %217 : f32 to vector<8x256xf32>
    %220 = arith.mulf %218, %219 : vector<8x256xf32>
    %221 = arith.addf %197, %220 : vector<8x256xf32>
    %c61 = arith.constant 61 : index
    %222 = memref.load %arg1[%c61] : memref<108xf32, #tpu.memory_space<smem>>
    %223 = vector.extract_strided_slice %211 {offsets = [16, 0], sizes = [8, 256], strides = [1, 1]} : vector<32x256xf32> to vector<8x256xf32>
    %224 = vector.broadcast %222 : f32 to vector<8x256xf32>
    %225 = arith.mulf %223, %224 : vector<8x256xf32>
    %226 = arith.addf %202, %225 : vector<8x256xf32>
    %c88 = arith.constant 88 : index
    %227 = memref.load %arg1[%c88] : memref<108xf32, #tpu.memory_space<smem>>
    %228 = vector.extract_strided_slice %211 {offsets = [24, 0], sizes = [8, 256], strides = [1, 1]} : vector<32x256xf32> to vector<8x256xf32>
    %229 = vector.broadcast %227 : f32 to vector<8x256xf32>
    %230 = arith.mulf %228, %229 : vector<8x256xf32>
    %231 = arith.addf %207, %230 : vector<8x256xf32>
    %c239_i32 = arith.constant 239 : i32
    %232 = tpu.dynamic_rotate %43 by %c239_i32 dim 1 : vector<32x256xf32>, i32 -> vector<32x256xf32>
    %c8_52 = arith.constant 8 : index
    %c0_53 = arith.constant 0 : index
    %233 = vector.load %arg3[%c8_52, %c0_53] : memref<16x256xf32, #tpu.memory_space<vmem>>, vector<1x256xf32>
    %234 = vector.broadcast %233 : vector<1x256xf32> to vector<32x256xf32>
    %235 = arith.mulf %232, %234 : vector<32x256xf32>
    %c8_54 = arith.constant 8 : index
    %236 = memref.load %arg1[%c8_54] : memref<108xf32, #tpu.memory_space<smem>>
    %237 = vector.extract_strided_slice %235 {offsets = [0, 0], sizes = [8, 256], strides = [1, 1]} : vector<32x256xf32> to vector<8x256xf32>
    %238 = vector.broadcast %236 : f32 to vector<8x256xf32>
    %239 = arith.mulf %237, %238 : vector<8x256xf32>
    %240 = arith.addf %216, %239 : vector<8x256xf32>
    %c35 = arith.constant 35 : index
    %241 = memref.load %arg1[%c35] : memref<108xf32, #tpu.memory_space<smem>>
    %242 = vector.extract_strided_slice %235 {offsets = [8, 0], sizes = [8, 256], strides = [1, 1]} : vector<32x256xf32> to vector<8x256xf32>
    %243 = vector.broadcast %241 : f32 to vector<8x256xf32>
    %244 = arith.mulf %242, %243 : vector<8x256xf32>
    %245 = arith.addf %221, %244 : vector<8x256xf32>
    %c62 = arith.constant 62 : index
    %246 = memref.load %arg1[%c62] : memref<108xf32, #tpu.memory_space<smem>>
    %247 = vector.extract_strided_slice %235 {offsets = [16, 0], sizes = [8, 256], strides = [1, 1]} : vector<32x256xf32> to vector<8x256xf32>
    %248 = vector.broadcast %246 : f32 to vector<8x256xf32>
    %249 = arith.mulf %247, %248 : vector<8x256xf32>
    %250 = arith.addf %226, %249 : vector<8x256xf32>
    %c89 = arith.constant 89 : index
    %251 = memref.load %arg1[%c89] : memref<108xf32, #tpu.memory_space<smem>>
    %252 = vector.extract_strided_slice %235 {offsets = [24, 0], sizes = [8, 256], strides = [1, 1]} : vector<32x256xf32> to vector<8x256xf32>
    %253 = vector.broadcast %251 : f32 to vector<8x256xf32>
    %254 = arith.mulf %252, %253 : vector<8x256xf32>
    %255 = arith.addf %231, %254 : vector<8x256xf32>
    %c1_55 = arith.constant 1 : index
    %c0_56 = arith.constant 0 : index
    %c0_57 = arith.constant 0 : index
    %256 = vector.load %arg8[%c1_55, %c0_56, %c0_57] : memref<3x32x256xf32, #tpu.memory_space<vmem>>, vector<1x32x256xf32>
    %257 = vector.shape_cast %256 : vector<1x32x256xf32> to vector<32x256xf32>
    %c17_i32_58 = arith.constant 17 : i32
    %258 = tpu.dynamic_rotate %257 by %c17_i32_58 dim 1 : vector<32x256xf32>, i32 -> vector<32x256xf32>
    %c0_59 = arith.constant 0 : index
    %c0_60 = arith.constant 0 : index
    %259 = vector.load %arg3[%c0_59, %c0_60] : memref<16x256xf32, #tpu.memory_space<vmem>>, vector<1x256xf32>
    %260 = vector.broadcast %259 : vector<1x256xf32> to vector<32x256xf32>
    %261 = arith.mulf %258, %260 : vector<32x256xf32>
    %c9 = arith.constant 9 : index
    %262 = memref.load %arg1[%c9] : memref<108xf32, #tpu.memory_space<smem>>
    %263 = vector.extract_strided_slice %261 {offsets = [0, 0], sizes = [8, 256], strides = [1, 1]} : vector<32x256xf32> to vector<8x256xf32>
    %264 = vector.broadcast %262 : f32 to vector<8x256xf32>
    %265 = arith.mulf %263, %264 : vector<8x256xf32>
    %266 = arith.addf %240, %265 : vector<8x256xf32>
    %c36 = arith.constant 36 : index
    %267 = memref.load %arg1[%c36] : memref<108xf32, #tpu.memory_space<smem>>
    %268 = vector.extract_strided_slice %261 {offsets = [8, 0], sizes = [8, 256], strides = [1, 1]} : vector<32x256xf32> to vector<8x256xf32>
    %269 = vector.broadcast %267 : f32 to vector<8x256xf32>
    %270 = arith.mulf %268, %269 : vector<8x256xf32>
    %271 = arith.addf %245, %270 : vector<8x256xf32>
    %c63 = arith.constant 63 : index
    %272 = memref.load %arg1[%c63] : memref<108xf32, #tpu.memory_space<smem>>
    %273 = vector.extract_strided_slice %261 {offsets = [16, 0], sizes = [8, 256], strides = [1, 1]} : vector<32x256xf32> to vector<8x256xf32>
    %274 = vector.broadcast %272 : f32 to vector<8x256xf32>
    %275 = arith.mulf %273, %274 : vector<8x256xf32>
    %276 = arith.addf %250, %275 : vector<8x256xf32>
    %c90 = arith.constant 90 : index
    %277 = memref.load %arg1[%c90] : memref<108xf32, #tpu.memory_space<smem>>
    %278 = vector.extract_strided_slice %261 {offsets = [24, 0], sizes = [8, 256], strides = [1, 1]} : vector<32x256xf32> to vector<8x256xf32>
    %279 = vector.broadcast %277 : f32 to vector<8x256xf32>
    %280 = arith.mulf %278, %279 : vector<8x256xf32>
    %281 = arith.addf %255, %280 : vector<8x256xf32>
    %c16_i32_61 = arith.constant 16 : i32
    %282 = tpu.dynamic_rotate %257 by %c16_i32_61 dim 1 : vector<32x256xf32>, i32 -> vector<32x256xf32>
    %c1_62 = arith.constant 1 : index
    %c0_63 = arith.constant 0 : index
    %283 = vector.load %arg3[%c1_62, %c0_63] : memref<16x256xf32, #tpu.memory_space<vmem>>, vector<1x256xf32>
    %284 = vector.broadcast %283 : vector<1x256xf32> to vector<32x256xf32>
    %285 = arith.mulf %282, %284 : vector<32x256xf32>
    %c10 = arith.constant 10 : index
    %286 = memref.load %arg1[%c10] : memref<108xf32, #tpu.memory_space<smem>>
    %287 = vector.extract_strided_slice %285 {offsets = [0, 0], sizes = [8, 256], strides = [1, 1]} : vector<32x256xf32> to vector<8x256xf32>
    %288 = vector.broadcast %286 : f32 to vector<8x256xf32>
    %289 = arith.mulf %287, %288 : vector<8x256xf32>
    %290 = arith.addf %266, %289 : vector<8x256xf32>
    %c37 = arith.constant 37 : index
    %291 = memref.load %arg1[%c37] : memref<108xf32, #tpu.memory_space<smem>>
    %292 = vector.extract_strided_slice %285 {offsets = [8, 0], sizes = [8, 256], strides = [1, 1]} : vector<32x256xf32> to vector<8x256xf32>
    %293 = vector.broadcast %291 : f32 to vector<8x256xf32>
    %294 = arith.mulf %292, %293 : vector<8x256xf32>
    %295 = arith.addf %271, %294 : vector<8x256xf32>
    %c64 = arith.constant 64 : index
    %296 = memref.load %arg1[%c64] : memref<108xf32, #tpu.memory_space<smem>>
    %297 = vector.extract_strided_slice %285 {offsets = [16, 0], sizes = [8, 256], strides = [1, 1]} : vector<32x256xf32> to vector<8x256xf32>
    %298 = vector.broadcast %296 : f32 to vector<8x256xf32>
    %299 = arith.mulf %297, %298 : vector<8x256xf32>
    %300 = arith.addf %276, %299 : vector<8x256xf32>
    %c91 = arith.constant 91 : index
    %301 = memref.load %arg1[%c91] : memref<108xf32, #tpu.memory_space<smem>>
    %302 = vector.extract_strided_slice %285 {offsets = [24, 0], sizes = [8, 256], strides = [1, 1]} : vector<32x256xf32> to vector<8x256xf32>
    %303 = vector.broadcast %301 : f32 to vector<8x256xf32>
    %304 = arith.mulf %302, %303 : vector<8x256xf32>
    %305 = arith.addf %281, %304 : vector<8x256xf32>
    %c15_i32_64 = arith.constant 15 : i32
    %306 = tpu.dynamic_rotate %257 by %c15_i32_64 dim 1 : vector<32x256xf32>, i32 -> vector<32x256xf32>
    %c2_65 = arith.constant 2 : index
    %c0_66 = arith.constant 0 : index
    %307 = vector.load %arg3[%c2_65, %c0_66] : memref<16x256xf32, #tpu.memory_space<vmem>>, vector<1x256xf32>
    %308 = vector.broadcast %307 : vector<1x256xf32> to vector<32x256xf32>
    %309 = arith.mulf %306, %308 : vector<32x256xf32>
    %c11 = arith.constant 11 : index
    %310 = memref.load %arg1[%c11] : memref<108xf32, #tpu.memory_space<smem>>
    %311 = vector.extract_strided_slice %309 {offsets = [0, 0], sizes = [8, 256], strides = [1, 1]} : vector<32x256xf32> to vector<8x256xf32>
    %312 = vector.broadcast %310 : f32 to vector<8x256xf32>
    %313 = arith.mulf %311, %312 : vector<8x256xf32>
    %314 = arith.addf %290, %313 : vector<8x256xf32>
    %c38 = arith.constant 38 : index
    %315 = memref.load %arg1[%c38] : memref<108xf32, #tpu.memory_space<smem>>
    %316 = vector.extract_strided_slice %309 {offsets = [8, 0], sizes = [8, 256], strides = [1, 1]} : vector<32x256xf32> to vector<8x256xf32>
    %317 = vector.broadcast %315 : f32 to vector<8x256xf32>
    %318 = arith.mulf %316, %317 : vector<8x256xf32>
    %319 = arith.addf %295, %318 : vector<8x256xf32>
    %c65 = arith.constant 65 : index
    %320 = memref.load %arg1[%c65] : memref<108xf32, #tpu.memory_space<smem>>
    %321 = vector.extract_strided_slice %309 {offsets = [16, 0], sizes = [8, 256], strides = [1, 1]} : vector<32x256xf32> to vector<8x256xf32>
    %322 = vector.broadcast %320 : f32 to vector<8x256xf32>
    %323 = arith.mulf %321, %322 : vector<8x256xf32>
    %324 = arith.addf %300, %323 : vector<8x256xf32>
    %c92 = arith.constant 92 : index
    %325 = memref.load %arg1[%c92] : memref<108xf32, #tpu.memory_space<smem>>
    %326 = vector.extract_strided_slice %309 {offsets = [24, 0], sizes = [8, 256], strides = [1, 1]} : vector<32x256xf32> to vector<8x256xf32>
    %327 = vector.broadcast %325 : f32 to vector<8x256xf32>
    %328 = arith.mulf %326, %327 : vector<8x256xf32>
    %329 = arith.addf %305, %328 : vector<8x256xf32>
    %c1_i32_67 = arith.constant 1 : i32
    %330 = tpu.dynamic_rotate %257 by %c1_i32_67 dim 1 : vector<32x256xf32>, i32 -> vector<32x256xf32>
    %c3_68 = arith.constant 3 : index
    %c0_69 = arith.constant 0 : index
    %331 = vector.load %arg3[%c3_68, %c0_69] : memref<16x256xf32, #tpu.memory_space<vmem>>, vector<1x256xf32>
    %332 = vector.broadcast %331 : vector<1x256xf32> to vector<32x256xf32>
    %333 = arith.mulf %330, %332 : vector<32x256xf32>
    %c12 = arith.constant 12 : index
    %334 = memref.load %arg1[%c12] : memref<108xf32, #tpu.memory_space<smem>>
    %335 = vector.extract_strided_slice %333 {offsets = [0, 0], sizes = [8, 256], strides = [1, 1]} : vector<32x256xf32> to vector<8x256xf32>
    %336 = vector.broadcast %334 : f32 to vector<8x256xf32>
    %337 = arith.mulf %335, %336 : vector<8x256xf32>
    %338 = arith.addf %314, %337 : vector<8x256xf32>
    %c39 = arith.constant 39 : index
    %339 = memref.load %arg1[%c39] : memref<108xf32, #tpu.memory_space<smem>>
    %340 = vector.extract_strided_slice %333 {offsets = [8, 0], sizes = [8, 256], strides = [1, 1]} : vector<32x256xf32> to vector<8x256xf32>
    %341 = vector.broadcast %339 : f32 to vector<8x256xf32>
    %342 = arith.mulf %340, %341 : vector<8x256xf32>
    %343 = arith.addf %319, %342 : vector<8x256xf32>
    %c66 = arith.constant 66 : index
    %344 = memref.load %arg1[%c66] : memref<108xf32, #tpu.memory_space<smem>>
    %345 = vector.extract_strided_slice %333 {offsets = [16, 0], sizes = [8, 256], strides = [1, 1]} : vector<32x256xf32> to vector<8x256xf32>
    %346 = vector.broadcast %344 : f32 to vector<8x256xf32>
    %347 = arith.mulf %345, %346 : vector<8x256xf32>
    %348 = arith.addf %324, %347 : vector<8x256xf32>
    %c93 = arith.constant 93 : index
    %349 = memref.load %arg1[%c93] : memref<108xf32, #tpu.memory_space<smem>>
    %350 = vector.extract_strided_slice %333 {offsets = [24, 0], sizes = [8, 256], strides = [1, 1]} : vector<32x256xf32> to vector<8x256xf32>
    %351 = vector.broadcast %349 : f32 to vector<8x256xf32>
    %352 = arith.mulf %350, %351 : vector<8x256xf32>
    %353 = arith.addf %329, %352 : vector<8x256xf32>
    %c13 = arith.constant 13 : index
    %354 = memref.load %arg1[%c13] : memref<108xf32, #tpu.memory_space<smem>>
    %355 = vector.extract_strided_slice %257 {offsets = [0, 0], sizes = [8, 256], strides = [1, 1]} : vector<32x256xf32> to vector<8x256xf32>
    %356 = vector.broadcast %354 : f32 to vector<8x256xf32>
    %357 = arith.mulf %355, %356 : vector<8x256xf32>
    %358 = arith.addf %338, %357 : vector<8x256xf32>
    %c40 = arith.constant 40 : index
    %359 = memref.load %arg1[%c40] : memref<108xf32, #tpu.memory_space<smem>>
    %360 = vector.extract_strided_slice %257 {offsets = [8, 0], sizes = [8, 256], strides = [1, 1]} : vector<32x256xf32> to vector<8x256xf32>
    %361 = vector.broadcast %359 : f32 to vector<8x256xf32>
    %362 = arith.mulf %360, %361 : vector<8x256xf32>
    %363 = arith.addf %343, %362 : vector<8x256xf32>
    %c67 = arith.constant 67 : index
    %364 = memref.load %arg1[%c67] : memref<108xf32, #tpu.memory_space<smem>>
    %365 = vector.extract_strided_slice %257 {offsets = [16, 0], sizes = [8, 256], strides = [1, 1]} : vector<32x256xf32> to vector<8x256xf32>
    %366 = vector.broadcast %364 : f32 to vector<8x256xf32>
    %367 = arith.mulf %365, %366 : vector<8x256xf32>
    %368 = arith.addf %348, %367 : vector<8x256xf32>
    %c94 = arith.constant 94 : index
    %369 = memref.load %arg1[%c94] : memref<108xf32, #tpu.memory_space<smem>>
    %370 = vector.extract_strided_slice %257 {offsets = [24, 0], sizes = [8, 256], strides = [1, 1]} : vector<32x256xf32> to vector<8x256xf32>
    %371 = vector.broadcast %369 : f32 to vector<8x256xf32>
    %372 = arith.mulf %370, %371 : vector<8x256xf32>
    %373 = arith.addf %353, %372 : vector<8x256xf32>
    %c255_i32_70 = arith.constant 255 : i32
    %374 = tpu.dynamic_rotate %257 by %c255_i32_70 dim 1 : vector<32x256xf32>, i32 -> vector<32x256xf32>
    %c5_71 = arith.constant 5 : index
    %c0_72 = arith.constant 0 : index
    %375 = vector.load %arg3[%c5_71, %c0_72] : memref<16x256xf32, #tpu.memory_space<vmem>>, vector<1x256xf32>
    %376 = vector.broadcast %375 : vector<1x256xf32> to vector<32x256xf32>
    %377 = arith.mulf %374, %376 : vector<32x256xf32>
    %c14 = arith.constant 14 : index
    %378 = memref.load %arg1[%c14] : memref<108xf32, #tpu.memory_space<smem>>
    %379 = vector.extract_strided_slice %377 {offsets = [0, 0], sizes = [8, 256], strides = [1, 1]} : vector<32x256xf32> to vector<8x256xf32>
    %380 = vector.broadcast %378 : f32 to vector<8x256xf32>
    %381 = arith.mulf %379, %380 : vector<8x256xf32>
    %382 = arith.addf %358, %381 : vector<8x256xf32>
    %c41 = arith.constant 41 : index
    %383 = memref.load %arg1[%c41] : memref<108xf32, #tpu.memory_space<smem>>
    %384 = vector.extract_strided_slice %377 {offsets = [8, 0], sizes = [8, 256], strides = [1, 1]} : vector<32x256xf32> to vector<8x256xf32>
    %385 = vector.broadcast %383 : f32 to vector<8x256xf32>
    %386 = arith.mulf %384, %385 : vector<8x256xf32>
    %387 = arith.addf %363, %386 : vector<8x256xf32>
    %c68 = arith.constant 68 : index
    %388 = memref.load %arg1[%c68] : memref<108xf32, #tpu.memory_space<smem>>
    %389 = vector.extract_strided_slice %377 {offsets = [16, 0], sizes = [8, 256], strides = [1, 1]} : vector<32x256xf32> to vector<8x256xf32>
    %390 = vector.broadcast %388 : f32 to vector<8x256xf32>
    %391 = arith.mulf %389, %390 : vector<8x256xf32>
    %392 = arith.addf %368, %391 : vector<8x256xf32>
    %c95 = arith.constant 95 : index
    %393 = memref.load %arg1[%c95] : memref<108xf32, #tpu.memory_space<smem>>
    %394 = vector.extract_strided_slice %377 {offsets = [24, 0], sizes = [8, 256], strides = [1, 1]} : vector<32x256xf32> to vector<8x256xf32>
    %395 = vector.broadcast %393 : f32 to vector<8x256xf32>
    %396 = arith.mulf %394, %395 : vector<8x256xf32>
    %397 = arith.addf %373, %396 : vector<8x256xf32>
    %c241_i32_73 = arith.constant 241 : i32
    %398 = tpu.dynamic_rotate %257 by %c241_i32_73 dim 1 : vector<32x256xf32>, i32 -> vector<32x256xf32>
    %c6_74 = arith.constant 6 : index
    %c0_75 = arith.constant 0 : index
    %399 = vector.load %arg3[%c6_74, %c0_75] : memref<16x256xf32, #tpu.memory_space<vmem>>, vector<1x256xf32>
    %400 = vector.broadcast %399 : vector<1x256xf32> to vector<32x256xf32>
    %401 = arith.mulf %398, %400 : vector<32x256xf32>
    %c15_76 = arith.constant 15 : index
    %402 = memref.load %arg1[%c15_76] : memref<108xf32, #tpu.memory_space<smem>>
    %403 = vector.extract_strided_slice %401 {offsets = [0, 0], sizes = [8, 256], strides = [1, 1]} : vector<32x256xf32> to vector<8x256xf32>
    %404 = vector.broadcast %402 : f32 to vector<8x256xf32>
    %405 = arith.mulf %403, %404 : vector<8x256xf32>
    %406 = arith.addf %382, %405 : vector<8x256xf32>
    %c42 = arith.constant 42 : index
    %407 = memref.load %arg1[%c42] : memref<108xf32, #tpu.memory_space<smem>>
    %408 = vector.extract_strided_slice %401 {offsets = [8, 0], sizes = [8, 256], strides = [1, 1]} : vector<32x256xf32> to vector<8x256xf32>
    %409 = vector.broadcast %407 : f32 to vector<8x256xf32>
    %410 = arith.mulf %408, %409 : vector<8x256xf32>
    %411 = arith.addf %387, %410 : vector<8x256xf32>
    %c69 = arith.constant 69 : index
    %412 = memref.load %arg1[%c69] : memref<108xf32, #tpu.memory_space<smem>>
    %413 = vector.extract_strided_slice %401 {offsets = [16, 0], sizes = [8, 256], strides = [1, 1]} : vector<32x256xf32> to vector<8x256xf32>
    %414 = vector.broadcast %412 : f32 to vector<8x256xf32>
    %415 = arith.mulf %413, %414 : vector<8x256xf32>
    %416 = arith.addf %392, %415 : vector<8x256xf32>
    %c96 = arith.constant 96 : index
    %417 = memref.load %arg1[%c96] : memref<108xf32, #tpu.memory_space<smem>>
    %418 = vector.extract_strided_slice %401 {offsets = [24, 0], sizes = [8, 256], strides = [1, 1]} : vector<32x256xf32> to vector<8x256xf32>
    %419 = vector.broadcast %417 : f32 to vector<8x256xf32>
    %420 = arith.mulf %418, %419 : vector<8x256xf32>
    %421 = arith.addf %397, %420 : vector<8x256xf32>
    %c240_i32_77 = arith.constant 240 : i32
    %422 = tpu.dynamic_rotate %257 by %c240_i32_77 dim 1 : vector<32x256xf32>, i32 -> vector<32x256xf32>
    %c7_78 = arith.constant 7 : index
    %c0_79 = arith.constant 0 : index
    %423 = vector.load %arg3[%c7_78, %c0_79] : memref<16x256xf32, #tpu.memory_space<vmem>>, vector<1x256xf32>
    %424 = vector.broadcast %423 : vector<1x256xf32> to vector<32x256xf32>
    %425 = arith.mulf %422, %424 : vector<32x256xf32>
    %c16_80 = arith.constant 16 : index
    %426 = memref.load %arg1[%c16_80] : memref<108xf32, #tpu.memory_space<smem>>
    %427 = vector.extract_strided_slice %425 {offsets = [0, 0], sizes = [8, 256], strides = [1, 1]} : vector<32x256xf32> to vector<8x256xf32>
    %428 = vector.broadcast %426 : f32 to vector<8x256xf32>
    %429 = arith.mulf %427, %428 : vector<8x256xf32>
    %430 = arith.addf %406, %429 : vector<8x256xf32>
    %c43 = arith.constant 43 : index
    %431 = memref.load %arg1[%c43] : memref<108xf32, #tpu.memory_space<smem>>
    %432 = vector.extract_strided_slice %425 {offsets = [8, 0], sizes = [8, 256], strides = [1, 1]} : vector<32x256xf32> to vector<8x256xf32>
    %433 = vector.broadcast %431 : f32 to vector<8x256xf32>
    %434 = arith.mulf %432, %433 : vector<8x256xf32>
    %435 = arith.addf %411, %434 : vector<8x256xf32>
    %c70 = arith.constant 70 : index
    %436 = memref.load %arg1[%c70] : memref<108xf32, #tpu.memory_space<smem>>
    %437 = vector.extract_strided_slice %425 {offsets = [16, 0], sizes = [8, 256], strides = [1, 1]} : vector<32x256xf32> to vector<8x256xf32>
    %438 = vector.broadcast %436 : f32 to vector<8x256xf32>
    %439 = arith.mulf %437, %438 : vector<8x256xf32>
    %440 = arith.addf %416, %439 : vector<8x256xf32>
    %c97 = arith.constant 97 : index
    %441 = memref.load %arg1[%c97] : memref<108xf32, #tpu.memory_space<smem>>
    %442 = vector.extract_strided_slice %425 {offsets = [24, 0], sizes = [8, 256], strides = [1, 1]} : vector<32x256xf32> to vector<8x256xf32>
    %443 = vector.broadcast %441 : f32 to vector<8x256xf32>
    %444 = arith.mulf %442, %443 : vector<8x256xf32>
    %445 = arith.addf %421, %444 : vector<8x256xf32>
    %c239_i32_81 = arith.constant 239 : i32
    %446 = tpu.dynamic_rotate %257 by %c239_i32_81 dim 1 : vector<32x256xf32>, i32 -> vector<32x256xf32>
    %c8_82 = arith.constant 8 : index
    %c0_83 = arith.constant 0 : index
    %447 = vector.load %arg3[%c8_82, %c0_83] : memref<16x256xf32, #tpu.memory_space<vmem>>, vector<1x256xf32>
    %448 = vector.broadcast %447 : vector<1x256xf32> to vector<32x256xf32>
    %449 = arith.mulf %446, %448 : vector<32x256xf32>
    %c17 = arith.constant 17 : index
    %450 = memref.load %arg1[%c17] : memref<108xf32, #tpu.memory_space<smem>>
    %451 = vector.extract_strided_slice %449 {offsets = [0, 0], sizes = [8, 256], strides = [1, 1]} : vector<32x256xf32> to vector<8x256xf32>
    %452 = vector.broadcast %450 : f32 to vector<8x256xf32>
    %453 = arith.mulf %451, %452 : vector<8x256xf32>
    %454 = arith.addf %430, %453 : vector<8x256xf32>
    %c44 = arith.constant 44 : index
    %455 = memref.load %arg1[%c44] : memref<108xf32, #tpu.memory_space<smem>>
    %456 = vector.extract_strided_slice %449 {offsets = [8, 0], sizes = [8, 256], strides = [1, 1]} : vector<32x256xf32> to vector<8x256xf32>
    %457 = vector.broadcast %455 : f32 to vector<8x256xf32>
    %458 = arith.mulf %456, %457 : vector<8x256xf32>
    %459 = arith.addf %435, %458 : vector<8x256xf32>
    %c71 = arith.constant 71 : index
    %460 = memref.load %arg1[%c71] : memref<108xf32, #tpu.memory_space<smem>>
    %461 = vector.extract_strided_slice %449 {offsets = [16, 0], sizes = [8, 256], strides = [1, 1]} : vector<32x256xf32> to vector<8x256xf32>
    %462 = vector.broadcast %460 : f32 to vector<8x256xf32>
    %463 = arith.mulf %461, %462 : vector<8x256xf32>
    %464 = arith.addf %440, %463 : vector<8x256xf32>
    %c98 = arith.constant 98 : index
    %465 = memref.load %arg1[%c98] : memref<108xf32, #tpu.memory_space<smem>>
    %466 = vector.extract_strided_slice %449 {offsets = [24, 0], sizes = [8, 256], strides = [1, 1]} : vector<32x256xf32> to vector<8x256xf32>
    %467 = vector.broadcast %465 : f32 to vector<8x256xf32>
    %468 = arith.mulf %466, %467 : vector<8x256xf32>
    %469 = arith.addf %445, %468 : vector<8x256xf32>
    %c2_84 = arith.constant 2 : index
    %c0_85 = arith.constant 0 : index
    %c0_86 = arith.constant 0 : index
    %470 = vector.load %arg8[%c2_84, %c0_85, %c0_86] : memref<3x32x256xf32, #tpu.memory_space<vmem>>, vector<1x32x256xf32>
    %471 = vector.shape_cast %470 : vector<1x32x256xf32> to vector<32x256xf32>
    %c17_i32_87 = arith.constant 17 : i32
    %472 = tpu.dynamic_rotate %471 by %c17_i32_87 dim 1 : vector<32x256xf32>, i32 -> vector<32x256xf32>
    %c0_88 = arith.constant 0 : index
    %c0_89 = arith.constant 0 : index
    %473 = vector.load %arg3[%c0_88, %c0_89] : memref<16x256xf32, #tpu.memory_space<vmem>>, vector<1x256xf32>
    %474 = vector.broadcast %473 : vector<1x256xf32> to vector<32x256xf32>
    %475 = arith.mulf %472, %474 : vector<32x256xf32>
    %c18 = arith.constant 18 : index
    %476 = memref.load %arg1[%c18] : memref<108xf32, #tpu.memory_space<smem>>
    %477 = vector.extract_strided_slice %475 {offsets = [0, 0], sizes = [8, 256], strides = [1, 1]} : vector<32x256xf32> to vector<8x256xf32>
    %478 = vector.broadcast %476 : f32 to vector<8x256xf32>
    %479 = arith.mulf %477, %478 : vector<8x256xf32>
    %480 = arith.addf %454, %479 : vector<8x256xf32>
    %c45 = arith.constant 45 : index
    %481 = memref.load %arg1[%c45] : memref<108xf32, #tpu.memory_space<smem>>
    %482 = vector.extract_strided_slice %475 {offsets = [8, 0], sizes = [8, 256], strides = [1, 1]} : vector<32x256xf32> to vector<8x256xf32>
    %483 = vector.broadcast %481 : f32 to vector<8x256xf32>
    %484 = arith.mulf %482, %483 : vector<8x256xf32>
    %485 = arith.addf %459, %484 : vector<8x256xf32>
    %c72 = arith.constant 72 : index
    %486 = memref.load %arg1[%c72] : memref<108xf32, #tpu.memory_space<smem>>
    %487 = vector.extract_strided_slice %475 {offsets = [16, 0], sizes = [8, 256], strides = [1, 1]} : vector<32x256xf32> to vector<8x256xf32>
    %488 = vector.broadcast %486 : f32 to vector<8x256xf32>
    %489 = arith.mulf %487, %488 : vector<8x256xf32>
    %490 = arith.addf %464, %489 : vector<8x256xf32>
    %c99 = arith.constant 99 : index
    %491 = memref.load %arg1[%c99] : memref<108xf32, #tpu.memory_space<smem>>
    %492 = vector.extract_strided_slice %475 {offsets = [24, 0], sizes = [8, 256], strides = [1, 1]} : vector<32x256xf32> to vector<8x256xf32>
    %493 = vector.broadcast %491 : f32 to vector<8x256xf32>
    %494 = arith.mulf %492, %493 : vector<8x256xf32>
    %495 = arith.addf %469, %494 : vector<8x256xf32>
    %c16_i32_90 = arith.constant 16 : i32
    %496 = tpu.dynamic_rotate %471 by %c16_i32_90 dim 1 : vector<32x256xf32>, i32 -> vector<32x256xf32>
    %c1_91 = arith.constant 1 : index
    %c0_92 = arith.constant 0 : index
    %497 = vector.load %arg3[%c1_91, %c0_92] : memref<16x256xf32, #tpu.memory_space<vmem>>, vector<1x256xf32>
    %498 = vector.broadcast %497 : vector<1x256xf32> to vector<32x256xf32>
    %499 = arith.mulf %496, %498 : vector<32x256xf32>
    %c19 = arith.constant 19 : index
    %500 = memref.load %arg1[%c19] : memref<108xf32, #tpu.memory_space<smem>>
    %501 = vector.extract_strided_slice %499 {offsets = [0, 0], sizes = [8, 256], strides = [1, 1]} : vector<32x256xf32> to vector<8x256xf32>
    %502 = vector.broadcast %500 : f32 to vector<8x256xf32>
    %503 = arith.mulf %501, %502 : vector<8x256xf32>
    %504 = arith.addf %480, %503 : vector<8x256xf32>
    %c46 = arith.constant 46 : index
    %505 = memref.load %arg1[%c46] : memref<108xf32, #tpu.memory_space<smem>>
    %506 = vector.extract_strided_slice %499 {offsets = [8, 0], sizes = [8, 256], strides = [1, 1]} : vector<32x256xf32> to vector<8x256xf32>
    %507 = vector.broadcast %505 : f32 to vector<8x256xf32>
    %508 = arith.mulf %506, %507 : vector<8x256xf32>
    %509 = arith.addf %485, %508 : vector<8x256xf32>
    %c73 = arith.constant 73 : index
    %510 = memref.load %arg1[%c73] : memref<108xf32, #tpu.memory_space<smem>>
    %511 = vector.extract_strided_slice %499 {offsets = [16, 0], sizes = [8, 256], strides = [1, 1]} : vector<32x256xf32> to vector<8x256xf32>
    %512 = vector.broadcast %510 : f32 to vector<8x256xf32>
    %513 = arith.mulf %511, %512 : vector<8x256xf32>
    %514 = arith.addf %490, %513 : vector<8x256xf32>
    %c100 = arith.constant 100 : index
    %515 = memref.load %arg1[%c100] : memref<108xf32, #tpu.memory_space<smem>>
    %516 = vector.extract_strided_slice %499 {offsets = [24, 0], sizes = [8, 256], strides = [1, 1]} : vector<32x256xf32> to vector<8x256xf32>
    %517 = vector.broadcast %515 : f32 to vector<8x256xf32>
    %518 = arith.mulf %516, %517 : vector<8x256xf32>
    %519 = arith.addf %495, %518 : vector<8x256xf32>
    %c15_i32_93 = arith.constant 15 : i32
    %520 = tpu.dynamic_rotate %471 by %c15_i32_93 dim 1 : vector<32x256xf32>, i32 -> vector<32x256xf32>
    %c2_94 = arith.constant 2 : index
    %c0_95 = arith.constant 0 : index
    %521 = vector.load %arg3[%c2_94, %c0_95] : memref<16x256xf32, #tpu.memory_space<vmem>>, vector<1x256xf32>
    %522 = vector.broadcast %521 : vector<1x256xf32> to vector<32x256xf32>
    %523 = arith.mulf %520, %522 : vector<32x256xf32>
    %c20 = arith.constant 20 : index
    %524 = memref.load %arg1[%c20] : memref<108xf32, #tpu.memory_space<smem>>
    %525 = vector.extract_strided_slice %523 {offsets = [0, 0], sizes = [8, 256], strides = [1, 1]} : vector<32x256xf32> to vector<8x256xf32>
    %526 = vector.broadcast %524 : f32 to vector<8x256xf32>
    %527 = arith.mulf %525, %526 : vector<8x256xf32>
    %528 = arith.addf %504, %527 : vector<8x256xf32>
    %c47 = arith.constant 47 : index
    %529 = memref.load %arg1[%c47] : memref<108xf32, #tpu.memory_space<smem>>
    %530 = vector.extract_strided_slice %523 {offsets = [8, 0], sizes = [8, 256], strides = [1, 1]} : vector<32x256xf32> to vector<8x256xf32>
    %531 = vector.broadcast %529 : f32 to vector<8x256xf32>
    %532 = arith.mulf %530, %531 : vector<8x256xf32>
    %533 = arith.addf %509, %532 : vector<8x256xf32>
    %c74 = arith.constant 74 : index
    %534 = memref.load %arg1[%c74] : memref<108xf32, #tpu.memory_space<smem>>
    %535 = vector.extract_strided_slice %523 {offsets = [16, 0], sizes = [8, 256], strides = [1, 1]} : vector<32x256xf32> to vector<8x256xf32>
    %536 = vector.broadcast %534 : f32 to vector<8x256xf32>
    %537 = arith.mulf %535, %536 : vector<8x256xf32>
    %538 = arith.addf %514, %537 : vector<8x256xf32>
    %c101 = arith.constant 101 : index
    %539 = memref.load %arg1[%c101] : memref<108xf32, #tpu.memory_space<smem>>
    %540 = vector.extract_strided_slice %523 {offsets = [24, 0], sizes = [8, 256], strides = [1, 1]} : vector<32x256xf32> to vector<8x256xf32>
    %541 = vector.broadcast %539 : f32 to vector<8x256xf32>
    %542 = arith.mulf %540, %541 : vector<8x256xf32>
    %543 = arith.addf %519, %542 : vector<8x256xf32>
    %c1_i32_96 = arith.constant 1 : i32
    %544 = tpu.dynamic_rotate %471 by %c1_i32_96 dim 1 : vector<32x256xf32>, i32 -> vector<32x256xf32>
    %c3_97 = arith.constant 3 : index
    %c0_98 = arith.constant 0 : index
    %545 = vector.load %arg3[%c3_97, %c0_98] : memref<16x256xf32, #tpu.memory_space<vmem>>, vector<1x256xf32>
    %546 = vector.broadcast %545 : vector<1x256xf32> to vector<32x256xf32>
    %547 = arith.mulf %544, %546 : vector<32x256xf32>
    %c21 = arith.constant 21 : index
    %548 = memref.load %arg1[%c21] : memref<108xf32, #tpu.memory_space<smem>>
    %549 = vector.extract_strided_slice %547 {offsets = [0, 0], sizes = [8, 256], strides = [1, 1]} : vector<32x256xf32> to vector<8x256xf32>
    %550 = vector.broadcast %548 : f32 to vector<8x256xf32>
    %551 = arith.mulf %549, %550 : vector<8x256xf32>
    %552 = arith.addf %528, %551 : vector<8x256xf32>
    %c48 = arith.constant 48 : index
    %553 = memref.load %arg1[%c48] : memref<108xf32, #tpu.memory_space<smem>>
    %554 = vector.extract_strided_slice %547 {offsets = [8, 0], sizes = [8, 256], strides = [1, 1]} : vector<32x256xf32> to vector<8x256xf32>
    %555 = vector.broadcast %553 : f32 to vector<8x256xf32>
    %556 = arith.mulf %554, %555 : vector<8x256xf32>
    %557 = arith.addf %533, %556 : vector<8x256xf32>
    %c75 = arith.constant 75 : index
    %558 = memref.load %arg1[%c75] : memref<108xf32, #tpu.memory_space<smem>>
    %559 = vector.extract_strided_slice %547 {offsets = [16, 0], sizes = [8, 256], strides = [1, 1]} : vector<32x256xf32> to vector<8x256xf32>
    %560 = vector.broadcast %558 : f32 to vector<8x256xf32>
    %561 = arith.mulf %559, %560 : vector<8x256xf32>
    %562 = arith.addf %538, %561 : vector<8x256xf32>
    %c102 = arith.constant 102 : index
    %563 = memref.load %arg1[%c102] : memref<108xf32, #tpu.memory_space<smem>>
    %564 = vector.extract_strided_slice %547 {offsets = [24, 0], sizes = [8, 256], strides = [1, 1]} : vector<32x256xf32> to vector<8x256xf32>
    %565 = vector.broadcast %563 : f32 to vector<8x256xf32>
    %566 = arith.mulf %564, %565 : vector<8x256xf32>
    %567 = arith.addf %543, %566 : vector<8x256xf32>
    %c22 = arith.constant 22 : index
    %568 = memref.load %arg1[%c22] : memref<108xf32, #tpu.memory_space<smem>>
    %569 = vector.extract_strided_slice %471 {offsets = [0, 0], sizes = [8, 256], strides = [1, 1]} : vector<32x256xf32> to vector<8x256xf32>
    %570 = vector.broadcast %568 : f32 to vector<8x256xf32>
    %571 = arith.mulf %569, %570 : vector<8x256xf32>
    %572 = arith.addf %552, %571 : vector<8x256xf32>
    %c49 = arith.constant 49 : index
    %573 = memref.load %arg1[%c49] : memref<108xf32, #tpu.memory_space<smem>>
    %574 = vector.extract_strided_slice %471 {offsets = [8, 0], sizes = [8, 256], strides = [1, 1]} : vector<32x256xf32> to vector<8x256xf32>
    %575 = vector.broadcast %573 : f32 to vector<8x256xf32>
    %576 = arith.mulf %574, %575 : vector<8x256xf32>
    %577 = arith.addf %557, %576 : vector<8x256xf32>
    %c76 = arith.constant 76 : index
    %578 = memref.load %arg1[%c76] : memref<108xf32, #tpu.memory_space<smem>>
    %579 = vector.extract_strided_slice %471 {offsets = [16, 0], sizes = [8, 256], strides = [1, 1]} : vector<32x256xf32> to vector<8x256xf32>
    %580 = vector.broadcast %578 : f32 to vector<8x256xf32>
    %581 = arith.mulf %579, %580 : vector<8x256xf32>
    %582 = arith.addf %562, %581 : vector<8x256xf32>
    %c103 = arith.constant 103 : index
    %583 = memref.load %arg1[%c103] : memref<108xf32, #tpu.memory_space<smem>>
    %584 = vector.extract_strided_slice %471 {offsets = [24, 0], sizes = [8, 256], strides = [1, 1]} : vector<32x256xf32> to vector<8x256xf32>
    %585 = vector.broadcast %583 : f32 to vector<8x256xf32>
    %586 = arith.mulf %584, %585 : vector<8x256xf32>
    %587 = arith.addf %567, %586 : vector<8x256xf32>
    %c255_i32_99 = arith.constant 255 : i32
    %588 = tpu.dynamic_rotate %471 by %c255_i32_99 dim 1 : vector<32x256xf32>, i32 -> vector<32x256xf32>
    %c5_100 = arith.constant 5 : index
    %c0_101 = arith.constant 0 : index
    %589 = vector.load %arg3[%c5_100, %c0_101] : memref<16x256xf32, #tpu.memory_space<vmem>>, vector<1x256xf32>
    %590 = vector.broadcast %589 : vector<1x256xf32> to vector<32x256xf32>
    %591 = arith.mulf %588, %590 : vector<32x256xf32>
    %c23_102 = arith.constant 23 : index
    %592 = memref.load %arg1[%c23_102] : memref<108xf32, #tpu.memory_space<smem>>
    %593 = vector.extract_strided_slice %591 {offsets = [0, 0], sizes = [8, 256], strides = [1, 1]} : vector<32x256xf32> to vector<8x256xf32>
    %594 = vector.broadcast %592 : f32 to vector<8x256xf32>
    %595 = arith.mulf %593, %594 : vector<8x256xf32>
    %596 = arith.addf %572, %595 : vector<8x256xf32>
    %c50 = arith.constant 50 : index
    %597 = memref.load %arg1[%c50] : memref<108xf32, #tpu.memory_space<smem>>
    %598 = vector.extract_strided_slice %591 {offsets = [8, 0], sizes = [8, 256], strides = [1, 1]} : vector<32x256xf32> to vector<8x256xf32>
    %599 = vector.broadcast %597 : f32 to vector<8x256xf32>
    %600 = arith.mulf %598, %599 : vector<8x256xf32>
    %601 = arith.addf %577, %600 : vector<8x256xf32>
    %c77 = arith.constant 77 : index
    %602 = memref.load %arg1[%c77] : memref<108xf32, #tpu.memory_space<smem>>
    %603 = vector.extract_strided_slice %591 {offsets = [16, 0], sizes = [8, 256], strides = [1, 1]} : vector<32x256xf32> to vector<8x256xf32>
    %604 = vector.broadcast %602 : f32 to vector<8x256xf32>
    %605 = arith.mulf %603, %604 : vector<8x256xf32>
    %606 = arith.addf %582, %605 : vector<8x256xf32>
    %c104 = arith.constant 104 : index
    %607 = memref.load %arg1[%c104] : memref<108xf32, #tpu.memory_space<smem>>
    %608 = vector.extract_strided_slice %591 {offsets = [24, 0], sizes = [8, 256], strides = [1, 1]} : vector<32x256xf32> to vector<8x256xf32>
    %609 = vector.broadcast %607 : f32 to vector<8x256xf32>
    %610 = arith.mulf %608, %609 : vector<8x256xf32>
    %611 = arith.addf %587, %610 : vector<8x256xf32>
    %c241_i32_103 = arith.constant 241 : i32
    %612 = tpu.dynamic_rotate %471 by %c241_i32_103 dim 1 : vector<32x256xf32>, i32 -> vector<32x256xf32>
    %c6_104 = arith.constant 6 : index
    %c0_105 = arith.constant 0 : index
    %613 = vector.load %arg3[%c6_104, %c0_105] : memref<16x256xf32, #tpu.memory_space<vmem>>, vector<1x256xf32>
    %614 = vector.broadcast %613 : vector<1x256xf32> to vector<32x256xf32>
    %615 = arith.mulf %612, %614 : vector<32x256xf32>
    %c24_106 = arith.constant 24 : index
    %616 = memref.load %arg1[%c24_106] : memref<108xf32, #tpu.memory_space<smem>>
    %617 = vector.extract_strided_slice %615 {offsets = [0, 0], sizes = [8, 256], strides = [1, 1]} : vector<32x256xf32> to vector<8x256xf32>
    %618 = vector.broadcast %616 : f32 to vector<8x256xf32>
    %619 = arith.mulf %617, %618 : vector<8x256xf32>
    %620 = arith.addf %596, %619 : vector<8x256xf32>
    %c51 = arith.constant 51 : index
    %621 = memref.load %arg1[%c51] : memref<108xf32, #tpu.memory_space<smem>>
    %622 = vector.extract_strided_slice %615 {offsets = [8, 0], sizes = [8, 256], strides = [1, 1]} : vector<32x256xf32> to vector<8x256xf32>
    %623 = vector.broadcast %621 : f32 to vector<8x256xf32>
    %624 = arith.mulf %622, %623 : vector<8x256xf32>
    %625 = arith.addf %601, %624 : vector<8x256xf32>
    %c78 = arith.constant 78 : index
    %626 = memref.load %arg1[%c78] : memref<108xf32, #tpu.memory_space<smem>>
    %627 = vector.extract_strided_slice %615 {offsets = [16, 0], sizes = [8, 256], strides = [1, 1]} : vector<32x256xf32> to vector<8x256xf32>
    %628 = vector.broadcast %626 : f32 to vector<8x256xf32>
    %629 = arith.mulf %627, %628 : vector<8x256xf32>
    %630 = arith.addf %606, %629 : vector<8x256xf32>
    %c105 = arith.constant 105 : index
    %631 = memref.load %arg1[%c105] : memref<108xf32, #tpu.memory_space<smem>>
    %632 = vector.extract_strided_slice %615 {offsets = [24, 0], sizes = [8, 256], strides = [1, 1]} : vector<32x256xf32> to vector<8x256xf32>
    %633 = vector.broadcast %631 : f32 to vector<8x256xf32>
    %634 = arith.mulf %632, %633 : vector<8x256xf32>
    %635 = arith.addf %611, %634 : vector<8x256xf32>
    %c240_i32_107 = arith.constant 240 : i32
    %636 = tpu.dynamic_rotate %471 by %c240_i32_107 dim 1 : vector<32x256xf32>, i32 -> vector<32x256xf32>
    %c7_108 = arith.constant 7 : index
    %c0_109 = arith.constant 0 : index
    %637 = vector.load %arg3[%c7_108, %c0_109] : memref<16x256xf32, #tpu.memory_space<vmem>>, vector<1x256xf32>
    %638 = vector.broadcast %637 : vector<1x256xf32> to vector<32x256xf32>
    %639 = arith.mulf %636, %638 : vector<32x256xf32>
    %c25 = arith.constant 25 : index
    %640 = memref.load %arg1[%c25] : memref<108xf32, #tpu.memory_space<smem>>
    %641 = vector.extract_strided_slice %639 {offsets = [0, 0], sizes = [8, 256], strides = [1, 1]} : vector<32x256xf32> to vector<8x256xf32>
    %642 = vector.broadcast %640 : f32 to vector<8x256xf32>
    %643 = arith.mulf %641, %642 : vector<8x256xf32>
    %644 = arith.addf %620, %643 : vector<8x256xf32>
    %c52 = arith.constant 52 : index
    %645 = memref.load %arg1[%c52] : memref<108xf32, #tpu.memory_space<smem>>
    %646 = vector.extract_strided_slice %639 {offsets = [8, 0], sizes = [8, 256], strides = [1, 1]} : vector<32x256xf32> to vector<8x256xf32>
    %647 = vector.broadcast %645 : f32 to vector<8x256xf32>
    %648 = arith.mulf %646, %647 : vector<8x256xf32>
    %649 = arith.addf %625, %648 : vector<8x256xf32>
    %c79 = arith.constant 79 : index
    %650 = memref.load %arg1[%c79] : memref<108xf32, #tpu.memory_space<smem>>
    %651 = vector.extract_strided_slice %639 {offsets = [16, 0], sizes = [8, 256], strides = [1, 1]} : vector<32x256xf32> to vector<8x256xf32>
    %652 = vector.broadcast %650 : f32 to vector<8x256xf32>
    %653 = arith.mulf %651, %652 : vector<8x256xf32>
    %654 = arith.addf %630, %653 : vector<8x256xf32>
    %c106 = arith.constant 106 : index
    %655 = memref.load %arg1[%c106] : memref<108xf32, #tpu.memory_space<smem>>
    %656 = vector.extract_strided_slice %639 {offsets = [24, 0], sizes = [8, 256], strides = [1, 1]} : vector<32x256xf32> to vector<8x256xf32>
    %657 = vector.broadcast %655 : f32 to vector<8x256xf32>
    %658 = arith.mulf %656, %657 : vector<8x256xf32>
    %659 = arith.addf %635, %658 : vector<8x256xf32>
    %c239_i32_110 = arith.constant 239 : i32
    %660 = tpu.dynamic_rotate %471 by %c239_i32_110 dim 1 : vector<32x256xf32>, i32 -> vector<32x256xf32>
    %c8_111 = arith.constant 8 : index
    %c0_112 = arith.constant 0 : index
    %661 = vector.load %arg3[%c8_111, %c0_112] : memref<16x256xf32, #tpu.memory_space<vmem>>, vector<1x256xf32>
    %662 = vector.broadcast %661 : vector<1x256xf32> to vector<32x256xf32>
    %663 = arith.mulf %660, %662 : vector<32x256xf32>
    %c26 = arith.constant 26 : index
    %664 = memref.load %arg1[%c26] : memref<108xf32, #tpu.memory_space<smem>>
    %665 = vector.extract_strided_slice %663 {offsets = [0, 0], sizes = [8, 256], strides = [1, 1]} : vector<32x256xf32> to vector<8x256xf32>
    %666 = vector.broadcast %664 : f32 to vector<8x256xf32>
    %667 = arith.mulf %665, %666 : vector<8x256xf32>
    %668 = arith.addf %644, %667 : vector<8x256xf32>
    %c53 = arith.constant 53 : index
    %669 = memref.load %arg1[%c53] : memref<108xf32, #tpu.memory_space<smem>>
    %670 = vector.extract_strided_slice %663 {offsets = [8, 0], sizes = [8, 256], strides = [1, 1]} : vector<32x256xf32> to vector<8x256xf32>
    %671 = vector.broadcast %669 : f32 to vector<8x256xf32>
    %672 = arith.mulf %670, %671 : vector<8x256xf32>
    %673 = arith.addf %649, %672 : vector<8x256xf32>
    %c80 = arith.constant 80 : index
    %674 = memref.load %arg1[%c80] : memref<108xf32, #tpu.memory_space<smem>>
    %675 = vector.extract_strided_slice %663 {offsets = [16, 0], sizes = [8, 256], strides = [1, 1]} : vector<32x256xf32> to vector<8x256xf32>
    %676 = vector.broadcast %674 : f32 to vector<8x256xf32>
    %677 = arith.mulf %675, %676 : vector<8x256xf32>
    %678 = arith.addf %654, %677 : vector<8x256xf32>
    %c107 = arith.constant 107 : index
    %679 = memref.load %arg1[%c107] : memref<108xf32, #tpu.memory_space<smem>>
    %680 = vector.extract_strided_slice %663 {offsets = [24, 0], sizes = [8, 256], strides = [1, 1]} : vector<32x256xf32> to vector<8x256xf32>
    %681 = vector.broadcast %679 : f32 to vector<8x256xf32>
    %682 = arith.mulf %680, %681 : vector<8x256xf32>
    %683 = arith.addf %659, %682 : vector<8x256xf32>
    %c0_113 = arith.constant 0 : index
    %684 = memref.load %arg2[%c0_113] : memref<32xf32, #tpu.memory_space<smem>>
    %685 = vector.broadcast %684 : f32 to vector<8x256xf32>
    %686 = arith.mulf %668, %685 : vector<8x256xf32>
    %c1_114 = arith.constant 1 : index
    %687 = memref.load %arg2[%c1_114] : memref<32xf32, #tpu.memory_space<smem>>
    %688 = vector.broadcast %687 : f32 to vector<8x256xf32>
    %689 = arith.mulf %673, %688 : vector<8x256xf32>
    %690 = arith.addf %686, %689 : vector<8x256xf32>
    %c2_115 = arith.constant 2 : index
    %691 = memref.load %arg2[%c2_115] : memref<32xf32, #tpu.memory_space<smem>>
    %692 = vector.broadcast %691 : f32 to vector<8x256xf32>
    %693 = arith.mulf %678, %692 : vector<8x256xf32>
    %694 = arith.addf %690, %693 : vector<8x256xf32>
    %c3_116 = arith.constant 3 : index
    %695 = memref.load %arg2[%c3_116] : memref<32xf32, #tpu.memory_space<smem>>
    %696 = vector.broadcast %695 : f32 to vector<8x256xf32>
    %697 = arith.mulf %683, %696 : vector<8x256xf32>
    %698 = arith.addf %694, %697 : vector<8x256xf32>
    %cst_117 = arith.constant 0.000000e+00 : f32
    %699 = vector.broadcast %cst_117 : f32 to vector<8x256xf32>
    %700 = arith.maximumf %698, %699 : vector<8x256xf32>
    %c4_118 = arith.constant 4 : index
    %701 = memref.load %arg2[%c4_118] : memref<32xf32, #tpu.memory_space<smem>>
    %702 = vector.broadcast %701 : f32 to vector<8x256xf32>
    %703 = arith.mulf %668, %702 : vector<8x256xf32>
    %c5_119 = arith.constant 5 : index
    %704 = memref.load %arg2[%c5_119] : memref<32xf32, #tpu.memory_space<smem>>
    %705 = vector.broadcast %704 : f32 to vector<8x256xf32>
    %706 = arith.mulf %673, %705 : vector<8x256xf32>
    %707 = arith.addf %703, %706 : vector<8x256xf32>
    %c6_120 = arith.constant 6 : index
    %708 = memref.load %arg2[%c6_120] : memref<32xf32, #tpu.memory_space<smem>>
    %709 = vector.broadcast %708 : f32 to vector<8x256xf32>
    %710 = arith.mulf %678, %709 : vector<8x256xf32>
    %711 = arith.addf %707, %710 : vector<8x256xf32>
    %c7_121 = arith.constant 7 : index
    %712 = memref.load %arg2[%c7_121] : memref<32xf32, #tpu.memory_space<smem>>
    %713 = vector.broadcast %712 : f32 to vector<8x256xf32>
    %714 = arith.mulf %683, %713 : vector<8x256xf32>
    %715 = arith.addf %711, %714 : vector<8x256xf32>
    %cst_122 = arith.constant 0.000000e+00 : f32
    %716 = vector.broadcast %cst_122 : f32 to vector<8x256xf32>
    %717 = arith.maximumf %715, %716 : vector<8x256xf32>
    %c8_123 = arith.constant 8 : index
    %718 = memref.load %arg2[%c8_123] : memref<32xf32, #tpu.memory_space<smem>>
    %719 = vector.broadcast %718 : f32 to vector<8x256xf32>
    %720 = arith.mulf %668, %719 : vector<8x256xf32>
    %c9_124 = arith.constant 9 : index
    %721 = memref.load %arg2[%c9_124] : memref<32xf32, #tpu.memory_space<smem>>
    %722 = vector.broadcast %721 : f32 to vector<8x256xf32>
    %723 = arith.mulf %673, %722 : vector<8x256xf32>
    %724 = arith.addf %720, %723 : vector<8x256xf32>
    %c10_125 = arith.constant 10 : index
    %725 = memref.load %arg2[%c10_125] : memref<32xf32, #tpu.memory_space<smem>>
    %726 = vector.broadcast %725 : f32 to vector<8x256xf32>
    %727 = arith.mulf %678, %726 : vector<8x256xf32>
    %728 = arith.addf %724, %727 : vector<8x256xf32>
    %c11_126 = arith.constant 11 : index
    %729 = memref.load %arg2[%c11_126] : memref<32xf32, #tpu.memory_space<smem>>
    %730 = vector.broadcast %729 : f32 to vector<8x256xf32>
    %731 = arith.mulf %683, %730 : vector<8x256xf32>
    %732 = arith.addf %728, %731 : vector<8x256xf32>
    %cst_127 = arith.constant 0.000000e+00 : f32
    %733 = vector.broadcast %cst_127 : f32 to vector<8x256xf32>
    %734 = arith.maximumf %732, %733 : vector<8x256xf32>
    %c12_128 = arith.constant 12 : index
    %735 = memref.load %arg2[%c12_128] : memref<32xf32, #tpu.memory_space<smem>>
    %736 = vector.broadcast %735 : f32 to vector<8x256xf32>
    %737 = arith.mulf %668, %736 : vector<8x256xf32>
    %c13_129 = arith.constant 13 : index
    %738 = memref.load %arg2[%c13_129] : memref<32xf32, #tpu.memory_space<smem>>
    %739 = vector.broadcast %738 : f32 to vector<8x256xf32>
    %740 = arith.mulf %673, %739 : vector<8x256xf32>
    %741 = arith.addf %737, %740 : vector<8x256xf32>
    %c14_130 = arith.constant 14 : index
    %742 = memref.load %arg2[%c14_130] : memref<32xf32, #tpu.memory_space<smem>>
    %743 = vector.broadcast %742 : f32 to vector<8x256xf32>
    %744 = arith.mulf %678, %743 : vector<8x256xf32>
    %745 = arith.addf %741, %744 : vector<8x256xf32>
    %c15_131 = arith.constant 15 : index
    %746 = memref.load %arg2[%c15_131] : memref<32xf32, #tpu.memory_space<smem>>
    %747 = vector.broadcast %746 : f32 to vector<8x256xf32>
    %748 = arith.mulf %683, %747 : vector<8x256xf32>
    %749 = arith.addf %745, %748 : vector<8x256xf32>
    %cst_132 = arith.constant 0.000000e+00 : f32
    %750 = vector.broadcast %cst_132 : f32 to vector<8x256xf32>
    %751 = arith.maximumf %749, %750 : vector<8x256xf32>
    %c16_133 = arith.constant 16 : index
    %752 = memref.load %arg2[%c16_133] : memref<32xf32, #tpu.memory_space<smem>>
    %753 = vector.broadcast %752 : f32 to vector<8x256xf32>
    %754 = arith.mulf %668, %753 : vector<8x256xf32>
    %c17_134 = arith.constant 17 : index
    %755 = memref.load %arg2[%c17_134] : memref<32xf32, #tpu.memory_space<smem>>
    %756 = vector.broadcast %755 : f32 to vector<8x256xf32>
    %757 = arith.mulf %673, %756 : vector<8x256xf32>
    %758 = arith.addf %754, %757 : vector<8x256xf32>
    %c18_135 = arith.constant 18 : index
    %759 = memref.load %arg2[%c18_135] : memref<32xf32, #tpu.memory_space<smem>>
    %760 = vector.broadcast %759 : f32 to vector<8x256xf32>
    %761 = arith.mulf %678, %760 : vector<8x256xf32>
    %762 = arith.addf %758, %761 : vector<8x256xf32>
    %c19_136 = arith.constant 19 : index
    %763 = memref.load %arg2[%c19_136] : memref<32xf32, #tpu.memory_space<smem>>
    %764 = vector.broadcast %763 : f32 to vector<8x256xf32>
    %765 = arith.mulf %683, %764 : vector<8x256xf32>
    %766 = arith.addf %762, %765 : vector<8x256xf32>
    %cst_137 = arith.constant 0.000000e+00 : f32
    %767 = vector.broadcast %cst_137 : f32 to vector<8x256xf32>
    %768 = arith.maximumf %766, %767 : vector<8x256xf32>
    %c20_138 = arith.constant 20 : index
    %769 = memref.load %arg2[%c20_138] : memref<32xf32, #tpu.memory_space<smem>>
    %770 = vector.broadcast %769 : f32 to vector<8x256xf32>
    %771 = arith.mulf %668, %770 : vector<8x256xf32>
    %c21_139 = arith.constant 21 : index
    %772 = memref.load %arg2[%c21_139] : memref<32xf32, #tpu.memory_space<smem>>
    %773 = vector.broadcast %772 : f32 to vector<8x256xf32>
    %774 = arith.mulf %673, %773 : vector<8x256xf32>
    %775 = arith.addf %771, %774 : vector<8x256xf32>
    %c22_140 = arith.constant 22 : index
    %776 = memref.load %arg2[%c22_140] : memref<32xf32, #tpu.memory_space<smem>>
    %777 = vector.broadcast %776 : f32 to vector<8x256xf32>
    %778 = arith.mulf %678, %777 : vector<8x256xf32>
    %779 = arith.addf %775, %778 : vector<8x256xf32>
    %c23_141 = arith.constant 23 : index
    %780 = memref.load %arg2[%c23_141] : memref<32xf32, #tpu.memory_space<smem>>
    %781 = vector.broadcast %780 : f32 to vector<8x256xf32>
    %782 = arith.mulf %683, %781 : vector<8x256xf32>
    %783 = arith.addf %779, %782 : vector<8x256xf32>
    %cst_142 = arith.constant 0.000000e+00 : f32
    %784 = vector.broadcast %cst_142 : f32 to vector<8x256xf32>
    %785 = arith.maximumf %783, %784 : vector<8x256xf32>
    %c24_143 = arith.constant 24 : index
    %786 = memref.load %arg2[%c24_143] : memref<32xf32, #tpu.memory_space<smem>>
    %787 = vector.broadcast %786 : f32 to vector<8x256xf32>
    %788 = arith.mulf %668, %787 : vector<8x256xf32>
    %c25_144 = arith.constant 25 : index
    %789 = memref.load %arg2[%c25_144] : memref<32xf32, #tpu.memory_space<smem>>
    %790 = vector.broadcast %789 : f32 to vector<8x256xf32>
    %791 = arith.mulf %673, %790 : vector<8x256xf32>
    %792 = arith.addf %788, %791 : vector<8x256xf32>
    %c26_145 = arith.constant 26 : index
    %793 = memref.load %arg2[%c26_145] : memref<32xf32, #tpu.memory_space<smem>>
    %794 = vector.broadcast %793 : f32 to vector<8x256xf32>
    %795 = arith.mulf %678, %794 : vector<8x256xf32>
    %796 = arith.addf %792, %795 : vector<8x256xf32>
    %c27_146 = arith.constant 27 : index
    %797 = memref.load %arg2[%c27_146] : memref<32xf32, #tpu.memory_space<smem>>
    %798 = vector.broadcast %797 : f32 to vector<8x256xf32>
    %799 = arith.mulf %683, %798 : vector<8x256xf32>
    %800 = arith.addf %796, %799 : vector<8x256xf32>
    %cst_147 = arith.constant 0.000000e+00 : f32
    %801 = vector.broadcast %cst_147 : f32 to vector<8x256xf32>
    %802 = arith.maximumf %800, %801 : vector<8x256xf32>
    %c28_148 = arith.constant 28 : index
    %803 = memref.load %arg2[%c28_148] : memref<32xf32, #tpu.memory_space<smem>>
    %804 = vector.broadcast %803 : f32 to vector<8x256xf32>
    %805 = arith.mulf %668, %804 : vector<8x256xf32>
    %c29_149 = arith.constant 29 : index
    %806 = memref.load %arg2[%c29_149] : memref<32xf32, #tpu.memory_space<smem>>
    %807 = vector.broadcast %806 : f32 to vector<8x256xf32>
    %808 = arith.mulf %673, %807 : vector<8x256xf32>
    %809 = arith.addf %805, %808 : vector<8x256xf32>
    %c30_150 = arith.constant 30 : index
    %810 = memref.load %arg2[%c30_150] : memref<32xf32, #tpu.memory_space<smem>>
    %811 = vector.broadcast %810 : f32 to vector<8x256xf32>
    %812 = arith.mulf %678, %811 : vector<8x256xf32>
    %813 = arith.addf %809, %812 : vector<8x256xf32>
    %c31_151 = arith.constant 31 : index
    %814 = memref.load %arg2[%c31_151] : memref<32xf32, #tpu.memory_space<smem>>
    %815 = vector.broadcast %814 : f32 to vector<8x256xf32>
    %816 = arith.mulf %683, %815 : vector<8x256xf32>
    %817 = arith.addf %813, %816 : vector<8x256xf32>
    %cst_152 = arith.constant 0.000000e+00 : f32
    %818 = vector.broadcast %cst_152 : f32 to vector<8x256xf32>
    %819 = arith.maximumf %817, %818 : vector<8x256xf32>
    %820 = tpu.concatenate %700, %717, %734, %751, %768, %785, %802, %819 in 0 : vector<8x256xf32>, vector<8x256xf32>, vector<8x256xf32>, vector<8x256xf32>, vector<8x256xf32>, vector<8x256xf32>, vector<8x256xf32>, vector<8x256xf32> -> vector<64x256xf32>
    %c0_153 = arith.constant 0 : index
    %c0_154 = arith.constant 0 : index
    %821 = vector.load %arg4[%c0_153, %c0_154] : memref<256x1024xf32, #tpu.memory_space<vmem>>, vector<256x1024xf32>
    %cst_155 = arith.constant dense<0.000000e+00> : vector<64x1024xf32>
    %822 = tpu.matmul %820, %821, %cst_155 {dimension_numbers = #tpu.dot_dimension_numbers<[1], [0], [0], [1], [0, 0, 1, 1], [], []>} : vector<64x256xf32>, vector<256x1024xf32>, vector<64x1024xf32> -> vector<64x1024xf32>
    %c0_156 = arith.constant 0 : index
    %c0_157 = arith.constant 0 : index
    %823 = vector.load %arg5[%c0_156, %c0_157] : memref<128x64xf32, #tpu.memory_space<vmem>>, vector<128x64xf32>
    %cst_158 = arith.constant dense<0.000000e+00> : vector<128x1024xf32>
    %824 = tpu.matmul %823, %822, %cst_158 {dimension_numbers = #tpu.dot_dimension_numbers<[1], [0], [0], [1], [0, 0, 1, 1], [], []>} : vector<128x64xf32>, vector<64x1024xf32>, vector<128x1024xf32> -> vector<128x1024xf32>
    %825 = vector.extract_strided_slice %824 {offsets = [0, 0], sizes = [16, 1024], strides = [1, 1]} : vector<128x1024xf32> to vector<16x1024xf32>
    %c0_159 = arith.constant 0 : index
    %c0_160 = arith.constant 0 : index
    %c0_161 = arith.constant 0 : index
    %c0_162 = arith.constant 0 : index
    %826 = vector.load %arg7[%c0_159, %c0_160, %c0_161, %c0_162] : memref<1x8x16x1024xf32, #tpu.memory_space<vmem>>, vector<1x1x16x1024xf32>
    %827 = vector.shape_cast %826 : vector<1x1x16x1024xf32> to vector<16x1024xf32>
    %828 = vector.shape_cast %825 : vector<16x1024xf32> to vector<1x1x16x1024xf32>
    tpu.vector_store %arg7[%c0_159, %c0_160, %c0_161, %c0_162], %828 {strides = array<i32>} : memref<1x8x16x1024xf32, #tpu.memory_space<vmem>>, vector<1x1x16x1024xf32>,
    %829 = vector.extract_strided_slice %824 {offsets = [16, 0], sizes = [16, 1024], strides = [1, 1]} : vector<128x1024xf32> to vector<16x1024xf32>
    %c0_163 = arith.constant 0 : index
    %c1_164 = arith.constant 1 : index
    %c0_165 = arith.constant 0 : index
    %c0_166 = arith.constant 0 : index
    %830 = vector.load %arg7[%c0_163, %c1_164, %c0_165, %c0_166] : memref<1x8x16x1024xf32, #tpu.memory_space<vmem>>, vector<1x1x16x1024xf32>
    %831 = vector.shape_cast %830 : vector<1x1x16x1024xf32> to vector<16x1024xf32>
    %832 = vector.shape_cast %829 : vector<16x1024xf32> to vector<1x1x16x1024xf32>
    tpu.vector_store %arg7[%c0_163, %c1_164, %c0_165, %c0_166], %832 {strides = array<i32>} : memref<1x8x16x1024xf32, #tpu.memory_space<vmem>>, vector<1x1x16x1024xf32>,
    %833 = vector.extract_strided_slice %824 {offsets = [32, 0], sizes = [16, 1024], strides = [1, 1]} : vector<128x1024xf32> to vector<16x1024xf32>
    %c0_167 = arith.constant 0 : index
    %c2_168 = arith.constant 2 : index
    %c0_169 = arith.constant 0 : index
    %c0_170 = arith.constant 0 : index
    %834 = vector.load %arg7[%c0_167, %c2_168, %c0_169, %c0_170] : memref<1x8x16x1024xf32, #tpu.memory_space<vmem>>, vector<1x1x16x1024xf32>
    %835 = vector.shape_cast %834 : vector<1x1x16x1024xf32> to vector<16x1024xf32>
    %836 = vector.shape_cast %833 : vector<16x1024xf32> to vector<1x1x16x1024xf32>
    tpu.vector_store %arg7[%c0_167, %c2_168, %c0_169, %c0_170], %836 {strides = array<i32>} : memref<1x8x16x1024xf32, #tpu.memory_space<vmem>>, vector<1x1x16x1024xf32>,
    %837 = vector.extract_strided_slice %824 {offsets = [48, 0], sizes = [16, 1024], strides = [1, 1]} : vector<128x1024xf32> to vector<16x1024xf32>
    %c0_171 = arith.constant 0 : index
    %c3_172 = arith.constant 3 : index
    %c0_173 = arith.constant 0 : index
    %c0_174 = arith.constant 0 : index
    %838 = vector.load %arg7[%c0_171, %c3_172, %c0_173, %c0_174] : memref<1x8x16x1024xf32, #tpu.memory_space<vmem>>, vector<1x1x16x1024xf32>
    %839 = vector.shape_cast %838 : vector<1x1x16x1024xf32> to vector<16x1024xf32>
    %840 = vector.shape_cast %837 : vector<16x1024xf32> to vector<1x1x16x1024xf32>
    tpu.vector_store %arg7[%c0_171, %c3_172, %c0_173, %c0_174], %840 {strides = array<i32>} : memref<1x8x16x1024xf32, #tpu.memory_space<vmem>>, vector<1x1x16x1024xf32>,
    %841 = vector.extract_strided_slice %824 {offsets = [64, 0], sizes = [16, 1024], strides = [1, 1]} : vector<128x1024xf32> to vector<16x1024xf32>
    %c0_175 = arith.constant 0 : index
    %c4_176 = arith.constant 4 : index
    %c0_177 = arith.constant 0 : index
    %c0_178 = arith.constant 0 : index
    %842 = vector.load %arg7[%c0_175, %c4_176, %c0_177, %c0_178] : memref<1x8x16x1024xf32, #tpu.memory_space<vmem>>, vector<1x1x16x1024xf32>
    %843 = vector.shape_cast %842 : vector<1x1x16x1024xf32> to vector<16x1024xf32>
    %844 = vector.shape_cast %841 : vector<16x1024xf32> to vector<1x1x16x1024xf32>
    tpu.vector_store %arg7[%c0_175, %c4_176, %c0_177, %c0_178], %844 {strides = array<i32>} : memref<1x8x16x1024xf32, #tpu.memory_space<vmem>>, vector<1x1x16x1024xf32>,
    %845 = vector.extract_strided_slice %824 {offsets = [80, 0], sizes = [16, 1024], strides = [1, 1]} : vector<128x1024xf32> to vector<16x1024xf32>
    %c0_179 = arith.constant 0 : index
    %c5_180 = arith.constant 5 : index
    %c0_181 = arith.constant 0 : index
    %c0_182 = arith.constant 0 : index
    %846 = vector.load %arg7[%c0_179, %c5_180, %c0_181, %c0_182] : memref<1x8x16x1024xf32, #tpu.memory_space<vmem>>, vector<1x1x16x1024xf32>
    %847 = vector.shape_cast %846 : vector<1x1x16x1024xf32> to vector<16x1024xf32>
    %848 = vector.shape_cast %845 : vector<16x1024xf32> to vector<1x1x16x1024xf32>
    tpu.vector_store %arg7[%c0_179, %c5_180, %c0_181, %c0_182], %848 {strides = array<i32>} : memref<1x8x16x1024xf32, #tpu.memory_space<vmem>>, vector<1x1x16x1024xf32>,
    %849 = vector.extract_strided_slice %824 {offsets = [96, 0], sizes = [16, 1024], strides = [1, 1]} : vector<128x1024xf32> to vector<16x1024xf32>
    %c0_183 = arith.constant 0 : index
    %c6_184 = arith.constant 6 : index
    %c0_185 = arith.constant 0 : index
    %c0_186 = arith.constant 0 : index
    %850 = vector.load %arg7[%c0_183, %c6_184, %c0_185, %c0_186] : memref<1x8x16x1024xf32, #tpu.memory_space<vmem>>, vector<1x1x16x1024xf32>
    %851 = vector.shape_cast %850 : vector<1x1x16x1024xf32> to vector<16x1024xf32>
    %852 = vector.shape_cast %849 : vector<16x1024xf32> to vector<1x1x16x1024xf32>
    tpu.vector_store %arg7[%c0_183, %c6_184, %c0_185, %c0_186], %852 {strides = array<i32>} : memref<1x8x16x1024xf32, #tpu.memory_space<vmem>>, vector<1x1x16x1024xf32>,
    %853 = vector.extract_strided_slice %824 {offsets = [112, 0], sizes = [16, 1024], strides = [1, 1]} : vector<128x1024xf32> to vector<16x1024xf32>
    %c0_187 = arith.constant 0 : index
    %c7_188 = arith.constant 7 : index
    %c0_189 = arith.constant 0 : index
    %c0_190 = arith.constant 0 : index
    %854 = vector.load %arg7[%c0_187, %c7_188, %c0_189, %c0_190] : memref<1x8x16x1024xf32, #tpu.memory_space<vmem>>, vector<1x1x16x1024xf32>
    %855 = vector.shape_cast %854 : vector<1x1x16x1024xf32> to vector<16x1024xf32>
    %856 = vector.shape_cast %853 : vector<16x1024xf32> to vector<1x1x16x1024xf32>
    tpu.vector_store %arg7[%c0_187, %c7_188, %c0_189, %c0_190], %856 {strides = array<i32>} : memref<1x8x16x1024xf32, #tpu.memory_space<vmem>>, vector<1x1x16x1024xf32>,
    return
  }
  func.func @transform_0(%arg0: i32) -> i32 {
    %c0_i32 = arith.constant 0 : i32
    %c0_i32_0 = arith.constant 0 : i32
    return %c0_i32 : i32
  }
  func.func @transform_1(%arg0: i32) -> i32 {
    %c0_i32 = arith.constant 0 : i32
    %c0_i32_0 = arith.constant 0 : i32
    return %c0_i32 : i32
  }
  func.func @transform_2(%arg0: i32) -> (i32, i32) {
    %c0_i32 = arith.constant 0 : i32
    %c0_i32_0 = arith.constant 0 : i32
    %c0_i32_1 = arith.constant 0 : i32
    return %c0_i32, %c0_i32_0 : i32, i32
  }
  func.func @transform_3(%arg0: i32) -> (i32, i32) {
    %c0_i32 = arith.constant 0 : i32
    %c0_i32_0 = arith.constant 0 : i32
    %c0_i32_1 = arith.constant 0 : i32
    return %c0_i32, %c0_i32_0 : i32, i32
  }
  func.func @transform_4(%arg0: i32) -> (i32, i32) {
    %c0_i32 = arith.constant 0 : i32
    %c0_i32_0 = arith.constant 0 : i32
    %c0_i32_1 = arith.constant 0 : i32
    return %c0_i32, %c0_i32_0 : i32, i32
  }
  func.func @transform_5(%arg0: i32) -> (i32, i32, i32) {
    %c0_i32 = arith.constant 0 : i32
    %c0_i32_0 = arith.constant 0 : i32
    %c0_i32_1 = arith.constant 0 : i32
    return %arg0, %c0_i32, %c0_i32_0 : i32, i32, i32
  }
  func.func @transform_6(%arg0: i32) -> (i32, i32, i32, i32) {
    %c0_i32 = arith.constant 0 : i32
    %c0_i32_0 = arith.constant 0 : i32
    %c0_i32_1 = arith.constant 0 : i32
    %c0_i32_2 = arith.constant 0 : i32
    return %arg0, %c0_i32, %c0_i32_0, %c0_i32_1 : i32, i32, i32, i32
  }
}

</mosaic_0001>

<bundles_post_ra>
// kernel: tpu_custom_call.1
= control target key start
LH: loop header
LB: loop body
LE: loop exit
PB: predicated region body
PF: predicated region fallthrough
CT: control target
= control target key end

     0   :  { %s7907_s0 = inlined_call_operand.vmem [shape: f32[108], index: 0, kind: input, shape index: {}]   ;;  %s7908_s1 = inlined_call_operand.vmem [shape: f32[32], index: 1, kind: input, shape index: {}]   ;;  %s7909_s2 = inlined_call_operand.vmem [shape: f32[16,256], index: 2, kind: input, shape index: {}]   ;;  %s7910_s3 = inlined_call_operand.hbm [shape: f32[256,1024], index: 3, kind: input, shape index: {}]   ;;  %s7911_s4 = inlined_call_operand.vmem [shape: f32[128,64], index: 4, kind: input, shape index: {}]   ;;  %s7912_s5 = inlined_call_operand.vmem [shape: f32[2,32,256], index: 5, kind: input, shape index: {}]   ;;  %s7913_s6 = inlined_call_operand.hbm [shape: f32[2,8,16,1024], index: 6, kind: output, shape index: {}]  }
   0x1   :  { %7947 = sst [smem:[#allocation31_spill]] %s7907_s0 }
   0x2   :  { %7948 = sst [smem:[#allocation32_spill]] %s7908_s1 }
   0x3   :  { %7949 = sst [smem:[#allocation33_spill]] %s7909_s2 }
   0x4   :  { %7950 = sst [smem:[#allocation34_spill]] %s7910_s3 }
   0x5   :  { %7951 = sst [smem:[#allocation35_spill]] %s7912_s5 }
   0x6   :  { %11 = vsyncpa [#allocation6], 0 }
   0x7   :  { %12 = vsyncpa [#allocation8], 0 }
   0x8   :  { %13 = vsyncpa [#allocation4], 0 }
   0x9   :  { %14 = vsyncpa [#allocation5], 0 }
   0xa   :  { %16 = vsyncpa [#allocation5 + $0x1], 0  ;;  %s4545_s21 = smov 0   ;;  %s4547_s22 = smov 0  }
   0xb   :  { %s4549_s23 = smov 0   ;;  %s4551_s24 = smov 0  }
   0xc LB: > { %7952 = sst [smem:[#allocation15_spill]] %s4488_s23  ;;  %s4566_s25 = sadd.s32 4294967295, %s4492_s24   ;;  %s4492_s24 = sphi %s4551_s24, %s8010_s24   ;;  %s4488_s23 = sphi %s4549_s23, %s8012_s23   ;;  %s4484_s22 = sphi %s4547_s22, %s8014_s22   ;;  %s4480_s21 = sphi %s4545_s21, %s8013_s21  }
   0xd   : > { %s3854_s26 = sadd.s32 4294967294, %s4492_s24   ;;  %s4570_s27 = sadd.s32 1, %s4492_s24  }
   0xe   : > { %7953 = sst [smem:[#allocation16_spill]] %s4570_s27  ;;  %s160_s28 = sadd.s32 1, %s4488_s23 }
   0xf   : > { %s157_s29 = ssub.s32 %s4492_s24, %s4570_s27  ;;  %p170_p0 = scmp.ne.s32.totalorder %s4488_s23, %s4484_s22 }
  0x10   : > { %p158_p1 = scmp.eq.s32.totalorder %s157_s29, 0  ;;  %p171_p2 = scmp.eq.s32.totalorder %s4566_s25, 1 }
  0x11   : > { %p176_p3 = scmp.ne.s32.totalorder %s4484_s22, %s4480_s21  ;;  %p177_p4 = scmp.eq.s32.totalorder %s3854_s26, 1 }
  0x12   : > { %s4581_s30 = scalar_select %p158_p1, %s4488_s23, %s160_s28  }
  0x13   : > { %p4583_p5 = por %p171_p2, %p170_p0  ;;  %p4587_p6 = por %p177_p4, %p176_p3 }
  0x14   : > { %7954 = sst [smem:[#allocation17_spill]] %s4581_s30  ;;  %p3855_p7 = scmp.ge.s32.totalorder %s4492_s24, 1 }
  0x15   : > { %p184_p8 = scmp.lt.s32.totalorder %s4492_s24, 3  ;;  %p4287_p9 = scmp.eq.s32.totalorder %s4566_s25, 0 }
  0x16   : > { %s7958_s0 = sld [smem:[#allocation31_spill]]  ;;  %s4494_s19 = smov [#allocation9]  }
  0x17   : > { %p4594_p10 = pnand %p3855_p7, %p184_p8  ;;  %s7959_s1 = sld [smem:[#allocation32_spill]] }
  0x18   : > { %s7960_s3 = sld [smem:[#allocation34_spill]]  ;;  %s220_s20 = sshll.u32 %s4494_s19, 4  ;;  %s221_s20 = int_to_ptr.vmem [resolvable:$true] %s220_s20 }
  0x19   : > { %p4273_p11 = pneg %p4594_p10  ;;  %s4495_s26 = smov [#allocation3]  }
  0x1a   : > { %s4496_s28 = smov [#allocation7]   ;;  %s4497_s29 = smov 1024  }
  0x1b   : > { %p4274_p12 = pnand %p4287_p9, %p4273_p11  ;;  %s4498_s10 = smov 64  }
  0x1c   : > { %s196_s12 = sshll.u32 %s7958_s0, 4  ;;  %s197_s12 = int_to_ptr.vmem [resolvable:$true] %s196_s12 }
  0x1d   : > { %s206_s15 = sshll.u32 %s7959_s1, 4  ;;  %247 = sbr.rel (%p4594_p10) target bundleno = 1350 (0x546), region = 44  ;;  %s207_s15 = int_to_ptr.vmem [resolvable:$true] %s206_s15 }
  0x1e   : > { %s218_s18 = sshll.u32 %s7960_s3, 4  ;;  %s219_s18 = int_to_ptr.hbm [resolvable:$true] %s218_s18 }
  0x1f   : > { %4276 = dma.vmem_to_smem (!%p4274_p12), %s197_s12, 16, %s4495_s26, [#allocation6]  }
  0x20   : > { %4279 = dma.vmem_to_smem (!%p4274_p12), %s207_s15, 16, %s4496_s28, [#allocation8]  }
  0x21   : > { %4282 = dma.hbm_to_vmem [thread:$0]  (!%p4274_p12), %s219_s18, 32768, %s221_s20, [#allocation4], %s4497_s29, %s4497_s29, %s4498_s10  }
  0x22   : > { %4463 = dma.done.wait (%p4287_p9), [#allocation6], 16  }
  0x23   : > { %4465 = vsyncadd (%p4287_p9), [#allocation6], 4294967280 }
  0x24   : > { %4467 = dma.done.wait (%p4287_p9), [#allocation8], 16  }
  0x25   : > { %4469 = vsyncadd (%p4287_p9), [#allocation8], 4294967280 }
  0x26   : > { %4471 = dma.done.wait (%p4287_p9), [#allocation4], 32768  }
  0x27   : > { %4473 = vsyncadd (%p4287_p9), [#allocation4], 4294934528 }
  0x28   : > { %264 = sfence }
  0x29   : > { %p289_p13 = scmp.lt.s32.totalorder %s4566_s25, 1  ;;  %v382_v0 = vlaneseq  ;;  %v7961_v1 = vmov 0  ;;  %v7920_v2 = vmov 0.0   ;;  %s7964_s5 = sld [smem:[#allocation35_spill]]  ;;  %vm319_vm1 = vcmask 1040384  }
  0x2a   : > { %s7938_s15 = smov 17   ;;  %s4501_s16 = smov 16   ;;  %vm350_vm10 = vcmask 1046528   ;;  %vm3034_vm11 = vcmask 523264  }
  0x2b   : > { %s290_s9 = scalar_select %p289_p13, %s4566_s25, 1  ;;  %vm4628_vm0 = vcmp.lt.s32.totalorder %v382_v0, 256  ;;  %v4915_v63 = vand.u32 127, %v382_v0 }
  0x2c   : > { %v7962_v1 = vsel %vm4628_vm0, 4294967295, %v7961_v1  ;;  %386 = vst.msk [vmem:[#allocation2] ss:$8 sm:$0x3] %vm4628_vm0, %v7920_v2  ;;  %s4502_s17 = smov 15   ;;  %s7942_s18 = smov 1  }
  0x2d   : > { %7963 = vst [vmem:[#allocation18_spill] sm:$0xff] %v7962_v1  ;;  %s4257_s11 = sshll.u32 %s290_s9, 6  ;;  %s7940_s19 = smov 127   ;;  %vm435_vm2 = vcmp.lt.s32.totalorder %v4915_v63, 17  ;;  %vm498_vm3 = vcmp.lt.s32.totalorder %v4915_v63, 16  ;;  %vm562_vm4 = vcmp.lt.s32.totalorder %v4915_v63, 15 }
  0x2e   : > { %407 = vst.msk [vmem:[#allocation2 + $0xb7] ss:$8 sm:$0x3] %vm4628_vm0, %v7920_v2  ;;  %s7918_s20 = smov 113   ;;  %s7916_s26 = smov 112   ;;  %vm626_vm5 = vcmp.lt.s32.totalorder %v4915_v63, 1 }
  0x2f   : > { %s293_s14 = scalar_lea.vmem %s7964_s5, %s4257_s11  ;;  %s7914_s28 = smov 111   ;;  %vm714_vm6 = vcmp.lt.s32.totalorder %v4915_v63, 127  ;;  %vm778_vm7 = vcmp.lt.s32.totalorder %v4915_v63, 113  ;;  %vm842_vm8 = vcmp.lt.s32.totalorder %v4915_v63, 112  ;;  %vm906_vm9 = vcmp.lt.s32.totalorder %v4915_v63, 111 }
  0x30   : > { %v4641_v3 = vld [vmem:[%s293_s14 + $0x8] sm:$0xff]  ;;  %v4643_v4 = vld [vmem:[%s293_s14] sm:$0xff]  ;;  %v4645_v5 = vld [vmem:[%s293_s14 + $0x10] sm:$0xff]  ;;  %s4890_s29 = sld [smem:[#allocation3]] }
  0x31   : > { %v321_v6 = vrot.slane %v4641_v3, 7  ;;  %304 = vst [vmem:[#allocation2 + $0x48] sm:$0xff] %v4641_v3  ;;  %v320_v7 = vrot.slane %v4643_v4, 7  ;;  %v4650_v8 = vld [vmem:[%s293_s14 + $0x18] sm:$0xff]  ;;  %v322_v9 = vrot.slane %v4645_v5, 7  ;;  %v4655_v11 = vld [vmem:[%s293_s14 + $0x20] sm:$0xff] }
  0x32   : > { %7965 = vst [vmem:[#allocation19_spill] sm:$0xff] %v4650_v8  ;;  %v324_v10 = vrot.slane %v4650_v8, 7  ;;  %v4657_v12 = vld [vmem:[%s293_s14 + $0x28] sm:$0xff]  ;;  %v326_v14 = vrot.slane %v4655_v11, 7  ;;  %v4667_v18 = vld [vmem:[%s293_s14 + $0x30] sm:$0xff]  ;;  %v4669_v19 = vld [vmem:[%s293_s14 + $0x38] sm:$0xff] }
  0x33   : > { %303 = vst [vmem:[#allocation2 + $0x40] sm:$0xff] %v4643_v4  ;;  %v323_v13 = vsel %vm319_vm1, %v320_v7, %v322_v9  ;;  %v328_v16 = vrot.slane %v4657_v12, 7  ;;  %v330_v21 = vrot.slane %v4667_v18, 7  ;;  %v332_v22 = vrot.slane %v4669_v19, 7  ;;  %s4894_s10 = sld [smem:[#allocation3 + $0x1]] }
  0x34   : > { %343 = vst [vmem:[#allocation2 + $0x8] sm:$0xfe] %v321_v6  ;;  %v325_v15 = vsel %vm319_vm1, %v321_v6, %v324_v10  ;;  %v327_v17 = vsel %vm319_vm1, %v322_v9, %v326_v14  ;;  %s4900_s9 = sld [smem:[#allocation3 + $0x1c]] }
  0x35   : > { %342 = vst [vmem:[#allocation2] sm:$0xfe] %v320_v7  ;;  %v329_v20 = vsel %vm319_vm1, %v324_v10, %v328_v16  ;;  %v331_v25 = vsel %vm319_vm1, %v326_v14, %v330_v21  ;;  %v333_v26 = vsel %vm319_vm1, %v328_v16, %v332_v22  ;;  %s4904_s11 = sld [smem:[#allocation3 + $0x1b]] }
  0x36   : > { %344 = vst [vmem:[#allocation2 + $0x10] sm:$0xff] %v323_v13  ;;  %s4910_s12 = sld [smem:[#allocation3 + $0x37]] }
  0x37   : > { %345 = vst [vmem:[#allocation2 + $0x18] sm:$0xff] %v325_v15  ;;  %s4912_s13 = sld [smem:[#allocation3 + $0x36]] }
  0x38   : > { %392 = vst.msk [vmem:[#allocation2 + $0x10] ss:$8 sm:$0x3] %vm4628_vm0, %v7920_v2  ;;  %s7972_s2 = sld [smem:[#allocation33_spill]] }
  0x39   : > { %7966 = vst [vmem:[#allocation20_spill] sm:$0xff] %v4667_v18  ;;  %v523_v15 = vstv %s4894_s10  ;;  %s5047_s14 = sld [smem:[#allocation3 + $0x4]] }
  0x3a   : > { %305 = vst [vmem:[#allocation2 + $0x50] sm:$0xff] %v4645_v5  ;;  %v529_v21 = vstv %s4900_s9  ;;  %s5009_s9 = sld [smem:[#allocation3 + $0x51]] }
  0x3b   : > { %306 = vst [vmem:[#allocation2 + $0x58] sm:$0xff] %v4650_v8  ;;  %v4676_v23 = vld [vmem:[#allocation2 + $0x8] sm:$0xff]  ;;  %v465_v22 = vstv %s4904_s11  ;;  %s5017_s11 = sld [smem:[#allocation3 + $0x52]] }
  0x3c   : > { %346 = vst [vmem:[#allocation2 + $0x20] sm:$0xff] %v327_v17  ;;  %425 = vrot.lane.b32.xlu1 %v4676_v23, %s7938_s15  ;;  %v4680_v24 = vld [vmem:[#allocation2] sm:$0xff]  ;;  %s5060_s10 = sld [smem:[#allocation3 + $0x3]] }
  0x3d   : > { %347 = vst [vmem:[#allocation2 + $0x28] sm:$0xff] %v329_v20  ;;  %417 = vrot.lane.b32.xlu0 %v4680_v24, %s7938_s15  ;;  %482 = vrot.lane.b32.xlu2 %v4680_v24, %s4501_s16  ;;  %s6678_s0 = sld [smem:[#allocation3 + $0x50]] }
  0x3e   : > { %398 = vst.msk [vmem:[#allocation2 + $0x20] ss:$8 sm:$0x3] %vm4628_vm0, %v7920_v2  ;;  %v444_v6 = vld [vmem:[%s7972_s2] ss:$8 sm:$0x3] }
  0x3f   : > { %307 = vst [vmem:[#allocation2 + $0x60] sm:$0xff] %v4655_v11  ;;  %v4693_v27 = vld [vmem:[#allocation2 + $0x18] sm:$0xff]  ;;  %v4701_v28 = vld [vmem:[#allocation2 + $0x10] sm:$0xff]  ;;  %v3870_v7 = vld [vmem:[%s7972_s2 + $0x1] ss:$8 sm:$0x3] }
  0x40   : > { %308 = vst [vmem:[#allocation2 + $0x68] sm:$0xff] %v4657_v12  ;;  %v4934_v10 = vperm.slane %v444_v6, 0  ;;  %v4936_v13 = vperm.slane %v444_v6, 1  ;;  %v4938_v14 = vperm.slane %v3870_v7, 0  ;;  %v4945_v20 = vperm.slane %v3870_v7, 1  ;;  %s6686_s1 = sld [smem:[#allocation3 + $0x6b]] }
  0x41   : > { %348 = vst [vmem:[#allocation2 + $0x30] sm:$0xff] %v331_v25  ;;  %v535_v25 = vstv %s4910_s12  ;;  %v471_v7 = vstv %s4912_s13  ;;  %s5027_s12 = sld [smem:[#allocation3 + $0x38]] }
  0x42   : > { %349 = vst [vmem:[#allocation2 + $0x38] sm:$0xff] %v333_v26  ;;  %s5037_s13 = sld [smem:[#allocation3 + $0x1e]] }
  0x43   : > { %404 = vst.msk [vmem:[#allocation2 + $0x30] ss:$8 sm:$0x3] %vm4628_vm0, %v7920_v2  ;;  %s6696_s3 = sld [smem:[#allocation7 + $0x18]] }
  0x44   : > { %309 = vst [vmem:[#allocation2 + $0x70] sm:$0xff] %v4667_v18  ;;  %427 = vrot.lane.b32.xlu1 %v4693_v27, %s7938_s15  ;;  %s6698_s5 = sld [smem:[#allocation7 + $0x2]] }
  0x45   : > { %310 = vst [vmem:[#allocation2 + $0x78] sm:$0xff] %v4669_v19  ;;  %490 = vrot.lane.b32.xlu0 %v4676_v23, %s4501_s16  ;;  %484 = vrot.lane.b32.xlu2 %v4701_v28, %s4501_s16  ;;  %v4710_v29 = vld [vmem:[#allocation2 + $0x20] sm:$0xff]  ;;  %v4716_v30 = vld [vmem:[#allocation2 + $0x28] sm:$0xff]  ;;  %s6707_s30 = sld [smem:[#allocation7 + $0x3]] }
  0x46   : > { %s6714_s23 = sld [smem:[#allocation7 + $0x19]] }
  0x47   : > { %s6718_s27 = sld [smem:[#allocation7 + $0x7]] }
  0x4a   : > { %v4730_v31 = vld [vmem:[#allocation2 + $0x30] sm:$0xff]  ;;  %v4734_v32 = vld [vmem:[#allocation2 + $0x38] sm:$0xff] }
  0x4b   : > { %7967 = vst [vmem:[#allocation21_spill] sm:$0xff] %v4730_v31 }
  0x4c   : > { %492 = vrot.lane.b32.xlu1 %v4693_v27, %s4501_s16  ;;  %7968 = vst [vmem:[#allocation22_spill] sm:$0xff] %v4734_v32 }
  0x4d   : > { %419 = vrot.lane.b32.xlu0 %v4701_v28, %s7938_s15  ;;  %421 = vrot.lane.b32.xlu2 %v4710_v29, %s7938_s15 }
  0x54   : > { %486 = vrot.lane.b32.xlu1 %v4710_v29, %s4501_s16 }
  0x55   : > { %429 = vrot.lane.b32.xlu0 %v4716_v30, %s7938_s15  ;;  %494 = vrot.lane.b32.xlu2 %v4716_v30, %s4501_s16 }
  0x5c   : > { %548 = vrot.lane.b32.xlu1 %v4701_v28, %s4502_s17 }
  0x5d   : > { %546 = vrot.lane.b32.xlu0 %v4680_v24, %s4502_s17  ;;  %554 = vrot.lane.b32.xlu2 %v4676_v23, %s4502_s17 }
  0x64   : > { %423 = vrot.lane.b32.xlu1 %v4730_v31, %s7938_s15 }
  0x65   : > { %556 = vrot.lane.b32.xlu0 %v4693_v27, %s4502_s17  ;;  %431 = vrot.lane.b32.xlu2 %v4734_v32, %s7938_s15 }
  0x6c   : > { %496 = vrot.lane.b32.xlu1 %v4734_v32, %s4501_s16 }
  0x6d   : > { %488 = vrot.lane.b32.xlu0 %v4730_v31, %s4501_s16  ;;  %550 = vrot.lane.b32.xlu2 %v4710_v29, %s4502_s17 }
  0x74   : > { %610 = vrot.lane.b32.xlu1 %v4680_v24, %s7942_s18 }
  0x75   : > { %558 = vrot.lane.b32.xlu0 %v4716_v30, %s4502_s17  ;;  %612 = vrot.lane.b32.xlu2 %v4701_v28, %s7942_s18 }
  0x7c   : > { %620 = vrot.lane.b32.xlu1 %v4693_v27, %s7942_s18 }
  0x7d   : > { %618 = vrot.lane.b32.xlu0 %v4676_v23, %s7942_s18  ;;  %552 = vrot.lane.b32.xlu2 %v4730_v31, %s4502_s17 }
  0x84   : > { %614 = vrot.lane.b32.xlu1 %v4710_v29, %s7942_s18 }
  0x85   : > { %560 = vrot.lane.b32.xlu0 %v4734_v32, %s4502_s17  ;;  %622 = vrot.lane.b32.xlu2 %v4716_v30, %s7942_s18 }
  0x8c   : > { %624 = vrot.lane.b32.xlu1 %v4734_v32, %s7942_s18 }
  0x8d   : > { %616 = vrot.lane.b32.xlu0 %v4730_v31, %s7942_s18  ;;  %698 = vrot.lane.b32.xlu2 %v4680_v24, %s7940_s19  ;;  %s5243_s18 = sld [smem:[#allocation3 + $0x6]] }
  0x94   : > { %706 = vrot.lane.b32.xlu1 %v4676_v23, %s7940_s19 }
  0x95   : > { %700 = vrot.lane.b32.xlu0 %v4701_v28, %s7940_s19  ;;  %708 = vrot.lane.b32.xlu2 %v4693_v27, %s7940_s19 }
  0x97   : > { %v4776_v33 = vpop.permute.xlu2 %482 }
  0x9c   : > { %710 = vrot.lane.b32.xlu1 %v4716_v30, %s7940_s19 }
  0x9d   : > { %702 = vrot.lane.b32.xlu0 %v4710_v29, %s7940_s19  ;;  %762 = vrot.lane.b32.xlu2 %v4680_v24, %s7918_s20 }
  0x9f   : > { %v4784_v34 = vpop.permute.xlu2 %484 }
  0xa4   : > { %770 = vrot.lane.b32.xlu1 %v4676_v23, %s7918_s20 }
  0xa5   : > { %764 = vrot.lane.b32.xlu0 %v4701_v28, %s7918_s20  ;;  %772 = vrot.lane.b32.xlu2 %v4693_v27, %s7918_s20 }
  0xa7   : > { %v4792_v35 = vpop.permute.xlu2 %421 }
  0xac   : > { %712 = vrot.lane.b32.xlu1 %v4734_v32, %s7940_s19 }
  0xad   : > { %704 = vrot.lane.b32.xlu0 %v4730_v31, %s7940_s19  ;;  %766 = vrot.lane.b32.xlu2 %v4710_v29, %s7918_s20  ;;  %s7991_s19 = smov 1  }
  0xae   : > { %v4800_v36 = vpop.permute.xlu1 %425 }
  0xaf   : > { %v4802_v37 = vpop.permute.xlu0 %417  ;;  %v4804_v38 = vpop.permute.xlu2 %494 }
  0xb0   : > { %v436_v0 = vsel %vm435_vm2, %v4802_v37, %v4800_v36 }
  0xb4   : > { %826 = vrot.lane.b32.xlu1 %v4680_v24, %s7916_s26 }
  0xb5   : > { %774 = vrot.lane.b32.xlu0 %v4716_v30, %s7918_s20  ;;  %828 = vrot.lane.b32.xlu2 %v4701_v28, %s7916_s26 }
  0xb6   : > { %v4812_v39 = vpop.permute.xlu1 %427 }
  0xb7   : > { %v4814_v40 = vpop.permute.xlu0 %490  ;;  %v4816_v41 = vpop.permute.xlu2 %554 }
  0xb8   : > { %v499_v26 = vsel %vm498_vm3, %v4776_v33, %v4814_v40  ;;  %v503_v6 = vsel %vm498_vm3, %v4814_v40, %v4776_v33 }
  0xbc   : > { %836 = vrot.lane.b32.xlu1 %v4693_v27, %s7916_s26 }
  0xbd   : > { %834 = vrot.lane.b32.xlu0 %v4676_v23, %s7916_s26  ;;  %768 = vrot.lane.b32.xlu2 %v4730_v31, %s7918_s20 }
  0xbe   : > { %v4824_v42 = vpop.permute.xlu1 %492 }
  0xbf   : > { %v4826_v43 = vpop.permute.xlu0 %419  ;;  %v4828_v44 = vpop.permute.xlu2 %431  ;;  %v504_v2 = vsel %vm498_vm3, %v4824_v42, %v4784_v34  ;;  %v500_v1 = vsel %vm498_vm3, %v4784_v34, %v4824_v42 }
  0xc0   : > { %v437_v33 = vsel %vm435_vm2, %v4826_v43, %v4812_v39  ;;  %v441_v40 = vsel %vm435_vm2, %v4812_v39, %v4826_v43  ;;  %v440_v43 = vsel %vm435_vm2, %v4800_v36, %v4802_v37 }
  0xc1   : > { %v453_v36 = vmul.f32 %v4936_v13, %v437_v33  ;;  %v450_v33 = vmul.f32 %v4934_v10, %v440_v43 }
  0xc4   : > { %830 = vrot.lane.b32.xlu1 %v4710_v29, %s7916_s26 }
  0xc5   : > { %776 = vrot.lane.b32.xlu0 %v4734_v32, %s7918_s20  ;;  %838 = vrot.lane.b32.xlu2 %v4716_v30, %s7916_s26  ;;  %s4979_s20 = sld [smem:[#allocation3 + $0x2]] }
  0xc6   : > { %v4836_v45 = vpop.permute.xlu1 %486 }
  0xc7   : > { %v4838_v46 = vpop.permute.xlu0 %429  ;;  %v4840_v47 = vpop.permute.xlu2 %550  ;;  %v505_v34 = vsel %vm498_vm3, %v4804_v38, %v4836_v45 }
  0xc8   : > { %v438_v42 = vsel %vm435_vm2, %v4792_v35, %v4838_v46  ;;  %v442_v39 = vsel %vm435_vm2, %v4838_v46, %v4792_v35  ;;  %v517_v35 = vmul.f32 %v4945_v20, %v500_v1  ;;  %v452_v46 = vmul.f32 %v4934_v10, %v441_v40 }
  0xc9   : > { %v454_v1 = vmul.f32 %v4934_v10, %v442_v39  ;;  %v451_v40 = vmul.f32 %v4936_v13, %v436_v0 }
  0xca   : > { %v466_v43 = vmul.f32 %v465_v22, %v452_v46 }
  0xcc   : > { %892 = vrot.lane.b32.xlu1 %v4701_v28, %s7914_s28 }
  0xcd   : > { %890 = vrot.lane.b32.xlu0 %v4680_v24, %s7914_s28  ;;  %898 = vrot.lane.b32.xlu2 %v4676_v23, %s7914_s28 }
  0xce   : > { %v4848_v48 = vpop.permute.xlu1 %548 }
  0xcf   : > { %v4850_v49 = vpop.permute.xlu0 %546  ;;  %v4852_v50 = vpop.permute.xlu2 %612 }
  0xd0   : > { %v567_v0 = vsel %vm562_vm4, %v4816_v41, %v4850_v49 }
  0xd4   : > { %832 = vrot.lane.b32.xlu1 %v4730_v31, %s7916_s26 }
  0xd5   : > { %900 = vrot.lane.b32.xlu0 %v4693_v27, %s7914_s28  ;;  %840 = vrot.lane.b32.xlu2 %v4734_v32, %s7916_s26  ;;  %s4997_s26 = sld [smem:[#allocation3 + $0x1d]] }
  0xd6   : > { %v4860_v51 = vpop.permute.xlu1 %423 }
  0xd7   : > { %v4862_v52 = vpop.permute.xlu0 %556  ;;  %v4864_v53 = vpop.permute.xlu2 %552 }
  0xd8   : > { %7969 = vst [vmem:[#allocation23_spill] sm:$0xff] %v4864_v53 }
  0xdc   : > { %902 = vrot.lane.b32.xlu1 %v4716_v30, %s7914_s28 }
  0xdd   : > { %894 = vrot.lane.b32.xlu0 %v4710_v29, %s7914_s28  ;;  %962 = vrot.lane.b32.xlu2 %v4643_v4, %s7938_s15 }
  0xde   : > { %v4872_v54 = vpop.permute.xlu1 %496 }
  0xdf   : > { %v4874_v55 = vpop.permute.xlu0 %488  ;;  %v4876_v56 = vpop.permute.xlu2 %622 }
  0xe4   : > { %970 = vrot.lane.b32.xlu1 %v4641_v3, %s7938_s15 }
  0xe5   : > { %964 = vrot.lane.b32.xlu0 %v4645_v5, %s7938_s15  ;;  %972 = vrot.lane.b32.xlu2 %v4650_v8, %s7938_s15 }
  0xe6   : > { %v4884_v57 = vpop.permute.xlu1 %610 }
  0xe7   : > { %v4886_v58 = vpop.permute.xlu0 %558  ;;  %v4888_v59 = vpop.permute.xlu2 %698 }
  0xe8   : > { %7970 = vst [vmem:[#allocation24_spill] sm:$0xff] %v4888_v59  ;;  %v3875_v59 = vld [vmem:[%s7972_s2 + $0x2] ss:$8 sm:$0x3] }
  0xec   : > { %904 = vrot.lane.b32.xlu1 %v4734_v32, %s7914_s28  ;;  %v5033_v32 = vperm.slane %v3875_v59, 0 }
  0xed   : > { %896 = vrot.lane.b32.xlu0 %v4730_v31, %s7914_s28  ;;  %966 = vrot.lane.b32.xlu2 %v4655_v11, %s7938_s15  ;;  %v5035_v31 = vperm.slane %v3875_v59, 1  ;;  %v531_v59 = vmul.f32 %v529_v21, %v517_v35  ;;  %s5053_s28 = sld [smem:[#allocation3 + $0x1f]] }
  0xee   : > { %v4902_v60 = vpop.permute.xlu1 %620 }
  0xef   : > { %v4906_v61 = vpop.permute.xlu0 %618  ;;  %v4908_v62 = vpop.permute.xlu2 %708 }
  0xf0   : > { %7971 = vst [vmem:[#allocation25_spill] sm:$0xff] %v4908_v62  ;;  %v514_v62 = vmul.f32 %v4938_v14, %v503_v6 }
  0xf4   : > { %1018 = vrot.lane.b32.xlu1 %v4643_v4, %s4501_s16 }
  0xf5   : > { %974 = vrot.lane.b32.xlu0 %v4657_v12, %s7938_s15  ;;  %1020 = vrot.lane.b32.xlu2 %v4645_v5, %s4501_s16 }
  0xf6   : > { %v4932_v9 = vpop.permute.xlu1 %614 }
  0xf7   : > { %v4941_v16 = vpop.permute.xlu0 %560  ;;  %v4943_v17 = vpop.permute.xlu2 %762 }
  0xf8   : > { %7973 = vst [vmem:[#allocation26_spill] sm:$0xff] %v4941_v16 }
  0xf9   : > { %7974 = vst [vmem:[#allocation27_spill] sm:$0xff] %v4943_v17  ;;  %v501_v17 = vsel %vm498_vm3, %v4836_v45, %v4804_v38  ;;  %v515_v38 = vmul.f32 %v4945_v20, %v499_v26  ;;  %v516_v45 = vmul.f32 %v4938_v14, %v504_v2  ;;  %v518_v2 = vmul.f32 %v4938_v14, %v505_v34 }
  0xfa   : > { %v519_v37 = vmul.f32 %v4945_v20, %v501_v17  ;;  %v455_v26 = vmul.f32 %v4936_v13, %v438_v42  ;;  %v524_v42 = vmul.f32 %v523_v15, %v514_v62  ;;  %v563_v62 = vsel %vm562_vm4, %v4850_v49, %v4816_v41 }
  0xfb   : > { %v525_v39 = vmul.f32 %v523_v15, %v515_v38  ;;  %v530_v53 = vmul.f32 %v529_v21, %v516_v45  ;;  %v536_v15 = vmul.f32 %v535_v25, %v518_v2  ;;  %v472_v45 = vmul.f32 %v471_v7, %v454_v1 }
  0xfc   : > { %1028 = vrot.lane.b32.xlu1 %v4650_v8, %s4501_s16  ;;  %v537_v38 = vmul.f32 %v535_v25, %v519_v37  ;;  %v578_v21 = vmul.f32 %v5033_v32, %v567_v0  ;;  %v579_v35 = vmul.f32 %v5035_v31, %v563_v62  ;;  %v477_v41 = vstv %s5009_s9  ;;  %s5098_s9 = sld [smem:[#allocation3 + $0x53]] }
  0xfd   : > { %1026 = vrot.lane.b32.xlu0 %v4641_v3, %s4501_s16  ;;  %968 = vrot.lane.b32.xlu2 %v4667_v18, %s7938_s15  ;;  %v593_v49 = vstv %s4997_s26  ;;  %v5079_v2 = vadd.f32 %v536_v15, %v472_v45  ;;  %v675_v0 = vstv %s5047_s14  ;;  %v502_v15 = vsel %vm498_vm3, %v4874_v55, %v4872_v54  ;;  %s5136_s14 = sld [smem:[#allocation3 + $0x54]] }
  0xfe   : > { %v5029_v6 = vpop.permute.xlu1 %624  ;;  %s5168_s26 = sld [smem:[#allocation3 + $0x5]] }
  0xff   : > { %7975 = vst [vmem:[#allocation28_spill] sm:$0xff] %v5029_v6  ;;  %v5039_v34 = vpop.permute.xlu0 %616  ;;  %v5041_v17 = vpop.permute.xlu2 %772  ;;  %v467_v6 = vmul.f32 %v465_v22, %v453_v36  ;;  %v587_v22 = vstv %s4979_s20  ;;  %v541_v36 = vstv %s5017_s11  ;;  %s5113_s20 = sld [smem:[#allocation3 + $0x3a]] }
 0x100   : > { %7976 = vst [vmem:[#allocation29_spill] sm:$0xff] %v5039_v34  ;;  %v7978_v34 = vstv %s4890_s29  ;;  %s5071_s29 = sld [smem:[#allocation3 + $0x39]]  ;;  %v588_v1 = vmul.f32 %v587_v22, %v578_v21  ;;  %v651_v21 = vstv %s5060_s10 }
 0x101   : > { %7977 = vst [vmem:[#allocation30_spill] sm:$0xff] %v5041_v17  ;;  %v473_v17 = vmul.f32 %v471_v7, %v455_v26  ;;  %v460_v16 = vmul.f32 %v7978_v34, %v450_v33  ;;  %v7979_v8 = vmov %v7978_v34  ;;  %v5068_v7 = vadd.f32 %v530_v53, %v466_v43  ;;  %s5217_s11 = sld [smem:[#allocation3 + $0x3b]] }
 0x102   : > { %v461_v18 = vmul.f32 %v7979_v8, %v451_v40  ;;  %v5077_v8 = vadd.f32 %v531_v59, %v467_v6  ;;  %v564_v26 = vsel %vm562_vm4, %v4848_v48, %v4862_v52  ;;  %v568_v6 = vsel %vm562_vm4, %v4862_v52, %v4848_v48  ;;  %s5337_s10 = sld [smem:[#allocation3 + $0x3c]] }
 0x103   : > { %v526_v25 = vadd.f32 %v524_v42, %v460_v16  ;;  %v5081_v37 = vadd.f32 %v537_v38, %v473_v17  ;;  %v599_v16 = vstv %s5027_s12  ;;  %v589_v34 = vmul.f32 %v587_v22, %v579_v35  ;;  %s5723_s12 = sld [smem:[#allocation3 + $0x25]] }
 0x104   : > { %1022 = vrot.lane.b32.xlu1 %v4655_v11, %s4501_s16  ;;  %v527_v46 = vadd.f32 %v525_v39, %v461_v18  ;;  %v3880_v18 = vld [vmem:[%s7972_s2 + $0x3] ss:$8 sm:$0x3]  ;;  %v439_v17 = vsel %vm435_vm2, %v4860_v51, %v4828_v44  ;;  %v443_v48 = vsel %vm435_vm2, %v4828_v44, %v4860_v51  ;;  %v657_v52 = vstv %s5037_s13  ;;  %s8003_s13 = smov 127  }
 0x105   : > { %976 = vrot.lane.b32.xlu0 %v4669_v19, %s7938_s15  ;;  %1030 = vrot.lane.b32.xlu2 %v4657_v12, %s4501_s16  ;;  %v5115_v42 = vperm.slane %v3880_v18, 0  ;;  %v5117_v39 = vperm.slane %v3880_v18, 1  ;;  %v681_v59 = vstv %s5053_s28  ;;  %v580_v43 = vmul.f32 %v5033_v32, %v568_v6  ;;  %s5160_s28 = sld [smem:[#allocation3 + $0x55]] }
 0x106   : > { %v5087_v53 = vpop.permute.xlu1 %706  ;;  %v581_v62 = vmul.f32 %v5035_v31, %v564_v26  ;;  %v506_v44 = vsel %vm498_vm3, %v4872_v54, %v4874_v55  ;;  %v5131_v51 = vadd.f32 %v588_v1, %v526_v25  ;;  %v456_v38 = vmul.f32 %v4934_v10, %v443_v48  ;;  %s5314_s15 = sld [smem:[#allocation3 + $0x21]] }
 0x107   : > { %v5100_v33 = vpop.permute.xlu0 %700  ;;  %v5102_v40 = vpop.permute.xlu2 %766  ;;  %v457_v45 = vmul.f32 %v4936_v13, %v439_v17  ;;  %v5138_v22 = vadd.f32 %v589_v34, %v527_v46  ;;  %v5141_v35 = vmul.f32 %v675_v0, %v4680_v24  ;;  %v5144_v18 = vmul.f32 %v675_v0, %v4676_v23 }
 0x108   : > { %v5147_v26 = vmul.f32 %v681_v59, %v4693_v27  ;;  %v520_v54 = vmul.f32 %v4938_v14, %v506_v44  ;;  %v521_v55 = vmul.f32 %v4945_v20, %v502_v15  ;;  %v628_v25 = vsel %vm626_vm5, %v4852_v50, %v4902_v60 }
 0x109   : > { %v594_v23 = vmul.f32 %v593_v49, %v580_v43  ;;  %v595_v27 = vmul.f32 %v593_v49, %v581_v62  ;;  %v632_v46 = vsel %vm626_vm5, %v4902_v60, %v4852_v50  ;;  %v5171_v1 = vmul.f32 %v681_v59, %v4701_v28 }
 0x10a   : > { %v478_v34 = vmul.f32 %v477_v41, %v456_v38  ;;  %v479_v17 = vmul.f32 %v477_v41, %v457_v45  ;;  %v565_v49 = vsel %vm562_vm4, %v4840_v47, %v4886_v58  ;;  %v569_v48 = vsel %vm562_vm4, %v4886_v58, %v4840_v47 }
 0x10b   : > { %v645_v28 = vmul.f32 %v5117_v39, %v628_v25  ;;  %v631_v41 = vsel %vm626_vm5, %v4906_v61, %v4884_v57  ;;  %v687_v59 = vstv %s5113_s20  ;;  %v542_v43 = vmul.f32 %v541_v36, %v520_v54  ;;  %s5207_s20 = sld [smem:[#allocation3 + $0x20]]  ;;  %v7984_v54 = vld [vmem:[#allocation21_spill] sm:$0xff] }
 0x10c   : > { %1076 = vrot.lane.b32.xlu1 %v4645_v5, %s4502_s17  ;;  %v543_v62 = vmul.f32 %v541_v36, %v521_v55  ;;  %v644_v47 = vmul.f32 %v5115_v42, %v632_v46  ;;  %v627_v58 = vsel %vm626_vm5, %v4884_v57, %v4906_v61  ;;  %v596_v15 = vadd.f32 %v594_v23, %v5068_v7  ;;  %v3889_v46 = vld [vmem:[%s7972_s2 + $0x5] ss:$8 sm:$0x3] }
 0x10d   : > { %1074 = vrot.lane.b32.xlu0 %v4643_v4, %s4502_s17  ;;  %1082 = vrot.lane.b32.xlu2 %v4641_v3, %s4502_s17  ;;  %v597_v44 = vadd.f32 %v595_v27, %v5077_v8  ;;  %v582_v38 = vmul.f32 %v5033_v32, %v569_v48  ;;  %v583_v45 = vmul.f32 %v5035_v31, %v565_v49  ;;  %v7981_v49 = vld [vmem:[#allocation19_spill] sm:$0xff] }
 0x10e   : > { %v5173_v6 = vpop.permute.xlu1 %710  ;;  %v642_v36 = vmul.f32 %v5115_v42, %v631_v41  ;;  %v5212_v55 = vmul.f32 %v687_v59, %v4710_v29  ;;  %v5215_v57 = vmul.f32 %v687_v59, %v4716_v30  ;;  %v659_v61 = vmul.f32 %v657_v52, %v645_v28  ;;  %v7980_v30 = vld [vmem:[#allocation20_spill] sm:$0xff]  ;;  %v7982_v41 = vld [vmem:[#allocation26_spill] sm:$0xff]  ;;  %v7983_v59 = vld [vmem:[#allocation23_spill] sm:$0xff] }
 0x10f   : > { %v5183_v50 = vpop.permute.xlu0 %702  ;;  %v5185_v60 = vpop.permute.xlu2 %828  ;;  %v643_v7 = vmul.f32 %v5117_v39, %v627_v58  ;;  %v629_v8 = vsel %vm626_vm5, %v4932_v9, %v4876_v56  ;;  %v633_v29 = vsel %vm626_vm5, %v4876_v56, %v4932_v9  ;;  %v5232_v25 = vadd.f32 %v542_v43, %v478_v34 }
 0x110   : > { %v5234_v23 = vadd.f32 %v543_v62, %v479_v17  ;;  %v658_v27 = vmul.f32 %v657_v52, %v644_v47  ;;  %v693_v56 = vstv %s5160_s28  ;;  %v600_v9 = vmul.f32 %v599_v16, %v582_v38  ;;  %s5615_s28 = sld [smem:[#allocation3 + $0x9]] }
 0x111   : > { %v601_v34 = vmul.f32 %v599_v16, %v583_v45  ;;  %v646_v48 = vmul.f32 %v5115_v42, %v633_v29  ;;  %v647_v28 = vmul.f32 %v5117_v39, %v629_v8  ;;  %v566_v43 = vsel %vm562_vm4, %v7983_v59, %v7982_v41 }
 0x112   : > { %v570_v16 = vsel %vm562_vm4, %v7982_v41, %v7983_v59  ;;  %v661_v58 = vadd.f32 %v659_v61, %v597_v44  ;;  %v652_v38 = vmul.f32 %v651_v21, %v642_v36  ;;  %v653_v45 = vmul.f32 %v651_v21, %v643_v7  ;;  %v7985_v41 = vld [vmem:[#allocation22_spill] sm:$0xff] }
 0x113   : > { %v5274_v8 = vperm.slane %v3889_v46, 0  ;;  %v660_v29 = vadd.f32 %v658_v27, %v596_v15  ;;  %v5276_v52 = vperm.slane %v3889_v46, 1  ;;  %v5279_v0 = vmul.f32 %v693_v56, %v7984_v54 }
 0x114   : > { %1024 = vrot.lane.b32.xlu1 %v7980_v30, %s4501_s16  ;;  %v5282_v59 = vmul.f32 %v693_v56, %v7985_v41  ;;  %v602_v24 = vadd.f32 %v600_v9, %v5079_v2  ;;  %v584_v44 = vmul.f32 %v5033_v32, %v570_v16  ;;  %v585_v36 = vmul.f32 %v5035_v31, %v566_v43  ;;  %v7989_v9 = vld [vmem:[#allocation28_spill] sm:$0xff] }
 0x115   : > { %1084 = vrot.lane.b32.xlu0 %v7981_v49, %s4502_s17  ;;  %1032 = vrot.lane.b32.xlu2 %v4669_v19, %s4501_s16  ;;  %v745_v61 = vstv %s5207_s20  ;;  %v603_v21 = vadd.f32 %v601_v34, %v5081_v37  ;;  %v7986_v7 = vstv %s5071_s29  ;;  %v654_v56 = vadd.f32 %v652_v38, %v5131_v51  ;;  %v7988_v37 = vld [vmem:[#allocation29_spill] sm:$0xff]  ;;  %s5402_s29 = sld [smem:[#allocation3 + $0x22]] }
 0x116   : > { %v5254_v17 = vpop.permute.xlu1 %770  ;;  %v664_v15 = vmul.f32 %v7986_v7, %v646_v48  ;;  %v7987_v27 = vmov %v7986_v7  ;;  %v751_v46 = vstv %s5217_s11  ;;  %v655_v41 = vadd.f32 %v653_v45, %v5138_v22  ;;  %v7990_v48 = vld [vmem:[#allocation24_spill] sm:$0xff]  ;;  %v3894_v45 = vld [vmem:[%s7972_s2 + $0x6] ss:$8 sm:$0x3]  ;;  %s5459_s20 = sld [smem:[#allocation3 + $0x3d]] }
 0x117   : > { %v5266_v62 = vpop.permute.xlu0 %764  ;;  %v5268_v47 = vpop.permute.xlu2 %768  ;;  %v665_v54 = vmul.f32 %v7987_v27, %v647_v28  ;;  %v5297_v2 = vadd.f32 %v5147_v26, %v661_v58  ;;  %v634_v34 = vsel %vm626_vm5, %v7989_v9, %v7988_v37  ;;  %v715_v51 = vsel %vm714_vm6, %v7990_v48, %v5087_v53  ;;  %s5465_s11 = sld [smem:[#allocation3 + $0x57]] }
 0x118   : > { %v5311_v22 = vadd.f32 %v5171_v1, %v660_v29  ;;  %v7992_v28 = vstv %s5098_s9  ;;  %v630_v38 = vsel %vm626_vm5, %v7988_v37, %v7989_v9  ;;  %v719_v1 = vsel %vm714_vm6, %v5087_v53, %v7990_v48  ;;  %s5411_s9 = sld [smem:[#allocation3 + $0x7]] }
 0x119   : > { %v606_v43 = vmul.f32 %v7992_v28, %v584_v44  ;;  %v7993_v16 = vmov %v7992_v28  ;;  %v667_v44 = vadd.f32 %v665_v54, %v603_v21  ;;  %v648_v9 = vmul.f32 %v5115_v42, %v634_v34 }
 0x11a   : > { %v607_v58 = vmul.f32 %v7993_v16, %v585_v36  ;;  %v7994_v36 = vld [vmem:[#allocation25_spill] sm:$0xff]  ;;  %v717_v21 = vsel %vm714_vm6, %v5183_v50, %v5173_v6  ;;  %v731_v54 = vmul.f32 %v5276_v52, %v719_v1  ;;  %v5363_v34 = vperm.slane %v3894_v45, 0 }
 0x11b   : > { %v716_v7 = vsel %vm714_vm6, %v5100_v33, %v7994_v36  ;;  %v720_v53 = vsel %vm714_vm6, %v7994_v36, %v5100_v33  ;;  %v721_v33 = vsel %vm714_vm6, %v5173_v6, %v5183_v50  ;;  %v5365_v48 = vperm.slane %v3894_v45, 1 }
 0x11c   : > { %1086 = vrot.lane.b32.xlu1 %v4657_v12, %s4502_s17  ;;  %v679_v28 = vadd.f32 %v5144_v18, %v655_v41  ;;  %v732_v16 = vmul.f32 %v5274_v8, %v716_v7  ;;  %v733_v36 = vmul.f32 %v5276_v52, %v720_v53  ;;  %v5372_v6 = vadd.f32 %v606_v43, %v5232_v25  ;;  %v7999_v7 = vld [vmem:[#allocation27_spill] sm:$0xff] }
 0x11d   : > { %1078 = vrot.lane.b32.xlu0 %v4655_v11, %s4502_s17  ;;  %1130 = vrot.lane.b32.xlu2 %v4643_v4, %s7991_s19  ;;  %v666_v4 = vadd.f32 %v664_v15, %v602_v24  ;;  %v730_v24 = vmul.f32 %v5274_v8, %v715_v51  ;;  %v649_v15 = vmul.f32 %v5117_v39, %v630_v38  ;;  %v7995_v45 = vstv %s5136_s14  ;;  %s8004_s14 = smov 113  }
 0x11e   : > { %v5335_v29 = vpop.permute.xlu1 %712  ;;  %v678_v51 = vadd.f32 %v5141_v35, %v654_v56  ;;  %v5375_v50 = vadd.f32 %v607_v58, %v5234_v23  ;;  %v734_v38 = vmul.f32 %v5274_v8, %v717_v21  ;;  %v735_v1 = vmul.f32 %v5276_v52, %v721_v33  ;;  %v8000_v33 = vld [vmem:[#allocation30_spill] sm:$0xff] }
 0x11f   : > { %v5347_v27 = vpop.permute.xlu0 %704  ;;  %v5349_v37 = vpop.permute.xlu2 %838  ;;  %v5381_v26 = vmul.f32 %v7995_v45, %v648_v9  ;;  %v7996_v35 = vstv %s5168_s26  ;;  %v690_v56 = vadd.f32 %v5212_v55, %v666_v4  ;;  %v691_v41 = vadd.f32 %v5215_v57, %v667_v44  ;;  %s5442_s26 = sld [smem:[#allocation3 + $0x56]] }
 0x120   : > { %v740_v18 = vmul.f32 %v7996_v35, %v730_v24  ;;  %v7997_v25 = vmov %v7995_v45  ;;  %v7998_v43 = vmov %v7996_v35  ;;  %v779_v53 = vsel %vm778_vm7, %v7999_v7, %v5254_v17 }
 0x121   : > { %v5391_v23 = vmul.f32 %v7997_v25, %v649_v15  ;;  %v741_v58 = vmul.f32 %v7998_v43, %v731_v54  ;;  %v809_v9 = vstv %s5314_s15  ;;  %v747_v55 = vmul.f32 %v745_v61, %v733_v36  ;;  %s5718_s15 = sld [smem:[#allocation3 + $0xa]] }
 0x122   : > { %v783_v57 = vsel %vm778_vm7, %v5254_v17, %v7999_v7  ;;  %v815_v44 = vstv %s5337_s10  ;;  %v752_v24 = vmul.f32 %v751_v46, %v734_v38  ;;  %v753_v21 = vmul.f32 %v751_v46, %v735_v1  ;;  %s5556_s10 = sld [smem:[#allocation3 + $0x58]] }
 0x123   : > { %v780_v15 = vsel %vm778_vm7, %v5266_v62, %v8000_v33  ;;  %v742_v17 = vadd.f32 %v740_v18, %v678_v51  ;;  %v743_v38 = vadd.f32 %v741_v58, %v679_v28  ;;  %v795_v1 = vmul.f32 %v5365_v48, %v783_v57  ;;  %v3899_v51 = vld [vmem:[%s7972_s2 + $0x7] ss:$8 sm:$0x3] }
 0x124   : > { %1138 = vrot.lane.b32.xlu1 %v4641_v3, %s7991_s19  ;;  %v746_v3 = vmul.f32 %v745_v61, %v732_v16  ;;  %v794_v16 = vmul.f32 %v5363_v34, %v779_v53  ;;  %v749_v18 = vadd.f32 %v747_v55, %v5297_v2  ;;  %v796_v25 = vmul.f32 %v5363_v34, %v780_v15 }
 0x125   : > { %1132 = vrot.lane.b32.xlu0 %v4645_v5, %s7991_s19  ;;  %1140 = vrot.lane.b32.xlu2 %v7981_v49, %s7991_s19  ;;  %v784_v49 = vsel %vm778_vm7, %v8000_v33, %v5266_v62  ;;  %v754_v28 = vadd.f32 %v752_v24, %v690_v56  ;;  %v755_v43 = vadd.f32 %v753_v21, %v691_v41  ;;  %v8001_v53 = vstv %s5243_s18  ;;  %s5526_s18 = sld [smem:[#allocation3 + $0x8]] }
 0x126   : > { %v827_v4 = vpop.permute.xlu1 %826  ;;  %v748_v35 = vadd.f32 %v746_v3, %v5311_v22  ;;  %v804_v57 = vmul.f32 %v8001_v53, %v794_v16  ;;  %v5447_v2 = vperm.slane %v3899_v51, 0  ;;  %v5449_v22 = vperm.slane %v3899_v51, 1 }
 0x127   : > { %v775_v61 = vpop.permute.xlu0 %774  ;;  %v5421_v54 = vpop.permute.xlu2 %898  ;;  %v8002_v3 = vmov %v8001_v53  ;;  %v873_v21 = vstv %s5402_s29  ;;  %v867_v15 = vstv %s5411_s9  ;;  %s5558_s29 = sld [smem:[#allocation3 + $0x23]] }
 0x128   : > { %v781_v46 = vsel %vm778_vm7, %v5102_v40, %v775_v61  ;;  %v785_v36 = vsel %vm778_vm7, %v775_v61, %v5102_v40  ;;  %v797_v40 = vmul.f32 %v5365_v48, %v784_v49  ;;  %v805_v56 = vmul.f32 %v8002_v3, %v795_v1  ;;  %s3907_s9 = sld [smem:[#allocation3 + $0x3e]] }
 0x129   : > { %v798_v62 = vmul.f32 %v5363_v34, %v781_v46  ;;  %v799_v45 = vmul.f32 %v5365_v48, %v785_v36  ;;  %v718_v49 = vsel %vm714_vm6, %v5347_v27, %v5335_v29  ;;  %v722_v61 = vsel %vm714_vm6, %v5335_v29, %v5347_v27 }
 0x12a   : > { %v811_v24 = vmul.f32 %v809_v9, %v797_v40  ;;  %v806_v27 = vadd.f32 %v804_v57, %v742_v17  ;;  %v807_v51 = vadd.f32 %v805_v56, %v743_v38  ;;  %v737_v53 = vmul.f32 %v5276_v52, %v722_v61 }
 0x12b   : > { %v816_v58 = vmul.f32 %v815_v44, %v798_v62  ;;  %v817_v7 = vmul.f32 %v815_v44, %v799_v45  ;;  %v810_v44 = vmul.f32 %v809_v9, %v796_v25  ;;  %v757_v17 = vstv %s5442_s26  ;;  %s5617_s26 = sld [smem:[#allocation3 + $0x24]] }
 0x12c   : > { %1088 = vrot.lane.b32.xlu1 %v4669_v19, %s4502_s17 }
 0x12d   : > { %v5453_v41 = vadd.f32 %v816_v58, %v754_v28  ;;  %v5455_v55 = vadd.f32 %v817_v7, %v755_v43  ;;  %1080 = vrot.lane.b32.xlu0 %v7980_v30, %s4502_s17  ;;  %1134 = vrot.lane.b32.xlu2 %v4655_v11, %s7991_s19  ;;  %v812_v40 = vadd.f32 %v810_v44, %v748_v35  ;;  %v821_v44 = vstv %s5465_s11  ;;  %s8005_s11 = smov 112  }
 0x12e   : > { %v837_v33 = vpop.permute.xlu1 %836  ;;  %v813_v28 = vadd.f32 %v811_v24, %v749_v18  ;;  %v736_v7 = vmul.f32 %v5274_v8, %v718_v49  ;;  %v673_v35 = vadd.f32 %v5391_v23, %v5375_v50 }
 0x12f   : > { %v844_v16 = vsel %vm842_vm8, %v5185_v60, %v837_v33  ;;  %v848_v9 = vsel %vm842_vm8, %v837_v33, %v5185_v60  ;;  %v835_v46 = vpop.permute.xlu0 %834  ;;  %v5481_v36 = vpop.permute.xlu2 %840 }
 0x130   : > { %v860_v1 = vmul.f32 %v5447_v2, %v844_v16  ;;  %v861_v62 = vmul.f32 %v5449_v22, %v848_v9  ;;  %v843_v45 = vsel %vm842_vm8, %v827_v4, %v835_v46  ;;  %v847_v29 = vsel %vm842_vm8, %v835_v46, %v827_v4 }
 0x131   : > { %v858_v25 = vmul.f32 %v5447_v2, %v843_v45  ;;  %v859_v60 = vmul.f32 %v5449_v22, %v847_v29  ;;  %v672_v4 = vadd.f32 %v5381_v26, %v5372_v6  ;;  %v879_v6 = vstv %s5459_s20  ;;  %v3904_v29 = vld [vmem:[%s7972_s2 + $0x10] ss:$8 sm:$0x3]  ;;  %s5661_s20 = sld [smem:[#allocation3 + $0x59]] }
 0x132   : > { %v874_v43 = vmul.f32 %v873_v21, %v860_v1  ;;  %v875_v58 = vmul.f32 %v873_v21, %v861_v62  ;;  %v758_v24 = vmul.f32 %v757_v17, %v736_v7  ;;  %v759_v21 = vmul.f32 %v757_v17, %v737_v53  ;;  %s6694_s2 = sld [smem:[#allocation7 + $0x15]] }
 0x133   : > { %v868_v3 = vmul.f32 %v867_v15, %v858_v25  ;;  %v869_v33 = vmul.f32 %v867_v15, %v859_v60  ;;  %v696_v9 = vadd.f32 %v5279_v0, %v672_v4  ;;  %v931_v53 = vstv %s5526_s18  ;;  %s5693_s18 = sld [smem:[#allocation3 + $0x3f]] }
 0x134   : > { %v5496_v38 = vadd.f32 %v874_v43, %v812_v40  ;;  %v5498_v57 = vadd.f32 %v875_v58, %v813_v28  ;;  %1136 = vrot.lane.b32.xlu1 %v7980_v30, %s7991_s19  ;;  %v5544_v28 = vld [vmem:[#allocation2 + $0x40] sm:$0xff]  ;;  %v5548_v43 = vperm.slane %v3904_v29, 0  ;;  %v5552_v58 = vld [vmem:[#allocation2 + $0x48] sm:$0xff] }
 0x135   : > { %v870_v18 = vadd.f32 %v868_v3, %v806_v27  ;;  %v871_v56 = vadd.f32 %v869_v33, %v807_v51  ;;  %1142 = vrot.lane.b32.xlu0 %v4657_v12, %s7991_s19  ;;  %1144 = vrot.lane.b32.xlu2 %v4669_v19, %s7991_s19  ;;  %v760_v27 = vadd.f32 %v758_v24, %v696_v9  ;;  %v5577_v24 = vld [vmem:[#allocation2 + $0x58] sm:$0xff] }
 0x136   : > { %v831_v26 = vpop.permute.xlu1 %830 }
 0x137   : > { %v845_v30 = vsel %vm842_vm8, %v831_v26, %v5349_v37  ;;  %v849_v50 = vsel %vm842_vm8, %v5349_v37, %v831_v26  ;;  %v777_v23 = vpop.permute.xlu0 %776  ;;  %v5516_v15 = vpop.permute.xlu2 %962  ;;  %v697_v37 = vadd.f32 %v5282_v59, %v673_v35 }
 0x138   : > { %v862_v49 = vmul.f32 %v5447_v2, %v845_v30  ;;  %v863_v19 = vmul.f32 %v5449_v22, %v849_v50  ;;  %v782_v61 = vsel %vm778_vm7, %v5268_v47, %v777_v23  ;;  %v786_v16 = vsel %vm778_vm7, %v777_v23, %v5268_v47 }
 0x139   : > { %v800_v46 = vmul.f32 %v5363_v34, %v782_v61  ;;  %v801_v1 = vmul.f32 %v5365_v48, %v786_v16  ;;  %v761_v51 = vadd.f32 %v759_v21, %v697_v37  ;;  %v885_v21 = vstv %s5556_s10  ;;  %s5747_s10 = sld [smem:[#allocation3 + $0x5a]] }
 0x13a   : > { %v880_v62 = vmul.f32 %v879_v6, %v862_v49  ;;  %v881_v45 = vmul.f32 %v879_v6, %v863_v19 }
 0x13b   : > { %v822_v25 = vmul.f32 %v821_v44, %v800_v46  ;;  %v823_v47 = vmul.f32 %v821_v44, %v801_v1 }
 0x13c   : > { %v5536_v60 = vadd.f32 %v880_v62, %v5453_v41  ;;  %v5539_v0 = vadd.f32 %v881_v45, %v5455_v55  ;;  %1212 = vrot.lane.b32.xlu1 %v4645_v5, %s8003_s13  ;;  %v5550_v41 = vperm.slane %v3904_v29, 1  ;;  %v5605_v45 = vld [vmem:[#allocation2 + $0x50] sm:$0xff] }
 0x13d   : > { %v824_v59 = vadd.f32 %v822_v25, %v760_v27  ;;  %v825_v40 = vadd.f32 %v823_v47, %v761_v51  ;;  %1210 = vrot.lane.b32.xlu0 %v5544_v28, %s8003_s13  ;;  %1218 = vrot.lane.b32.xlu2 %v5552_v58, %s8003_s13 }
 0x13e   : > { %v893_v55 = vpop.permute.xlu1 %892 }
 0x13f   : > { %v891_v5 = vpop.permute.xlu0 %890  ;;  %v5560_v7 = vpop.permute.xlu2 %972 }
 0x140   : > { %v907_v3 = vsel %vm906_vm9, %v891_v5, %v5421_v54  ;;  %v911_v33 = vsel %vm906_vm9, %v5421_v54, %v891_v5 }
 0x141   : > { %v922_v4 = vmul.f32 %v5548_v43, %v907_v3  ;;  %v923_v17 = vmul.f32 %v5550_v41, %v911_v33  ;;  %v5627_v3 = vld [vmem:[#allocation2 + $0x70] sm:$0xff] }
 0x143   : > { %v932_v35 = vmul.f32 %v931_v53, %v922_v4  ;;  %v933_v26 = vmul.f32 %v931_v53, %v923_v17  ;;  %v5639_v17 = vld [vmem:[#allocation2 + $0x78] sm:$0xff] }
 0x144   : > { %1214 = vrot.lane.b32.xlu1 %v4655_v11, %s8003_s13 }
 0x145   : > { %v5573_v6 = vadd.f32 %v932_v35, %v870_v18  ;;  %v5575_v44 = vadd.f32 %v933_v26, %v871_v56  ;;  %1220 = vrot.lane.b32.xlu0 %v5577_v24, %s8003_s13  ;;  %1222 = vrot.lane.b32.xlu2 %v4657_v12, %s8003_s13  ;;  %v937_v18 = vstv %s5558_s29  ;;  %v995_v26 = vstv %s5615_s28  ;;  %s5757_s29 = sld [smem:[#allocation3 + $0x40]] }
 0x146   : > { %v833_v54 = vpop.permute.xlu1 %832  ;;  %s3917_s28 = sld [smem:[#allocation3 + $0xb]] }
 0x147   : > { %v846_v30 = vsel %vm842_vm8, %v833_v54, %v5481_v36  ;;  %v850_v11 = vsel %vm842_vm8, %v5481_v36, %v833_v54  ;;  %v901_v56 = vpop.permute.xlu0 %900  ;;  %v5591_v50 = vpop.permute.xlu2 %966 }
 0x148   : > { %v864_v23 = vmul.f32 %v5447_v2, %v846_v30  ;;  %v865_v49 = vmul.f32 %v5449_v22, %v850_v11  ;;  %v908_v12 = vsel %vm906_vm9, %v893_v55, %v901_v56  ;;  %v912_v19 = vsel %vm906_vm9, %v901_v56, %v893_v55 }
 0x149   : > { %v924_v61 = vmul.f32 %v5548_v43, %v908_v12  ;;  %v925_v16 = vmul.f32 %v5550_v41, %v912_v19 }
 0x14a   : > { %v886_v36 = vmul.f32 %v885_v21, %v864_v23  ;;  %v887_v9 = vmul.f32 %v885_v21, %v865_v49  ;;  %v1001_v21 = vstv %s5617_s26  ;;  %s5822_s26 = sld [smem:[#allocation3 + $0x26]] }
 0x14b   : > { %v938_v37 = vmul.f32 %v937_v18, %v924_v61  ;;  %v939_v46 = vmul.f32 %v937_v18, %v925_v16 }
 0x14c   : > { %v5601_v1 = vadd.f32 %v886_v36, %v824_v59  ;;  %v5603_v62 = vadd.f32 %v887_v9, %v825_v40  ;;  %1268 = vrot.lane.b32.xlu1 %v5605_v45, %s8004_s14  ;;  %v943_v59 = vstv %s3907_s9  ;;  %s8008_s9 = smov 111  }
 0x14d   : > { %v940_v29 = vadd.f32 %v938_v37, %v5496_v38  ;;  %v941_v27 = vadd.f32 %v939_v46, %v5498_v57  ;;  %1266 = vrot.lane.b32.xlu0 %v5544_v28, %s8004_s14  ;;  %1274 = vrot.lane.b32.xlu2 %v5552_v58, %s8004_s14  ;;  %v5671_v37 = vld [vmem:[#allocation2 + $0x68] sm:$0xff] }
 0x14e   : > { %v903_v51 = vpop.permute.xlu1 %902 }
 0x14f   : > { %v895_v25 = vpop.permute.xlu0 %894  ;;  %v5619_v47 = vpop.permute.xlu2 %1020 }
 0x150   : > { %v909_v38 = vsel %vm906_vm9, %v895_v25, %v903_v51  ;;  %v913_v57 = vsel %vm906_vm9, %v903_v51, %v895_v25  ;;  %v5679_v51 = vld [vmem:[#allocation2 + $0x60] sm:$0xff] }
 0x151   : > { %v926_v40 = vmul.f32 %v5548_v43, %v909_v38  ;;  %v927_v55 = vmul.f32 %v5550_v41, %v913_v57  ;;  %v949_v38 = vstv %s5661_s20  ;;  %s3916_s20 = sld [smem:[#allocation3 + $0x5b]] }
 0x153   : > { %v944_v5 = vmul.f32 %v943_v59, %v926_v40  ;;  %v945_v53 = vmul.f32 %v943_v59, %v927_v55  ;;  %v354_v59 = vrot.slane %v5552_v58, 1  ;;  %v351_v55 = vrot.slane %v5544_v28, 1 }
 0x154   : > { %1216 = vrot.lane.b32.xlu1 %v5627_v3, %s8003_s13 }
 0x155   : > { %v5632_v33 = vadd.f32 %v944_v5, %v5536_v60  ;;  %v5635_v4 = vadd.f32 %v945_v53, %v5539_v0  ;;  %1276 = vrot.lane.b32.xlu0 %v5577_v24, %s8004_s14  ;;  %1224 = vrot.lane.b32.xlu2 %v5639_v17, %s8003_s13  ;;  %v352_v5 = vrot.slane %v5605_v45, 1  ;;  %v355_v53 = vrot.slane %v5577_v24, 1 }
 0x156   : > { %v971_v35 = vpop.permute.xlu1 %970 }
 0x157   : > { %v978_v54 = vsel %vm435_vm2, %v5516_v15, %v971_v35  ;;  %v982_v60 = vsel %vm435_vm2, %v971_v35, %v5516_v15  ;;  %v965_v0 = vpop.permute.xlu0 %964  ;;  %v5651_v30 = vpop.permute.xlu2 %968  ;;  %v357_v35 = vrot.slane %v5679_v51, 1 }
 0x158   : > { %v986_v11 = vmul.f32 %v982_v60, %v4934_v10  ;;  %v987_v18 = vmul.f32 %v978_v54, %v4936_v13  ;;  %v979_v56 = vsel %vm435_vm2, %v965_v0, %v5560_v7  ;;  %v983_v23 = vsel %vm435_vm2, %v5560_v7, %v965_v0 }
 0x159   : > { %v988_v15 = vmul.f32 %v983_v23, %v4934_v10  ;;  %v989_v49 = vmul.f32 %v979_v56, %v4936_v13  ;;  %v353_v0 = vsel %vm350_vm10, %v351_v55, %v352_v5  ;;  %v1057_v55 = vstv %s5723_s12  ;;  %s5879_s12 = sld [smem:[#allocation3 + $0xc]] }
 0x15a   : > { %v996_v12 = vmul.f32 %v995_v26, %v986_v11  ;;  %v997_v19 = vmul.f32 %v995_v26, %v987_v18  ;;  %v359_v26 = vrot.slane %v5671_v37, 1  ;;  %374 = vst [vmem:[#allocation2 + $0x80] sm:$0xff] %v353_v0  ;;  %v358_v11 = vsel %vm350_vm10, %v352_v5, %v357_v35 }
 0x15b   : > { %v1002_v61 = vmul.f32 %v1001_v21, %v988_v15  ;;  %v1003_v16 = vmul.f32 %v1001_v21, %v989_v49  ;;  %v356_v21 = vsel %vm350_vm10, %v354_v59, %v355_v53  ;;  %v8006_v49 = vmov 0.0   ;;  %376 = vst [vmem:[#allocation2 + $0x90] sm:$0xff] %v358_v11 }
 0x15c   : > { %v5666_v36 = vadd.f32 %v996_v12, %v5573_v6  ;;  %v5669_v9 = vadd.f32 %v997_v19, %v5575_v44  ;;  %1278 = vrot.lane.b32.xlu1 %v5671_v37, %s8004_s14  ;;  %375 = vst [vmem:[#allocation2 + $0x88] sm:$0xff] %v356_v21  ;;  %v360_v23 = vsel %vm350_vm10, %v355_v53, %v359_v26  ;;  %v1007_v19 = vstv %s5693_s18  ;;  %s3919_s18 = sld [smem:[#allocation3 + $0x41]] }
 0x15d   : > { %v5675_v7 = vadd.f32 %v1002_v61, %v940_v29  ;;  %v5677_v46 = vadd.f32 %v1003_v16, %v941_v27  ;;  %1270 = vrot.lane.b32.xlu0 %v5679_v51, %s8004_s14  ;;  %1322 = vrot.lane.b32.xlu2 %v5544_v28, %s8005_s11  ;;  %389 = vst.msk [vmem:[#allocation2 + $0x87] ss:$8 sm:$0x3] %vm4628_vm0, %v8006_v49 }
 0x15e   : > { %v905_v6 = vpop.permute.xlu1 %904  ;;  %377 = vst [vmem:[#allocation2 + $0x98] sm:$0xff] %v360_v23  ;;  %v363_v23 = vrot.slane %v5639_v17, 1 }
 0x15f   : > { %v897_v44 = vpop.permute.xlu0 %896  ;;  %v5685_v25 = vpop.permute.xlu2 %1030  ;;  %395 = vst.msk [vmem:[#allocation2 + $0x97] ss:$8 sm:$0x3] %vm4628_vm0, %v8006_v49 }
 0x160   : > { %v910_v29 = vsel %vm906_vm9, %v897_v44, %v905_v6  ;;  %v914_v27 = vsel %vm906_vm9, %v905_v6, %v897_v44  ;;  %381 = vst [vmem:[#allocation2 + $0xb8] sm:$0x7f] %v363_v23 }
 0x161   : > { %v928_v57 = vmul.f32 %v5548_v43, %v910_v29  ;;  %v929_v40 = vmul.f32 %v5550_v41, %v914_v27 }
 0x163   : > { %v950_v54 = vmul.f32 %v949_v38, %v928_v57  ;;  %v951_v60 = vmul.f32 %v949_v38, %v929_v40  ;;  %v1051_v57 = vstv %s5718_s15  ;;  %s8009_s15 = smov 17  }
 0x164   : > { %1330 = vrot.lane.b32.xlu1 %v5552_v58, %s8005_s11 }
 0x165   : > { %v5708_v18 = vadd.f32 %v950_v54, %v5601_v1  ;;  %v5711_v56 = vadd.f32 %v951_v60, %v5603_v62  ;;  %1324 = vrot.lane.b32.xlu0 %v5605_v45, %s8005_s11  ;;  %1332 = vrot.lane.b32.xlu2 %v5577_v24, %s8005_s11 }
 0x166   : > { %v1019_v15 = vpop.permute.xlu1 %1018 }
 0x167   : > { %v975_v1 = vpop.permute.xlu0 %974  ;;  %v5725_v62 = vpop.permute.xlu2 %1082 }
 0x168   : > { %v980_v61 = vsel %vm435_vm2, %v5591_v50, %v975_v1  ;;  %v984_v16 = vsel %vm435_vm2, %v975_v1, %v5591_v50 }
 0x169   : > { %v990_v6 = vmul.f32 %v984_v16, %v4934_v10  ;;  %v991_v44 = vmul.f32 %v980_v61, %v4936_v13 }
 0x16b   : > { %v1008_v59 = vmul.f32 %v1007_v19, %v990_v6  ;;  %v1009_v38 = vmul.f32 %v1007_v19, %v991_v44 }
 0x16c   : > { %1280 = vrot.lane.b32.xlu1 %v5639_v17, %s8004_s14 }
 0x16d   : > { %v1010_v29 = vadd.f32 %v1008_v59, %v5632_v33  ;;  %v1011_v27 = vadd.f32 %v1009_v38, %v5635_v4  ;;  %1272 = vrot.lane.b32.xlu0 %v5627_v3, %s8004_s14  ;;  %1326 = vrot.lane.b32.xlu2 %v5679_v51, %s8005_s11 }
 0x16e   : > { %v1029_v50 = vpop.permute.xlu1 %1028 }
 0x16f   : > { %v1027_v40 = vpop.permute.xlu0 %1026  ;;  %v1035_v5 = vsel %vm498_vm3, %v5619_v47, %v1029_v50  ;;  %v1039_v33 = vsel %vm498_vm3, %v1029_v50, %v5619_v47  ;;  %v5759_v4 = vpop.permute.xlu2 %1032  ;;  %v361_v47 = vrot.slane %v5627_v3, 1 }
 0x170   : > { %v1034_v53 = vsel %vm498_vm3, %v1019_v15, %v1027_v40  ;;  %v1038_v54 = vsel %vm498_vm3, %v1027_v40, %v1019_v15  ;;  %v1044_v60 = vmul.f32 %v1039_v33, %v4938_v14  ;;  %v1045_v0 = vmul.f32 %v1035_v5, %v4945_v20 }
 0x171   : > { %v1042_v21 = vmul.f32 %v1038_v54, %v4938_v14  ;;  %v1043_v11 = vmul.f32 %v1034_v53, %v4945_v20  ;;  %v362_v6 = vsel %vm350_vm10, %v357_v35, %v361_v47  ;;  %v364_v15 = vsel %vm350_vm10, %v359_v26, %v363_v23  ;;  %380 = vst [vmem:[#allocation2 + $0xb0] sm:$0x7f] %v361_v47 }
 0x172   : > { %v1058_v1 = vmul.f32 %v1057_v55, %v1044_v60  ;;  %v1059_v19 = vmul.f32 %v1057_v55, %v1045_v0  ;;  %378 = vst [vmem:[#allocation2 + $0xa0] sm:$0xff] %v362_v6  ;;  %v1063_v26 = vstv %s5757_s29  ;;  %v1107_v23 = vstv %s3917_s28  ;;  %s3920_s29 = sld [smem:[#allocation3 + $0x5c]] }
 0x173   : > { %v1052_v61 = vmul.f32 %v1051_v57, %v1042_v21  ;;  %v1053_v16 = vmul.f32 %v1051_v57, %v1043_v11  ;;  %379 = vst [vmem:[#allocation2 + $0xa8] sm:$0xff] %v364_v15  ;;  %s5945_s28 = sld [smem:[#allocation3 + $0x42]] }
 0x174   : > { %v5774_v44 = vadd.f32 %v1058_v1, %v5675_v7  ;;  %v5777_v59 = vadd.f32 %v1059_v19, %v5677_v46  ;;  %1378 = vrot.lane.b32.xlu1 %v5544_v28, %s8008_s9  ;;  %401 = vst.msk [vmem:[#allocation2 + $0xa7] ss:$8 sm:$0x3] %vm4628_vm0, %v8006_v49  ;;  %v1013_v46 = vstv %s5747_s10  ;;  %s5881_s10 = sld [smem:[#allocation3 + $0x27]] }
 0x175   : > { %v1054_v38 = vadd.f32 %v1052_v61, %v5666_v36  ;;  %v1055_v50 = vadd.f32 %v1053_v16, %v5669_v9  ;;  %1334 = vrot.lane.b32.xlu0 %v5671_v37, %s8005_s11  ;;  %1380 = vrot.lane.b32.xlu2 %v5605_v45, %s8008_s9 }
 0x176   : > { %v1023_v7 = vpop.permute.xlu1 %1022 }
 0x177   : > { %v977_v35 = vpop.permute.xlu0 %976  ;;  %v1036_v36 = vsel %vm498_vm3, %v1023_v7, %v5685_v25  ;;  %v1040_v9 = vsel %vm498_vm3, %v5685_v25, %v1023_v7  ;;  %v5798_v57 = vpop.permute.xlu2 %1130  ;;  %v1113_v7 = vstv %s5822_s26  ;;  %s5947_s26 = sld [smem:[#allocation3 + $0x5d]] }
 0x178   : > { %v981_v40 = vsel %vm435_vm2, %v5651_v30, %v977_v35  ;;  %v985_v49 = vsel %vm435_vm2, %v977_v35, %v5651_v30  ;;  %v1046_v12 = vmul.f32 %v1040_v9, %v4938_v14  ;;  %v1047_v55 = vmul.f32 %v1036_v36, %v4945_v20 }
 0x179   : > { %v992_v5 = vmul.f32 %v985_v49, %v4934_v10  ;;  %v993_v25 = vmul.f32 %v981_v40, %v4936_v13  ;;  %v1069_v35 = vstv %s3916_s20  ;;  %s5959_s20 = sld [smem:[#allocation3 + $0xd]] }
 0x17a   : > { %v1064_v33 = vmul.f32 %v1063_v26, %v1046_v12  ;;  %v1065_v53 = vmul.f32 %v1063_v26, %v1047_v55 }
 0x17b   : > { %v1014_v54 = vmul.f32 %v1013_v46, %v992_v5  ;;  %v1015_v60 = vmul.f32 %v1013_v46, %v993_v25  ;;  %v5861_v5 = vld [vmem:[#allocation2 + $0x90] sm:$0xff] }
 0x17c   : > { %v5810_v0 = vadd.f32 %v1064_v33, %v1010_v29  ;;  %v5812_v21 = vadd.f32 %v1065_v53, %v1011_v27  ;;  %1388 = vrot.lane.b32.xlu1 %v5577_v24, %s8008_s9  ;;  %v5863_v33 = vld [vmem:[#allocation2 + $0x80] sm:$0xff]  ;;  %v5865_v53 = vld [vmem:[#allocation2 + $0x88] sm:$0xff] }
 0x17d   : > { %v1016_v30 = vadd.f32 %v1014_v54, %v5708_v18  ;;  %v1017_v11 = vadd.f32 %v1015_v60, %v5711_v56  ;;  %1386 = vrot.lane.b32.xlu0 %v5552_v58, %s8008_s9  ;;  %1328 = vrot.lane.b32.xlu2 %v5627_v3, %s8005_s11 }
 0x17e   : > { %v1077_v47 = vpop.permute.xlu1 %1076 }
 0x17f   : > { %v1075_v29 = vpop.permute.xlu0 %1074  ;;  %v5824_v27 = vpop.permute.xlu2 %1140 }
 0x180   : > { %v1090_v18 = vsel %vm562_vm4, %v1075_v29, %v5725_v62  ;;  %v1094_v56 = vsel %vm562_vm4, %v5725_v62, %v1075_v29 }
 0x181   : > { %v1098_v1 = vmul.f32 %v1094_v56, %v5033_v32  ;;  %v1099_v19 = vmul.f32 %v1090_v18, %v5035_v31 }
 0x183   : > { %v1108_v61 = vmul.f32 %v1107_v23, %v1098_v1  ;;  %v1109_v16 = vmul.f32 %v1107_v23, %v1099_v19  ;;  %v1119_v1 = vstv %s3919_s18  ;;  %s5985_s18 = sld [smem:[#allocation3 + $0xe]] }
 0x184   : > { %1382 = vrot.lane.b32.xlu1 %v5679_v51, %s8008_s9 }
 0x185   : > { %v5836_v6 = vadd.f32 %v1108_v61, %v1054_v38  ;;  %v5838_v15 = vadd.f32 %v1109_v16, %v1055_v50  ;;  %1336 = vrot.lane.b32.xlu0 %v5639_v17, %s8005_s11  ;;  %1390 = vrot.lane.b32.xlu2 %v5671_v37, %s8008_s9  ;;  %v5891_v16 = vld [vmem:[#allocation2 + $0x98] sm:$0xff] }
 0x186   : > { %v1025_v62 = vpop.permute.xlu1 %1024 }
 0x187   : > { %v1085_v46 = vpop.permute.xlu0 %1084  ;;  %v1037_v26 = vsel %vm498_vm3, %v1025_v62, %v5759_v4  ;;  %v1041_v38 = vsel %vm498_vm3, %v5759_v4, %v1025_v62  ;;  %v5851_v50 = vpop.permute.xlu2 %1134 }
 0x188   : > { %v1091_v36 = vsel %vm562_vm4, %v1077_v47, %v1085_v46  ;;  %v1095_v9 = vsel %vm562_vm4, %v1085_v46, %v1077_v47  ;;  %v1048_v40 = vmul.f32 %v1041_v38, %v4938_v14  ;;  %v1049_v49 = vmul.f32 %v1037_v26, %v4945_v20 }
 0x189   : > { %v1100_v12 = vmul.f32 %v1095_v9, %v5033_v32  ;;  %v1101_v55 = vmul.f32 %v1091_v36, %v5035_v31  ;;  %v1163_v36 = vstv %s5879_s12  ;;  %s5991_s12 = sld [smem:[#allocation3 + $0x28]] }
 0x18a   : > { %v1070_v4 = vmul.f32 %v1069_v35, %v1048_v40  ;;  %v1071_v25 = vmul.f32 %v1069_v35, %v1049_v49  ;;  %v1169_v40 = vstv %s5881_s10  ;;  %s5995_s10 = sld [smem:[#allocation3 + $0x43]] }
 0x18b   : > { %v1114_v54 = vmul.f32 %v1113_v7, %v1100_v12  ;;  %v1115_v60 = vmul.f32 %v1113_v7, %v1101_v55 }
 0x18c   : > { %v5867_v47 = vadd.f32 %v1070_v4, %v1016_v30  ;;  %v5869_v29 = vadd.f32 %v1071_v25, %v1017_v11  ;;  %1444 = vrot.lane.b32.xlu1 %v5861_v5, %s8009_s15 }
 0x18d   : > { %v1116_v23 = vadd.f32 %v1114_v54, %v5774_v44  ;;  %v1117_v18 = vadd.f32 %v1115_v60, %v5777_v59  ;;  %1442 = vrot.lane.b32.xlu0 %v5863_v33, %s8009_s15  ;;  %1450 = vrot.lane.b32.xlu2 %v5865_v53, %s8009_s15  ;;  %v5925_v54 = vld [vmem:[#allocation2 + $0xa8] sm:$0xff] }
 0x18e   : > { %v1087_v56 = vpop.permute.xlu1 %1086 }
 0x18f   : > { %v1079_v30 = vpop.permute.xlu0 %1078  ;;  %v5883_v11 = vpop.permute.xlu2 %1144 }
 0x190   : > { %v1092_v44 = vsel %vm562_vm4, %v1079_v30, %v1087_v56  ;;  %v1096_v59 = vsel %vm562_vm4, %v1087_v56, %v1079_v30  ;;  %v5927_v30 = vld [vmem:[#allocation2 + $0xa0] sm:$0xff] }
 0x191   : > { %v1102_v19 = vmul.f32 %v1096_v59, %v5033_v32  ;;  %v1103_v61 = vmul.f32 %v1092_v44, %v5035_v31 }
 0x193   : > { %v1120_v62 = vmul.f32 %v1119_v1, %v1102_v19  ;;  %v1121_v7 = vmul.f32 %v1119_v1, %v1103_v61 }
 0x194   : > { %1384 = vrot.lane.b32.xlu1 %v5627_v3, %s8008_s9 }
 0x195   : > { %v5896_v46 = vadd.f32 %v1120_v62, %v5810_v0  ;;  %v5899_v35 = vadd.f32 %v1121_v7, %v5812_v21  ;;  %1452 = vrot.lane.b32.xlu0 %v5891_v16, %s8009_s15  ;;  %1392 = vrot.lane.b32.xlu2 %v5639_v17, %s8008_s9  ;;  %v1125_v7 = vstv %s3920_s29  ;;  %s6010_s29 = sld [smem:[#allocation3 + $0x29]] }
 0x196   : > { %v1139_v26 = vpop.permute.xlu1 %1138 }
 0x197   : > { %v1133_v38 = vpop.permute.xlu0 %1132  ;;  %v1146_v9 = vsel %vm626_vm5, %v5798_v57, %v1139_v26  ;;  %v1150_v0 = vsel %vm626_vm5, %v1139_v26, %v5798_v57  ;;  %v5913_v21 = vpop.permute.xlu2 %1218 }
 0x198   : > { %v1154_v49 = vmul.f32 %v1150_v0, %v5115_v42  ;;  %v1155_v12 = vmul.f32 %v1146_v9, %v5117_v39  ;;  %v1147_v55 = vsel %vm626_vm5, %v1133_v38, %v5824_v27  ;;  %v1151_v4 = vsel %vm626_vm5, %v5824_v27, %v1133_v38 }
 0x199   : > { %v1156_v25 = vmul.f32 %v1151_v4, %v5115_v42  ;;  %v1157_v57 = vmul.f32 %v1147_v55, %v5117_v39  ;;  %v1181_v4 = vstv %s5947_s26  ;;  %s3928_s26 = sld [smem:[#allocation3 + $0x5e]] }
 0x19a   : > { %v1164_v60 = vmul.f32 %v1163_v36, %v1154_v49  ;;  %v1165_v56 = vmul.f32 %v1163_v36, %v1155_v12  ;;  %v1175_v12 = vstv %s5945_s28  ;;  %s6014_s28 = sld [smem:[#allocation3 + $0x44]] }
 0x19b   : > { %v1170_v1 = vmul.f32 %v1169_v40, %v1156_v25  ;;  %v1171_v44 = vmul.f32 %v1169_v40, %v1157_v57 }
 0x19c   : > { %v5930_v59 = vadd.f32 %v1164_v60, %v5836_v6  ;;  %v5933_v19 = vadd.f32 %v1165_v56, %v5838_v15  ;;  %1454 = vrot.lane.b32.xlu1 %v5925_v54, %s8009_s15 }
 0x19d   : > { %v5937_v27 = vadd.f32 %v1170_v1, %v1116_v23  ;;  %v5939_v61 = vadd.f32 %v1171_v44, %v1117_v18  ;;  %1446 = vrot.lane.b32.xlu0 %v5927_v30, %s8009_s15  ;;  %1498 = vrot.lane.b32.xlu2 %v5863_v33, %s4501_s16 }
 0x19e   : > { %v1089_v62 = vpop.permute.xlu1 %1088 }
 0x19f   : > { %v1081_v6 = vpop.permute.xlu0 %1080  ;;  %v5949_v15 = vpop.permute.xlu2 %1222 }
 0x1a0   : > { %v1093_v23 = vsel %vm562_vm4, %v1081_v6, %v1089_v62  ;;  %v1097_v18 = vsel %vm562_vm4, %v1089_v62, %v1081_v6  ;;  %v5989_v62 = vld [vmem:[#allocation2 + $0xb8] sm:$0xff] }
 0x1a1   : > { %v1104_v26 = vmul.f32 %v1097_v18, %v5033_v32  ;;  %v1105_v38 = vmul.f32 %v1093_v23, %v5035_v31  ;;  %v5993_v23 = vld [vmem:[#allocation2 + $0xb0] sm:$0xff] }
 0x1a3   : > { %v1126_v36 = vmul.f32 %v1125_v7, %v1104_v26  ;;  %v1127_v9 = vmul.f32 %v1125_v7, %v1105_v38 }
 0x1a4   : > { %1506 = vrot.lane.b32.xlu1 %v5865_v53, %s4501_s16 }
 0x1a5   : > { %v1128_v0 = vadd.f32 %v1126_v36, %v5867_v47  ;;  %v1129_v40 = vadd.f32 %v1127_v9, %v5869_v29  ;;  %1500 = vrot.lane.b32.xlu0 %v5861_v5, %s4501_s16  ;;  %1508 = vrot.lane.b32.xlu2 %v5891_v16, %s4501_s16  ;;  %v1187_v36 = vstv %s5959_s20  ;;  %s6071_s20 = sld [smem:[#allocation3 + $0x2a]] }
 0x1a6   : > { %v1137_v49 = vpop.permute.xlu1 %1136 }
 0x1a7   : > { %v1143_v55 = vpop.permute.xlu0 %1142  ;;  %v1149_v25 = vsel %vm626_vm5, %v1137_v49, %v5883_v11  ;;  %v1153_v47 = vsel %vm626_vm5, %v5883_v11, %v1137_v49  ;;  %v5975_v57 = vpop.permute.xlu2 %1274 }
 0x1a8   : > { %v1148_v29 = vsel %vm626_vm5, %v5851_v50, %v1143_v55  ;;  %v1152_v60 = vsel %vm626_vm5, %v1143_v55, %v5851_v50  ;;  %v1160_v56 = vmul.f32 %v1153_v47, %v5115_v42  ;;  %v1161_v1 = vmul.f32 %v1149_v25, %v5117_v39 }
 0x1a9   : > { %v1158_v44 = vmul.f32 %v1152_v60, %v5115_v42  ;;  %v1159_v11 = vmul.f32 %v1148_v29, %v5117_v39  ;;  %v1188_v55 = vmul.f32 %v5544_v28, %v1187_v36  ;;  %v1199_v28 = vstv %s5995_s10  ;;  %s6125_s10 = sld [smem:[#allocation3 + $0x2b]] }
 0x1aa   : > { %v1182_v6 = vmul.f32 %v1181_v4, %v1160_v56  ;;  %v1183_v7 = vmul.f32 %v1181_v4, %v1161_v1 }
 0x1ab   : > { %v1176_v50 = vmul.f32 %v1175_v12, %v1158_v44  ;;  %v1177_v18 = vmul.f32 %v1175_v12, %v1159_v11  ;;  %v1189_v12 = vmul.f32 %v5552_v58, %v1187_v36  ;;  %v1193_v58 = vstv %s5991_s12  ;;  %s6123_s12 = sld [smem:[#allocation3 + $0x10]] }
 0x1ac   : > { %v5997_v26 = vadd.f32 %v1182_v6, %v1128_v0  ;;  %v5999_v38 = vadd.f32 %v1183_v7, %v1129_v40  ;;  %1456 = vrot.lane.b32.xlu1 %v5989_v62, %s8009_s15  ;;  %v1190_v56 = vadd.f32 %v1188_v55, %v5930_v59  ;;  %v1200_v59 = vmul.f32 %v5679_v51, %v1199_v28 }
 0x1ad   : > { %v1178_v9 = vadd.f32 %v1176_v50, %v5896_v46  ;;  %v1179_v49 = vadd.f32 %v1177_v18, %v5899_v35  ;;  %1448 = vrot.lane.b32.xlu0 %v5993_v23, %s8009_s15  ;;  %1502 = vrot.lane.b32.xlu2 %v5927_v30, %s4501_s16  ;;  %v1243_v35 = vstv %s5985_s18  ;;  %v1191_v60 = vadd.f32 %v1189_v12, %v5933_v19  ;;  %s3933_s15 = sld [smem:[#allocation3 + $0xf]] }
 0x1ae   : > { %v1213_v0 = vpop.permute.xlu1 %1212  ;;  %v1195_v19 = vmul.f32 %v5577_v24, %v1193_v58  ;;  %v1201_v50 = vmul.f32 %v5671_v37, %v1199_v28  ;;  %v1249_v18 = vstv %s6010_s29  ;;  %s6073_s18 = sld [smem:[#allocation3 + $0x5f]] }
 0x1af   : > { %v1211_v40 = vpop.permute.xlu0 %1210  ;;  %v6016_v46 = vpop.permute.xlu2 %1224  ;;  %s3939_s29 = sld [smem:[#allocation3 + $0x46]] }
 0x1b0   : > { %v1226_v4 = vsel %vm714_vm6, %v1211_v40, %v5913_v21  ;;  %v1230_v25 = vsel %vm714_vm6, %v5913_v21, %v1211_v40  ;;  %v1194_v21 = vmul.f32 %v5605_v45, %v1193_v58  ;;  %v1255_v40 = vstv %s6014_s28  ;;  %s6189_s28 = sld [smem:[#allocation3 + $0x11]] }
 0x1b1   : > { %v1234_v47 = vmul.f32 %v1226_v4, %v5274_v8  ;;  %v1235_v29 = vmul.f32 %v1230_v25, %v5276_v52 }
 0x1b2   : > { %v1196_v28 = vadd.f32 %v1194_v21, %v5937_v27 }
 0x1b3   : > { %v1244_v1 = vmul.f32 %v1243_v35, %v1234_v47  ;;  %v1245_v44 = vmul.f32 %v1243_v35, %v1235_v29  ;;  %v1202_v47 = vadd.f32 %v1200_v59, %v1178_v9  ;;  %v1203_v29 = vadd.f32 %v1201_v50, %v1179_v49 }
 0x1b4   : > { %1554 = vrot.lane.b32.xlu1 %v5863_v33, %s4502_s17  ;;  %v1299_v49 = vstv %s3933_s15  ;;  %s3942_s15 = sld [smem:[#allocation3 + $0x2c]] }
 0x1b5   : > { %v1246_v11 = vadd.f32 %v1244_v1, %v1190_v56  ;;  %v1247_v6 = vadd.f32 %v1245_v44, %v1191_v60  ;;  %1510 = vrot.lane.b32.xlu0 %v5925_v54, %s4501_s16  ;;  %1556 = vrot.lane.b32.xlu2 %v5861_v5, %s4502_s17  ;;  %v1197_v60 = vadd.f32 %v1195_v19, %v5939_v61 }
 0x1b6   : > { %v1215_v7 = vpop.permute.xlu1 %1214 }
 0x1b7   : > { %v1221_v36 = vpop.permute.xlu0 %1220  ;;  %v1228_v12 = vsel %vm714_vm6, %v1215_v7, %v5949_v15  ;;  %v1232_v55 = vsel %vm714_vm6, %v5949_v15, %v1215_v7  ;;  %v6049_v35 = vpop.permute.xlu2 %1322 }
 0x1b8   : > { %v1227_v24 = vsel %vm714_vm6, %v1213_v0, %v1221_v36  ;;  %v1231_v45 = vsel %vm714_vm6, %v1221_v36, %v1213_v0  ;;  %v1238_v37 = vmul.f32 %v1228_v12, %v5274_v8  ;;  %v1239_v51 = vmul.f32 %v1232_v55, %v5276_v52 }
 0x1b9   : > { %v1236_v4 = vmul.f32 %v1227_v24, %v5274_v8  ;;  %v1237_v25 = vmul.f32 %v1231_v45, %v5276_v52  ;;  %v1205_v12 = vstv %s3928_s26  ;;  %s6216_s26 = sld [smem:[#allocation3 + $0x47]] }
 0x1ba   : > { %v1256_v15 = vmul.f32 %v1255_v40, %v1238_v37  ;;  %v1257_v58 = vmul.f32 %v1255_v40, %v1239_v51  ;;  %v1206_v45 = vmul.f32 %v5627_v3, %v1205_v12  ;;  %v1207_v37 = vmul.f32 %v5639_v17, %v1205_v12 }
 0x1bb   : > { %v1250_v56 = vmul.f32 %v1249_v18, %v1236_v4  ;;  %v1251_v1 = vmul.f32 %v1249_v18, %v1237_v25  ;;  %v1305_v51 = vstv %s6071_s20  ;;  %v1261_v25 = vstv %s6073_s18  ;;  %s3945_s20 = sld [smem:[#allocation3 + $0x12]] }
 0x1bc   : > { %v6061_v0 = vadd.f32 %v1256_v15, %v1202_v47  ;;  %v6063_v44 = vadd.f32 %v1257_v58, %v1203_v29  ;;  %1564 = vrot.lane.b32.xlu1 %v5891_v16, %s4502_s17  ;;  %s6266_s18 = sld [smem:[#allocation3 + $0x2d]] }
 0x1bd   : > { %v1252_v7 = vadd.f32 %v1250_v56, %v1196_v28  ;;  %v1253_v36 = vadd.f32 %v1251_v1, %v1197_v60  ;;  %1562 = vrot.lane.b32.xlu0 %v5865_v53, %s4502_s17  ;;  %1504 = vrot.lane.b32.xlu2 %v5993_v23, %s4501_s16  ;;  %v1208_v60 = vadd.f32 %v1206_v45, %v5997_v26 }
 0x1be   : > { %v1269_v27 = vpop.permute.xlu1 %1268 }
 0x1bf   : > { %v1267_v61 = vpop.permute.xlu0 %1266  ;;  %v6075_v9 = vpop.permute.xlu2 %1332 }
 0x1c0   : > { %v1282_v21 = vsel %vm778_vm7, %v1267_v61, %v5975_v57  ;;  %v1286_v19 = vsel %vm778_vm7, %v5975_v57, %v1267_v61 }
 0x1c1   : > { %v1290_v59 = vmul.f32 %v1282_v21, %v5363_v34  ;;  %v1291_v50 = vmul.f32 %v1286_v19, %v5365_v48 }
 0x1c3   : > { %v1300_v18 = vmul.f32 %v1299_v49, %v1290_v59  ;;  %v1301_v40 = vmul.f32 %v1299_v49, %v1291_v50 }
 0x1c4   : > { %1558 = vrot.lane.b32.xlu1 %v5927_v30, %s4502_s17 }
 0x1c5   : > { %v6087_v55 = vadd.f32 %v1300_v18, %v1246_v11  ;;  %v6089_v24 = vadd.f32 %v1301_v40, %v1247_v6  ;;  %1512 = vrot.lane.b32.xlu0 %v5989_v62, %s4501_s16  ;;  %1566 = vrot.lane.b32.xlu2 %v5925_v54, %s4502_s17  ;;  %s3935_s16 = sld [smem:[#allocation3 + $0x45]] }
 0x1c6   : > { %v1217_v57 = vpop.permute.xlu1 %1216 }
 0x1c7   : > { %v1277_v4 = vpop.permute.xlu0 %1276  ;;  %v1229_v11 = vsel %vm714_vm6, %v1217_v57, %v6016_v46  ;;  %v1233_v6 = vsel %vm714_vm6, %v6016_v46, %v1217_v57  ;;  %v6105_v47 = vpop.permute.xlu2 %1326  ;;  %v1209_v46 = vadd.f32 %v1207_v37, %v5999_v38 }
 0x1c8   : > { %v1283_v29 = vsel %vm778_vm7, %v1269_v27, %v1277_v4  ;;  %v1287_v3 = vsel %vm778_vm7, %v1277_v4, %v1269_v27  ;;  %v1240_v17 = vmul.f32 %v1229_v11, %v5274_v8  ;;  %v1241_v15 = vmul.f32 %v1233_v6, %v5276_v52 }
 0x1c9   : > { %v1292_v58 = vmul.f32 %v1283_v29, %v5363_v34  ;;  %v1293_v28 = vmul.f32 %v1287_v3, %v5365_v48  ;;  %v1355_v11 = vstv %s6123_s12  ;;  %s6313_s12 = sld [smem:[#allocation3 + $0x13]] }
 0x1ca   : > { %v1262_v56 = vmul.f32 %v1261_v25, %v1240_v17  ;;  %v1263_v1 = vmul.f32 %v1261_v25, %v1241_v15 }
 0x1cb   : > { %v1306_v61 = vmul.f32 %v1305_v51, %v1292_v58  ;;  %v1307_v49 = vmul.f32 %v1305_v51, %v1293_v28  ;;  %v1311_v18 = vstv %s3935_s16  ;;  %s3944_s16 = sld [smem:[#allocation3 + $0x62]] }
 0x1cc   : > { %v1264_v21 = vadd.f32 %v1262_v56, %v1208_v60  ;;  %v1265_v19 = vadd.f32 %v1263_v1, %v1209_v46  ;;  %1612 = vrot.lane.b32.xlu1 %v5861_v5, %s7991_s19 }
 0x1cd   : > { %v1308_v27 = vadd.f32 %v1306_v61, %v1252_v7  ;;  %v1309_v59 = vadd.f32 %v1307_v49, %v1253_v36  ;;  %1610 = vrot.lane.b32.xlu0 %v5863_v33, %s7991_s19  ;;  %1618 = vrot.lane.b32.xlu2 %v5865_v53, %s7991_s19 }
 0x1ce   : > { %v1279_v26 = vpop.permute.xlu1 %1278 }
 0x1cf   : > { %v1271_v38 = vpop.permute.xlu0 %1270  ;;  %v6127_v50 = vpop.permute.xlu2 %1380 }
 0x1d0   : > { %v1284_v7 = vsel %vm778_vm7, %v1271_v38, %v1279_v26  ;;  %v1288_v36 = vsel %vm778_vm7, %v1279_v26, %v1271_v38 }
 0x1d1   : > { %v1294_v40 = vmul.f32 %v1284_v7, %v5363_v34  ;;  %v1295_v12 = vmul.f32 %v1288_v36, %v5365_v48 }
 0x1d3   : > { %v1312_v57 = vmul.f32 %v1311_v18, %v1294_v40  ;;  %v1313_v45 = vmul.f32 %v1311_v18, %v1295_v12 }
 0x1d4   : > { %1560 = vrot.lane.b32.xlu1 %v5993_v23, %s4502_s17 }
 0x1d5   : > { %v1314_v37 = vadd.f32 %v1312_v57, %v6061_v0  ;;  %v1315_v51 = vadd.f32 %v1313_v45, %v6063_v44  ;;  %1620 = vrot.lane.b32.xlu0 %v5891_v16, %s7991_s19  ;;  %1568 = vrot.lane.b32.xlu2 %v5989_v62, %s4502_s17  ;;  %v1361_v0 = vstv %s6125_s10  ;;  %s3936_s17 = sld [smem:[#allocation3 + $0x60]] }
 0x1d6   : > { %v1331_v4 = vpop.permute.xlu1 %1330  ;;  %s6315_s10 = sld [smem:[#allocation3 + $0x2e]] }
 0x1d7   : > { %v1325_v25 = vpop.permute.xlu0 %1324  ;;  %v1338_v6 = vsel %vm842_vm8, %v6049_v35, %v1331_v4  ;;  %v1342_v29 = vsel %vm842_vm8, %v1331_v4, %v6049_v35  ;;  %v6151_v3 = vpop.permute.xlu2 %1328 }
 0x1d8   : > { %v1346_v44 = vmul.f32 %v1338_v6, %v5447_v2  ;;  %v1347_v17 = vmul.f32 %v1342_v29, %v5449_v22  ;;  %v1339_v15 = vsel %vm842_vm8, %v1325_v25, %v6075_v9  ;;  %v1343_v58 = vsel %vm842_vm8, %v6075_v9, %v1325_v25 }
 0x1d9   : > { %v1348_v28 = vmul.f32 %v1339_v15, %v5447_v2  ;;  %v1349_v35 = vmul.f32 %v1343_v58, %v5449_v22  ;;  %v1367_v6 = vstv %s3939_s29  ;;  %s6377_s29 = sld [smem:[#allocation3 + $0x14]] }
 0x1da   : > { %v1356_v60 = vmul.f32 %v1355_v11, %v1346_v44  ;;  %v1357_v46 = vmul.f32 %v1355_v11, %v1347_v17 }
 0x1db   : > { %v1362_v56 = vmul.f32 %v1361_v0, %v1348_v28  ;;  %v1363_v1 = vmul.f32 %v1361_v0, %v1349_v35  ;;  %v1317_v36 = vstv %s3936_s17  ;;  %s3951_s17 = sld [smem:[#allocation3 + $0x49]] }
 0x1dc   : > { %v1358_v61 = vadd.f32 %v1356_v60, %v6087_v55  ;;  %v1359_v49 = vadd.f32 %v1357_v46, %v6089_v24  ;;  %1622 = vrot.lane.b32.xlu1 %v5925_v54, %s7991_s19  ;;  %v1417_v60 = vstv %s3942_s15  ;;  %s6395_s15 = sld [smem:[#allocation3 + $0x64]] }
 0x1dd   : > { %v1364_v26 = vadd.f32 %v1362_v56, %v1308_v27  ;;  %v1365_v38 = vadd.f32 %v1363_v1, %v1309_v59  ;;  %1614 = vrot.lane.b32.xlu0 %v5927_v30, %s7991_s19  ;;  %1616 = vrot.lane.b32.xlu2 %v5993_v23, %s7991_s19 }
 0x1de   : > { %v1281_v9 = vpop.permute.xlu1 %1280 }
 0x1df   : > { %v1273_v18 = vpop.permute.xlu0 %1272  ;;  %v6171_v7 = vpop.permute.xlu2 %1390 }
 0x1e0   : > { %v1285_v55 = vsel %vm778_vm7, %v1273_v18, %v1281_v9  ;;  %v1289_v24 = vsel %vm778_vm7, %v1281_v9, %v1273_v18 }
 0x1e1   : > { %v1296_v27 = vmul.f32 %v1285_v55, %v5363_v34  ;;  %v1297_v59 = vmul.f32 %v1289_v24, %v5365_v48 }
 0x1e3   : > { %v1318_v40 = vmul.f32 %v1317_v36, %v1296_v27  ;;  %v1319_v12 = vmul.f32 %v1317_v36, %v1297_v59 }
 0x1e4   : > { %1690 = vrot.lane.b32.xlu1 %v5863_v33, %s8003_s13 }
 0x1e5   : > { %v6181_v57 = vadd.f32 %v1318_v40, %v1264_v21  ;;  %v6183_v45 = vadd.f32 %v1319_v12, %v1265_v19  ;;  %1624 = vrot.lane.b32.xlu0 %v5989_v62, %s7991_s19  ;;  %1692 = vrot.lane.b32.xlu2 %v5861_v5, %s8003_s13  ;;  %s6207_s19 = sld [smem:[#allocation3 + $0x61]] }
 0x1e6   : > { %v1379_v4 = vpop.permute.xlu1 %1378 }
 0x1e7   : > { %v1335_v25 = vpop.permute.xlu0 %1334  ;;  %v6191_v11 = vpop.permute.xlu2 %1450 }
 0x1e8   : > { %v1340_v21 = vsel %vm842_vm8, %v6105_v47, %v1335_v25  ;;  %v1344_v19 = vsel %vm842_vm8, %v1335_v25, %v6105_v47  ;;  %v1411_v47 = vstv %s6189_s28  ;;  %s3954_s28 = sld [smem:[#allocation3 + $0x2f]] }
 0x1e9   : > { %v1350_v29 = vmul.f32 %v1340_v21, %v5447_v2  ;;  %v1351_v0 = vmul.f32 %v1344_v19, %v5449_v22 }
 0x1eb   : > { %v1368_v44 = vmul.f32 %v1367_v6, %v1350_v29  ;;  %v1369_v17 = vmul.f32 %v1367_v6, %v1351_v0  ;;  %v1373_v21 = vstv %s6207_s19  ;;  %v1423_v29 = vstv %s6216_s26  ;;  %s6404_s19 = sld [smem:[#allocation3 + $0x4a]] }
 0x1ec   : > { %1700 = vrot.lane.b32.xlu1 %v5891_v16, %s8003_s13  ;;  %s3956_s26 = sld [smem:[#allocation3 + $0x65]] }
 0x1ed   : > { %v1370_v15 = vadd.f32 %v1368_v44, %v1314_v37  ;;  %v1371_v58 = vadd.f32 %v1369_v17, %v1315_v51  ;;  %1698 = vrot.lane.b32.xlu0 %v5865_v53, %s8003_s13  ;;  %1694 = vrot.lane.b32.xlu2 %v5927_v30, %s8003_s13 }
 0x1ee   : > { %v1389_v28 = vpop.permute.xlu1 %1388 }
 0x1ef   : > { %v1387_v35 = vpop.permute.xlu0 %1386  ;;  %v1395_v46 = vsel %vm906_vm9, %v6127_v50, %v1389_v28  ;;  %v1399_v37 = vsel %vm906_vm9, %v1389_v28, %v6127_v50  ;;  %v6218_v51 = vpop.permute.xlu2 %1392 }
 0x1f0   : > { %v1394_v56 = vsel %vm906_vm9, %v1379_v4, %v1387_v35  ;;  %v1398_v1 = vsel %vm906_vm9, %v1387_v35, %v1379_v4  ;;  %v1404_v9 = vmul.f32 %v1395_v46, %v5548_v43  ;;  %v1405_v18 = vmul.f32 %v1399_v37, %v5550_v41 }
 0x1f1   : > { %v1402_v36 = vmul.f32 %v1394_v56, %v5548_v43  ;;  %v1403_v50 = vmul.f32 %v1398_v1, %v5550_v41 }
 0x1f2   : > { %v1418_v55 = vmul.f32 %v1417_v60, %v1404_v9  ;;  %v1419_v24 = vmul.f32 %v1417_v60, %v1405_v18 }
 0x1f3   : > { %v1412_v27 = vmul.f32 %v1411_v47, %v1402_v36  ;;  %v1413_v59 = vmul.f32 %v1411_v47, %v1403_v50 }
 0x1f4   : > { %v6228_v40 = vadd.f32 %v1418_v55, %v1364_v26  ;;  %v6230_v12 = vadd.f32 %v1419_v24, %v1365_v38  ;;  %1746 = vrot.lane.b32.xlu1 %v5863_v33, %s8004_s14 }
 0x1f5   : > { %v1414_v4 = vadd.f32 %v1412_v27, %v1358_v61  ;;  %v1415_v25 = vadd.f32 %v1413_v59, %v1359_v49  ;;  %1702 = vrot.lane.b32.xlu0 %v5925_v54, %s8003_s13  ;;  %1748 = vrot.lane.b32.xlu2 %v5861_v5, %s8004_s14 }
 0x1f6   : > { %v1383_v6 = vpop.permute.xlu1 %1382 }
 0x1f7   : > { %v1337_v19 = vpop.permute.xlu0 %1336  ;;  %v1396_v26 = vsel %vm906_vm9, %v1383_v6, %v6171_v7  ;;  %v1400_v38 = vsel %vm906_vm9, %v6171_v7, %v1383_v6  ;;  %v6246_v61 = vpop.permute.xlu2 %1498  ;;  %v1481_v6 = vstv %s6266_s18  ;;  %s3960_s18 = sld [smem:[#allocation3 + $0x66]] }
 0x1f8   : > { %v1341_v49 = vsel %vm842_vm8, %v6151_v3, %v1337_v19  ;;  %v1345_v0 = vsel %vm842_vm8, %v1337_v19, %v6151_v3  ;;  %v1406_v44 = vmul.f32 %v1396_v26, %v5548_v43  ;;  %v1407_v17 = vmul.f32 %v1400_v38, %v5550_v41 }
 0x1f9   : > { %v1352_v28 = vmul.f32 %v1341_v49, %v5447_v2  ;;  %v1353_v47 = vmul.f32 %v1345_v0, %v5449_v22  ;;  %v1429_v19 = vstv %s3944_s16  ;;  %s3961_s16 = sld [smem:[#allocation3 + $0x16]] }
 0x1fa   : > { %v1424_v7 = vmul.f32 %v1423_v29, %v1406_v44  ;;  %v1425_v35 = vmul.f32 %v1423_v29, %v1407_v17 }
 0x1fb   : > { %v1374_v60 = vmul.f32 %v1373_v21, %v1352_v28  ;;  %v1375_v46 = vmul.f32 %v1373_v21, %v1353_v47 }
 0x1fc   : > { %v1426_v37 = vadd.f32 %v1424_v7, %v1370_v15  ;;  %v1427_v56 = vadd.f32 %v1425_v35, %v1371_v58  ;;  %1756 = vrot.lane.b32.xlu1 %v5891_v16, %s8004_s14  ;;  %v1475_v58 = vstv %s3945_s20  ;;  %s3959_s20 = sld [smem:[#allocation3 + $0x4b]] }
 0x1fd   : > { %v1376_v3 = vadd.f32 %v1374_v60, %v6181_v57  ;;  %v1377_v1 = vadd.f32 %v1375_v46, %v6183_v45  ;;  %1754 = vrot.lane.b32.xlu0 %v5865_v53, %s8004_s14  ;;  %1696 = vrot.lane.b32.xlu2 %v5993_v23, %s8003_s13 }
 0x1fe   : > { %v1445_v9 = vpop.permute.xlu1 %1444 }
 0x1ff   : > { %v1443_v18 = vpop.permute.xlu0 %1442  ;;  %v6268_v15 = vpop.permute.xlu2 %1508 }
 0x200   : > { %v1458_v57 = vsel %vm435_vm2, %v1443_v18, %v6191_v11  ;;  %v1462_v45 = vsel %vm435_vm2, %v6191_v11, %v1443_v18 }
 0x201   : > { %v1466_v36 = vmul.f32 %v1462_v45, %v4934_v10  ;;  %v1467_v50 = vmul.f32 %v1458_v57, %v4936_v13 }
 0x203   : > { %v1476_v55 = vmul.f32 %v1475_v58, %v1466_v36  ;;  %v1477_v24 = vmul.f32 %v1475_v58, %v1467_v50 }
 0x204   : > { %1750 = vrot.lane.b32.xlu1 %v5927_v30, %s8004_s14 }
 0x205   : > { %v6280_v27 = vadd.f32 %v1476_v55, %v1414_v4  ;;  %v6282_v59 = vadd.f32 %v1477_v24, %v1415_v25  ;;  %1704 = vrot.lane.b32.xlu0 %v5989_v62, %s8003_s13  ;;  %1758 = vrot.lane.b32.xlu2 %v5925_v54, %s8004_s14  ;;  %s3947_s13 = sld [smem:[#allocation3 + $0x48]] }
 0x206   : > { %v1385_v11 = vpop.permute.xlu1 %1384 }
 0x207   : > { %v1453_v21 = vpop.permute.xlu0 %1452  ;;  %v1397_v29 = vsel %vm906_vm9, %v1385_v11, %v6218_v51  ;;  %v1401_v4 = vsel %vm906_vm9, %v6218_v51, %v1385_v11  ;;  %v6295_v25 = vpop.permute.xlu2 %1502 }
 0x208   : > { %v1459_v26 = vsel %vm435_vm2, %v1445_v9, %v1453_v21  ;;  %v1463_v38 = vsel %vm435_vm2, %v1453_v21, %v1445_v9  ;;  %v1408_v49 = vmul.f32 %v1397_v29, %v5548_v43  ;;  %v1409_v0 = vmul.f32 %v1401_v4, %v5550_v41 }
 0x209   : > { %v1468_v44 = vmul.f32 %v1463_v38, %v4934_v10  ;;  %v1469_v17 = vmul.f32 %v1459_v26, %v4936_v13  ;;  %v1531_v21 = vstv %s6313_s12  ;;  %v1537_v4 = vstv %s6315_s10  ;;  %s6488_s12 = sld [smem:[#allocation3 + $0x17]] }
 0x20a   : > { %v1430_v28 = vmul.f32 %v1429_v19, %v1408_v49  ;;  %v1431_v47 = vmul.f32 %v1429_v19, %v1409_v0  ;;  %s6490_s10 = sld [smem:[#allocation3 + $0x32]] }
 0x20b   : > { %v1482_v51 = vmul.f32 %v1481_v6, %v1468_v44  ;;  %v1483_v7 = vmul.f32 %v1481_v6, %v1469_v17 }
 0x20c   : > { %v1432_v35 = vadd.f32 %v1430_v28, %v1376_v3  ;;  %v1433_v60 = vadd.f32 %v1431_v47, %v1377_v1  ;;  %1804 = vrot.lane.b32.xlu1 %v5861_v5, %s8005_s11  ;;  %v1487_v1 = vstv %s3947_s13  ;;  %s3962_s13 = sld [smem:[#allocation3 + $0x31]] }
 0x20d   : > { %v1484_v46 = vadd.f32 %v1482_v51, %v6228_v40  ;;  %v1485_v9 = vadd.f32 %v1483_v7, %v6230_v12  ;;  %1802 = vrot.lane.b32.xlu0 %v5863_v33, %s8005_s11  ;;  %1810 = vrot.lane.b32.xlu2 %v5865_v53, %s8005_s11 }
 0x20e   : > { %v1455_v18 = vpop.permute.xlu1 %1454 }
 0x20f   : > { %v1447_v58 = vpop.permute.xlu0 %1446  ;;  %v6317_v3 = vpop.permute.xlu2 %1556 }
 0x210   : > { %v1460_v40 = vsel %vm435_vm2, %v1447_v58, %v1455_v18  ;;  %v1464_v12 = vsel %vm435_vm2, %v1455_v18, %v1447_v58 }
 0x211   : > { %v1470_v57 = vmul.f32 %v1464_v12, %v4934_v10  ;;  %v1471_v45 = vmul.f32 %v1460_v40, %v4936_v13 }
 0x213   : > { %v1488_v36 = vmul.f32 %v1487_v1, %v1470_v57  ;;  %v1489_v50 = vmul.f32 %v1487_v1, %v1471_v45 }
 0x214   : > { %1752 = vrot.lane.b32.xlu1 %v5993_v23, %s8004_s14 }
 0x215   : > { %v1490_v55 = vadd.f32 %v1488_v36, %v1426_v37  ;;  %v1491_v24 = vadd.f32 %v1489_v50, %v1427_v56  ;;  %1812 = vrot.lane.b32.xlu0 %v5891_v16, %s8005_s11  ;;  %1760 = vrot.lane.b32.xlu2 %v5989_v62, %s8004_s14  ;;  %s3948_s14 = sld [smem:[#allocation3 + $0x63]] }
 0x216   : > { %v1507_v11 = vpop.permute.xlu1 %1506 }
 0x217   : > { %v1501_v6 = vpop.permute.xlu0 %1500  ;;  %v1514_v19 = vsel %vm498_vm3, %v6246_v61, %v1507_v11  ;;  %v1518_v29 = vsel %vm498_vm3, %v1507_v11, %v6246_v61  ;;  %v6339_v37 = vpop.permute.xlu2 %1504  ;;  %v1543_v11 = vstv %s3951_s17  ;;  %s6522_s17 = sld [smem:[#allocation3 + $0x4d]] }
 0x218   : > { %v1522_v56 = vmul.f32 %v1518_v29, %v4938_v14  ;;  %v1523_v26 = vmul.f32 %v1514_v19, %v4945_v20  ;;  %v1515_v38 = vsel %vm498_vm3, %v1501_v6, %v6268_v15  ;;  %v1519_v49 = vsel %vm498_vm3, %v6268_v15, %v1501_v6 }
 0x219   : > { %v1524_v0 = vmul.f32 %v1519_v49, %v4938_v14  ;;  %v1525_v61 = vmul.f32 %v1515_v38, %v4945_v20 }
 0x21a   : > { %v1532_v44 = vmul.f32 %v1531_v21, %v1522_v56  ;;  %v1533_v17 = vmul.f32 %v1531_v21, %v1523_v26  ;;  %v1593_v56 = vstv %s3954_s28  ;;  %s3970_s28 = sld [smem:[#allocation3 + $0x33]] }
 0x21b   : > { %v1538_v28 = vmul.f32 %v1537_v4, %v1524_v0  ;;  %v1539_v47 = vmul.f32 %v1537_v4, %v1525_v61  ;;  %v1493_v12 = vstv %s3948_s14  ;;  %s6500_s14 = sld [smem:[#allocation3 + $0x4c]] }
 0x21c   : > { %v1534_v51 = vadd.f32 %v1532_v44, %v6280_v27  ;;  %v1535_v7 = vadd.f32 %v1533_v17, %v6282_v59  ;;  %1814 = vrot.lane.b32.xlu1 %v5925_v54, %s8005_s11 }
 0x21d   : > { %v1540_v18 = vadd.f32 %v1538_v28, %v1484_v46  ;;  %v1541_v58 = vadd.f32 %v1539_v47, %v1485_v9  ;;  %1806 = vrot.lane.b32.xlu0 %v5927_v30, %s8005_s11  ;;  %1858 = vrot.lane.b32.xlu2 %v5863_v33, %s8008_s9 }
 0x21e   : > { %v1457_v15 = vpop.permute.xlu1 %1456 }
 0x21f   : > { %v1449_v1 = vpop.permute.xlu0 %1448  ;;  %v6359_v40 = vpop.permute.xlu2 %1566 }
 0x220   : > { %v1461_v27 = vsel %vm435_vm2, %v1449_v1, %v1457_v15  ;;  %v1465_v59 = vsel %vm435_vm2, %v1457_v15, %v1449_v1 }
 0x221   : > { %v1472_v46 = vmul.f32 %v1465_v59, %v4934_v10  ;;  %v1473_v9 = vmul.f32 %v1461_v27, %v4936_v13 }
 0x223   : > { %v1494_v57 = vmul.f32 %v1493_v12, %v1472_v46  ;;  %v1495_v45 = vmul.f32 %v1493_v12, %v1473_v9  ;;  %v1549_v46 = vstv %s6395_s15  ;;  %s3964_s15 = sld [smem:[#allocation3 + $0x67]] }
 0x224   : > { %1866 = vrot.lane.b32.xlu1 %v5865_v53, %s8008_s9 }
 0x225   : > { %v6369_v33 = vadd.f32 %v1494_v57, %v1432_v35  ;;  %v6371_v36 = vadd.f32 %v1495_v45, %v1433_v60  ;;  %1860 = vrot.lane.b32.xlu0 %v5861_v5, %s8008_s9  ;;  %1868 = vrot.lane.b32.xlu2 %v5891_v16, %s8008_s9  ;;  %v1599_v57 = vstv %s6404_s19  ;;  %s6546_s19 = sld [smem:[#allocation3 + $0x68]] }
 0x226   : > { %v1555_v50 = vpop.permute.xlu1 %1554 }
 0x227   : > { %v1511_v10 = vpop.permute.xlu0 %1510  ;;  %v6379_v13 = vpop.permute.xlu2 %1618 }
 0x228   : > { %v1516_v53 = vsel %vm498_vm3, %v6295_v25, %v1511_v10  ;;  %v1520_v5 = vsel %vm498_vm3, %v1511_v10, %v6295_v25  ;;  %v1587_v25 = vstv %s6377_s29  ;;  %s6529_s29 = sld [smem:[#allocation3 + $0x18]] }
 0x229   : > { %v1526_v35 = vmul.f32 %v1520_v5, %v4938_v14  ;;  %v1527_v16 = vmul.f32 %v1516_v53, %v4945_v20 }
 0x22b   : > { %v1544_v60 = vmul.f32 %v1543_v11, %v1526_v35  ;;  %v1545_v6 = vmul.f32 %v1543_v11, %v1527_v16 }
 0x22c   : > { %1816 = vrot.lane.b32.xlu1 %v5989_v62, %s8005_s11 }
 0x22d   : > { %v1546_v21 = vadd.f32 %v1544_v60, %v1490_v55  ;;  %v1547_v19 = vadd.f32 %v1545_v6, %v1491_v24  ;;  %1808 = vrot.lane.b32.xlu0 %v5993_v23, %s8005_s11  ;;  %1862 = vrot.lane.b32.xlu2 %v5927_v30, %s8008_s9  ;;  %s3957_s11 = sld [smem:[#allocation3 + $0x15]] }
 0x22e   : > { %v1565_v29 = vpop.permute.xlu1 %1564 }
 0x22f   : > { %v1563_v4 = vpop.permute.xlu0 %1562  ;;  %v1571_v26 = vsel %vm562_vm4, %v6317_v3, %v1565_v29  ;;  %v1575_v55 = vsel %vm562_vm4, %v1565_v29, %v6317_v3  ;;  %v1569_v24 = vpop.permute.xlu2 %1568 }
 0x230   : > { %v1570_v30 = vsel %vm562_vm4, %v1555_v50, %v1563_v4  ;;  %v1574_v38 = vsel %vm562_vm4, %v1563_v4, %v1555_v50  ;;  %v1580_v49 = vmul.f32 %v1575_v55, %v5033_v32  ;;  %v1581_v0 = vmul.f32 %v1571_v26, %v5035_v31 }
 0x231   : > { %v1578_v61 = vmul.f32 %v1574_v38, %v5033_v32  ;;  %v1579_v44 = vmul.f32 %v1570_v30, %v5035_v31  ;;  %v1605_v38 = vstv %s3956_s26  ;;  %s6594_s26 = sld [smem:[#allocation3 + $0x34]] }
 0x232   : > { %v1594_v3 = vmul.f32 %v1593_v56, %v1580_v49  ;;  %v1595_v17 = vmul.f32 %v1593_v56, %v1581_v0 }
 0x233   : > { %v1588_v28 = vmul.f32 %v1587_v25, %v1578_v61  ;;  %v1589_v47 = vmul.f32 %v1587_v25, %v1579_v44  ;;  %v1643_v29 = vstv %s3957_s11  ;;  %s6555_s11 = sld [smem:[#allocation3 + $0x4e]] }
 0x234   : > { %v6414_v15 = vadd.f32 %v1594_v3, %v1540_v18  ;;  %v6416_v1 = vadd.f32 %v1595_v17, %v1541_v58  ;;  %1864 = vrot.lane.b32.xlu1 %v5993_v23, %s8008_s9 }
 0x235   : > { %v1590_v12 = vadd.f32 %v1588_v28, %v1534_v51  ;;  %v1591_v27 = vadd.f32 %v1589_v47, %v1535_v7  ;;  %1870 = vrot.lane.b32.xlu0 %v5925_v54, %s8008_s9  ;;  %1872 = vrot.lane.b32.xlu2 %v5989_v62, %s8008_s9  ;;  %s3958_s9 = sld [smem:[#allocation3 + $0x30]] }
 0x236   : > { %v1559_v59 = vpop.permute.xlu1 %1558 }
 0x237   : > { %v1513_v9 = vpop.permute.xlu0 %1512  ;;  %v1572_v18 = vsel %vm562_vm4, %v1559_v59, %v6359_v40  ;;  %v1576_v23 = vsel %vm562_vm4, %v6359_v40, %v1559_v59  ;;  %v6432_v51 = vpop.permute.xlu2 %1616 }
 0x238   : > { %v1517_v54 = vsel %vm498_vm3, %v6339_v37, %v1513_v9  ;;  %v1521_v62 = vsel %vm498_vm3, %v1513_v9, %v6339_v37  ;;  %v1582_v7 = vmul.f32 %v1576_v23, %v5033_v32  ;;  %v1583_v58 = vmul.f32 %v1572_v18, %v5035_v31 }
 0x239   : > { %v1528_v45 = vmul.f32 %v1521_v62, %v4938_v14  ;;  %v1529_v50 = vmul.f32 %v1517_v54, %v4945_v20 }
 0x23a   : > { %v1600_v40 = vmul.f32 %v1599_v57, %v1582_v7  ;;  %v1601_v10 = vmul.f32 %v1599_v57, %v1583_v58 }
 0x23b   : > { %v1550_v11 = vmul.f32 %v1549_v46, %v1528_v45  ;;  %v1551_v53 = vmul.f32 %v1549_v46, %v1529_v50  ;;  %v1649_v55 = vstv %s3958_s9  ;;  %s6589_s9 = sld [smem:[#allocation3 + $0x19]] }
 0x23c   : > { %v1602_v5 = vadd.f32 %v1600_v40, %v1546_v21  ;;  %v1603_v35 = vadd.f32 %v1601_v10, %v1547_v19 }
 0x23d   : > { %v1552_v16 = vadd.f32 %v1550_v11, %v6369_v33  ;;  %v1553_v60 = vadd.f32 %v1551_v53, %v6371_v36  ;;  %v1661_v53 = vstv %s3960_s18  ;;  %s6607_s18 = sld [smem:[#allocation3 + $0x4f]] }
 0x23e   : > { %v1613_v37 = vpop.permute.xlu1 %1612 }
 0x23f   : > { %v1611_v6 = vpop.permute.xlu0 %1610  ;;  %v6452_v25 = vpop.permute.xlu2 %1692 }
 0x240   : > { %v1626_v14 = vsel %vm626_vm5, %v1611_v6, %v6379_v13  ;;  %v1630_v20 = vsel %vm626_vm5, %v6379_v13, %v1611_v6 }
 0x241   : > { %v1634_v21 = vmul.f32 %v1630_v20, %v5115_v42  ;;  %v1635_v33 = vmul.f32 %v1626_v14, %v5117_v39  ;;  %v1673_v14 = vstv %s3962_s13  ;;  %s6617_s13 = sld [smem:[#allocation3 + $0x35]] }
 0x243   : > { %v1644_v36 = vmul.f32 %v1643_v29, %v1634_v21  ;;  %v1645_v19 = vmul.f32 %v1643_v29, %v1635_v33  ;;  %v1667_v29 = vstv %s3961_s16  ;;  %v4350_v33 = vld [vmem:[#allocation2 + $0x80] sm:$0xff]  ;;  %s6613_s16 = sld [smem:[#allocation3 + $0x1a]] }
 0x245   : > { %v6456_v4 = vadd.f32 %v1644_v36, %v1590_v12  ;;  %v6458_v56 = vadd.f32 %v1645_v19, %v1591_v27  ;;  %v1668_v36 = vmul.f32 %v4350_v33, %v1667_v29  ;;  %v4351_v19 = vld [vmem:[#allocation2 + $0x88] sm:$0xff] }
 0x246   : > { %v1561_v26 = vpop.permute.xlu1 %1560 }
 0x247   : > { %v1621_v30 = vpop.permute.xlu0 %1620  ;;  %v1573_v49 = vsel %vm562_vm4, %v1561_v26, %v1569_v24  ;;  %v1577_v13 = vsel %vm562_vm4, %v1569_v24, %v1561_v26  ;;  %v6472_v27 = vpop.permute.xlu2 %1694  ;;  %v4352_v26 = vld [vmem:[#allocation2 + $0x90] sm:$0xff] }
 0x248   : > { %v1627_v0 = vsel %vm626_vm5, %v1613_v37, %v1621_v30  ;;  %v1631_v61 = vsel %vm626_vm5, %v1621_v30, %v1613_v37  ;;  %v1584_v44 = vmul.f32 %v1577_v13, %v5033_v32  ;;  %v1585_v3 = vmul.f32 %v1573_v49, %v5035_v31 }
 0x249   : > { %v1636_v17 = vmul.f32 %v1631_v61, %v5115_v42  ;;  %v1637_v28 = vmul.f32 %v1627_v0, %v5117_v39  ;;  %v1655_v31 = vstv %s3959_s20  ;;  %v1723_v49 = vstv %s6488_s12  ;;  %s6597_s20 = sld [smem:[#allocation3 + $0x69]] }
 0x24a   : > { %v1606_v47 = vmul.f32 %v1605_v38, %v1584_v44  ;;  %v1607_v12 = vmul.f32 %v1605_v38, %v1585_v3  ;;  %v1729_v0 = vstv %s6490_s10  ;;  %s6619_s12 = sld [smem:[#allocation7]] }
 0x24b   : > { %v1650_v24 = vmul.f32 %v1649_v55, %v1636_v17  ;;  %v1651_v59 = vmul.f32 %v1649_v55, %v1637_v28  ;;  %v4353_v55 = vld [vmem:[#allocation2 + $0x98] sm:$0xff]  ;;  %s6628_s10 = sld [smem:[#allocation7 + $0x1]] }
 0x24c   : > { %v1608_v46 = vadd.f32 %v1606_v47, %v1552_v16  ;;  %v1609_v9 = vadd.f32 %v1607_v12, %v1553_v60 }
 0x24d   : > { %v1652_v57 = vadd.f32 %v1650_v24, %v6414_v15  ;;  %v1653_v18 = vadd.f32 %v1651_v59, %v6416_v1 }
 0x24e   : > { %v1623_v32 = vpop.permute.xlu1 %1622 }
 0x24f   : > { %v1615_v23 = vpop.permute.xlu0 %1614  ;;  %v6482_v15 = vpop.permute.xlu2 %1748 }
 0x250   : > { %v1628_v54 = vsel %vm626_vm5, %v1615_v23, %v1623_v32  ;;  %v1632_v62 = vsel %vm626_vm5, %v1623_v32, %v1615_v23  ;;  %v1670_v32 = vadd.f32 %v1668_v36, %v6456_v4  ;;  %v1735_v4 = vstv %s6522_s17  ;;  %s6634_s17 = sld [smem:[#allocation7 + $0x5]] }
 0x251   : > { %v1638_v7 = vmul.f32 %v1632_v62, %v5115_v42  ;;  %v1639_v58 = vmul.f32 %v1628_v54, %v5117_v39 }
 0x253   : > { %v1656_v45 = vmul.f32 %v1655_v31, %v1638_v7  ;;  %v1657_v50 = vmul.f32 %v1655_v31, %v1639_v58  ;;  %v1679_v58 = vstv %s6500_s14  ;;  %s6632_s14 = sld [smem:[#allocation7 + $0x4]] }
 0x255   : > { %v6484_v1 = vadd.f32 %v1656_v45, %v1602_v5  ;;  %v6486_v40 = vadd.f32 %v1657_v50, %v1603_v35 }
 0x256   : > { %v1691_v10 = vpop.permute.xlu1 %1690 }
 0x257   : > { %v1625_v11 = vpop.permute.xlu0 %1624  ;;  %v6506_v38 = vpop.permute.xlu2 %1696 }
 0x258   : > { %v1629_v16 = vsel %vm626_vm5, %v6432_v51, %v1625_v11  ;;  %v1633_v60 = vsel %vm626_vm5, %v1625_v11, %v6432_v51  ;;  %v1669_v51 = vmul.f32 %v4351_v19, %v1667_v29  ;;  %v4354_v11 = vld [vmem:[#allocation2 + $0xa0] sm:$0xff] }
 0x259   : > { %v1640_v5 = vmul.f32 %v1633_v60, %v5115_v42  ;;  %v1641_v35 = vmul.f32 %v1629_v16, %v5117_v39  ;;  %v1674_v42 = vmul.f32 %v4352_v26, %v1673_v14  ;;  %v1675_v39 = vmul.f32 %v4353_v55, %v1673_v14 }
 0x25a   : > { %v1671_v23 = vadd.f32 %v1669_v51, %v6458_v56 }
 0x25b   : > { %v1662_v37 = vmul.f32 %v1661_v53, %v1640_v5  ;;  %v1663_v6 = vmul.f32 %v1661_v53, %v1641_v35  ;;  %v1676_v59 = vadd.f32 %v1674_v42, %v1652_v57  ;;  %v1680_v57 = vmul.f32 %v4354_v11, %v1679_v58  ;;  %v2354_v11 = vld [vmem:[#allocation9 + $0x7c0] sm:$0xff] }
 0x25c   : > { %v1785_v42 = vstv %s3970_s28  ;;  %2403 = vmatpush.msra.mxu1 %v2354_v11  ;;  %s6638_s28 = sld [smem:[#allocation7 + $0x8]] }
 0x25d   : > { %v6502_v20 = vadd.f32 %v1662_v37, %v1608_v46  ;;  %v6504_v21 = vadd.f32 %v1663_v6, %v1609_v9  ;;  %v1677_v46 = vadd.f32 %v1675_v39, %v1653_v18  ;;  %v4355_v18 = vld [vmem:[#allocation2 + $0xa8] sm:$0xff]  ;;  %v1682_v6 = vadd.f32 %v1680_v57, %v6484_v1 }
 0x25e   : > { %v1701_v30 = vpop.permute.xlu1 %1700  ;;  %v1681_v53 = vmul.f32 %v4355_v18, %v1679_v58  ;;  %v1791_v58 = vstv %s6555_s11  ;;  %s6660_s11 = sld [smem:[#allocation7 + $0xd]] }
 0x25f   : > { %v1699_v13 = vpop.permute.xlu0 %1698  ;;  %v1707_v61 = vsel %vm714_vm6, %v6452_v25, %v1701_v30  ;;  %v1711_v44 = vsel %vm714_vm6, %v1701_v30, %v6452_v25  ;;  %v1759_v5 = vpop.permute.xlu2 %1758 }
 0x260   : > { %v1706_v3 = vsel %vm714_vm6, %v1691_v10, %v1699_v13  ;;  %v1710_v17 = vsel %vm714_vm6, %v1699_v13, %v1691_v10  ;;  %v1716_v28 = vmul.f32 %v1707_v61, %v5274_v8  ;;  %v1717_v47 = vmul.f32 %v1711_v44, %v5276_v52 }
 0x261   : > { %v1714_v12 = vmul.f32 %v1706_v3, %v5274_v8  ;;  %v1715_v24 = vmul.f32 %v1710_v17, %v5276_v52  ;;  %v1683_v29 = vadd.f32 %v1681_v53, %v6486_v40 }
 0x262   : > { %v1730_v25 = vmul.f32 %v1729_v0, %v1716_v28  ;;  %v1731_v9 = vmul.f32 %v1729_v0, %v1717_v47  ;;  %v1685_v28 = vstv %s3964_s15  ;;  %s6646_s15 = sld [smem:[#allocation7 + $0x9]] }
 0x263   : > { %v1724_v31 = vmul.f32 %v1723_v49, %v1714_v12  ;;  %v1725_v54 = vmul.f32 %v1723_v49, %v1715_v24 }
 0x264   : > { %v1732_v62 = vadd.f32 %v1730_v25, %v1676_v59  ;;  %v1733_v7 = vadd.f32 %v1731_v9, %v1677_v46  ;;  %v4356_v46 = vld [vmem:[#allocation2 + $0xb0] sm:$0xff]  ;;  %v4357_v9 = vld [vmem:[#allocation2 + $0xb8] sm:$0xff] }
 0x265   : > { %v1726_v45 = vadd.f32 %v1724_v31, %v1670_v32  ;;  %v1727_v50 = vadd.f32 %v1725_v54, %v1671_v23  ;;  %v1686_v25 = vmul.f32 %v4356_v46, %v1685_v28  ;;  %v1687_v32 = vmul.f32 %v4357_v9, %v1685_v28  ;;  %v2323_v28 = vld [vmem:[#allocation9 + $0x6c8] sm:$0xff]  ;;  %v2186_v9 = vld [vmem:[#allocation9 + $0x280] sm:$0xff] }
 0x266   : > { %v1747_v10 = vpop.permute.xlu1 %1746  ;;  %v1741_v31 = vstv %s6546_s19  ;;  %s6650_s19 = sld [smem:[#allocation7 + $0xc]] }
 0x267   : > { %v1703_v16 = vpop.permute.xlu0 %1702 }
 0x268   : > { %v1708_v56 = vsel %vm714_vm6, %v6472_v27, %v1703_v16  ;;  %v1712_v60 = vsel %vm714_vm6, %v1703_v16, %v6472_v27  ;;  %v1779_v27 = vstv %s6529_s29  ;;  %v2355_v16 = vld [vmem:[#allocation9 + $0x7c8] sm:$0xff]  ;;  %s6636_s29 = sld [smem:[#allocation3 + $0x6a]] }
 0x269   : > { %v1718_v35 = vmul.f32 %v1708_v56, %v5274_v8  ;;  %v1719_v37 = vmul.f32 %v1712_v60, %v5276_v52  ;;  %v2218_v60 = vld [vmem:[#allocation9 + $0x380] sm:$0xff]  ;;  %2485 = vmatpush.msra.mxu3 %v2355_v16 }
 0x26b   : > { %v1736_v14 = vmul.f32 %v1735_v4, %v1718_v35  ;;  %v1737_v33 = vmul.f32 %v1735_v4, %v1719_v37  ;;  %v2219_v35 = vld [vmem:[#allocation9 + $0x388] sm:$0xff]  ;;  %v1688_v37 = vadd.f32 %v1686_v25, %v6502_v20 }
 0x26d   : > { %v6542_v36 = vadd.f32 %v1736_v14, %v1682_v6  ;;  %v6544_v19 = vadd.f32 %v1737_v33, %v1683_v29  ;;  %v2347_v29 = vld [vmem:[#allocation9 + $0x788] sm:$0xff]  ;;  %v1689_v14 = vadd.f32 %v1687_v32, %v6504_v21  ;;  %v2314_v32 = vld [vmem:[#allocation9 + $0x680] sm:$0xff] }
 0x26e   : > { %v1757_v51 = vpop.permute.xlu1 %1756  ;;  %2486 = vmatpush.msra.mxu3 %v2347_v29  ;;  %v2339_v21 = vld [vmem:[#allocation9 + $0x748] sm:$0xff] }
 0x26f   : > { %v1755_v26 = vpop.permute.xlu0 %1754  ;;  %v1763_v55 = vsel %vm778_vm7, %v6482_v15, %v1757_v51  ;;  %v1767_v1 = vsel %vm778_vm7, %v1757_v51, %v6482_v15  ;;  %v6565_v15 = vpop.permute.xlu2 %1810  ;;  %v2338_v51 = vld [vmem:[#allocation9 + $0x740] sm:$0xff] }
 0x270   : > { %v1762_v40 = vsel %vm778_vm7, %v1747_v10, %v1755_v26  ;;  %v1766_v39 = vsel %vm778_vm7, %v1755_v26, %v1747_v10  ;;  %v1772_v30 = vmul.f32 %v1763_v55, %v5363_v34  ;;  %v1773_v49 = vmul.f32 %v1767_v1, %v5365_v48  ;;  %2487 = vmatpush.msra.mxu3 %v2339_v21  ;;  %v2155_v21 = vld [vmem:[#allocation9 + $0x188] sm:$0xff] }
 0x271   : > { %v1770_v13 = vmul.f32 %v1762_v40, %v5363_v34  ;;  %v1771_v0 = vmul.f32 %v1766_v39, %v5365_v48  ;;  %v2330_v40 = vld [vmem:[#allocation9 + $0x700] sm:$0xff] }
 0x272   : > { %v1786_v61 = vmul.f32 %v1785_v42, %v1772_v30  ;;  %v1787_v44 = vmul.f32 %v1785_v42, %v1773_v49  ;;  %v2331_v30 = vld [vmem:[#allocation9 + $0x708] sm:$0xff] }
 0x273   : > { %v1780_v3 = vmul.f32 %v1779_v27, %v1770_v13  ;;  %v1781_v17 = vmul.f32 %v1779_v27, %v1771_v0  ;;  %v2211_v27 = vld [vmem:[#allocation9 + $0x348] sm:$0xff]  ;;  %v2194_v13 = vld [vmem:[#allocation9 + $0x2c0] sm:$0xff]  ;;  %2488 = vmatpush.msra.mxu3 %v2331_v30 }
 0x274   : > { %v6567_v47 = vadd.f32 %v1786_v61, %v1732_v62  ;;  %v6569_v12 = vadd.f32 %v1787_v44, %v1733_v7  ;;  %v2226_v7 = vld [vmem:[#allocation9 + $0x3c0] sm:$0xff]  ;;  %v2195_v61 = vld [vmem:[#allocation9 + $0x2c8] sm:$0xff]  ;;  %v1835_v44 = vstv %s6589_s9  ;;  %s6670_s9 = sld [smem:[#allocation7 + $0x10]] }
 0x275   : > { %v6571_v24 = vadd.f32 %v1780_v3, %v1726_v45  ;;  %v6573_v59 = vadd.f32 %v1781_v17, %v1727_v50  ;;  %v2227_v45 = vld [vmem:[#allocation9 + $0x3c8] sm:$0xff]  ;;  %2362 = vmatpush.msra.mxu0 %v2226_v7  ;;  %v2322_v0 = vld [vmem:[#allocation9 + $0x6c0] sm:$0xff]  ;;  %2489 = vmatpush.msra.mxu3 %v2323_v28 }
 0x276   : > { %v1751_v23 = vpop.permute.xlu1 %1750  ;;  %2444 = vmatpush.msra.mxu2 %v2227_v45  ;;  %v2307_v7 = vld [vmem:[#allocation9 + $0x648] sm:$0xff]  ;;  %v2274_v30 = vld [vmem:[#allocation9 + $0x540] sm:$0xff] }
 0x277   : > { %v1705_v54 = vpop.permute.xlu0 %1704  ;;  %v1764_v10 = vsel %vm778_vm7, %v1751_v23, %v1759_v5  ;;  %v1768_v62 = vsel %vm778_vm7, %v1759_v5, %v1751_v23  ;;  %v2346_v5 = vld [vmem:[#allocation9 + $0x780] sm:$0xff]  ;;  %2363 = vmatpush.msra.mxu0 %v2218_v60  ;;  %v6605_v42 = vpop.permute.xlu2 %1760  ;;  %v2187_v23 = vld [vmem:[#allocation9 + $0x288] sm:$0xff]  ;;  %v1797_v60 = vstv %s6597_s20  ;;  %s6676_s20 = sld [smem:[#allocation7 + $0x14]] }
 0x278   : > { %v1709_v50 = vsel %vm714_vm6, %v6506_v38, %v1705_v54  ;;  %v1713_v57 = vsel %vm714_vm6, %v1705_v54, %v6506_v38  ;;  %v1774_v18 = vmul.f32 %v1764_v10, %v5363_v34  ;;  %v1775_v53 = vmul.f32 %v1768_v62, %v5365_v48  ;;  %2404 = vmatpush.msra.mxu1 %v2346_v5  ;;  %v2306_v10 = vld [vmem:[#allocation9 + $0x640] sm:$0xff]  ;;  %v2179_v62 = vld [vmem:[#allocation9 + $0x248] sm:$0xff] }
 0x279   : > { %v1720_v4 = vmul.f32 %v1709_v50, %v5274_v8  ;;  %v1721_v56 = vmul.f32 %v1713_v57, %v5276_v52  ;;  %2445 = vmatpush.msra.mxu2 %v2219_v35  ;;  %v2210_v52 = vld [vmem:[#allocation9 + $0x340] sm:$0xff] }
 0x27a   : > { %v1792_v38 = vmul.f32 %v1791_v58, %v1774_v18  ;;  %v1793_v6 = vmul.f32 %v1791_v58, %v1775_v53  ;;  %2364 = vmatpush.msra.mxu0 %v2210_v52  ;;  %2405 = vmatpush.msra.mxu1 %v2338_v51  ;;  %v2178_v58 = vld [vmem:[#allocation9 + $0x240] sm:$0xff]  ;;  %v2171_v18 = vld [vmem:[#allocation9 + $0x208] sm:$0xff] }
 0x27b   : > { %v1742_v33 = vmul.f32 %v1741_v31, %v1720_v4  ;;  %v1743_v8 = vmul.f32 %v1741_v31, %v1721_v56  ;;  %2446 = vmatpush.msra.mxu2 %v2211_v27  ;;  %v2315_v31 = vld [vmem:[#allocation9 + $0x688] sm:$0xff]  ;;  %v2170_v50 = vld [vmem:[#allocation9 + $0x200] sm:$0xff] }
 0x27c   : > { %v6600_v20 = vadd.f32 %v1792_v38, %v6542_v36  ;;  %v6603_v26 = vadd.f32 %v1793_v6, %v6544_v19  ;;  %v2202_v36 = vld [vmem:[#allocation9 + $0x300] sm:$0xff]  ;;  %v2203_v19 = vld [vmem:[#allocation9 + $0x308] sm:$0xff]  ;;  %2406 = vmatpush.msra.mxu1 %v2330_v40  ;;  %2490 = vmatpush.msra.mxu3 %v2315_v31 }
 0x27d   : > { %v6609_v55 = vadd.f32 %v1742_v33, %v1688_v37  ;;  %v6611_v1 = vadd.f32 %v1743_v8, %v1689_v14  ;;  %2365 = vmatpush.msra.mxu0 %v2202_v36  ;;  %2447 = vmatpush.msra.mxu2 %v2203_v19  ;;  %v2298_v57 = vld [vmem:[#allocation9 + $0x600] sm:$0xff]  ;;  %v2299_v4 = vld [vmem:[#allocation9 + $0x608] sm:$0xff] }
 0x27e   : > { %v6615_v39 = vpop.permute.xlu1 %1804  ;;  %2407 = vmatpush.msra.mxu1 %v2322_v0  ;;  %2491 = vmatpush.msra.mxu3 %v2307_v7  ;;  %v2162_v35 = vld [vmem:[#allocation9 + $0x1c0] sm:$0xff]  ;;  %v2163_v38 = vld [vmem:[#allocation9 + $0x1c8] sm:$0xff] }
 0x27f   : > { %v1803_v49 = vpop.permute.xlu0 %1802  ;;  %2366 = vmatpush.msra.mxu0 %v2194_v13  ;;  %2448 = vmatpush.msra.mxu2 %v2195_v61  ;;  %v6648_v16 = vpop.permute.xlu2 %1858  ;;  %v2290_v37 = vld [vmem:[#allocation9 + $0x5c0] sm:$0xff]  ;;  %v2291_v8 = vld [vmem:[#allocation9 + $0x5c8] sm:$0xff] }
 0x280   : > { %v1818_v3 = vsel %vm842_vm8, %v1803_v49, %v6565_v15  ;;  %v1822_v17 = vsel %vm842_vm8, %v6565_v15, %v1803_v49  ;;  %2408 = vmatpush.msra.mxu1 %v2314_v32  ;;  %2492 = vmatpush.msra.mxu3 %v2299_v4  ;;  %v2154_v27 = vld [vmem:[#allocation9 + $0x180] sm:$0xff]  ;;  %v2147_v49 = vld [vmem:[#allocation9 + $0x148] sm:$0xff] }
 0x281   : > { %v1826_v46 = vmul.f32 %v1818_v3, %v5447_v2  ;;  %v1827_v25 = vmul.f32 %v1822_v17, %v5449_v22  ;;  %2367 = vmatpush.msra.mxu0 %v2186_v9  ;;  %2449 = vmatpush.msra.mxu2 %v2187_v23  ;;  %v2275_v61 = vld [vmem:[#allocation9 + $0x548] sm:$0xff]  ;;  %v2138_v17 = vld [vmem:[#allocation9 + $0x100] sm:$0xff]  ;;  %v1847_v23 = vstv %s6607_s18  ;;  %s6711_s18 = sld [smem:[#allocation7 + $0x6]] }
 0x282   : > { %2409 = vmatpush.msra.mxu1 %v2306_v10  ;;  %2493 = vmatpush.msra.mxu3 %v2291_v8  ;;  %v2266_v28 = vld [vmem:[#allocation9 + $0x500] sm:$0xff]  ;;  %v2259_v32 = vld [vmem:[#allocation9 + $0x4c8] sm:$0xff] }
 0x283   : > { %v1836_v15 = vmul.f32 %v1835_v44, %v1826_v46  ;;  %v1837_v54 = vmul.f32 %v1835_v44, %v1827_v25  ;;  %2368 = vmatpush.msra.mxu0 %v2178_v58  ;;  %2450 = vmatpush.msra.mxu2 %v2179_v62  ;;  %v2267_v46 = vld [vmem:[#allocation9 + $0x508] sm:$0xff]  ;;  %v2130_v25 = vld [vmem:[#allocation9 + $0xc0] sm:$0xff] }
 0x284   : > { %2410 = vmatpush.msra.mxu1 %v2298_v57  ;;  %v2258_v9 = vld [vmem:[#allocation9 + $0x4c0] sm:$0xff]  ;;  %v2251_v57 = vld [vmem:[#allocation9 + $0x488] sm:$0xff] }
 0x285   : > { %v6641_v11 = vadd.f32 %v1836_v15, %v6571_v24  ;;  %v6644_v45 = vadd.f32 %v1837_v54, %v6573_v59  ;;  %2369 = vmatpush.msra.mxu0 %v2170_v50  ;;  %v1841_v24 = vstv %s6594_s26  ;;  %2451 = vmatpush.msra.mxu2 %v2171_v18  ;;  %s6674_s26 = sld [smem:[#allocation7 + $0x11]]  ;;  %v2122_v58 = vld [vmem:[#allocation9 + $0x80] sm:$0xff]  ;;  %v2123_v50 = vld [vmem:[#allocation9 + $0x88] sm:$0xff]  ;;  %v1891_v18 = vstv %s6613_s16 }
 0x286   : > { %v1753_v53 = vpop.permute.xlu1 %1752  ;;  %2411 = vmatpush.msra.mxu1 %v2290_v37  ;;  %v2250_v10 = vld [vmem:[#allocation9 + $0x480] sm:$0xff]  ;;  %v1853_v37 = vstv %s6636_s29  ;;  %s6724_s16 = sld [smem:[#allocation7 + $0xa]] }
 0x287   : > { %v1813_v56 = vpop.permute.xlu0 %1812  ;;  %v1765_v59 = vsel %vm778_vm7, %v1753_v53, %v6605_v42  ;;  %v1769_v5 = vsel %vm778_vm7, %v6605_v42, %v1753_v53  ;;  %2370 = vmatpush.msra.mxu0 %v2162_v35  ;;  %v2282_v42 = vld [vmem:[#allocation9 + $0x580] sm:$0xff]  ;;  %2452 = vmatpush.msra.mxu2 %v2163_v38  ;;  %v6705_v54 = vpop.permute.xlu2 %1868  ;;  %v1915_v35 = vstv %s6619_s12  ;;  %s6819_s12 = sld [smem:[#allocation7 + $0xe]] }
 0x288   : > { %v1819_v6 = vsel %vm842_vm8, %v6615_v39, %v1813_v56  ;;  %v1823_v29 = vsel %vm842_vm8, %v1813_v56, %v6615_v39  ;;  %v1776_v14 = vmul.f32 %v1765_v59, %v5363_v34  ;;  %v1777_v33 = vmul.f32 %v1769_v5, %v5365_v48  ;;  %v2283_v34 = vld [vmem:[#allocation9 + $0x588] sm:$0xff]  ;;  %2412 = vmatpush.msra.mxu1 %v2282_v42  ;;  %v2146_v39 = vld [vmem:[#allocation9 + $0x140] sm:$0xff]  ;;  %s6998_s29 = sld [smem:[#allocation7 + $0x1e]] }
 0x289   : > { %v1828_v52 = vmul.f32 %v1819_v6, %v5447_v2  ;;  %v1829_v51 = vmul.f32 %v1823_v29, %v5449_v22  ;;  %2371 = vmatpush.msra.mxu0 %v2154_v27  ;;  %2453 = vmatpush.msra.mxu2 %v2155_v21  ;;  %v2114_v53 = vld [vmem:[#allocation9 + $0x40] sm:$0xff]  ;;  %v2115_v59 = vld [vmem:[#allocation9 + $0x48] sm:$0xff]  ;;  %v1919_v29 = vstv %s6628_s10  ;;  %v1963_v27 = vstv %s6638_s28  ;;  %s6831_s10 = sld [smem:[#allocation7 + $0xf]] }
 0x28a   : > { %v1798_v36 = vmul.f32 %v1797_v60, %v1776_v14  ;;  %v1799_v40 = vmul.f32 %v1797_v60, %v1777_v33  ;;  %2494 = vmatpush.msra.mxu3 %v2283_v34  ;;  %2413 = vmatpush.msra.mxu1 %v2274_v30  ;;  %v2242_v4 = vld [vmem:[#allocation9 + $0x440] sm:$0xff]  ;;  %v1897_v60 = vstv %s6617_s13  ;;  %v2243_v5 = vld [vmem:[#allocation9 + $0x448] sm:$0xff]  ;;  %v1939_v14 = vstv %s6632_s14  ;;  %s6734_s13 = sld [smem:[#allocation7 + $0xb]] }
 0x28b   : > { %v1842_v48 = vmul.f32 %v1841_v24, %v1828_v52  ;;  %v1843_v19 = vmul.f32 %v1841_v24, %v1829_v51  ;;  %2372 = vmatpush.msra.mxu0 %v2146_v39  ;;  %2454 = vmatpush.msra.mxu2 %v2147_v49  ;;  %v2106_v38 = vld [vmem:[#allocation9] sm:$0xff]  ;;  %v1943_v33 = vstv %s6634_s17  ;;  %v2107_v51 = vld [vmem:[#allocation9 + $0x8] sm:$0xff]  ;;  %v1967_v42 = vstv %s6646_s15  ;;  %s6845_s14 = sld [smem:[#allocation7 + $0x12]] }
 0x28c   : > { %v6681_v13 = vadd.f32 %v1798_v36, %v6609_v55  ;;  %v6684_v0 = vadd.f32 %v1799_v40, %v6611_v1  ;;  %v2139_v55 = vld [vmem:[#allocation9 + $0x108] sm:$0xff]  ;;  %2495 = vmatpush.msra.mxu3 %v2275_v61  ;;  %2414 = vmatpush.msra.mxu1 %v2266_v28  ;;  %v2234_v6 = vld [vmem:[#allocation9 + $0x400] sm:$0xff]  ;;  %v1903_v36 = vstv %s6678_s0  ;;  %v1987_v34 = vstv %s6650_s19  ;;  %s6852_s17 = sld [smem:[#allocation7 + $0x13]] }
 0x28d   : > { %v6689_v44 = vadd.f32 %v1842_v48, %v6567_v47  ;;  %v6692_v3 = vadd.f32 %v1843_v19, %v6569_v12  ;;  %2373 = vmatpush.msra.mxu0 %v2138_v17  ;;  %v2131_v12 = vld [vmem:[#allocation9 + $0xc8] sm:$0xff]  ;;  %2455 = vmatpush.msra.mxu2 %v2139_v55  ;;  %v2011_v48 = vstv %s6670_s9  ;;  %v2015_v30 = vstv %s6674_s26  ;;  %s6922_s0 = sld [smem:[#allocation7 + $0x17]] }
 0x28e   : > { %v1815_v1 = vpop.permute.xlu1 %1814  ;;  %2496 = vmatpush.msra.mxu3 %v2267_v46  ;;  %2415 = vmatpush.msra.mxu1 %v2258_v9  ;;  %v2235_v40 = vld [vmem:[#allocation9 + $0x408] sm:$0xff]  ;;  %v2035_v49 = vstv %s6676_s20  ;;  %v1909_v46 = vstv %s6686_s1  ;;  %s6910_s1 = sld [smem:[#allocation7 + $0x16]] }
 0x28f   : > { %v1807_v47 = vpop.permute.xlu0 %1806  ;;  %2374 = vmatpush.msra.mxu0 %v2130_v25  ;;  %2456 = vmatpush.msra.mxu2 %v2131_v12  ;;  %v2039_v25 = vstv %s6694_s2  ;;  %v6760_v12 = vpop.permute.xlu2 %1862  ;;  %s6964_s2 = sld [smem:[#allocation7 + $0x1c]] }
 0x290   : > { %v1820_v31 = vsel %vm842_vm8, %v1807_v47, %v1815_v1  ;;  %v1824_v15 = vsel %vm842_vm8, %v1815_v1, %v1807_v47  ;;  %2497 = vmatpush.msra.mxu3 %v2259_v32  ;;  %2416 = vmatpush.msra.mxu1 %v2250_v10  ;;  %v2059_v32 = vstv %s6696_s3  ;;  %s7015_s28 = sld [smem:[#allocation7 + $0x1f]] }
 0x291   : > { %v1830_v62 = vmul.f32 %v1820_v31, %v5447_v2  ;;  %v1831_v7 = vmul.f32 %v1824_v15, %v5449_v22  ;;  %2375 = vmatpush.msra.mxu0 %v2122_v58  ;;  %2457 = vmatpush.msra.mxu2 %v2123_v50  ;;  %v1931_v58 = vstv %s6707_s30  ;;  %v1955_v50 = vstv %s6718_s27  ;;  %s6973_s27 = sld [smem:[#allocation7 + $0x1b]] }
 0x292   : > { %2498 = vmatpush.msra.mxu3 %v2251_v57  ;;  %2417 = vmatpush.msra.mxu1 %v2242_v4  ;;  %v1979_v4 = vstv %s6734_s13  ;;  %s6987_s30 = sld [smem:[#allocation7 + $0x1d]] }
 0x293   : > { %v1848_v24 = vmul.f32 %v1847_v23, %v1830_v62  ;;  %v1849_v56 = vmul.f32 %v1847_v23, %v1831_v7  ;;  %2376 = vmatpush.msra.mxu0 %v2114_v53  ;;  %2458 = vmatpush.msra.mxu2 %v2115_v59  ;;  %v2063_v23 = vstv %s6714_s23  ;;  %v1949_v7 = vstv %s6711_s18 }
 0x294   : > { %2499 = vmatpush.msra.mxu3 %v2243_v5  ;;  %2418 = vmatpush.msra.mxu1 %v2234_v6  ;;  %v1973_v53 = vstv %s6724_s16  ;;  %s286_s16 = sand.u32 1, %s4484_s22  }
 0x295   : > { %v6727_v8 = vadd.f32 %v1848_v24, %v6600_v20  ;;  %v6730_v52 = vadd.f32 %v1849_v56, %v6603_v26  ;;  %v1991_v20 = vstv %s6660_s11  ;;  %2377 = vmatpush.msra.mxu0 %v2106_v38  ;;  %2459 = vmatpush.msra.mxu2 %v2107_v51  ;;  %s3864_s13 = sshll.u32 %s286_s16, 10 }
 0x296   : > { %v1867_v21 = vpop.permute.xlu1 %1866  ;;  %2500 = vmatpush.msra.mxu3 %v2235_v40 }
 0x297   : > { %v1861_v26 = vpop.permute.xlu0 %1860  ;;  %v1874_v19 = vsel %vm906_vm9, %v6648_v16, %v1867_v21  ;;  %v1878_v39 = vsel %vm906_vm9, %v1867_v21, %v6648_v16 }
 0x298   : > { %v1882_v61 = vmul.f32 %v1874_v19, %v5548_v43  ;;  %v1883_v17 = vmul.f32 %v1878_v39, %v5550_v41  ;;  %v1875_v28 = vsel %vm906_vm9, %v1861_v26, %v6705_v54  ;;  %v1879_v16 = vsel %vm906_vm9, %v6705_v54, %v1861_v26 }
 0x299   : > { %v1884_v55 = vmul.f32 %v1875_v28, %v5548_v43  ;;  %v1885_v1 = vmul.f32 %v1879_v16, %v5550_v41  ;;  %v1925_v54 = vstv %s6698_s5  ;;  %v1873_v16 = vpop.permute.xlu2 %1872  ;;  %s6969_s5 = sld [smem:[#allocation7 + $0x1a]] }
 0x29a   : > { %v1892_v9 = vmul.f32 %v1891_v18, %v1882_v61  ;;  %v1893_v47 = vmul.f32 %v1891_v18, %v1883_v17 }
 0x29b   : > { %v1898_v31 = vmul.f32 %v1897_v60, %v1884_v55  ;;  %v1899_v15 = vmul.f32 %v1897_v60, %v1885_v1 }
 0x29c   : > { %v6767_v10 = vadd.f32 %v1892_v9, %v6641_v11  ;;  %v6770_v62 = vadd.f32 %v1893_v47, %v6644_v45 }
 0x29d   : > { %v6775_v57 = vadd.f32 %v1898_v31, %v6689_v44  ;;  %v6778_v18 = vadd.f32 %v1899_v15, %v6692_v3 }
 0x29e   : > { %v1817_v24 = vpop.permute.xlu1 %1816  ;;  %v1916_v11 = vmul.f32 %v1915_v35, %v6767_v10  ;;  %v1917_v45 = vmul.f32 %v1915_v35, %v6770_v62  ;;  %v1940_v56 = vmul.f32 %v1939_v14, %v6767_v10  ;;  %v1941_v60 = vmul.f32 %v1939_v14, %v6770_v62 }
 0x29f   : > { %v1809_v44 = vpop.permute.xlu0 %1808  ;;  %v1920_v59 = vmul.f32 %v1919_v29, %v6775_v57  ;;  %v1921_v3 = vmul.f32 %v1919_v29, %v6778_v18  ;;  %v1944_v5 = vmul.f32 %v1943_v33, %v6775_v57  ;;  %v1945_v38 = vmul.f32 %v1943_v33, %v6778_v18 }
 0x2a0   : > { %v1821_v35 = vsel %vm842_vm8, %v1809_v44, %v1817_v24  ;;  %v1825_v6 = vsel %vm842_vm8, %v1817_v24, %v1809_v44  ;;  %v1964_v14 = vmul.f32 %v1963_v27, %v6767_v10  ;;  %v1968_v29 = vmul.f32 %v1967_v42, %v6775_v57 }
 0x2a1   : > { %v1832_v51 = vmul.f32 %v1821_v35, %v5447_v2  ;;  %v1833_v33 = vmul.f32 %v1825_v6, %v5449_v22  ;;  %v6806_v21 = vadd.f32 %v1920_v59, %v1916_v11  ;;  %v6808_v40 = vadd.f32 %v1921_v3, %v1917_v45 }
 0x2a2   : > { %v6810_v26 = vadd.f32 %v1944_v5, %v1940_v56  ;;  %v6812_v19 = vadd.f32 %v1945_v38, %v1941_v60  ;;  %v6814_v39 = vadd.f32 %v1968_v29, %v1964_v14  ;;  %v1965_v61 = vmul.f32 %v1963_v27, %v6770_v62 }
 0x2a3   : > { %v1854_v2 = vmul.f32 %v1853_v37, %v1832_v51  ;;  %v1855_v22 = vmul.f32 %v1853_v37, %v1833_v33  ;;  %v1969_v17 = vmul.f32 %v1967_v42, %v6778_v18  ;;  %v1988_v28 = vmul.f32 %v1987_v34, %v6767_v10 }
 0x2a4   : > { %v1992_v27 = vmul.f32 %v1991_v20, %v6775_v57  ;;  %v1989_v55 = vmul.f32 %v1987_v34, %v6770_v62  ;;  %v1993_v37 = vmul.f32 %v1991_v20, %v6778_v18  ;;  %v2012_v42 = vmul.f32 %v2011_v48, %v6767_v10 }
 0x2a5   : > { %v1856_v1 = vadd.f32 %v1854_v2, %v6681_v13  ;;  %v1857_v9 = vadd.f32 %v1855_v22, %v6684_v0  ;;  %v1971_v47 = vadd.f32 %v1969_v17, %v1965_v61  ;;  %v2016_v31 = vmul.f32 %v2015_v30, %v6775_v57 }
 0x2a6   : > { %v1865_v34 = vpop.permute.xlu1 %1864  ;;  %v6854_v15 = vadd.f32 %v1992_v27, %v1988_v28  ;;  %v6856_v20 = vadd.f32 %v1993_v37, %v1989_v55  ;;  %v2013_v24 = vmul.f32 %v2011_v48, %v6770_v62  ;;  %v2017_v13 = vmul.f32 %v2015_v30, %v6778_v18 }
 0x2a7   : > { %v1871_v0 = vpop.permute.xlu0 %1870  ;;  %v1877_v11 = vsel %vm906_vm9, %v1865_v34, %v1873_v16  ;;  %v1881_v45 = vsel %vm906_vm9, %v1873_v16, %v1865_v34  ;;  %v6868_v56 = vadd.f32 %v2016_v31, %v2012_v42  ;;  %v2036_v48 = vmul.f32 %v2035_v49, %v6767_v10 }
 0x2a8   : > { %v1876_v30 = vsel %vm906_vm9, %v6760_v12, %v1871_v0  ;;  %v1880_v60 = vsel %vm906_vm9, %v1871_v0, %v6760_v12  ;;  %v1888_v44 = vmul.f32 %v1877_v11, %v5548_v43  ;;  %v1889_v59 = vmul.f32 %v1881_v45, %v5550_v41 }
 0x2a9   : > { %v1886_v3 = vmul.f32 %v1876_v30, %v5548_v43  ;;  %v1887_v5 = vmul.f32 %v1880_v60, %v5550_v41  ;;  %v6883_v38 = vadd.f32 %v2017_v13, %v2013_v24  ;;  %v2040_v35 = vmul.f32 %v2039_v25, %v6775_v57 }
 0x2aa   : > { %v1910_v6 = vmul.f32 %v1909_v46, %v1888_v44  ;;  %v1911_v63 = vmul.f32 %v1909_v46, %v1889_v59  ;;  %v2037_v12 = vmul.f32 %v2035_v49, %v6770_v62  ;;  %v2041_v43 = vmul.f32 %v2039_v25, %v6778_v18 }
 0x2ab   : > { %v1904_v41 = vmul.f32 %v1903_v36, %v1886_v3  ;;  %v1905_v14 = vmul.f32 %v1903_v36, %v1887_v5  ;;  %v1997_v29 = vstv %s6819_s12  ;;  %v6903_v51 = vadd.f32 %v2040_v35, %v2036_v48  ;;  %s7615_s12 = scalar_lea.vmem [#allocation10], %s3864_s13 }
 0x2ac   : > { %v6905_v46 = vadd.f32 %v1910_v6, %v1856_v1  ;;  %v6907_v49 = vadd.f32 %v1911_v63, %v1857_v9  ;;  %v2003_v33 = vstv %s6831_s10  ;;  %v6912_v25 = vadd.f32 %v2041_v43, %v2037_v12  ;;  %v2228_v63 = vld [vmem:[#allocation9 + $0x3d0] sm:$0xff]  ;;  %v2229_v43 = vld [vmem:[#allocation9 + $0x3d8] sm:$0xff]  ;;  %s4258_s10 = sshll.u32 %s4566_s25, 10  ;;  %s3739_s25 = scalar_lea.sflag [#allocation5], %s286_s16 }
 0x2ad   : > { %v6915_v36 = vadd.f32 %v1904_v41, %v6727_v8  ;;  %v6918_v61 = vadd.f32 %v1905_v14, %v6730_v52  ;;  %v2021_v2 = vstv %s6845_s14  ;;  %v2027_v22 = vstv %s6852_s17  ;;  %v2356_v12 = vld [vmem:[#allocation9 + $0x7d0] sm:$0xff]  ;;  %2526 = vmatpush.msrb.mxu0 %v2228_v63  ;;  %2608 = vmatpush.msrb.mxu2 %v2229_v43 }
 0x2ae   : > { %v1932_v17 = vmul.f32 %v1931_v58, %v6905_v46  ;;  %v1933_v28 = vmul.f32 %v1931_v58, %v6907_v49  ;;  %v1956_v16 = vmul.f32 %v1955_v50, %v6905_v46  ;;  %v1957_v8 = vmul.f32 %v1955_v50, %v6907_v49  ;;  %2567 = vmatpush.msrb.mxu1 %v2356_v12 }
 0x2af   : > { %v1926_v52 = vmul.f32 %v1925_v54, %v6915_v36  ;;  %v1927_v27 = vmul.f32 %v1925_v54, %v6918_v61  ;;  %v1950_v55 = vmul.f32 %v1949_v7, %v6915_v36  ;;  %v1951_v37 = vmul.f32 %v1949_v7, %v6918_v61 }
 0x2b0   : > { %v1974_v58 = vmul.f32 %v1973_v53, %v6915_v36  ;;  %v1980_v42 = vmul.f32 %v1979_v4, %v6905_v46  ;;  %v1975_v50 = vmul.f32 %v1973_v53, %v6918_v61  ;;  %v1981_v1 = vmul.f32 %v1979_v4, %v6907_v49 }
 0x2b1   : > { %v1928_v54 = vadd.f32 %v1926_v52, %v6806_v21  ;;  %v1929_v9 = vadd.f32 %v1927_v27, %v6808_v40  ;;  %v1952_v31 = vadd.f32 %v1950_v55, %v6810_v26  ;;  %v1953_v7 = vadd.f32 %v1951_v37, %v6812_v19  ;;  %v2349_v52 = vld [vmem:[#allocation9 + $0x798] sm:$0xff]  ;;  %v2212_v27 = vld [vmem:[#allocation9 + $0x350] sm:$0xff] }
 0x2b2   : > { %v1976_v34 = vadd.f32 %v1974_v58, %v6814_v39  ;;  %v1977_v24 = vadd.f32 %v1975_v50, %v1971_v47  ;;  %v1998_v53 = vmul.f32 %v1997_v29, %v6915_v36  ;;  %v2004_v13 = vmul.f32 %v2003_v33, %v6905_v46  ;;  %v2213_v50 = vld [vmem:[#allocation9 + $0x358] sm:$0xff] }
 0x2b3   : > { %v1934_v4 = vadd.f32 %v1932_v17, %v1928_v54  ;;  %v1935_v21 = vadd.f32 %v1933_v28, %v1929_v9  ;;  %v1958_v40 = vadd.f32 %v1956_v16, %v1952_v31  ;;  %v6971_v26 = vadd.f32 %v1957_v8, %v1953_v7  ;;  %v2220_v17 = vld [vmem:[#allocation9 + $0x390] sm:$0xff]  ;;  %v2221_v8 = vld [vmem:[#allocation9 + $0x398] sm:$0xff] }
 0x2b4   : > { %v6975_v19 = vadd.f32 %v1980_v42, %v1976_v34  ;;  %v6977_v39 = vadd.f32 %v1981_v1, %v1977_v24  ;;  %v2000_v47 = vadd.f32 %v1998_v53, %v6854_v15  ;;  %v1999_v0 = vmul.f32 %v1997_v29, %v6918_v61  ;;  %v2348_v28 = vld [vmem:[#allocation9 + $0x790] sm:$0xff]  ;;  %2527 = vmatpush.msrb.mxu0 %v2220_v17  ;;  %v2189_v17 = vld [vmem:[#allocation9 + $0x298] sm:$0xff] }
 0x2b5   : > { %v6981_v11 = vmax.f32 %v1934_v4, 0.0  ;;  %v6983_v45 = vmax.f32 %v1935_v21, 0.0  ;;  %v2045_v48 = vstv %s6910_s1  ;;  %v2051_v30 = vstv %s6922_s0  ;;  %2568 = vmatpush.msrb.mxu1 %v2348_v28  ;;  %v2340_v42 = vld [vmem:[#allocation9 + $0x750] sm:$0xff]  ;;  %2609 = vmatpush.msrb.mxu2 %v2221_v8  ;;  %v2317_v28 = vld [vmem:[#allocation9 + $0x698] sm:$0xff]  ;;  %s3750_s1 = scalar_lea.hbm %s7913_s6, %s4258_s10  ;;  %s3751_s0 = sshll.u32 %s7615_s12, 4  ;;  %s3752_s0 = int_to_ptr.vmem [resolvable:$true] %s3751_s0 }
 0x2b6   : > { %v6989_v60 = vadd.f32 %v2004_v13, %v2000_v47  ;;  %v2001_v44 = vadd.f32 %v1999_v0, %v6856_v20  ;;  %v2060_v59 = vmul.f32 %v2059_v32, %v6767_v10  ;;  %v2064_v15 = vmul.f32 %v2063_v23, %v6775_v57  ;;  %2528 = vmatpush.msrb.mxu0 %v2212_v27  ;;  %v2204_v21 = vld [vmem:[#allocation9 + $0x310] sm:$0xff]  ;;  %v2205_v0 = vld [vmem:[#allocation9 + $0x318] sm:$0xff] }
 0x2b7   : > { %2378 = vmatmul.f32.vlgmr.msra.gmra.mxu0 %v6981_v11  ;;  %2419 = vmatmul.f32.vlgmr.msra.gmra.mxu1 %v6983_v45  ;;  %v2005_v3 = vmul.f32 %v2003_v33, %v6907_v49  ;;  %v2022_v5 = vmul.f32 %v2021_v2, %v6915_v36  ;;  %v2028_v35 = vmul.f32 %v2027_v22, %v6905_v46  ;;  %v2357_v33 = vld [vmem:[#allocation9 + $0x7d8] sm:$0xff]  ;;  %v2069_v37 = vstv %s6969_s5 }
 0x2b8   : > { %2460 = vmatmul.f32.vlgmr.msra.gmra.mxu2 %v6981_v11  ;;  %2501 = vmatmul.f32.vlgmr.msra.gmra.mxu3 %v6983_v45  ;;  %v2023_v20 = vmul.f32 %v2021_v2, %v6918_v61  ;;  %v2029_v6 = vmul.f32 %v2027_v22, %v6907_v49  ;;  %v2046_v41 = vmul.f32 %v2045_v48, %v6915_v36  ;;  %v2083_v2 = vstv %s6964_s2  ;;  %s3753_s2 = sshll.u32 %s3750_s1, 4  ;;  %s3754_s2 = int_to_ptr.hbm [resolvable:$true] %s3753_s2 }
 0x2b9   : > { %v7010_v14 = vadd.f32 %v2005_v3, %v2001_v44  ;;  %v2024_v29 = vadd.f32 %v2022_v5, %v6868_v56  ;;  %v2052_v16 = vmul.f32 %v2051_v30, %v6905_v46  ;;  %2649 = vmatpush.msrb.mxu3 %v2357_v33  ;;  %v2047_v55 = vmul.f32 %v2045_v48, %v6918_v61  ;;  %v2333_v48 = vld [vmem:[#allocation9 + $0x718] sm:$0xff]  ;;  %s4432_s5 = sshra.s32 %s3754_s2, 4  ;;  %s4433_s5 = int_to_ptr.hbm [resolvable:$true] %s4432_s5 }
 0x2ba   : > { %v2025_v22 = vadd.f32 %v2023_v20, %v6883_v38  ;;  %v2048_v56 = vadd.f32 %v2046_v41, %v6903_v51  ;;  %v2341_v38 = vld [vmem:[#allocation9 + $0x758] sm:$0xff]  ;;  %v2053_v1 = vmul.f32 %v2051_v30, %v6907_v49  ;;  %v2066_v54 = vadd.f32 %v2064_v15, %v2060_v59  ;;  %2569 = vmatpush.msrb.mxu1 %v2340_v42  ;;  %v2196_v59 = vld [vmem:[#allocation9 + $0x2d0] sm:$0xff]  ;;  %p4439_p3 = scmp.lt.s32.totalorder %s4433_s5, %s7913_s6 }
 0x2bb   : > { %v7021_v58 = vadd.f32 %v2028_v35, %v2024_v29  ;;  %v2075_v9 = vstv %s6973_s27  ;;  %v7025_v31 = vmax.f32 %v1958_v40, 0.0  ;;  %2650 = vmatpush.msrb.mxu3 %v2349_v52  ;;  %v2049_v34 = vadd.f32 %v2047_v55, %v6912_v25  ;;  %2610 = vmatpush.msrb.mxu2 %v2213_v50  ;;  %v2332_v40 = vld [vmem:[#allocation9 + $0x710] sm:$0xff]  ;;  %v2197_v35 = vld [vmem:[#allocation9 + $0x2d8] sm:$0xff]  ;;  %s4434_s27 = scalar_lea.hbm %s4433_s5, 1024 }
 0x2bc   : > { %v7027_v7 = vadd.f32 %v2029_v6, %v2025_v22  ;;  %v7029_v51 = vadd.f32 %v2052_v16, %v2048_v56  ;;  %v7033_v24 = vmax.f32 %v6971_v26, 0.0  ;;  %v2070_v53 = vmul.f32 %v2069_v37, %v6915_v36  ;;  %v2324_v15 = vld [vmem:[#allocation9 + $0x6d0] sm:$0xff]  ;;  %2529 = vmatpush.msrb.mxu0 %v2204_v21  ;;  %2570 = vmatpush.msrb.mxu1 %v2332_v40  ;;  %v2325_v20 = vld [vmem:[#allocation9 + $0x6d8] sm:$0xff]  ;;  %p4435_p0 = scmp.ne.s32.totalorder %s4433_s5, %s4434_s27 }
 0x2bd   : > { %v2061_v13 = vmul.f32 %v2059_v32, %v6770_v62  ;;  %v2087_v4 = vstv %s6987_s30  ;;  %2651 = vmatpush.msrb.mxu3 %v2341_v38  ;;  %v7040_v47 = vadd.f32 %v2053_v1, %v2049_v34  ;;  %v2065_v25 = vmul.f32 %v2063_v23, %v6778_v18  ;;  %2611 = vmatpush.msrb.mxu2 %v2205_v0  ;;  %v2188_v41 = vld [vmem:[#allocation9 + $0x290] sm:$0xff]  ;;  %v2309_v55 = vld [vmem:[#allocation9 + $0x658] sm:$0xff] }
 0x2be   : > { %v2093_v26 = vstv %s6998_s29  ;;  %v2072_v30 = vadd.f32 %v2070_v53, %v2066_v54  ;;  %v2076_v32 = vmul.f32 %v2075_v9, %v6905_v46  ;;  %v2071_v44 = vmul.f32 %v2069_v37, %v6918_v61  ;;  %v2316_v29 = vld [vmem:[#allocation9 + $0x690] sm:$0xff]  ;;  %2530 = vmatpush.msrb.mxu0 %v2196_v59  ;;  %2571 = vmatpush.msrb.mxu1 %v2324_v15  ;;  %v2173_v50 = vld [vmem:[#allocation9 + $0x218] sm:$0xff]  ;;  %p4436_p1 = pnand %p4435_p0, %p4583_p5 }
 0x2bf   : > { %2381 = vmatmul.f32.gmra.mxu0 %v7025_v31  ;;  %2422 = vmatmul.f32.gmra.mxu1 %v7033_v24  ;;  %v2067_v23 = vadd.f32 %v2065_v25, %v2061_v13  ;;  %v2084_v3 = vmul.f32 %v2083_v2, %v6767_v10  ;;  %v2088_v5 = vmul.f32 %v2087_v4, %v6775_v57  ;;  %v2099_v43 = vstv %s7015_s28  ;;  %v2300_v42 = vld [vmem:[#allocation9 + $0x610] sm:$0xff]  ;;  %v2301_v38 = vld [vmem:[#allocation9 + $0x618] sm:$0xff]  ;;  %s4438_s28 = scalar_lea.hbm %s7913_s6, 2048 }
 0x2c0   : > { %2463 = vmatmul.f32.gmra.mxu2 %v7025_v31  ;;  %2504 = vmatmul.f32.gmra.mxu3 %v7033_v24  ;;  %v7056_v6 = vadd.f32 %v2076_v32, %v2072_v30  ;;  %v2077_v63 = vmul.f32 %v2075_v9, %v6907_v49  ;;  %v2094_v12 = vmul.f32 %v2093_v26, %v6915_v36  ;;  %v7070_v27 = vmax.f32 %v6975_v19, 0.0  ;;  %v2164_v54 = vld [vmem:[#allocation9 + $0x1d0] sm:$0xff]  ;;  %v2165_v34 = vld [vmem:[#allocation9 + $0x1d8] sm:$0xff]  ;;  %p4437_p2 = pneg %p4436_p1  ;;  %p4440_p4 = scmp.lt.s32.totalorder %s4438_s28, %s4434_s27 }
 0x2c1   : > { %2652 = vmatpush.msrb.mxu3 %v2333_v48  ;;  %v2073_v33 = vadd.f32 %v2071_v44, %v2067_v23  ;;  %v2090_v10 = vadd.f32 %v2088_v5, %v2084_v3  ;;  %v2085_v57 = vmul.f32 %v2083_v2, %v6770_v62  ;;  %v2089_v16 = vmul.f32 %v2087_v4, %v6778_v18  ;;  %v2180_v18 = vld [vmem:[#allocation9 + $0x250] sm:$0xff]  ;;  %v2157_v40 = vld [vmem:[#allocation9 + $0x198] sm:$0xff] }
 0x2c2   : > { %v2095_v22 = vmul.f32 %v2093_v26, %v6918_v61  ;;  %2612 = vmatpush.msrb.mxu2 %v2197_v35  ;;  %v2100_v52 = vmul.f32 %v2099_v43, %v6905_v46  ;;  %v7073_v62 = vmax.f32 %v6977_v39, 0.0  ;;  %2531 = vmatpush.msrb.mxu0 %v2188_v41  ;;  %v2308_v61 = vld [vmem:[#allocation9 + $0x650] sm:$0xff]  ;;  %v2181_v46 = vld [vmem:[#allocation9 + $0x258] sm:$0xff]  ;;  %v2101_v37 = vmul.f32 %v2099_v43, %v6907_v49  ;;  %p4441_p7 = por %p4440_p4, %p4439_p3 }
 0x2c3   : > { %2653 = vmatpush.msrb.mxu3 %v2325_v20  ;;  %v7066_v36 = vadd.f32 %v2077_v63, %v2073_v33  ;;  %v2096_v8 = vadd.f32 %v2094_v12, %v2090_v10  ;;  %2572 = vmatpush.msrb.mxu1 %v2316_v29  ;;  %v2091_v2 = vadd.f32 %v2089_v16, %v2085_v57  ;;  %v2172_v39 = vld [vmem:[#allocation9 + $0x210] sm:$0xff]  ;;  %v2293_v49 = vld [vmem:[#allocation9 + $0x5d8] sm:$0xff]  ;;  %v7085_v53 = vmax.f32 %v6989_v60, 0.0 }
 0x2c4   : > { %2613 = vmatpush.msrb.mxu2 %v2189_v17  ;;  %2532 = vmatpush.msrb.mxu0 %v2180_v18  ;;  %v2292_v9 = vld [vmem:[#allocation9 + $0x5d0] sm:$0xff]  ;;  %v7088_v13 = vmax.f32 %v7010_v14, 0.0  ;;  %v2285_v25 = vld [vmem:[#allocation9 + $0x598] sm:$0xff]  ;;  %v7095_v59 = vmax.f32 %v7021_v58, 0.0  ;;  %v7098_v15 = vmax.f32 %v7027_v7, 0.0  ;;  %v7105_v33 = vmax.f32 %v7029_v51, 0.0  ;;  %p4442_p8 = pnand %p4441_p7, %p4437_p2 }
 0x2c5   : > { %2654 = vmatpush.msrb.mxu3 %v2317_v28  ;;  %v7075_v56 = vadd.f32 %v2100_v52, %v2096_v8  ;;  %v2097_v19 = vadd.f32 %v2095_v22, %v2091_v2  ;;  %2573 = vmatpush.msrb.mxu1 %v2308_v61  ;;  %v2156_v4 = vld [vmem:[#allocation9 + $0x190] sm:$0xff]  ;;  %v2149_v14 = vld [vmem:[#allocation9 + $0x158] sm:$0xff]  ;;  %v7108_v10 = vmax.f32 %v7040_v47, 0.0  ;;  %v7115_v51 = vmax.f32 %v7056_v6, 0.0  ;;  %v2230_v6 = vld [vmem:[#allocation9 + $0x3e0] sm:$0xff] }
 0x2c6   : > { %2614 = vmatpush.msrb.mxu2 %v2181_v46  ;;  %2533 = vmatpush.msrb.mxu0 %v2172_v39  ;;  %v2284_v21 = vld [vmem:[#allocation9 + $0x590] sm:$0xff]  ;;  %v2277_v0 = vld [vmem:[#allocation9 + $0x558] sm:$0xff]  ;;  %v7118_v47 = vmax.f32 %v7066_v36, 0.0  ;;  %v2358_v36 = vld [vmem:[#allocation9 + $0x7e0] sm:$0xff] }
 0x2c7   : > { %2384 = vmatmul.f32.gmra.mxu0 %v7070_v27  ;;  %2425 = vmatmul.f32.gmra.mxu1 %v7073_v62  ;;  %v7082_v1 = vadd.f32 %v2101_v37, %v2097_v19  ;;  %v2148_v60 = vld [vmem:[#allocation9 + $0x150] sm:$0xff]  ;;  %v2141_v32 = vld [vmem:[#allocation9 + $0x118] sm:$0xff]  ;;  %v7125_v22 = vmax.f32 %v7075_v56, 0.0  ;;  %v2231_v52 = vld [vmem:[#allocation9 + $0x3e8] sm:$0xff] }
 0x2c8   : > { %2466 = vmatmul.f32.gmra.mxu2 %v7070_v27  ;;  %2507 = vmatmul.f32.gmra.mxu3 %v7073_v62  ;;  %v2276_v26 = vld [vmem:[#allocation9 + $0x550] sm:$0xff]  ;;  %v2269_v44 = vld [vmem:[#allocation9 + $0x518] sm:$0xff]  ;;  %v2359_v2 = vld [vmem:[#allocation9 + $0x7e8] sm:$0xff] }
 0x2c9   : > { %2655 = vmatpush.msrb.mxu3 %v2309_v55  ;;  %2574 = vmatpush.msrb.mxu1 %v2300_v42  ;;  %v2140_v48 = vld [vmem:[#allocation9 + $0x110] sm:$0xff]  ;;  %v2133_v5 = vld [vmem:[#allocation9 + $0xd8] sm:$0xff]  ;;  %v7128_v8 = vmax.f32 %v7082_v1, 0.0  ;;  %v2222_v18 = vld [vmem:[#allocation9 + $0x3a0] sm:$0xff] }
 0x2ca   : > { %2615 = vmatpush.msrb.mxu2 %v2173_v50  ;;  %2534 = vmatpush.msrb.mxu0 %v2164_v54  ;;  %v2268_v30 = vld [vmem:[#allocation9 + $0x510] sm:$0xff]  ;;  %v2261_v35 = vld [vmem:[#allocation9 + $0x4d8] sm:$0xff]  ;;  %v2350_v61 = vld [vmem:[#allocation9 + $0x7a0] sm:$0xff] }
 0x2cb   : > { %2656 = vmatpush.msrb.mxu3 %v2301_v38  ;;  %2575 = vmatpush.msrb.mxu1 %v2292_v9  ;;  %v2132_v23 = vld [vmem:[#allocation9 + $0xd0] sm:$0xff]  ;;  %v2125_v7 = vld [vmem:[#allocation9 + $0x98] sm:$0xff]  ;;  %v2223_v56 = vld [vmem:[#allocation9 + $0x3a8] sm:$0xff] }
 0x2cc   : > { %2616 = vmatpush.msrb.mxu2 %v2165_v34  ;;  %2535 = vmatpush.msrb.mxu0 %v2156_v4  ;;  %v2260_v3 = vld [vmem:[#allocation9 + $0x4d0] sm:$0xff]  ;;  %v2253_v63 = vld [vmem:[#allocation9 + $0x498] sm:$0xff]  ;;  %v2351_v46 = vld [vmem:[#allocation9 + $0x7a8] sm:$0xff] }
 0x2cd   : > { %2657 = vmatpush.msrb.mxu3 %v2293_v49  ;;  %2576 = vmatpush.msrb.mxu1 %v2284_v21  ;;  %v2124_v58 = vld [vmem:[#allocation9 + $0x90] sm:$0xff]  ;;  %v2117_v41 = vld [vmem:[#allocation9 + $0x58] sm:$0xff]  ;;  %v2214_v55 = vld [vmem:[#allocation9 + $0x360] sm:$0xff] }
 0x2ce   : > { %2617 = vmatpush.msrb.mxu2 %v2157_v40  ;;  %2536 = vmatpush.msrb.mxu0 %v2148_v60  ;;  %v2252_v20 = vld [vmem:[#allocation9 + $0x490] sm:$0xff]  ;;  %v2245_v29 = vld [vmem:[#allocation9 + $0x458] sm:$0xff]  ;;  %v2342_v19 = vld [vmem:[#allocation9 + $0x760] sm:$0xff] }
 0x2cf   : > { %2387 = vmatmul.f32.gmra.mxu0 %v7085_v53  ;;  %2428 = vmatmul.f32.gmra.mxu1 %v7088_v13  ;;  %v2116_v12 = vld [vmem:[#allocation9 + $0x50] sm:$0xff]  ;;  %v2109_v28 = vld [vmem:[#allocation9 + $0x18] sm:$0xff]  ;;  %v2215_v37 = vld [vmem:[#allocation9 + $0x368] sm:$0xff] }
 0x2d0   : > { %2469 = vmatmul.f32.gmra.mxu2 %v7085_v53  ;;  %2510 = vmatmul.f32.gmra.mxu3 %v7088_v13  ;;  %v2244_v43 = vld [vmem:[#allocation9 + $0x450] sm:$0xff]  ;;  %v2237_v16 = vld [vmem:[#allocation9 + $0x418] sm:$0xff]  ;;  %v2343_v39 = vld [vmem:[#allocation9 + $0x768] sm:$0xff] }
 0x2d1   : > { %2658 = vmatpush.msrb.mxu3 %v2285_v25  ;;  %2577 = vmatpush.msrb.mxu1 %v2276_v26  ;;  %v2108_v57 = vld [vmem:[#allocation9 + $0x10] sm:$0xff]  ;;  %v2206_v42 = vld [vmem:[#allocation9 + $0x320] sm:$0xff]  ;;  %v2207_v38 = vld [vmem:[#allocation9 + $0x328] sm:$0xff] }
 0x2d2   : > { %2618 = vmatpush.msrb.mxu2 %v2149_v14  ;;  %2537 = vmatpush.msrb.mxu0 %v2140_v48  ;;  %v2236_v17 = vld [vmem:[#allocation9 + $0x410] sm:$0xff]  ;;  %v2334_v50 = vld [vmem:[#allocation9 + $0x720] sm:$0xff]  ;;  %v2335_v1 = vld [vmem:[#allocation9 + $0x728] sm:$0xff] }
 0x2d3   : > { %2659 = vmatpush.msrb.mxu3 %v2277_v0  ;;  %2578 = vmatpush.msrb.mxu1 %v2268_v30  ;;  %v2198_v54 = vld [vmem:[#allocation9 + $0x2e0] sm:$0xff]  ;;  %v2199_v34 = vld [vmem:[#allocation9 + $0x2e8] sm:$0xff] }
 0x2d4   : > { %2619 = vmatpush.msrb.mxu2 %v2141_v32  ;;  %2538 = vmatpush.msrb.mxu0 %v2132_v23  ;;  %v2326_v9 = vld [vmem:[#allocation9 + $0x6e0] sm:$0xff]  ;;  %v2327_v49 = vld [vmem:[#allocation9 + $0x6e8] sm:$0xff] }
 0x2d5   : > { %2660 = vmatpush.msrb.mxu3 %v2269_v44  ;;  %2579 = vmatpush.msrb.mxu1 %v2260_v3  ;;  %v2190_v4 = vld [vmem:[#allocation9 + $0x2a0] sm:$0xff]  ;;  %v2191_v40 = vld [vmem:[#allocation9 + $0x2a8] sm:$0xff] }
 0x2d6   : > { %2620 = vmatpush.msrb.mxu2 %v2133_v5  ;;  %2539 = vmatpush.msrb.mxu0 %v2124_v58  ;;  %v2318_v21 = vld [vmem:[#allocation9 + $0x6a0] sm:$0xff]  ;;  %v2319_v25 = vld [vmem:[#allocation9 + $0x6a8] sm:$0xff] }
 0x2d7   : > { %2390 = vmatmul.f32.gmra.mxu0 %v7095_v59  ;;  %2431 = vmatmul.f32.gmra.mxu1 %v7098_v15  ;;  %v2182_v60 = vld [vmem:[#allocation9 + $0x260] sm:$0xff]  ;;  %v2183_v14 = vld [vmem:[#allocation9 + $0x268] sm:$0xff] }
 0x2d8   : > { %2472 = vmatmul.f32.gmra.mxu2 %v7095_v59  ;;  %2513 = vmatmul.f32.gmra.mxu3 %v7098_v15  ;;  %v2310_v26 = vld [vmem:[#allocation9 + $0x660] sm:$0xff]  ;;  %v2311_v0 = vld [vmem:[#allocation9 + $0x668] sm:$0xff] }
 0x2d9   : > { %2661 = vmatpush.msrb.mxu3 %v2261_v35  ;;  %2580 = vmatpush.msrb.mxu1 %v2252_v20  ;;  %v2174_v48 = vld [vmem:[#allocation9 + $0x220] sm:$0xff]  ;;  %v2175_v32 = vld [vmem:[#allocation9 + $0x228] sm:$0xff] }
 0x2da   : > { %2621 = vmatpush.msrb.mxu2 %v2125_v7  ;;  %2540 = vmatpush.msrb.mxu0 %v2116_v12  ;;  %v2302_v30 = vld [vmem:[#allocation9 + $0x620] sm:$0xff]  ;;  %v2303_v44 = vld [vmem:[#allocation9 + $0x628] sm:$0xff] }
 0x2db   : > { %2662 = vmatpush.msrb.mxu3 %v2253_v63  ;;  %2581 = vmatpush.msrb.mxu1 %v2244_v43  ;;  %v2166_v23 = vld [vmem:[#allocation9 + $0x1e0] sm:$0xff]  ;;  %v2167_v5 = vld [vmem:[#allocation9 + $0x1e8] sm:$0xff] }
 0x2dc   : > { %2622 = vmatpush.msrb.mxu2 %v2117_v41  ;;  %2541 = vmatpush.msrb.mxu0 %v2108_v57  ;;  %v2294_v3 = vld [vmem:[#allocation9 + $0x5e0] sm:$0xff]  ;;  %v2295_v35 = vld [vmem:[#allocation9 + $0x5e8] sm:$0xff] }
 0x2dd   : > { %2663 = vmatpush.msrb.mxu3 %v2245_v29  ;;  %2582 = vmatpush.msrb.mxu1 %v2236_v17  ;;  %v2158_v58 = vld [vmem:[#allocation9 + $0x1a0] sm:$0xff]  ;;  %v2159_v7 = vld [vmem:[#allocation9 + $0x1a8] sm:$0xff] }
 0x2de   : > { %2623 = vmatpush.msrb.mxu2 %v2109_v28  ;;  %2690 = vmatpush.msra.mxu0 %v2230_v6  ;;  %v2286_v20 = vld [vmem:[#allocation9 + $0x5a0] sm:$0xff]  ;;  %v2287_v63 = vld [vmem:[#allocation9 + $0x5a8] sm:$0xff] }
 0x2df   : > { %2393 = vmatmul.f32.gmra.mxu0 %v7105_v33  ;;  %2434 = vmatmul.f32.gmra.mxu1 %v7108_v10  ;;  %v2150_v12 = vld [vmem:[#allocation9 + $0x160] sm:$0xff]  ;;  %v2151_v41 = vld [vmem:[#allocation9 + $0x168] sm:$0xff] }
 0x2e0   : > { %2475 = vmatmul.f32.gmra.mxu2 %v7105_v33  ;;  %2516 = vmatmul.f32.gmra.mxu3 %v7108_v10  ;;  %v2278_v43 = vld [vmem:[#allocation9 + $0x560] sm:$0xff]  ;;  %v2279_v29 = vld [vmem:[#allocation9 + $0x568] sm:$0xff] }
 0x2e1   : > { %2664 = vmatpush.msrb.mxu3 %v2237_v16  ;;  %2731 = vmatpush.msra.mxu1 %v2358_v36  ;;  %v2142_v57 = vld [vmem:[#allocation9 + $0x120] sm:$0xff]  ;;  %v2143_v28 = vld [vmem:[#allocation9 + $0x128] sm:$0xff] }
 0x2e2   : > { %2772 = vmatpush.msra.mxu2 %v2231_v52  ;;  %2691 = vmatpush.msra.mxu0 %v2222_v18  ;;  %v2270_v17 = vld [vmem:[#allocation9 + $0x520] sm:$0xff]  ;;  %v2271_v16 = vld [vmem:[#allocation9 + $0x528] sm:$0xff] }
 0x2e3   : > { %2813 = vmatpush.msra.mxu3 %v2359_v2  ;;  %2732 = vmatpush.msra.mxu1 %v2350_v61  ;;  %v2134_v6 = vld [vmem:[#allocation9 + $0xe0] sm:$0xff]  ;;  %v2135_v52 = vld [vmem:[#allocation9 + $0xe8] sm:$0xff] }
 0x2e4   : > { %2773 = vmatpush.msra.mxu2 %v2223_v56  ;;  %2692 = vmatpush.msra.mxu0 %v2214_v55  ;;  %v2262_v36 = vld [vmem:[#allocation9 + $0x4e0] sm:$0xff]  ;;  %v2263_v2 = vld [vmem:[#allocation9 + $0x4e8] sm:$0xff] }
 0x2e5   : > { %2814 = vmatpush.msra.mxu3 %v2351_v46  ;;  %2733 = vmatpush.msra.mxu1 %v2342_v19  ;;  %v2126_v18 = vld [vmem:[#allocation9 + $0xa0] sm:$0xff]  ;;  %v2127_v56 = vld [vmem:[#allocation9 + $0xa8] sm:$0xff] }
 0x2e6   : > { %2774 = vmatpush.msra.mxu2 %v2215_v37  ;;  %2693 = vmatpush.msra.mxu0 %v2206_v42  ;;  %v2254_v61 = vld [vmem:[#allocation9 + $0x4a0] sm:$0xff]  ;;  %v2255_v46 = vld [vmem:[#allocation9 + $0x4a8] sm:$0xff] }
 0x2e7   : > { %2396 = vmatmul.f32.gmra.mxu0 %v7115_v51  ;;  %2437 = vmatmul.f32.gmra.mxu1 %v7118_v47  ;;  %v2118_v55 = vld [vmem:[#allocation9 + $0x60] sm:$0xff]  ;;  %v2119_v37 = vld [vmem:[#allocation9 + $0x68] sm:$0xff] }
 0x2e8   : > { %2478 = vmatmul.f32.gmra.mxu2 %v7115_v51  ;;  %2519 = vmatmul.f32.gmra.mxu3 %v7118_v47  ;;  %v2246_v19 = vld [vmem:[#allocation9 + $0x460] sm:$0xff] }
 0x2e9   : > { %2815 = vmatpush.msra.mxu3 %v2343_v39  ;;  %2734 = vmatpush.msra.mxu1 %v2334_v50  ;;  %v2247_v39 = vld [vmem:[#allocation9 + $0x468] sm:$0xff]  ;;  %v2110_v42 = vld [vmem:[#allocation9 + $0x20] sm:$0xff] }
 0x2ea   : > { %2775 = vmatpush.msra.mxu2 %v2207_v38  ;;  %2694 = vmatpush.msra.mxu0 %v2198_v54  ;;  %v2238_v50 = vld [vmem:[#allocation9 + $0x420] sm:$0xff]  ;;  %v2111_v38 = vld [vmem:[#allocation9 + $0x28] sm:$0xff]  ;;  %v2232_v54 = vld [vmem:[#allocation9 + $0x3f0] sm:$0xff] }
 0x2eb   : > { %2816 = vmatpush.msra.mxu3 %v2335_v1  ;;  %2735 = vmatpush.msra.mxu1 %v2326_v9  ;;  %v2239_v1 = vld [vmem:[#allocation9 + $0x428] sm:$0xff] }
 0x2ec   : > { %2776 = vmatpush.msra.mxu2 %v2199_v34  ;;  %2695 = vmatpush.msra.mxu0 %v2190_v4  ;;  %v2360_v4 = vld [vmem:[#allocation9 + $0x7f0] sm:$0xff] }
 0x2ed   : > { %2817 = vmatpush.msra.mxu3 %v2327_v49  ;;  %2736 = vmatpush.msra.mxu1 %v2318_v21  ;;  %v2224_v49 = vld [vmem:[#allocation9 + $0x3b0] sm:$0xff] }
 0x2ee   : > { %2777 = vmatpush.msra.mxu2 %v2191_v40  ;;  %2696 = vmatpush.msra.mxu0 %v2182_v60  ;;  %v2216_v21 = vld [vmem:[#allocation9 + $0x370] sm:$0xff]  ;;  %v2233_v60 = vld [vmem:[#allocation9 + $0x3f8] sm:$0xff] }
 0x2ef   : > { %2399 = vmatmul.f32.gmra.mxu0 %v7125_v22  ;;  %2440 = vmatmul.f32.gmra.mxu1 %v7128_v8  ;;  %v2208_v40 = vld [vmem:[#allocation9 + $0x330] sm:$0xff] }
 0x2f0   : > { %2481 = vmatmul.f32.gmra.mxu2 %v7125_v22  ;;  %2522 = vmatmul.f32.gmra.mxu3 %v7128_v8 }
 0x2f1   : > { %2818 = vmatpush.msra.mxu3 %v2319_v25  ;;  %2737 = vmatpush.msra.mxu1 %v2310_v26  ;;  %v2352_v25 = vld [vmem:[#allocation9 + $0x7b0] sm:$0xff]  ;;  %v2361_v26 = vld [vmem:[#allocation9 + $0x7f8] sm:$0xff] }
 0x2f2   : > { %2778 = vmatpush.msra.mxu2 %v2183_v14  ;;  %2697 = vmatpush.msra.mxu0 %v2174_v48  ;;  %v2200_v14 = vld [vmem:[#allocation9 + $0x2f0] sm:$0xff] }
 0x2f3   : > { %2819 = vmatpush.msra.mxu3 %v2311_v0  ;;  %2738 = vmatpush.msra.mxu1 %v2302_v30 }
 0x2f4   : > { %2779 = vmatpush.msra.mxu2 %v2175_v32  ;;  %2698 = vmatpush.msra.mxu0 %v2166_v23  ;;  %v2344_v23 = vld [vmem:[#allocation9 + $0x770] sm:$0xff] }
 0x2f5   : > { %2820 = vmatpush.msra.mxu3 %v2303_v44  ;;  %2739 = vmatpush.msra.mxu1 %v2294_v3  ;;  %v2225_v3 = vld [vmem:[#allocation9 + $0x3b8] sm:$0xff] }
 0x2f6   : > { %2780 = vmatpush.msra.mxu2 %v2167_v5  ;;  %2699 = vmatpush.msra.mxu0 %v2158_v58  ;;  %v2353_v5 = vld [vmem:[#allocation9 + $0x7b8] sm:$0xff]  ;;  %v2336_v58 = vld [vmem:[#allocation9 + $0x730] sm:$0xff] }
 0x2f7   : > { %2542 = vmatmul.f32.vlgmr.msrb.gmra.mxu0 %v6981_v11  ;;  %2583 = vmatmul.f32.vlgmr.msrb.gmra.mxu1 %v6983_v45 }
 0x2f8   : > { %2624 = vmatmul.f32.vlgmr.msrb.gmra.mxu2 %v6981_v11  ;;  %2665 = vmatmul.f32.vlgmr.msrb.gmra.mxu3 %v6983_v45 }
 0x2f9   : > { %2821 = vmatpush.msra.mxu3 %v2295_v35  ;;  %2740 = vmatpush.msra.mxu1 %v2286_v20  ;;  %v2192_v35 = vld [vmem:[#allocation9 + $0x2b0] sm:$0xff]  ;;  %v2217_v20 = vld [vmem:[#allocation9 + $0x378] sm:$0xff] }
 0x2fa   : > { %2781 = vmatpush.msra.mxu2 %v2159_v7  ;;  %2700 = vmatpush.msra.mxu0 %v2150_v12  ;;  %v2345_v7 = vld [vmem:[#allocation9 + $0x778] sm:$0xff]  ;;  %v2328_v12 = vld [vmem:[#allocation9 + $0x6f0] sm:$0xff] }
 0x2fb   : > { %2822 = vmatpush.msra.mxu3 %v2287_v63  ;;  %2741 = vmatpush.msra.mxu1 %v2278_v43  ;;  %v2184_v63 = vld [vmem:[#allocation9 + $0x270] sm:$0xff]  ;;  %v2209_v43 = vld [vmem:[#allocation9 + $0x338] sm:$0xff] }
 0x2fc   : > { %2782 = vmatpush.msra.mxu2 %v2151_v41  ;;  %2701 = vmatpush.msra.mxu0 %v2142_v57  ;;  %v2337_v41 = vld [vmem:[#allocation9 + $0x738] sm:$0xff]  ;;  %v2320_v57 = vld [vmem:[#allocation9 + $0x6b0] sm:$0xff] }
 0x2fd   : > { %2823 = vmatpush.msra.mxu3 %v2279_v29  ;;  %2742 = vmatpush.msra.mxu1 %v2270_v17  ;;  %v2176_v29 = vld [vmem:[#allocation9 + $0x230] sm:$0xff] }
 0x2fe   : > { %2783 = vmatpush.msra.mxu2 %v2143_v28  ;;  %2702 = vmatpush.msra.mxu0 %v2134_v6  ;;  %v2329_v6 = vld [vmem:[#allocation9 + $0x6f8] sm:$0xff] }
 0x2ff   : > { %2545 = vmatmul.f32.gmra.mxu0 %v7025_v31  ;;  %2586 = vmatmul.f32.gmra.mxu1 %v7033_v24 }
 0x300   : > { %2627 = vmatmul.f32.gmra.mxu2 %v7025_v31  ;;  %2668 = vmatmul.f32.gmra.mxu3 %v7033_v24 }
 0x301   : > { %2824 = vmatpush.msra.mxu3 %v2271_v16  ;;  %2743 = vmatpush.msra.mxu1 %v2262_v36  ;;  %v2201_v16 = vld [vmem:[#allocation9 + $0x2f8] sm:$0xff] }
 0x302   : > { %2784 = vmatpush.msra.mxu2 %v2135_v52  ;;  %2703 = vmatpush.msra.mxu0 %v2126_v18  ;;  %v2312_v18 = vld [vmem:[#allocation9 + $0x670] sm:$0xff] }
 0x303   : > { %2825 = vmatpush.msra.mxu3 %v2263_v2  ;;  %2744 = vmatpush.msra.mxu1 %v2254_v61  ;;  %v2168_v2 = vld [vmem:[#allocation9 + $0x1f0] sm:$0xff]  ;;  %v2193_v61 = vld [vmem:[#allocation9 + $0x2b8] sm:$0xff] }
 0x304   : > { %2785 = vmatpush.msra.mxu2 %v2127_v56  ;;  %2704 = vmatpush.msra.mxu0 %v2118_v55  ;;  %v2321_v56 = vld [vmem:[#allocation9 + $0x6b8] sm:$0xff]  ;;  %v2304_v55 = vld [vmem:[#allocation9 + $0x630] sm:$0xff] }
 0x305   : > { %2826 = vmatpush.msra.mxu3 %v2255_v46  ;;  %2745 = vmatpush.msra.mxu1 %v2246_v19  ;;  %v2160_v46 = vld [vmem:[#allocation9 + $0x1b0] sm:$0xff]  ;;  %v2185_v19 = vld [vmem:[#allocation9 + $0x278] sm:$0xff] }
 0x306   : > { %2786 = vmatpush.msra.mxu2 %v2119_v37  ;;  %2705 = vmatpush.msra.mxu0 %v2110_v42  ;;  %v2313_v37 = vld [vmem:[#allocation9 + $0x678] sm:$0xff]  ;;  %v2296_v42 = vld [vmem:[#allocation9 + $0x5f0] sm:$0xff] }
 0x307   : > { %2548 = vmatmul.f32.gmra.mxu0 %v7070_v27  ;;  %2589 = vmatmul.f32.gmra.mxu1 %v7073_v62 }
 0x308   : > { %2630 = vmatmul.f32.gmra.mxu2 %v7070_v27  ;;  %2671 = vmatmul.f32.gmra.mxu3 %v7073_v62 }
 0x309   : > { %2827 = vmatpush.msra.mxu3 %v2247_v39  ;;  %2746 = vmatpush.msra.mxu1 %v2238_v50  ;;  %v2152_v39 = vld [vmem:[#allocation9 + $0x170] sm:$0xff] }
 0x30a   : > { %2787 = vmatpush.msra.mxu2 %v2111_v38  ;;  %2854 = vmatpush.msrb.mxu0 %v2232_v54  ;;  %v2305_v54 = vld [vmem:[#allocation9 + $0x638] sm:$0xff] }
 0x30b   : > { %2828 = vmatpush.msra.mxu3 %v2239_v1  ;;  %2895 = vmatpush.msrb.mxu1 %v2360_v4  ;;  %v2177_v1 = vld [vmem:[#allocation9 + $0x238] sm:$0xff] }
 0x30c   : > { %2855 = vmatpush.msrb.mxu0 %v2224_v49  ;;  %2936 = vmatpush.msrb.mxu2 %v2233_v60  ;;  %v2297_v60 = vld [vmem:[#allocation9 + $0x5f8] sm:$0xff] }
 0x30d   : > { %2896 = vmatpush.msrb.mxu1 %v2352_v25  ;;  %2977 = vmatpush.msrb.mxu3 %v2361_v26  ;;  %v2169_v25 = vld [vmem:[#allocation9 + $0x1f8] sm:$0xff]  ;;  %v2136_v26 = vld [vmem:[#allocation9 + $0xf0] sm:$0xff] }
 0x30e   : > { %2856 = vmatpush.msrb.mxu0 %v2216_v21  ;;  %2937 = vmatpush.msrb.mxu2 %v2225_v3  ;;  %v2144_v21 = vld [vmem:[#allocation9 + $0x130] sm:$0xff] }
 0x30f   : > { %2551 = vmatmul.f32.gmra.mxu0 %v7085_v53  ;;  %2592 = vmatmul.f32.gmra.mxu1 %v7088_v13  ;;  %v2272_v3 = vld [vmem:[#allocation9 + $0x530] sm:$0xff] }
 0x310   : > { %2633 = vmatmul.f32.gmra.mxu2 %v7085_v53  ;;  %2674 = vmatmul.f32.gmra.mxu3 %v7088_v13 }
 0x311   : > { %2857 = vmatpush.msrb.mxu0 %v2208_v40  ;;  %2897 = vmatpush.msrb.mxu1 %v2344_v23  ;;  %v2288_v40 = vld [vmem:[#allocation9 + $0x5b0] sm:$0xff] }
 0x312   : > { %2978 = vmatpush.msrb.mxu3 %v2353_v5  ;;  %2938 = vmatpush.msrb.mxu2 %v2217_v20  ;;  %v2128_v23 = vld [vmem:[#allocation9 + $0xb0] sm:$0xff]  ;;  %v2281_v20 = vld [vmem:[#allocation9 + $0x578] sm:$0xff] }
 0x313   : > { %2858 = vmatpush.msrb.mxu0 %v2200_v14  ;;  %2898 = vmatpush.msrb.mxu1 %v2336_v58  ;;  %v2280_v14 = vld [vmem:[#allocation9 + $0x570] sm:$0xff]  ;;  %v2153_v58 = vld [vmem:[#allocation9 + $0x178] sm:$0xff] }
 0x314   : > { %2979 = vmatpush.msrb.mxu3 %v2345_v7  ;;  %2939 = vmatpush.msrb.mxu2 %v2209_v43  ;;  %v2264_v43 = vld [vmem:[#allocation9 + $0x4f0] sm:$0xff] }
 0x315   : > { %2859 = vmatpush.msrb.mxu0 %v2192_v35  ;;  %2899 = vmatpush.msrb.mxu1 %v2328_v12  ;;  %v2120_v12 = vld [vmem:[#allocation9 + $0x70] sm:$0xff] }
 0x316   : > { %2980 = vmatpush.msrb.mxu3 %v2337_v41  ;;  %2940 = vmatpush.msrb.mxu2 %v2201_v16  ;;  %v2145_v41 = vld [vmem:[#allocation9 + $0x138] sm:$0xff]  ;;  %v2256_v16 = vld [vmem:[#allocation9 + $0x4b0] sm:$0xff] }
 0x317   : > { %2554 = vmatmul.f32.gmra.mxu0 %v7095_v59  ;;  %2595 = vmatmul.f32.gmra.mxu1 %v7098_v15 }
 0x318   : > { %2636 = vmatmul.f32.gmra.mxu2 %v7095_v59  ;;  %2677 = vmatmul.f32.gmra.mxu3 %v7098_v15 }
 0x319   : > { %2860 = vmatpush.msrb.mxu0 %v2184_v63  ;;  %2900 = vmatpush.msrb.mxu1 %v2320_v57  ;;  %v2112_v57 = vld [vmem:[#allocation9 + $0x30] sm:$0xff] }
 0x31a   : > { %2981 = vmatpush.msrb.mxu3 %v2329_v6  ;;  %2941 = vmatpush.msrb.mxu2 %v2193_v61  ;;  %v2137_v6 = vld [vmem:[#allocation9 + $0xf8] sm:$0xff] }
 0x31b   : > { %2861 = vmatpush.msrb.mxu0 %v2176_v29  ;;  %2901 = vmatpush.msrb.mxu1 %v2312_v18  ;;  %v2273_v29 = vld [vmem:[#allocation9 + $0x538] sm:$0xff]  ;;  %v2248_v18 = vld [vmem:[#allocation9 + $0x470] sm:$0xff] }
 0x31c   : > { %2982 = vmatpush.msrb.mxu3 %v2321_v56  ;;  %2942 = vmatpush.msrb.mxu2 %v2185_v19 }
 0x31d   : > { %2862 = vmatpush.msrb.mxu0 %v2168_v2  ;;  %2902 = vmatpush.msrb.mxu1 %v2304_v55  ;;  %v2265_v2 = vld [vmem:[#allocation9 + $0x4f8] sm:$0xff] }
 0x31e   : > { %2983 = vmatpush.msrb.mxu3 %v2313_v37  ;;  %2943 = vmatpush.msrb.mxu2 %v2177_v1  ;;  %v2257_v55 = vld [vmem:[#allocation9 + $0x4b8] sm:$0xff] }
 0x31f   : > { %2557 = vmatmul.f32.gmra.mxu0 %v7105_v33  ;;  %2598 = vmatmul.f32.gmra.mxu1 %v7108_v10  ;;  %v2249_v1 = vld [vmem:[#allocation9 + $0x478] sm:$0xff] }
 0x320   : > { %2639 = vmatmul.f32.gmra.mxu2 %v7105_v33  ;;  %2680 = vmatmul.f32.gmra.mxu3 %v7108_v10 }
 0x321   : > { %2863 = vmatpush.msrb.mxu0 %v2160_v46  ;;  %2903 = vmatpush.msrb.mxu1 %v2296_v42  ;;  %v2129_v46 = vld [vmem:[#allocation9 + $0xb8] sm:$0xff] }
 0x322   : > { %2984 = vmatpush.msrb.mxu3 %v2305_v54  ;;  %2944 = vmatpush.msrb.mxu2 %v2169_v25  ;;  %v2121_v42 = vld [vmem:[#allocation9 + $0x78] sm:$0xff] }
 0x323   : > { %2864 = vmatpush.msrb.mxu0 %v2152_v39  ;;  %2904 = vmatpush.msrb.mxu1 %v2288_v40  ;;  %v2240_v39 = vld [vmem:[#allocation9 + $0x430] sm:$0xff]  ;;  %v2113_v54 = vld [vmem:[#allocation9 + $0x38] sm:$0xff] }
 0x324   : > { %2985 = vmatpush.msrb.mxu3 %v2297_v60 }
 0x325   : > { %2865 = vmatpush.msrb.mxu0 %v2144_v21  ;;  %2905 = vmatpush.msrb.mxu1 %v2280_v14  ;;  %v2241_v21 = vld [vmem:[#allocation9 + $0x438] sm:$0xff] }
 0x327   : > { %2560 = vmatmul.f32.gmra.mxu0 %v7115_v51  ;;  %2601 = vmatmul.f32.gmra.mxu1 %v7118_v47 }
 0x328   : > { %2642 = vmatmul.f32.gmra.mxu2 %v7115_v51  ;;  %2683 = vmatmul.f32.gmra.mxu3 %v7118_v47 }
 0x329   : > { %2866 = vmatpush.msrb.mxu0 %v2136_v26  ;;  %2906 = vmatpush.msrb.mxu1 %v2272_v3 }
 0x32b   : > { %2867 = vmatpush.msrb.mxu0 %v2128_v23  ;;  %2907 = vmatpush.msrb.mxu1 %v2264_v43 }
 0x32d   : > { %2868 = vmatpush.msrb.mxu0 %v2120_v12  ;;  %2908 = vmatpush.msrb.mxu1 %v2256_v16 }
 0x32f   : > { %2563 = vmatmul.f32.gmra.mxu0 %v7125_v22  ;;  %2604 = vmatmul.f32.gmra.mxu1 %v7128_v8 }
 0x330   : > { %2645 = vmatmul.f32.gmra.mxu2 %v7125_v22  ;;  %2686 = vmatmul.f32.gmra.mxu3 %v7128_v8 }
 0x331   : > { %2869 = vmatpush.msrb.mxu0 %v2112_v57  ;;  %2909 = vmatpush.msrb.mxu1 %v2248_v18 }
 0x333   : > { %2910 = vmatpush.msrb.mxu1 %v2240_v39 }
 0x334   : > { %v7166_v9 = vpop.f32.mrf.mxu0  ;;  %v7168_v34 = vpop.f32.mrf.mxu1 }
 0x337   : > { %2706 = vmatmul.f32.vlgmr.msra.gmra.mxu0 %v6981_v11  ;;  %2747 = vmatmul.f32.vlgmr.msra.gmra.mxu1 %v6983_v45 }
 0x338   : > { %2788 = vmatmul.f32.vlgmr.msra.gmra.mxu2 %v6981_v11  ;;  %2829 = vmatmul.f32.vlgmr.msra.gmra.mxu3 %v6983_v45 }
 0x33b   : > { %v2461_v0 = vpop.f32.mrf.mxu2  ;;  %v2502_v48 = vpop.f32.mrf.mxu3 }
 0x33c   : > { %v7174_v30 = vadd.f32 %v2502_v48, %v2461_v0  ;;  %v7176_v32 = vpop.f32.mrf.mxu0  ;;  %v7178_v44 = vpop.f32.mrf.mxu1  ;;  %v2161_v0 = vld [vmem:[#allocation9 + $0x1b8] sm:$0xff] }
 0x33d   : > { %v2289_v48 = vld [vmem:[#allocation9 + $0x5b8] sm:$0xff]  ;;  %2945 = vmatpush.msrb.mxu2 %v2161_v0 }
 0x33e   : > { %2986 = vmatpush.msrb.mxu3 %v2289_v48 }
 0x33f   : > { %2709 = vmatmul.f32.gmra.mxu0 %v7025_v31  ;;  %2750 = vmatmul.f32.gmra.mxu1 %v7033_v24 }
 0x340   : > { %2791 = vmatmul.f32.gmra.mxu2 %v7025_v31  ;;  %2832 = vmatmul.f32.gmra.mxu3 %v7033_v24 }
 0x341   : > { %2946 = vmatpush.msrb.mxu2 %v2153_v58  ;;  %2987 = vmatpush.msrb.mxu3 %v2281_v20 }
 0x343   : > { %v7184_v17 = vpop.f32.mrf.mxu2  ;;  %v7186_v28 = vpop.f32.mrf.mxu3  ;;  %2947 = vmatpush.msrb.mxu2 %v2145_v41  ;;  %2988 = vmatpush.msrb.mxu3 %v2273_v29 }
 0x344   : > { %v7188_v36 = vpop.f32.mrf.mxu0  ;;  %v7190_v52 = vpop.f32.mrf.mxu1 }
 0x345   : > { %2948 = vmatpush.msrb.mxu2 %v2137_v6  ;;  %2989 = vmatpush.msrb.mxu3 %v2265_v2  ;;  %v2427_v18 = vadd.f32 %v7190_v52, %v7188_v36 }
 0x347   : > { %2712 = vmatmul.f32.gmra.mxu0 %v7070_v27  ;;  %2753 = vmatmul.f32.gmra.mxu1 %v7073_v62 }
 0x348   : > { %2794 = vmatmul.f32.gmra.mxu2 %v7070_v27  ;;  %2835 = vmatmul.f32.gmra.mxu3 %v7073_v62 }
 0x349   : > { %2949 = vmatpush.msrb.mxu2 %v2129_v46  ;;  %2990 = vmatpush.msrb.mxu3 %v2257_v55 }
 0x34b   : > { %v7196_v50 = vpop.f32.mrf.mxu2  ;;  %v7198_v38 = vpop.f32.mrf.mxu3  ;;  %2950 = vmatpush.msrb.mxu2 %v2121_v42  ;;  %2991 = vmatpush.msrb.mxu3 %v2249_v1 }
 0x34c   : > { %v7200_v49 = vpop.f32.mrf.mxu0  ;;  %v7202_v4 = vpop.f32.mrf.mxu1 }
 0x34d   : > { %2951 = vmatpush.msrb.mxu2 %v2113_v54  ;;  %2992 = vmatpush.msrb.mxu3 %v2241_v21  ;;  %v2430_v6 = vadd.f32 %v7202_v4, %v7200_v49 }
 0x34f   : > { %2715 = vmatmul.f32.gmra.mxu0 %v7085_v53  ;;  %2756 = vmatmul.f32.gmra.mxu1 %v7088_v13 }
 0x350   : > { %2797 = vmatmul.f32.gmra.mxu2 %v7085_v53  ;;  %2838 = vmatmul.f32.gmra.mxu3 %v7088_v13 }
 0x353   : > { %v7208_v5 = vpop.f32.mrf.mxu2  ;;  %v7210_v35 = vpop.f32.mrf.mxu3 }
 0x354   : > { %v7212_v7 = vpop.f32.mrf.mxu0  ;;  %v7214_v63 = vpop.f32.mrf.mxu1 }
 0x355   : > { %v2433_v16 = vadd.f32 %v7214_v63, %v7212_v7  ;;  %v2424_v63 = vadd.f32 %v7178_v44, %v7176_v32  ;;  %v2512_v32 = vadd.f32 %v7210_v35, %v7208_v5  ;;  %v2509_v44 = vadd.f32 %v7198_v38, %v7196_v50 }
 0x357   : > { %2718 = vmatmul.f32.gmra.mxu0 %v7095_v59  ;;  %2759 = vmatmul.f32.gmra.mxu1 %v7098_v15 }
 0x358   : > { %2800 = vmatmul.f32.gmra.mxu2 %v7095_v59  ;;  %2841 = vmatmul.f32.gmra.mxu3 %v7098_v15 }
 0x35b   : > { %v7220_v61 = vpop.f32.mrf.mxu2  ;;  %v7222_v56 = vpop.f32.mrf.mxu3 }
 0x35c   : > { %v2394_v19 = vpop.f32.mrf.mxu0  ;;  %v2435_v37 = vpop.f32.mrf.mxu1  ;;  %v2515_v46 = vadd.f32 %v7222_v56, %v7220_v61 }
 0x35d   : > { %v2436_v20 = vadd.f32 %v2435_v37, %v2394_v19 }
 0x35f   : > { %2721 = vmatmul.f32.gmra.mxu0 %v7105_v33  ;;  %2762 = vmatmul.f32.gmra.mxu1 %v7108_v10 }
 0x360   : > { %2803 = vmatmul.f32.gmra.mxu2 %v7105_v33  ;;  %2844 = vmatmul.f32.gmra.mxu3 %v7108_v10 }
 0x363   : > { %v2476_v40 = vpop.f32.mrf.mxu2  ;;  %v2517_v25 = vpop.f32.mrf.mxu3 }
 0x364   : > { %v2397_v60 = vpop.f32.mrf.mxu0  ;;  %v2438_v26 = vpop.f32.mrf.mxu1  ;;  %v2518_v7 = vadd.f32 %v2517_v25, %v2476_v40 }
 0x365   : > { %v2439_v58 = vadd.f32 %v2438_v26, %v2397_v60 }
 0x367   : > { %2724 = vmatmul.f32.gmra.mxu0 %v7115_v51  ;;  %2765 = vmatmul.f32.gmra.mxu1 %v7118_v47 }
 0x368   : > { %2806 = vmatmul.f32.gmra.mxu2 %v7115_v51  ;;  %2847 = vmatmul.f32.gmra.mxu3 %v7118_v47 }
 0x36b   : > { %v2479_v14 = vpop.f32.mrf.mxu2  ;;  %v2520_v0 = vpop.f32.mrf.mxu3 }
 0x36c   : > { %v2400_v48 = vpop.f32.mrf.mxu0  ;;  %v2441_v23 = vpop.f32.mrf.mxu1  ;;  %v2521_v2 = vadd.f32 %v2520_v0, %v2479_v14 }
 0x36d   : > { %v2442_v3 = vadd.f32 %v2441_v23, %v2400_v48 }
 0x36f   : > { %2727 = vmatmul.f32.gmra.mxu0 %v7125_v22  ;;  %2768 = vmatmul.f32.gmra.mxu1 %v7128_v8 }
 0x370   : > { %2809 = vmatmul.f32.gmra.mxu2 %v7125_v22  ;;  %2850 = vmatmul.f32.gmra.mxu3 %v7128_v8 }
 0x371   : > { %3091 = vmatpush.msra.mxu0 %v2442_v3 }
 0x373   : > { %3092 = vmatpush.msra.mxu0 %v2439_v58  ;;  %v2482_v12 = vpop.f32.mrf.mxu2  ;;  %v2523_v43 = vpop.f32.mrf.mxu3 }
 0x374   : > { %v2524_v41 = vadd.f32 %v2523_v43, %v2482_v12  ;;  %v7236_v29 = vpop.f32.mrf.mxu0  ;;  %v7238_v57 = vpop.f32.mrf.mxu1 }
 0x375   : > { %3093 = vmatpush.msra.mxu0 %v2436_v20  ;;  %v2585_v3 = vadd.f32 %v7238_v57, %v7236_v29 }
 0x376   : > { %3156 = vmatpush.msra.mxu1 %v2524_v41 }
 0x377   : > { %3094 = vmatpush.msra.mxu0 %v2433_v16  ;;  %2911 = vmatmul.f32.vlgmr.msrb.gmra.mxu1 %v6983_v45 }
 0x378   : > { %2870 = vmatmul.f32.vlgmr.msrb.gmra.mxu0 %v6981_v11  ;;  %2952 = vmatmul.f32.vlgmr.msrb.gmra.mxu2 %v6981_v11 }
 0x379   : > { %2993 = vmatmul.f32.vlgmr.msrb.gmra.mxu3 %v6983_v45  ;;  %3095 = vmatpush.msra.mxu0 %v2430_v6  ;;  %v2421_v45 = vadd.f32 %v7168_v34, %v7166_v9  ;;  %v2506_v9 = vadd.f32 %v7186_v28, %v7184_v17 }
 0x37a   : > { %3157 = vmatpush.msra.mxu1 %v2521_v2 }
 0x37b   : > { %3096 = vmatpush.msra.mxu0 %v2427_v18  ;;  %v7252_v49 = vpop.f32.mrf.mxu2  ;;  %v7254_v4 = vpop.f32.mrf.mxu3  ;;  %v7343_v18 = vld [vmem:[%s7911_s4] sm:$0xff] }
 0x37c   : > { %3158 = vmatpush.msra.mxu1 %v2518_v7  ;;  %v7258_v11 = vpop.f32.mrf.mxu0  ;;  %v7260_v36 = vpop.f32.mrf.mxu1  ;;  %v2667_v16 = vadd.f32 %v7254_v4, %v7252_v49 }
 0x37d   : > { %3097 = vmatpush.msra.mxu0 %v2424_v63 }
 0x37e   : > { %3159 = vmatpush.msra.mxu1 %v2515_v46  ;;  %v7360_v46 = vld [vmem:[%s7911_s4 + $0x8] sm:$0xff] }
 0x37f   : > { %3098 = vmatpush.msra.mxu0 %v2421_v45  ;;  %2914 = vmatmul.f32.gmra.mxu1 %v7033_v24 }
 0x380   : > { %3160 = vmatpush.msra.mxu1 %v2512_v32  ;;  %2873 = vmatmul.f32.gmra.mxu0 %v7025_v31 }
 0x381   : > { %2955 = vmatmul.f32.gmra.mxu2 %v7025_v31  ;;  %2996 = vmatmul.f32.gmra.mxu3 %v7033_v24 }
 0x382   : > { %3161 = vmatpush.msra.mxu1 %v2509_v44  ;;  %v7377_v44 = vld [vmem:[%s7911_s4 + $0x10] sm:$0xff] }
 0x383   : > { %v7274_v34 = vpop.f32.mrf.mxu2  ;;  %v7276_v52 = vpop.f32.mrf.mxu3 }
 0x384   : > { %3162 = vmatpush.msra.mxu1 %v2506_v9  ;;  %v7278_v5 = vpop.f32.mrf.mxu0  ;;  %v2590_v35 = vpop.f32.mrf.mxu1  ;;  %v2670_v41 = vadd.f32 %v7276_v52, %v7274_v34 }
 0x385   : > { %v2591_v14 = vadd.f32 %v2590_v35, %v7278_v5  ;;  %v7390_v35 = vld [vmem:[%s7911_s4 + $0x18] sm:$0xff] }
 0x386   : > { %3163 = vmatpush.msra.mxu1 %v7174_v30 }
 0x387   : > { %2917 = vmatmul.f32.gmra.mxu1 %v7073_v62 }
 0x388   : > { %2876 = vmatmul.f32.gmra.mxu0 %v7070_v27 }
 0x389   : > { %2958 = vmatmul.f32.gmra.mxu2 %v7070_v27  ;;  %2999 = vmatmul.f32.gmra.mxu3 %v7073_v62 }
 0x38b   : > { %v7285_v31 = vpop.f32.mrf.mxu2  ;;  %v7287_v24 = vpop.f32.mrf.mxu3 }
 0x38c   : > { %v2552_v17 = vpop.f32.mrf.mxu0  ;;  %v2593_v28 = vpop.f32.mrf.mxu1  ;;  %v2673_v43 = vadd.f32 %v7287_v24, %v7285_v31 }
 0x38d   : > { %v2594_v60 = vadd.f32 %v2593_v28, %v2552_v17 }
 0x38f   : > { %2920 = vmatmul.f32.gmra.mxu1 %v7088_v13 }
 0x390   : > { %2879 = vmatmul.f32.gmra.mxu0 %v7085_v53 }
 0x391   : > { %2961 = vmatmul.f32.gmra.mxu2 %v7085_v53  ;;  %3002 = vmatmul.f32.gmra.mxu3 %v7088_v13 }
 0x393   : > { %v2634_v30 = vpop.f32.mrf.mxu2  ;;  %v2675_v50 = vpop.f32.mrf.mxu3 }
 0x394   : > { %v2555_v38 = vpop.f32.mrf.mxu0  ;;  %v2596_v27 = vpop.f32.mrf.mxu1  ;;  %v2676_v58 = vadd.f32 %v2675_v50, %v2634_v30  ;;  %v7403_v30 = vld [vmem:[%s7911_s4 + $0x20] sm:$0xff] }
 0x397   : > { %2923 = vmatmul.f32.gmra.mxu1 %v7098_v15 }
 0x398   : > { %2882 = vmatmul.f32.gmra.mxu0 %v7095_v59 }
 0x399   : > { %2964 = vmatmul.f32.gmra.mxu2 %v7095_v59  ;;  %3005 = vmatmul.f32.gmra.mxu3 %v7098_v15 }
 0x39b   : > { %v2637_v62 = vpop.f32.mrf.mxu2  ;;  %v2678_v61 = vpop.f32.mrf.mxu3 }
 0x39c   : > { %v2558_v56 = vpop.f32.mrf.mxu0  ;;  %v2599_v55 = vpop.f32.mrf.mxu1  ;;  %v2679_v0 = vadd.f32 %v2678_v61, %v2637_v62 }
 0x39f   : > { %2926 = vmatmul.f32.gmra.mxu1 %v7108_v10 }
 0x3a0   : > { %2885 = vmatmul.f32.gmra.mxu0 %v7105_v33 }
 0x3a1   : > { %2967 = vmatmul.f32.gmra.mxu2 %v7105_v33  ;;  %3008 = vmatmul.f32.gmra.mxu3 %v7108_v10  ;;  %v2600_v10 = vadd.f32 %v2599_v55, %v2558_v56  ;;  %v7416_v55 = vld [vmem:[%s7911_s4 + $0x28] sm:$0xff] }
 0x3a3   : > { %v2640_v53 = vpop.f32.mrf.mxu2  ;;  %v2681_v13 = vpop.f32.mrf.mxu3 }
 0x3a4   : > { %v2561_v19 = vpop.f32.mrf.mxu0  ;;  %v2602_v37 = vpop.f32.mrf.mxu1 }
 0x3a5   : > { %v2603_v33 = vadd.f32 %v2602_v37, %v2561_v19 }
 0x3a7   : > { %2929 = vmatmul.f32.gmra.mxu1 %v7118_v47 }
 0x3a8   : > { %2888 = vmatmul.f32.gmra.mxu0 %v7115_v51 }
 0x3a9   : > { %2970 = vmatmul.f32.gmra.mxu2 %v7115_v51  ;;  %3011 = vmatmul.f32.gmra.mxu3 %v7118_v47  ;;  %v2597_v47 = vadd.f32 %v2596_v27, %v2555_v38 }
 0x3ab   : > { %v2643_v59 = vpop.f32.mrf.mxu2  ;;  %v2684_v15 = vpop.f32.mrf.mxu3 }
 0x3ac   : > { %v2564_v39 = vpop.f32.mrf.mxu0  ;;  %v2605_v42 = vpop.f32.mrf.mxu1  ;;  %v2685_v26 = vadd.f32 %v2684_v15, %v2643_v59 }
 0x3ad   : > { %v2606_v1 = vadd.f32 %v2605_v42, %v2564_v39 }
 0x3af   : > { %2932 = vmatmul.f32.gmra.mxu1 %v7128_v8  ;;  %3221 = vmatpush.msra.mxu2 %v2606_v1 }
 0x3b0   : > { %2891 = vmatmul.f32.gmra.mxu0 %v7125_v22 }
 0x3b1   : > { %2973 = vmatmul.f32.gmra.mxu2 %v7125_v22  ;;  %3014 = vmatmul.f32.gmra.mxu3 %v7128_v8  ;;  %v2682_v22 = vadd.f32 %v2681_v13, %v2640_v53  ;;  %v2588_v8 = vadd.f32 %v7260_v36, %v7258_v11 }
 0x3b2   : > { %3222 = vmatpush.msra.mxu2 %v2603_v33 }
 0x3b3   : > { %v2646_v51 = vpop.f32.mrf.mxu2  ;;  %v2687_v54 = vpop.f32.mrf.mxu3 }
 0x3b4   : > { %v2688_v21 = vadd.f32 %v2687_v54, %v2646_v51  ;;  %3223 = vmatpush.msra.mxu2 %v2600_v10  ;;  %v7309_v40 = vpop.f32.mrf.mxu0  ;;  %v7311_v25 = vpop.f32.mrf.mxu1  ;;  %v7435_v10 = vld [vmem:[%s7911_s4 + $0x30] sm:$0xff] }
 0x3b6   : > { %3224 = vmatpush.msra.mxu2 %v2597_v47  ;;  %3286 = vmatpush.msra.mxu3 %v2688_v21  ;;  %v2749_v21 = vadd.f32 %v7311_v25, %v7309_v40  ;;  %v7464_v25 = vld [vmem:[%s7911_s4 + $0x38] sm:$0xff] }
 0x3b7   : > { %4028 = vmatmul.msk.f32.vlgmr.msra.gmra.mxu1 %vm3034_vm11, %v7343_v18 }
 0x3b8   : > { %3225 = vmatpush.msra.mxu2 %v2594_v60  ;;  %3287 = vmatpush.msra.mxu3 %v2685_v26 }
 0x3b9   : > { %4012 = vmatmul.msk.f32.vlgmr.msra.gmra.mxu0 %vm3034_vm11, %v7343_v18 }
 0x3ba   : > { %3226 = vmatpush.msra.mxu2 %v2591_v14  ;;  %3288 = vmatpush.msra.mxu3 %v2682_v22 }
 0x3bb   : > { %v7316_v48 = vpop.f32.mrf.mxu2  ;;  %v7318_v23 = vpop.f32.mrf.mxu3 }
 0x3bc   : > { %3227 = vmatpush.msra.mxu2 %v2588_v8  ;;  %3289 = vmatpush.msra.mxu3 %v2679_v0  ;;  %v7322_v20 = vpop.f32.mrf.mxu0  ;;  %v7324_v12 = vpop.f32.mrf.mxu1 }
 0x3bd   : > { %v2752_v54 = vadd.f32 %v7324_v12, %v7322_v20 }
 0x3be   : > { %3228 = vmatpush.msra.mxu2 %v2585_v3  ;;  %3290 = vmatpush.msra.mxu3 %v2676_v58  ;;  %v2831_v3 = vadd.f32 %v7318_v23, %v7316_v48  ;;  %v7489_v48 = vld [vmem:[%s7911_s4 + $0x40] sm:$0xff] }
 0x3bf   : > { %4044 = vmatmul.msk.f32.vlgmr.msra.gmra.mxu2 %vm3034_vm11, %v7343_v18  ;;  %4029 = vmatmul.msk.f32.gmra.mxu1 %vm3034_vm11, %v7360_v46 }
 0x3c0   : > { %3291 = vmatpush.msra.mxu3 %v2673_v43 }
 0x3c1   : > { %4013 = vmatmul.msk.f32.gmra.mxu0 %vm3034_vm11, %v7360_v46 }
 0x3c2   : > { %3292 = vmatpush.msra.mxu3 %v2670_v41 }
 0x3c3   : > { %v7332_v29 = vpop.f32.mrf.mxu2  ;;  %v7334_v57 = vpop.f32.mrf.mxu3 }
 0x3c4   : > { %3293 = vmatpush.msra.mxu3 %v2667_v16  ;;  %v7336_v6 = vpop.f32.mrf.mxu0  ;;  %v7338_v2 = vpop.f32.mrf.mxu1  ;;  %v2834_v0 = vadd.f32 %v7334_v57, %v7332_v29  ;;  %v7506_v57 = vld [vmem:[%s7911_s4 + $0x48] sm:$0xff] }
 0x3c5   : > { %4060 = vmatmul.msk.f32.vlgmr.msra.gmra.mxu3 %vm3034_vm11, %v7343_v18  ;;  %v2755_v33 = vadd.f32 %v7338_v2, %v7336_v6 }
 0x3c7   : > { %4045 = vmatmul.msk.f32.gmra.mxu2 %vm3034_vm11, %v7360_v46  ;;  %4030 = vmatmul.msk.f32.gmra.mxu1 %vm3034_vm11, %v7377_v44 }
 0x3c9   : > { %4014 = vmatmul.msk.f32.gmra.mxu0 %vm3034_vm11, %v7377_v44 }
 0x3cb   : > { %v7353_v7 = vpop.f32.mrf.mxu2  ;;  %v7355_v63 = vpop.f32.mrf.mxu3 }
 0x3cc   : > { %v2716_v49 = vpop.f32.mrf.mxu0  ;;  %v2757_v4 = vpop.f32.mrf.mxu1  ;;  %v2837_v40 = vadd.f32 %v7355_v63, %v7353_v7 }
 0x3cd   : > { %4061 = vmatmul.msk.f32.gmra.mxu3 %vm3034_vm11, %v7360_v46  ;;  %v2758_v39 = vadd.f32 %v2757_v4, %v2716_v49  ;;  %v7523_v49 = vld [vmem:[%s7911_s4 + $0x50] sm:$0xff] }
 0x3cf   : > { %4046 = vmatmul.msk.f32.gmra.mxu2 %vm3034_vm11, %v7377_v44  ;;  %4031 = vmatmul.msk.f32.gmra.mxu1 %vm3034_vm11, %v7390_v35 }
 0x3d1   : > { %4015 = vmatmul.msk.f32.gmra.mxu0 %vm3034_vm11, %v7390_v35 }
 0x3d3   : > { %v7370_v11 = vpop.f32.mrf.mxu2  ;;  %v7372_v36 = vpop.f32.mrf.mxu3 }
 0x3d4   : > { %v2719_v45 = vpop.f32.mrf.mxu0  ;;  %v2760_v32 = vpop.f32.mrf.mxu1  ;;  %v2840_v26 = vadd.f32 %v7372_v36, %v7370_v11 }
 0x3d5   : > { %4062 = vmatmul.msk.f32.gmra.mxu3 %vm3034_vm11, %v7377_v44  ;;  %v2761_v13 = vadd.f32 %v2760_v32, %v2719_v45  ;;  %v7536_v32 = vld [vmem:[%s7911_s4 + $0x58] sm:$0xff] }
 0x3d7   : > { %4047 = vmatmul.msk.f32.gmra.mxu2 %vm3034_vm11, %v7390_v35  ;;  %4032 = vmatmul.msk.f32.gmra.mxu1 %vm3034_vm11, %v7403_v30 }
 0x3d9   : > { %4016 = vmatmul.msk.f32.gmra.mxu0 %vm3034_vm11, %v7403_v30 }
 0x3db   : > { %v2801_v9 = vpop.f32.mrf.mxu2  ;;  %v2842_v34 = vpop.f32.mrf.mxu3 }
 0x3dc   : > { %v2722_v52 = vpop.f32.mrf.mxu0  ;;  %v2763_v5 = vpop.f32.mrf.mxu1  ;;  %v2843_v47 = vadd.f32 %v2842_v34, %v2801_v9 }
 0x3dd   : > { %4063 = vmatmul.msk.f32.gmra.mxu3 %vm3034_vm11, %v7390_v35  ;;  %v2764_v53 = vadd.f32 %v2763_v5, %v2722_v52 }
 0x3df   : > { %4048 = vmatmul.msk.f32.gmra.mxu2 %vm3034_vm11, %v7403_v30  ;;  %4033 = vmatmul.msk.f32.gmra.mxu1 %vm3034_vm11, %v7416_v55 }
 0x3e1   : > { %4017 = vmatmul.msk.f32.gmra.mxu0 %vm3034_vm11, %v7416_v55 }
 0x3e3   : > { %v2804_v31 = vpop.f32.mrf.mxu2  ;;  %v2845_v24 = vpop.f32.mrf.mxu3 }
 0x3e4   : > { %v2725_v17 = vpop.f32.mrf.mxu0  ;;  %v2766_v28 = vpop.f32.mrf.mxu1  ;;  %v2846_v51 = vadd.f32 %v2845_v24, %v2804_v31  ;;  %v7549_v31 = vld [vmem:[%s7911_s4 + $0x60] sm:$0xff] }
 0x3e5   : > { %4064 = vmatmul.msk.f32.gmra.mxu3 %vm3034_vm11, %v7403_v30  ;;  %v2767_v56 = vadd.f32 %v2766_v28, %v2725_v17 }
 0x3e7   : > { %4049 = vmatmul.msk.f32.gmra.mxu2 %vm3034_vm11, %v7416_v55  ;;  %4034 = vmatmul.msk.f32.gmra.mxu1 %vm3034_vm11, %v7435_v10 }
 0x3e9   : > { %4018 = vmatmul.msk.f32.gmra.mxu0 %vm3034_vm11, %v7435_v10 }
 0x3eb   : > { %v2807_v50 = vpop.f32.mrf.mxu2  ;;  %v2848_v38 = vpop.f32.mrf.mxu3 }
 0x3ec   : > { %v2728_v27 = vpop.f32.mrf.mxu0  ;;  %v2769_v62 = vpop.f32.mrf.mxu1  ;;  %v2849_v1 = vadd.f32 %v2848_v38, %v2807_v50 }
 0x3ed   : > { %v2770_v61 = vadd.f32 %v2769_v62, %v2728_v27  ;;  %4065 = vmatmul.msk.f32.gmra.mxu3 %vm3034_vm11, %v7416_v55  ;;  %v7562_v27 = vld [vmem:[%s7911_s4 + $0x68] sm:$0xff] }
 0x3ef   : > { %3351 = vmatpush.msrb.mxu0 %v2770_v61  ;;  %4050 = vmatmul.msk.f32.gmra.mxu2 %vm3034_vm11, %v7435_v10 }
 0x3f0   : > { %4035 = vmatmul.msk.f32.gmra.mxu1 %vm3034_vm11, %v7464_v25 }
 0x3f1   : > { %3352 = vmatpush.msrb.mxu0 %v2767_v56 }
 0x3f2   : > { %4019 = vmatmul.msk.f32.gmra.mxu0 %vm3034_vm11, %v7464_v25 }
 0x3f3   : > { %v2810_v19 = vpop.f32.mrf.mxu2  ;;  %v2851_v37 = vpop.f32.mrf.mxu3  ;;  %3353 = vmatpush.msrb.mxu0 %v2764_v53 }
 0x3f4   : > { %v2852_v59 = vadd.f32 %v2851_v37, %v2810_v19  ;;  %v7426_v15 = vpop.f32.mrf.mxu1 }
 0x3f5   : > { %v7428_v42 = vpop.f32.mrf.mxu0  ;;  %3354 = vmatpush.msrb.mxu0 %v2761_v13  ;;  %4066 = vmatmul.msk.f32.gmra.mxu3 %vm3034_vm11, %v7435_v10 }
 0x3f6   : > { %3416 = vmatpush.msrb.mxu1 %v2852_v59  ;;  %v7575_v59 = vld [vmem:[%s7911_s4 + $0x70] sm:$0xff] }
 0x3f7   : > { %3355 = vmatpush.msrb.mxu0 %v2758_v39  ;;  %4051 = vmatmul.msk.f32.gmra.mxu2 %vm3034_vm11, %v7464_v25 }
 0x3f8   : > { %3417 = vmatpush.msrb.mxu1 %v2849_v1 }
 0x3f9   : > { %3356 = vmatpush.msrb.mxu0 %v2755_v33  ;;  %4036 = vmatmul.msk.f32.gmra.mxu1 %vm3034_vm11, %v7489_v48 }
 0x3fa   : > { %3418 = vmatpush.msrb.mxu1 %v2846_v51  ;;  %4020 = vmatmul.msk.f32.gmra.mxu0 %vm3034_vm11, %v7489_v48 }
 0x3fb   : > { %v7447_v60 = vpop.f32.mrf.mxu2  ;;  %3357 = vmatpush.msrb.mxu0 %v2752_v54 }
 0x3fc   : > { %v7453_v14 = vpop.f32.mrf.mxu3  ;;  %3419 = vmatpush.msrb.mxu1 %v2843_v47  ;;  %v7455_v22 = vpop.f32.mrf.mxu1  ;;  %v2913_v47 = vadd.f32 %v7426_v15, %v7428_v42 }
 0x3fd   : > { %v7457_v8 = vpop.f32.mrf.mxu0  ;;  %3358 = vmatpush.msrb.mxu0 %v2749_v21  ;;  %4067 = vmatmul.msk.f32.gmra.mxu3 %vm3034_vm11, %v7464_v25  ;;  %v2995_v42 = vadd.f32 %v7453_v14, %v7447_v60 }
 0x3fe   : > { %3420 = vmatpush.msrb.mxu1 %v2840_v26  ;;  %v2916_v51 = vadd.f32 %v7455_v22, %v7457_v8  ;;  %v7596_v26 = vld [vmem:[%s7911_s4 + $0x78] sm:$0xff] }
 0x3ff   : > { %4052 = vmatmul.msk.f32.gmra.mxu2 %vm3034_vm11, %v7489_v48 }
 0x400   : > { %3421 = vmatpush.msrb.mxu1 %v2837_v40 }
 0x401   : > { %4037 = vmatmul.msk.f32.gmra.mxu1 %vm3034_vm11, %v7506_v57 }
 0x402   : > { %3422 = vmatpush.msrb.mxu1 %v2834_v0  ;;  %4021 = vmatmul.msk.f32.gmra.mxu0 %vm3034_vm11, %v7506_v57 }
 0x404   : > { %v7478_v58 = vpop.f32.mrf.mxu2  ;;  %v7480_v20 = vpop.f32.mrf.mxu3  ;;  %3423 = vmatpush.msrb.mxu1 %v2831_v3 }
 0x405   : > { %v7482_v12 = vpop.f32.mrf.mxu0  ;;  %v7484_v43 = vpop.f32.mrf.mxu1  ;;  %4068 = vmatmul.msk.f32.gmra.mxu3 %vm3034_vm11, %v7489_v48  ;;  %v2998_v15 = vadd.f32 %v7480_v20, %v7478_v58 }
 0x406   : > { %v2919_v1 = vadd.f32 %v7484_v43, %v7482_v12 }
 0x407   : > { %4053 = vmatmul.msk.f32.gmra.mxu2 %vm3034_vm11, %v7506_v57 }
 0x409   : > { %4038 = vmatmul.msk.f32.gmra.mxu1 %vm3034_vm11, %v7523_v49 }
 0x40a   : > { %4022 = vmatmul.msk.f32.gmra.mxu0 %vm3034_vm11, %v7523_v49 }
 0x40c   : > { %v7499_v23 = vpop.f32.mrf.mxu2  ;;  %v7501_v41 = vpop.f32.mrf.mxu3 }
 0x40d   : > { %v2880_v16 = vpop.f32.mrf.mxu0  ;;  %v2921_v29 = vpop.f32.mrf.mxu1  ;;  %4069 = vmatmul.msk.f32.gmra.mxu3 %vm3034_vm11, %v7506_v57  ;;  %v3001_v22 = vadd.f32 %v7501_v41, %v7499_v23 }
 0x40e   : > { %v2922_v37 = vadd.f32 %v2921_v29, %v2880_v16 }
 0x40f   : > { %4054 = vmatmul.msk.f32.gmra.mxu2 %vm3034_vm11, %v7523_v49 }
 0x411   : > { %4039 = vmatmul.msk.f32.gmra.mxu1 %vm3034_vm11, %v7536_v32 }
 0x412   : > { %4023 = vmatmul.msk.f32.gmra.mxu0 %vm3034_vm11, %v7536_v32 }
 0x414   : > { %v7516_v6 = vpop.f32.mrf.mxu2  ;;  %v7518_v2 = vpop.f32.mrf.mxu3 }
 0x415   : > { %v2883_v7 = vpop.f32.mrf.mxu0  ;;  %v2924_v63 = vpop.f32.mrf.mxu1  ;;  %4070 = vmatmul.msk.f32.gmra.mxu3 %vm3034_vm11, %v7523_v49  ;;  %v3004_v21 = vadd.f32 %v7518_v2, %v7516_v6 }
 0x416   : > { %v2925_v56 = vadd.f32 %v2924_v63, %v2883_v7 }
 0x417   : > { %4055 = vmatmul.msk.f32.gmra.mxu2 %vm3034_vm11, %v7536_v32 }
 0x419   : > { %4040 = vmatmul.msk.f32.gmra.mxu1 %vm3034_vm11, %v7549_v31 }
 0x41a   : > { %4024 = vmatmul.msk.f32.gmra.mxu0 %vm3034_vm11, %v7549_v31 }
 0x41c   : > { %v2965_v4 = vpop.f32.mrf.mxu2  ;;  %v3006_v11 = vpop.f32.mrf.mxu3 }
 0x41d   : > { %v2886_v36 = vpop.f32.mrf.mxu0  ;;  %v2927_v45 = vpop.f32.mrf.mxu1  ;;  %4071 = vmatmul.msk.f32.gmra.mxu3 %vm3034_vm11, %v7536_v32  ;;  %v3007_v54 = vadd.f32 %v3006_v11, %v2965_v4 }
 0x41e   : > { %v2928_v61 = vadd.f32 %v2927_v45, %v2886_v36 }
 0x41f   : > { %4056 = vmatmul.msk.f32.gmra.mxu2 %vm3034_vm11, %v7549_v31 }
 0x421   : > { %4041 = vmatmul.msk.f32.gmra.mxu1 %vm3034_vm11, %v7562_v27 }
 0x422   : > { %4025 = vmatmul.msk.f32.gmra.mxu0 %vm3034_vm11, %v7562_v27 }
 0x424   : > { %v2968_v9 = vpop.f32.mrf.mxu2  ;;  %v3009_v34 = vpop.f32.mrf.mxu3 }
 0x425   : > { %v2889_v52 = vpop.f32.mrf.mxu0  ;;  %v2930_v5 = vpop.f32.mrf.mxu1  ;;  %4072 = vmatmul.msk.f32.gmra.mxu3 %vm3034_vm11, %v7549_v31  ;;  %v3010_v33 = vadd.f32 %v3009_v34, %v2968_v9 }
 0x426   : > { %v2931_v62 = vadd.f32 %v2930_v5, %v2889_v52 }
 0x427   : > { %4057 = vmatmul.msk.f32.gmra.mxu2 %vm3034_vm11, %v7562_v27 }
 0x429   : > { %4042 = vmatmul.msk.f32.gmra.mxu1 %vm3034_vm11, %v7575_v59 }
 0x42a   : > { %4026 = vmatmul.msk.f32.gmra.mxu0 %vm3034_vm11, %v7575_v59 }
 0x42c   : > { %v2971_v24 = vpop.f32.mrf.mxu2  ;;  %v3012_v17 = vpop.f32.mrf.mxu3 }
 0x42d   : > { %v2892_v28 = vpop.f32.mrf.mxu0  ;;  %v2933_v50 = vpop.f32.mrf.mxu1  ;;  %4073 = vmatmul.msk.f32.gmra.mxu3 %vm3034_vm11, %v7562_v27  ;;  %v3013_v39 = vadd.f32 %v3012_v17, %v2971_v24 }
 0x42e   : > { %v2934_v38 = vadd.f32 %v2933_v50, %v2892_v28 }
 0x42f   : > { %4058 = vmatmul.msk.f32.gmra.mxu2 %vm3034_vm11, %v7575_v59 }
 0x430   : > { %3481 = vmatpush.msrb.mxu2 %v2934_v38 }
 0x431   : > { %4043 = vmatmul.msk.f32.gmra.mxu1 %vm3034_vm11, %v7596_v26 }
 0x432   : > { %3482 = vmatpush.msrb.mxu2 %v2931_v62  ;;  %4027 = vmatmul.msk.f32.gmra.mxu0 %vm3034_vm11, %v7596_v26 }
 0x434   : > { %v2974_v53 = vpop.f32.mrf.mxu2  ;;  %v3015_v13 = vpop.f32.mrf.mxu3  ;;  %3483 = vmatpush.msrb.mxu2 %v2928_v61 }
 0x435   : > { %v3016_v19 = vadd.f32 %v3015_v13, %v2974_v53  ;;  %4074 = vmatmul.msk.f32.gmra.mxu3 %vm3034_vm11, %v7575_v59  ;;  %v3165_v40 = vpop.f32.mrf.mxu1 }
 0x436   : > { %3484 = vmatpush.msrb.mxu2 %v2925_v56  ;;  %v3100_v8 = vpop.f32.mrf.mxu0  ;;  %3604 = vst [vmem:[%s7615_s12 + $0x8] sm:$0xff] %v3165_v40 }
 0x437   : > { %3546 = vmatpush.msrb.mxu3 %v3016_v19  ;;  %4059 = vmatmul.msk.f32.gmra.mxu2 %vm3034_vm11, %v7596_v26  ;;  %3603 = vst [vmem:[%s7615_s12] sm:$0xff] %v3100_v8 }
 0x438   : > { %3485 = vmatpush.msrb.mxu2 %v2922_v37 }
 0x439   : > { %3547 = vmatpush.msrb.mxu3 %v3013_v39  ;;  %4092 = vmatmul.msk.f32.vlgmr.msrb.gmra.mxu1 %vm3034_vm11, %v7343_v18 }
 0x43a   : > { %3486 = vmatpush.msrb.mxu2 %v2919_v1  ;;  %4076 = vmatmul.msk.f32.vlgmr.msrb.gmra.mxu0 %vm3034_vm11, %v7343_v18 }
 0x43b   : > { %3548 = vmatpush.msrb.mxu3 %v3010_v33 }
 0x43c   : > { %3487 = vmatpush.msrb.mxu2 %v2916_v51 }
 0x43d   : > { %3549 = vmatpush.msrb.mxu3 %v3007_v54  ;;  %v3168_v3 = vpop.f32.mrf.mxu1 }
 0x43e   : > { %3488 = vmatpush.msrb.mxu2 %v2913_v47  ;;  %4075 = vmatmul.msk.f32.gmra.mxu3 %vm3034_vm11, %v7596_v26  ;;  %v3103_v0 = vpop.f32.mrf.mxu0  ;;  %3612 = vst [vmem:[%s7615_s12 + $0x48] sm:$0xff] %v3168_v3 }
 0x43f   : > { %3550 = vmatpush.msrb.mxu3 %v3004_v21  ;;  %4108 = vmatmul.msk.f32.vlgmr.msrb.gmra.mxu2 %vm3034_vm11, %v7343_v18  ;;  %3611 = vst [vmem:[%s7615_s12 + $0x40] sm:$0xff] %v3103_v0 }
 0x441   : > { %3551 = vmatpush.msrb.mxu3 %v3001_v22  ;;  %4093 = vmatmul.msk.f32.gmra.mxu1 %vm3034_vm11, %v7360_v46 }
 0x442   : > { %v3230_v60 = vpop.f32.mrf.mxu2  ;;  %4077 = vmatmul.msk.f32.gmra.mxu0 %vm3034_vm11, %v7360_v46 }
 0x443   : > { %3552 = vmatpush.msrb.mxu3 %v2998_v15  ;;  %3605 = vst [vmem:[%s7615_s12 + $0x10] sm:$0xff] %v3230_v60 }
 0x445   : > { %3553 = vmatpush.msrb.mxu3 %v2995_v42  ;;  %v3171_v12 = vpop.f32.mrf.mxu1 }
 0x446   : > { %4124 = vmatmul.msk.f32.vlgmr.msrb.gmra.mxu3 %vm3034_vm11, %v7343_v18  ;;  %v3106_v18 = vpop.f32.mrf.mxu0  ;;  %4141 = vst [vmem:[%s7615_s12 + $0x88] sm:$0xff] %v3171_v12 }
 0x447   : > { %4109 = vmatmul.msk.f32.gmra.mxu2 %vm3034_vm11, %v7360_v46  ;;  %4140 = vst [vmem:[%s7615_s12 + $0x80] sm:$0xff] %v3106_v18 }
 0x448   : > { %v3295_v14 = vpop.f32.mrf.mxu3 }
 0x449   : > { %3606 = vst [vmem:[%s7615_s12 + $0x18] sm:$0xff] %v3295_v14  ;;  %4094 = vmatmul.msk.f32.gmra.mxu1 %vm3034_vm11, %v7377_v44 }
 0x44a   : > { %v3233_v58 = vpop.f32.mrf.mxu2  ;;  %4078 = vmatmul.msk.f32.gmra.mxu0 %vm3034_vm11, %v7377_v44 }
 0x44b   : > { %3613 = vst [vmem:[%s7615_s12 + $0x50] sm:$0xff] %v3233_v58 }
 0x44d   : > { %v3174_v41 = vpop.f32.mrf.mxu1 }
 0x44e   : > { %4125 = vmatmul.msk.f32.gmra.mxu3 %vm3034_vm11, %v7360_v46  ;;  %v3109_v46 = vpop.f32.mrf.mxu0  ;;  %4149 = vst [vmem:[%s7615_s12 + $0xc8] sm:$0xff] %v3174_v41 }
 0x44f   : > { %4110 = vmatmul.msk.f32.gmra.mxu2 %vm3034_vm11, %v7377_v44  ;;  %4148 = vst [vmem:[%s7615_s12 + $0xc0] sm:$0xff] %v3109_v46 }
 0x450   : > { %v3298_v20 = vpop.f32.mrf.mxu3 }
 0x451   : > { %3614 = vst [vmem:[%s7615_s12 + $0x58] sm:$0xff] %v3298_v20  ;;  %4095 = vmatmul.msk.f32.gmra.mxu1 %vm3034_vm11, %v7390_v35 }
 0x452   : > { %v3236_v43 = vpop.f32.mrf.mxu2  ;;  %4079 = vmatmul.msk.f32.gmra.mxu0 %vm3034_vm11, %v7390_v35 }
 0x453   : > { %4142 = vst [vmem:[%s7615_s12 + $0x90] sm:$0xff] %v3236_v43 }
 0x455   : > { %v3177_v6 = vpop.f32.mrf.mxu1 }
 0x456   : > { %4126 = vmatmul.msk.f32.gmra.mxu3 %vm3034_vm11, %v7377_v44  ;;  %v3112_v44 = vpop.f32.mrf.mxu0  ;;  %4157 = vst [vmem:[%s7615_s12 + $0x108] sm:$0xff] %v3177_v6 }
 0x457   : > { %4111 = vmatmul.msk.f32.gmra.mxu2 %vm3034_vm11, %v7390_v35  ;;  %4156 = vst [vmem:[%s7615_s12 + $0x100] sm:$0xff] %v3112_v44 }
 0x458   : > { %v3301_v23 = vpop.f32.mrf.mxu3 }
 0x459   : > { %4143 = vst [vmem:[%s7615_s12 + $0x98] sm:$0xff] %v3301_v23  ;;  %4096 = vmatmul.msk.f32.gmra.mxu1 %vm3034_vm11, %v7403_v30 }
 0x45a   : > { %v3239_v16 = vpop.f32.mrf.mxu2  ;;  %4080 = vmatmul.msk.f32.gmra.mxu0 %vm3034_vm11, %v7403_v30 }
 0x45b   : > { %4150 = vst [vmem:[%s7615_s12 + $0xd0] sm:$0xff] %v3239_v16 }
 0x45e   : > { %4127 = vmatmul.msk.f32.gmra.mxu3 %vm3034_vm11, %v7390_v35  ;;  %v3180_v35 = vpop.f32.mrf.mxu1  ;;  %v3115_v63 = vpop.f32.mrf.mxu0 }
 0x45f   : > { %4112 = vmatmul.msk.f32.gmra.mxu2 %vm3034_vm11, %v7403_v30  ;;  %4165 = vst [vmem:[%s7615_s12 + $0x148] sm:$0xff] %v3180_v35 }
 0x460   : > { %v3304_v29 = vpop.f32.mrf.mxu3  ;;  %4164 = vst [vmem:[%s7615_s12 + $0x140] sm:$0xff] %v3115_v63 }
 0x461   : > { %4151 = vst [vmem:[%s7615_s12 + $0xd8] sm:$0xff] %v3304_v29  ;;  %4097 = vmatmul.msk.f32.gmra.mxu1 %vm3034_vm11, %v7416_v55 }
 0x462   : > { %v3242_v2 = vpop.f32.mrf.mxu2  ;;  %4081 = vmatmul.msk.f32.gmra.mxu0 %vm3034_vm11, %v7416_v55 }
 0x463   : > { %4158 = vst [vmem:[%s7615_s12 + $0x110] sm:$0xff] %v3242_v2 }
 0x466   : > { %4128 = vmatmul.msk.f32.gmra.mxu3 %vm3034_vm11, %v7403_v30  ;;  %v3118_v30 = vpop.f32.mrf.mxu0  ;;  %v3183_v36 = vpop.f32.mrf.mxu1 }
 0x467   : > { %4113 = vmatmul.msk.f32.gmra.mxu2 %vm3034_vm11, %v7416_v55  ;;  %4172 = vst [vmem:[%s7615_s12 + $0x180] sm:$0xff] %v3118_v30 }
 0x468   : > { %v3307_v7 = vpop.f32.mrf.mxu3  ;;  %4173 = vst [vmem:[%s7615_s12 + $0x188] sm:$0xff] %v3183_v36 }
 0x469   : > { %4159 = vst [vmem:[%s7615_s12 + $0x118] sm:$0xff] %v3307_v7  ;;  %4098 = vmatmul.msk.f32.gmra.mxu1 %vm3034_vm11, %v7435_v10 }
 0x46a   : > { %v3245_v4 = vpop.f32.mrf.mxu2  ;;  %4082 = vmatmul.msk.f32.gmra.mxu0 %vm3034_vm11, %v7435_v10 }
 0x46b   : > { %4166 = vst [vmem:[%s7615_s12 + $0x150] sm:$0xff] %v3245_v4 }
 0x46e   : > { %4129 = vmatmul.msk.f32.gmra.mxu3 %vm3034_vm11, %v7416_v55  ;;  %v3186_v34 = vpop.f32.mrf.mxu1 }
 0x46f   : > { %4114 = vmatmul.msk.f32.gmra.mxu2 %vm3034_vm11, %v7435_v10  ;;  %v3121_v9 = vpop.f32.mrf.mxu0  ;;  %4181 = vst [vmem:[%s7615_s12 + $0x1c8] sm:$0xff] %v3186_v34 }
 0x470   : > { %v3310_v11 = vpop.f32.mrf.mxu3  ;;  %4180 = vst [vmem:[%s7615_s12 + $0x1c0] sm:$0xff] %v3121_v9 }
 0x471   : > { %4167 = vst [vmem:[%s7615_s12 + $0x158] sm:$0xff] %v3310_v11  ;;  %4099 = vmatmul.msk.f32.gmra.mxu1 %vm3034_vm11, %v7464_v25 }
 0x472   : > { %v3248_v45 = vpop.f32.mrf.mxu2  ;;  %4083 = vmatmul.msk.f32.gmra.mxu0 %vm3034_vm11, %v7464_v25 }
 0x473   : > { %4174 = vst [vmem:[%s7615_s12 + $0x190] sm:$0xff] %v3248_v45 }
 0x476   : > { %4130 = vmatmul.msk.f32.gmra.mxu3 %vm3034_vm11, %v7435_v10  ;;  %v3189_v24 = vpop.f32.mrf.mxu1 }
 0x477   : > { %4115 = vmatmul.msk.f32.gmra.mxu2 %vm3034_vm11, %v7464_v25  ;;  %v3124_v5 = vpop.f32.mrf.mxu0  ;;  %4189 = vst [vmem:[%s7615_s12 + $0x208] sm:$0xff] %v3189_v24 }
 0x478   : > { %v3313_v55 = vpop.f32.mrf.mxu3  ;;  %4188 = vst [vmem:[%s7615_s12 + $0x200] sm:$0xff] %v3124_v5 }
 0x479   : > { %4175 = vst [vmem:[%s7615_s12 + $0x198] sm:$0xff] %v3313_v55  ;;  %4100 = vmatmul.msk.f32.gmra.mxu1 %vm3034_vm11, %v7489_v48 }
 0x47a   : > { %v3251_v52 = vpop.f32.mrf.mxu2  ;;  %4084 = vmatmul.msk.f32.gmra.mxu0 %vm3034_vm11, %v7489_v48 }
 0x47b   : > { %4182 = vst [vmem:[%s7615_s12 + $0x1d0] sm:$0xff] %v3251_v52 }
 0x47e   : > { %4131 = vmatmul.msk.f32.gmra.mxu3 %vm3034_vm11, %v7464_v25  ;;  %v3192_v50 = vpop.f32.mrf.mxu1 }
 0x47f   : > { %4116 = vmatmul.msk.f32.gmra.mxu2 %vm3034_vm11, %v7489_v48  ;;  %v3127_v28 = vpop.f32.mrf.mxu0  ;;  %4197 = vst [vmem:[%s7615_s12 + $0x248] sm:$0xff] %v3192_v50 }
 0x480   : > { %v3316_v10 = vpop.f32.mrf.mxu3  ;;  %4196 = vst [vmem:[%s7615_s12 + $0x240] sm:$0xff] %v3127_v28 }
 0x481   : > { %4183 = vst [vmem:[%s7615_s12 + $0x1d8] sm:$0xff] %v3316_v10  ;;  %4101 = vmatmul.msk.f32.gmra.mxu1 %vm3034_vm11, %v7506_v57 }
 0x482   : > { %v3254_v17 = vpop.f32.mrf.mxu2  ;;  %4085 = vmatmul.msk.f32.gmra.mxu0 %vm3034_vm11, %v7506_v57 }
 0x483   : > { %4190 = vst [vmem:[%s7615_s12 + $0x210] sm:$0xff] %v3254_v17 }
 0x486   : > { %4132 = vmatmul.msk.f32.gmra.mxu3 %vm3034_vm11, %v7489_v48  ;;  %v3195_v61 = vpop.f32.mrf.mxu1 }
 0x487   : > { %4117 = vmatmul.msk.f32.gmra.mxu2 %vm3034_vm11, %v7506_v57  ;;  %v3130_v62 = vpop.f32.mrf.mxu0  ;;  %4205 = vst [vmem:[%s7615_s12 + $0x288] sm:$0xff] %v3195_v61 }
 0x488   : > { %v3319_v25 = vpop.f32.mrf.mxu3  ;;  %4204 = vst [vmem:[%s7615_s12 + $0x280] sm:$0xff] %v3130_v62 }
 0x489   : > { %4191 = vst [vmem:[%s7615_s12 + $0x218] sm:$0xff] %v3319_v25  ;;  %4102 = vmatmul.msk.f32.gmra.mxu1 %vm3034_vm11, %v7523_v49 }
 0x48a   : > { %v3257_v38 = vpop.f32.mrf.mxu2  ;;  %4086 = vmatmul.msk.f32.gmra.mxu0 %vm3034_vm11, %v7523_v49 }
 0x48b   : > { %4198 = vst [vmem:[%s7615_s12 + $0x250] sm:$0xff] %v3257_v38 }
 0x48e   : > { %4133 = vmatmul.msk.f32.gmra.mxu3 %vm3034_vm11, %v7506_v57  ;;  %v3198_v13 = vpop.f32.mrf.mxu1 }
 0x48f   : > { %4118 = vmatmul.msk.f32.gmra.mxu2 %vm3034_vm11, %v7523_v49  ;;  %v3133_v53 = vpop.f32.mrf.mxu0  ;;  %4213 = vst [vmem:[%s7615_s12 + $0x2c8] sm:$0xff] %v3198_v13 }
 0x490   : > { %v3322_v48 = vpop.f32.mrf.mxu3  ;;  %4212 = vst [vmem:[%s7615_s12 + $0x2c0] sm:$0xff] %v3133_v53 }
 0x491   : > { %4199 = vst [vmem:[%s7615_s12 + $0x258] sm:$0xff] %v3322_v48  ;;  %4103 = vmatmul.msk.f32.gmra.mxu1 %vm3034_vm11, %v7536_v32 }
 0x492   : > { %v3260_v56 = vpop.f32.mrf.mxu2  ;;  %4087 = vmatmul.msk.f32.gmra.mxu0 %vm3034_vm11, %v7536_v32 }
 0x493   : > { %4206 = vst [vmem:[%s7615_s12 + $0x290] sm:$0xff] %v3260_v56 }
 0x496   : > { %4134 = vmatmul.msk.f32.gmra.mxu3 %vm3034_vm11, %v7523_v49  ;;  %v3201_v39 = vpop.f32.mrf.mxu1 }
 0x497   : > { %4119 = vmatmul.msk.f32.gmra.mxu2 %vm3034_vm11, %v7536_v32  ;;  %v3136_v37 = vpop.f32.mrf.mxu0  ;;  %4221 = vst [vmem:[%s7615_s12 + $0x308] sm:$0xff] %v3201_v39 }
 0x498   : > { %v3325_v57 = vpop.f32.mrf.mxu3  ;;  %4220 = vst [vmem:[%s7615_s12 + $0x300] sm:$0xff] %v3136_v37 }
 0x499   : > { %4207 = vst [vmem:[%s7615_s12 + $0x298] sm:$0xff] %v3325_v57  ;;  %4104 = vmatmul.msk.f32.gmra.mxu1 %vm3034_vm11, %v7549_v31 }
 0x49a   : > { %v3263_v19 = vpop.f32.mrf.mxu2  ;;  %4088 = vmatmul.msk.f32.gmra.mxu0 %vm3034_vm11, %v7549_v31 }
 0x49b   : > { %4214 = vst [vmem:[%s7615_s12 + $0x2d0] sm:$0xff] %v3263_v19 }
 0x49e   : > { %4135 = vmatmul.msk.f32.gmra.mxu3 %vm3034_vm11, %v7536_v32  ;;  %v3204_v51 = vpop.f32.mrf.mxu1 }
 0x49f   : > { %4120 = vmatmul.msk.f32.gmra.mxu2 %vm3034_vm11, %v7549_v31  ;;  %v3139_v33 = vpop.f32.mrf.mxu0  ;;  %4229 = vst [vmem:[%s7615_s12 + $0x348] sm:$0xff] %v3204_v51 }
 0x4a0   : > { %v3328_v49 = vpop.f32.mrf.mxu3  ;;  %4228 = vst [vmem:[%s7615_s12 + $0x340] sm:$0xff] %v3139_v33 }
 0x4a1   : > { %4215 = vst [vmem:[%s7615_s12 + $0x2d8] sm:$0xff] %v3328_v49  ;;  %4105 = vmatmul.msk.f32.gmra.mxu1 %vm3034_vm11, %v7562_v27 }
 0x4a2   : > { %v3266_v1 = vpop.f32.mrf.mxu2  ;;  %4089 = vmatmul.msk.f32.gmra.mxu0 %vm3034_vm11, %v7562_v27 }
 0x4a3   : > { %4222 = vst [vmem:[%s7615_s12 + $0x310] sm:$0xff] %v3266_v1 }
 0x4a6   : > { %4136 = vmatmul.msk.f32.gmra.mxu3 %vm3034_vm11, %v7549_v31  ;;  %v3207_v21 = vpop.f32.mrf.mxu1 }
 0x4a7   : > { %4121 = vmatmul.msk.f32.gmra.mxu2 %vm3034_vm11, %v7562_v27  ;;  %v3142_v47 = vpop.f32.mrf.mxu0  ;;  %4237 = vst [vmem:[%s7615_s12 + $0x388] sm:$0xff] %v3207_v21 }
 0x4a8   : > { %v3331_v32 = vpop.f32.mrf.mxu3  ;;  %4236 = vst [vmem:[%s7615_s12 + $0x380] sm:$0xff] %v3142_v47 }
 0x4a9   : > { %4223 = vst [vmem:[%s7615_s12 + $0x318] sm:$0xff] %v3331_v32  ;;  %4106 = vmatmul.msk.f32.gmra.mxu1 %vm3034_vm11, %v7575_v59 }
 0x4aa   : > { %v3269_v54 = vpop.f32.mrf.mxu2  ;;  %4090 = vmatmul.msk.f32.gmra.mxu0 %vm3034_vm11, %v7575_v59 }
 0x4ab   : > { %4230 = vst [vmem:[%s7615_s12 + $0x350] sm:$0xff] %v3269_v54 }
 0x4ae   : > { %4137 = vmatmul.msk.f32.gmra.mxu3 %vm3034_vm11, %v7562_v27  ;;  %v3210_v42 = vpop.f32.mrf.mxu1 }
 0x4af   : > { %4122 = vmatmul.msk.f32.gmra.mxu2 %vm3034_vm11, %v7575_v59  ;;  %v3145_v15 = vpop.f32.mrf.mxu0  ;;  %4245 = vst [vmem:[%s7615_s12 + $0x3c8] sm:$0xff] %v3210_v42 }
 0x4b0   : > { %v3334_v31 = vpop.f32.mrf.mxu3  ;;  %4244 = vst [vmem:[%s7615_s12 + $0x3c0] sm:$0xff] %v3145_v15 }
 0x4b1   : > { %4231 = vst [vmem:[%s7615_s12 + $0x358] sm:$0xff] %v3334_v31  ;;  %4107 = vmatmul.msk.f32.gmra.mxu1 %vm3034_vm11, %v7596_v26 }
 0x4b2   : > { %v3272_v22 = vpop.f32.mrf.mxu2  ;;  %4091 = vmatmul.msk.f32.gmra.mxu0 %vm3034_vm11, %v7596_v26 }
 0x4b3   : > { %4238 = vst [vmem:[%s7615_s12 + $0x390] sm:$0xff] %v3272_v22 }
 0x4b6   : > { %4138 = vmatmul.msk.f32.gmra.mxu3 %vm3034_vm11, %v7575_v59  ;;  %v3425_v60 = vpop.f32.mrf.mxu1 }
 0x4b7   : > { %4123 = vmatmul.msk.f32.gmra.mxu2 %vm3034_vm11, %v7596_v26  ;;  %v3360_v40 = vpop.f32.mrf.mxu0  ;;  %3608 = vst [vmem:[%s7615_s12 + $0x28] sm:$0xff] %v3425_v60 }
 0x4b8   : > { %v3337_v27 = vpop.f32.mrf.mxu3  ;;  %3607 = vst [vmem:[%s7615_s12 + $0x20] sm:$0xff] %v3360_v40 }
 0x4b9   : > { %4239 = vst [vmem:[%s7615_s12 + $0x398] sm:$0xff] %v3337_v27 }
 0x4ba   : > { %v3275_v59 = vpop.f32.mrf.mxu2 }
 0x4bb   : > { %4246 = vst [vmem:[%s7615_s12 + $0x3d0] sm:$0xff] %v3275_v59 }
 0x4be   : > { %4139 = vmatmul.msk.f32.gmra.mxu3 %vm3034_vm11, %v7596_v26  ;;  %v3428_v26 = vpop.f32.mrf.mxu1 }
 0x4bf   : > { %v3363_v3 = vpop.f32.mrf.mxu0  ;;  %3616 = vst [vmem:[%s7615_s12 + $0x68] sm:$0xff] %v3428_v26 }
 0x4c0   : > { %3615 = vst [vmem:[%s7615_s12 + $0x60] sm:$0xff] %v3363_v3 }
 0x4c1   : > { %v3340_v8 = vpop.f32.mrf.mxu3 }
 0x4c2   : > { %4247 = vst [vmem:[%s7615_s12 + $0x3d8] sm:$0xff] %v3340_v8  ;;  %v3490_v14 = vpop.f32.mrf.mxu2 }
 0x4c3   : > { %3609 = vst [vmem:[%s7615_s12 + $0x30] sm:$0xff] %v3490_v14 }
 0x4c6   : > { %v3431_v12 = vpop.f32.mrf.mxu1 }
 0x4c7   : > { %v3366_v18 = vpop.f32.mrf.mxu0  ;;  %4145 = vst [vmem:[%s7615_s12 + $0xa8] sm:$0xff] %v3431_v12 }
 0x4c8   : > { %4144 = vst [vmem:[%s7615_s12 + $0xa0] sm:$0xff] %v3366_v18 }
 0x4c9   : > { %v3555_v0 = vpop.f32.mrf.mxu3 }
 0x4ca   : > { %3610 = vst [vmem:[%s7615_s12 + $0x38] sm:$0xff] %v3555_v0  ;;  %v3493_v58 = vpop.f32.mrf.mxu2 }
 0x4cb   : > { %3617 = vst [vmem:[%s7615_s12 + $0x70] sm:$0xff] %v3493_v58 }
 0x4ce   : > { %v3434_v41 = vpop.f32.mrf.mxu1 }
 0x4cf   : > { %v3369_v46 = vpop.f32.mrf.mxu0  ;;  %4153 = vst [vmem:[%s7615_s12 + $0xe8] sm:$0xff] %v3434_v41 }
 0x4d0   : > { %4152 = vst [vmem:[%s7615_s12 + $0xe0] sm:$0xff] %v3369_v46 }
 0x4d1   : > { %v3558_v20 = vpop.f32.mrf.mxu3 }
 0x4d2   : > { %3618 = vst [vmem:[%s7615_s12 + $0x78] sm:$0xff] %v3558_v20  ;;  %v3496_v43 = vpop.f32.mrf.mxu2 }
 0x4d3   : > { %4146 = vst [vmem:[%s7615_s12 + $0xb0] sm:$0xff] %v3496_v43 }
 0x4d6   : > { %v3437_v6 = vpop.f32.mrf.mxu1 }
 0x4d7   : > { %v3372_v44 = vpop.f32.mrf.mxu0  ;;  %4161 = vst [vmem:[%s7615_s12 + $0x128] sm:$0xff] %v3437_v6 }
 0x4d8   : > { %4160 = vst [vmem:[%s7615_s12 + $0x120] sm:$0xff] %v3372_v44 }
 0x4d9   : > { %v3561_v23 = vpop.f32.mrf.mxu3 }
 0x4da   : > { %4147 = vst [vmem:[%s7615_s12 + $0xb8] sm:$0xff] %v3561_v23  ;;  %v3499_v16 = vpop.f32.mrf.mxu2 }
 0x4db   : > { %4154 = vst [vmem:[%s7615_s12 + $0xf0] sm:$0xff] %v3499_v16 }
 0x4de   : > { %v3440_v63 = vpop.f32.mrf.mxu1 }
 0x4df   : > { %v3375_v35 = vpop.f32.mrf.mxu0  ;;  %4169 = vst [vmem:[%s7615_s12 + $0x168] sm:$0xff] %v3440_v63 }
 0x4e0   : > { %4168 = vst [vmem:[%s7615_s12 + $0x160] sm:$0xff] %v3375_v35 }
 0x4e1   : > { %v3564_v29 = vpop.f32.mrf.mxu3 }
 0x4e2   : > { %4155 = vst [vmem:[%s7615_s12 + $0xf8] sm:$0xff] %v3564_v29  ;;  %v3502_v2 = vpop.f32.mrf.mxu2 }
 0x4e3   : > { %4162 = vst [vmem:[%s7615_s12 + $0x130] sm:$0xff] %v3502_v2 }
 0x4e6   : > { %v3443_v36 = vpop.f32.mrf.mxu1 }
 0x4e7   : > { %v3378_v30 = vpop.f32.mrf.mxu0  ;;  %4177 = vst [vmem:[%s7615_s12 + $0x1a8] sm:$0xff] %v3443_v36 }
 0x4e8   : > { %4176 = vst [vmem:[%s7615_s12 + $0x1a0] sm:$0xff] %v3378_v30 }
 0x4e9   : > { %v3567_v7 = vpop.f32.mrf.mxu3 }
 0x4ea   : > { %4163 = vst [vmem:[%s7615_s12 + $0x138] sm:$0xff] %v3567_v7  ;;  %v3505_v4 = vpop.f32.mrf.mxu2 }
 0x4eb   : > { %4170 = vst [vmem:[%s7615_s12 + $0x170] sm:$0xff] %v3505_v4 }
 0x4ee   : > { %v3446_v34 = vpop.f32.mrf.mxu1 }
 0x4ef   : > { %v3381_v9 = vpop.f32.mrf.mxu0  ;;  %4185 = vst [vmem:[%s7615_s12 + $0x1e8] sm:$0xff] %v3446_v34 }
 0x4f0   : > { %4184 = vst [vmem:[%s7615_s12 + $0x1e0] sm:$0xff] %v3381_v9 }
 0x4f1   : > { %v3570_v11 = vpop.f32.mrf.mxu3 }
 0x4f2   : > { %4171 = vst [vmem:[%s7615_s12 + $0x178] sm:$0xff] %v3570_v11  ;;  %v3508_v45 = vpop.f32.mrf.mxu2 }
 0x4f3   : > { %4178 = vst [vmem:[%s7615_s12 + $0x1b0] sm:$0xff] %v3508_v45 }
 0x4f6   : > { %v3449_v24 = vpop.f32.mrf.mxu1 }
 0x4f7   : > { %v3384_v5 = vpop.f32.mrf.mxu0  ;;  %4193 = vst [vmem:[%s7615_s12 + $0x228] sm:$0xff] %v3449_v24 }
 0x4f8   : > { %4192 = vst [vmem:[%s7615_s12 + $0x220] sm:$0xff] %v3384_v5 }
 0x4f9   : > { %v3573_v55 = vpop.f32.mrf.mxu3 }
 0x4fa   : > { %4179 = vst [vmem:[%s7615_s12 + $0x1b8] sm:$0xff] %v3573_v55  ;;  %v3511_v52 = vpop.f32.mrf.mxu2 }
 0x4fb   : > { %4186 = vst [vmem:[%s7615_s12 + $0x1f0] sm:$0xff] %v3511_v52 }
 0x4fe   : > { %v3452_v50 = vpop.f32.mrf.mxu1 }
 0x4ff   : > { %v3387_v28 = vpop.f32.mrf.mxu0  ;;  %4201 = vst [vmem:[%s7615_s12 + $0x268] sm:$0xff] %v3452_v50 }
 0x500   : > { %4200 = vst [vmem:[%s7615_s12 + $0x260] sm:$0xff] %v3387_v28 }
 0x501   : > { %v3576_v10 = vpop.f32.mrf.mxu3 }
 0x502   : > { %4187 = vst [vmem:[%s7615_s12 + $0x1f8] sm:$0xff] %v3576_v10  ;;  %v3514_v17 = vpop.f32.mrf.mxu2 }
 0x503   : > { %4194 = vst [vmem:[%s7615_s12 + $0x230] sm:$0xff] %v3514_v17 }
 0x506   : > { %v3455_v61 = vpop.f32.mrf.mxu1 }
 0x507   : > { %v3390_v62 = vpop.f32.mrf.mxu0  ;;  %4209 = vst [vmem:[%s7615_s12 + $0x2a8] sm:$0xff] %v3455_v61 }
 0x508   : > { %4208 = vst [vmem:[%s7615_s12 + $0x2a0] sm:$0xff] %v3390_v62 }
 0x509   : > { %v3579_v25 = vpop.f32.mrf.mxu3 }
 0x50a   : > { %4195 = vst [vmem:[%s7615_s12 + $0x238] sm:$0xff] %v3579_v25  ;;  %v3517_v38 = vpop.f32.mrf.mxu2 }
 0x50b   : > { %4202 = vst [vmem:[%s7615_s12 + $0x270] sm:$0xff] %v3517_v38 }
 0x50e   : > { %v3458_v13 = vpop.f32.mrf.mxu1 }
 0x50f   : > { %v3393_v53 = vpop.f32.mrf.mxu0  ;;  %4217 = vst [vmem:[%s7615_s12 + $0x2e8] sm:$0xff] %v3458_v13 }
 0x510   : > { %4216 = vst [vmem:[%s7615_s12 + $0x2e0] sm:$0xff] %v3393_v53 }
 0x511   : > { %v3582_v48 = vpop.f32.mrf.mxu3 }
 0x512   : > { %4203 = vst [vmem:[%s7615_s12 + $0x278] sm:$0xff] %v3582_v48  ;;  %v3520_v56 = vpop.f32.mrf.mxu2 }
 0x513   : > { %4210 = vst [vmem:[%s7615_s12 + $0x2b0] sm:$0xff] %v3520_v56 }
 0x516   : > { %v3461_v39 = vpop.f32.mrf.mxu1 }
 0x517   : > { %v3396_v37 = vpop.f32.mrf.mxu0  ;;  %4225 = vst [vmem:[%s7615_s12 + $0x328] sm:$0xff] %v3461_v39 }
 0x518   : > { %4224 = vst [vmem:[%s7615_s12 + $0x320] sm:$0xff] %v3396_v37 }
 0x519   : > { %v3585_v57 = vpop.f32.mrf.mxu3 }
 0x51a   : > { %4211 = vst [vmem:[%s7615_s12 + $0x2b8] sm:$0xff] %v3585_v57  ;;  %v3523_v19 = vpop.f32.mrf.mxu2 }
 0x51b   : > { %4218 = vst [vmem:[%s7615_s12 + $0x2f0] sm:$0xff] %v3523_v19 }
 0x51e   : > { %v3464_v51 = vpop.f32.mrf.mxu1 }
 0x51f   : > { %v3399_v33 = vpop.f32.mrf.mxu0  ;;  %4233 = vst [vmem:[%s7615_s12 + $0x368] sm:$0xff] %v3464_v51 }
 0x520   : > { %4232 = vst [vmem:[%s7615_s12 + $0x360] sm:$0xff] %v3399_v33 }
 0x521   : > { %v3588_v49 = vpop.f32.mrf.mxu3 }
 0x522   : > { %4219 = vst [vmem:[%s7615_s12 + $0x2f8] sm:$0xff] %v3588_v49  ;;  %v3526_v1 = vpop.f32.mrf.mxu2 }
 0x523   : > { %4226 = vst [vmem:[%s7615_s12 + $0x330] sm:$0xff] %v3526_v1 }
 0x526   : > { %v3467_v21 = vpop.f32.mrf.mxu1 }
 0x527   : > { %v3402_v47 = vpop.f32.mrf.mxu0  ;;  %4241 = vst [vmem:[%s7615_s12 + $0x3a8] sm:$0xff] %v3467_v21 }
 0x528   : > { %4240 = vst [vmem:[%s7615_s12 + $0x3a0] sm:$0xff] %v3402_v47 }
 0x529   : > { %v3591_v32 = vpop.f32.mrf.mxu3 }
 0x52a   : > { %4227 = vst [vmem:[%s7615_s12 + $0x338] sm:$0xff] %v3591_v32  ;;  %v3529_v54 = vpop.f32.mrf.mxu2 }
 0x52b   : > { %4234 = vst [vmem:[%s7615_s12 + $0x370] sm:$0xff] %v3529_v54 }
 0x52e   : > { %v3470_v42 = vpop.f32.mrf.mxu1 }
 0x52f   : > { %v3405_v15 = vpop.f32.mrf.mxu0  ;;  %4249 = vst [vmem:[%s7615_s12 + $0x3e8] sm:$0xff] %v3470_v42 }
 0x530   : > { %4248 = vst [vmem:[%s7615_s12 + $0x3e0] sm:$0xff] %v3405_v15 }
 0x531   : > { %v3594_v31 = vpop.f32.mrf.mxu3 }
 0x532   : > { %4235 = vst [vmem:[%s7615_s12 + $0x378] sm:$0xff] %v3594_v31  ;;  %v3532_v22 = vpop.f32.mrf.mxu2 }
 0x533   : > { %4242 = vst [vmem:[%s7615_s12 + $0x3b0] sm:$0xff] %v3532_v22 }
 0x539   : > { %v3597_v27 = vpop.f32.mrf.mxu3 }
 0x53a   : > { %4243 = vst [vmem:[%s7615_s12 + $0x3b8] sm:$0xff] %v3597_v27  ;;  %v3535_v59 = vpop.f32.mrf.mxu2 }
 0x53b   : > { %4250 = vst [vmem:[%s7615_s12 + $0x3f0] sm:$0xff] %v3535_v59 }
 0x541   : > { %v3600_v8 = vpop.f32.mrf.mxu3 }
 0x542   : > { %4251 = vst [vmem:[%s7615_s12 + $0x3f8] sm:$0xff] %v3600_v8 }
 0x543   : > { %4445 = shalt.err (!%p4442_p8)
}
 0x544   : > { %s4508_s15 = smov 1024   ;;  %s4509_s19 = smov 64  }
 0x545   : > { %4271 = dma.vmem_to_hbm [thread:$0]  (%p4583_p5), %s3752_s0, 16384, %s3754_s2, %s3739_s25, %s4508_s15, %s4508_s15, %s4509_s19  }
 0x546 PF: > { %p4293_p9 = scmp.ge.s32.totalorder %s4492_s24, 2  ;;  %s3768_s11 = sand.u32 1, %s4480_s21  }
 0x547   : > { %s3769_s9 = scalar_lea.sflag [#allocation5], %s3768_s11 }
 0x548   : > { %p4284_p10 = pnand %p4293_p9, %p4587_p6 }
 0x54a   : > { %p4285_p11 = pneg %p4284_p10 }
 0x54c   : > { %4475 = dma.done.wait (%p4285_p11), %s3769_s9, 16384  }
 0x54d   : > { %4477 = vsyncadd (%p4285_p11), %s3769_s9, 4294950912  ;;  %s8010_s24 = sld [smem:[#allocation16_spill]]  ;;  %s8013_s21 = smov %s4484_s22 }
 0x54e   : > { %s8011_s26 = sld [smem:[#allocation15_spill]] }
 0x54f   : > { %s8012_s23 = sld [smem:[#allocation17_spill]] }
 0x553   : > { %p19_p12 = scmp.ge.s32.totalorder %s8010_s24, 4  }
 0x554   : > { %s8014_s22 = smov %s8011_s26 }
 0x555   :  { %21 = sbr.rel (!%p19_p12) target bundleno = 12 (0xc), region = 116 }
 0x55a   :  { %3775 = vsyncpa [#allocation4], 1 }
 0x55b   :  { %3777 = vsyncpa [#allocation4 + $0x1], 1 }
 0x55c   :  { %3778 = vsyncpa [#allocation5], 1 }
 0x55d   :  { %3780 = vsyncpa [#allocation5 + $0x1], 1 }
 0x55e   :  { %3781 = vsyncpa [#allocation6], 1 }
 0x55f   :  { %3783 = vsyncpa [#allocation6 + $0x1], 1 }
 0x560   :  { %3784 = vsyncpa [#allocation8], 1 }

</bundles_post_ra>
